<compile_context>
chip_gen: v6e
topology: v6e:2x2x1
jax: 0.10.0
libtpu: 0.0.40
codegen_flags: <defaults>
</compile_context>

<pallas_src>
import functools

import jax
import jax.numpy as jnp
from jax.experimental import pallas as pl
from jax.experimental.pallas import tpu as pltpu

EPS = 1e-5


# ---------------------------------------------------------------------------
# Small static helpers
# ---------------------------------------------------------------------------
def _round_up(x, m):
    return (x + m - 1) // m * m


def _pad_k(k):
    # Full 128-lane alignment for the reduction dim when it is big enough;
    # tiny K (conv1: 16) just needs sublane (8) alignment.
    return _round_up(k, 128) if k >= 128 else _round_up(k, 8)


def _choose_tiles(m, kpad, npad, tm_cap=1024, vmem_budget=20 * 1024 * 1024):
    """Pick an M-tile size that keeps double-buffered tiles inside a VMEM
    budget valid on v5e/v6e/v7x, then pad M to a multiple of it."""
    w_bytes = kpad * npad * 2 * 2                 # resident bf16 weight (x2 buf)
    per_row = kpad * 2 * 2 + npad * 4 * 2         # bf16 patch + f32 out, x2 buf
    tm = max(8, min(tm_cap, (vmem_budget - w_bytes) // per_row))
    tm = (tm // 8) * 8
    if m <= tm:
        tm = _round_up(m, 8)
    m_pad = _round_up(m, tm)
    return tm, m_pad, m_pad // tm


def _cparams():
    return pltpu.CompilerParams(
        dimension_semantics=("parallel",),
        vmem_limit_bytes=48 * 1024 * 1024,
    )


# ---------------------------------------------------------------------------
# Pallas kernels
# ---------------------------------------------------------------------------
def _matmul_stats_kernel(p_ref, w_ref, o_ref, s_ref):
    # bf16 (TM, Kpad) @ bf16 (Kpad, Npad) -> f32 (TM, Npad) on the MXU.
    acc = jnp.dot(p_ref[...], w_ref[...], preferred_element_type=jnp.float32)
    o_ref[...] = acc
    # Per-tile partial BN statistics (zero-padded rows contribute exactly 0).
    ssum = jnp.sum(acc, axis=0, keepdims=True)          # (1, Npad)
    ssq = jnp.sum(acc * acc, axis=0, keepdims=True)     # (1, Npad)
    s_ref[...] = jnp.concatenate([ssum, ssq], axis=0)[None]   # (1, 2, Npad)


def _bn_act_kernel(x_ref, scale_ref, shift_ref, o_ref, *, slope):
    # Precomputed per-channel scale/shift -> one FMA + LeakyReLU.
    y = x_ref[...] * scale_ref[...] + shift_ref[...]
    o_ref[...] = jnp.maximum(y, slope * y)              # LeakyReLU, 0 < slope < 1


def _matmul_tanh_kernel(p_ref, w_ref, o_ref):
    acc = jnp.dot(p_ref[...], w_ref[...], preferred_element_type=jnp.float32)
    o_ref[...] = jnp.tanh(acc)


# ---------------------------------------------------------------------------
# pallas_call wrappers (M-tiled, lane-dense N)
# ---------------------------------------------------------------------------
def _matmul_stats_call(p, w, tm, n_tiles, npad):
    m_pad, kpad = p.shape
    return pl.pallas_call(
        _matmul_stats_kernel,
        out_shape=(jax.ShapeDtypeStruct((m_pad, npad), jnp.float32),
                   jax.ShapeDtypeStruct((n_tiles, 2, npad), jnp.float32)),
        grid=(n_tiles,),
        in_specs=[pl.BlockSpec((tm, kpad), lambda i: (i, 0)),
                  pl.BlockSpec((kpad, npad), lambda i: (0, 0))],
        out_specs=(pl.BlockSpec((tm, npad), lambda i: (i, 0)),
                   pl.BlockSpec((1, 2, npad), lambda i: (i, 0, 0))),
        compiler_params=_cparams(),
    )(p, w)


def _bn_act_call(raw, scale, shift, tm, n_tiles, slope):
    m_pad, npad = raw.shape
    return pl.pallas_call(
        functools.partial(_bn_act_kernel, slope=slope),
        out_shape=jax.ShapeDtypeStruct((m_pad, npad), jnp.float32),
        grid=(n_tiles,),
        in_specs=[pl.BlockSpec((tm, npad), lambda i: (i, 0)),
                  pl.BlockSpec((1, npad), lambda i: (0, 0)),
                  pl.BlockSpec((1, npad), lambda i: (0, 0))],
        out_specs=pl.BlockSpec((tm, npad), lambda i: (i, 0)),
        compiler_params=_cparams(),
    )(raw, scale, shift)


def _matmul_tanh_call(p, w, tm, n_tiles, npad):
    m_pad, kpad = p.shape
    return pl.pallas_call(
        _matmul_tanh_kernel,
        out_shape=jax.ShapeDtypeStruct((m_pad, npad), jnp.float32),
        grid=(n_tiles,),
        in_specs=[pl.BlockSpec((tm, kpad), lambda i: (i, 0)),
                  pl.BlockSpec((kpad, npad), lambda i: (0, 0))],
        out_specs=pl.BlockSpec((tm, npad), lambda i: (i, 0)),
        compiler_params=_cparams(),
    )(p, w)


# ---------------------------------------------------------------------------
# Plain-JAX glue: padding / im2col / nearest upsample / param setup
# ---------------------------------------------------------------------------
def im2col(x, kh, kw, stride, pad):
    """x: (B, H, W, C) -> patches (B*Ho*Wo, kh*kw*C), output spatial shape."""
    if pad:
        x = jnp.pad(x, ((0, 0), (pad, pad), (pad, pad), (0, 0)))
    B, Hp, Wp, C = x.shape
    Ho = (Hp - kh) // stride + 1
    Wo = (Wp - kw) // stride + 1
    cols = []
    for i in range(kh):
        for j in range(kw):
            cols.append(x[:, i:i + (Ho - 1) * stride + 1:stride,
                          j:j + (Wo - 1) * stride + 1:stride, :])
    patches = jnp.concatenate(cols, axis=-1)  # (B, Ho, Wo, kh*kw*C)
    return patches.reshape(B * Ho * Wo, kh * kw * C), (B, Ho, Wo)


def upsample2_nearest(x):
    # nn.Upsample(scale_factor=2), default mode='nearest', on NHWC
    x = jnp.repeat(x, 2, axis=1)
    x = jnp.repeat(x, 2, axis=2)
    return x


def _to_matrix(w_oihw):
    # (Cout, Cin, KH, KW) -> (KH*KW*Cin, Cout), matching im2col's (i, j, c) order
    cout, cin, kh, kw = w_oihw.shape
    return jnp.transpose(w_oihw, (2, 3, 1, 0)).reshape(kh * kw * cin, cout)


def init_params(key, channel):
    specs = [
        ("conv1", 1, channel, 4),
        ("conv2", channel, 2 * channel, 4),
        ("conv3", 2 * channel, 2 * channel, 3),
        ("conv4", 2 * channel, 2 * channel, 3),
        ("conv5", 2 * channel, channel, 3),
        ("conv6", channel, channel, 5),
    ]
    params = {}
    for name, cin, cout, k in specs:
        key, k1, k2, k3 = jax.random.split(key, 4)
        fan_in = cin * k * k
        w = jax.random.normal(k1, (cout, cin, k, k), jnp.float32) / jnp.sqrt(fan_in)
        gamma = 1.0 + 0.1 * jax.random.normal(k2, (cout,), jnp.float32)
        beta = 0.1 * jax.random.normal(k3, (cout,), jnp.float32)
        params[name] = (_to_matrix(w), gamma, beta)
    key, k1 = jax.random.split(key)
    w7 = jax.random.normal(k1, (1, channel, 5, 5), jnp.float32) / jnp.sqrt(channel * 25)
    params["conv7"] = _to_matrix(w7)
    return params


# ---------------------------------------------------------------------------
# Layer builders
# ---------------------------------------------------------------------------
def conv_bn_lrelu(y, w_mat, gamma, beta, k, stride, pad, slope):
    # im2col in bf16 (matmul input precision); values identical to casting after.
    patches, (B, Ho, Wo) = im2col(y.astype(jnp.bfloat16), k, k, stride, pad)
    M, K = patches.shape
    N = w_mat.shape[1]
    Kp, Np = _pad_k(K), _round_up(N, 128)
    tm, m_pad, n_tiles = _choose_tiles(M, Kp, Np)

    p = jnp.pad(patches, ((0, m_pad - M), (0, Kp - K)))
    w = jnp.pad(w_mat, ((0, Kp - K), (0, Np - N))).astype(jnp.bfloat16)
    g = jnp.pad(gamma, (0, Np - N))
    b = jnp.pad(beta, (0, Np - N))

    # Pass 1: matmul + per-tile partial statistics.
    raw, stats = _matmul_stats_call(p, w, tm, n_tiles, Np)

    # Finalize batch statistics (tiny (2, Np) reduction in f32).
    s = jnp.sum(stats, axis=0)
    mean = s[0] / M
    var = jnp.maximum(s[1] / M - mean * mean, 0.0)   # biased var (PyTorch BN)
    scale = g * jax.lax.rsqrt(var + EPS)
    shift = b - mean * scale

    # Pass 2: apply scale/shift + LeakyReLU.
    out = _bn_act_call(raw, scale.reshape(1, Np), shift.reshape(1, Np),
                       tm, n_tiles, slope)
    return out[:M, :N].reshape(B, Ho, Wo, N)


def conv_tanh(y, w_mat, k, stride, pad):
    patches, (B, Ho, Wo) = im2col(y.astype(jnp.bfloat16), k, k, stride, pad)
    M, K = patches.shape
    N = w_mat.shape[1]
    Kp, Np = _pad_k(K), _round_up(N, 128)   # N=1 padded to 128 (lane-dense)
    tm, m_pad, n_tiles = _choose_tiles(M, Kp, Np)

    p = jnp.pad(patches, ((0, m_pad - M), (0, Kp - K)))
    w = jnp.pad(w_mat, ((0, Kp - K), (0, Np - N))).astype(jnp.bfloat16)

    out = _matmul_tanh_call(p, w, tm, n_tiles, Np)
    return out[:M, :N].reshape(B, Ho, Wo, N)


# ---------------------------------------------------------------------------
# Forward pass (mirrors NumberNoiseSimulation.forward)
# ---------------------------------------------------------------------------
def number_noise_simulation(mnist, params, leaky_slope=0.05):
    # mnist: (B, H, W) float32 ; torch does unsqueeze(1) -> channel-last here
    y = mnist[..., None].astype(jnp.float32)
    layer_cfg = [
        # (kernel, stride, pad, upsample_before)
        (4, 2, 1, False),   # conv1
        (4, 2, 1, False),   # conv2
        (3, 1, 1, False),   # conv3
        (3, 1, 1, False),   # conv4
        (3, 1, 1, True),    # conv5 (Upsample x2 then conv)
        (5, 1, 2, True),    # conv6 (Upsample x2 then conv)
    ]
    for idx, (k, s, p, up) in enumerate(layer_cfg):
        if up:
            y = upsample2_nearest(y)
        w_mat, gamma, beta = params[f"conv{idx + 1}"]
        y = conv_bn_lrelu(y, w_mat, gamma, beta, k, s, p, leaky_slope)

    # conv7 + tanh (no BN)
    y = conv_tanh(y, params["conv7"], 5, 1, 2)
    return jnp.squeeze(y)   # matches torch .squeeze()


if __name__ == "__main__":
    key = jax.random.PRNGKey(0)
    pkey, xkey = jax.random.split(key)

    channel = 16                       # small version of the default 64
    B, H, W = 2, 28, 28                # MNIST-like; spatial divisible by 4
    params = init_params(pkey, channel)
    mnist = jax.random.normal(xkey, (B, H, W), jnp.float32)

    fwd = jax.jit(functools.partial(number_noise_simulation, leaky_slope=0.05))
    out = jax.block_until_ready(fwd(mnist, params))

    assert out.shape == (B, H, W), out.shape
    assert out.dtype == jnp.float32
    assert bool(jnp.all(jnp.isfinite(out)))
    print("KERNEL_OK")
</pallas_src>

<mosaic_0001>
module attributes {stable_mosaic.version = 11 : i64} {
  func.func @_matmul_stats_kernel(%arg0: i32, %arg1: memref<392x16xbf16, #tpu.memory_space<vmem>>, %arg2: memref<16x128xbf16, #tpu.memory_space<vmem>>, %arg3: memref<392x128xf32, #tpu.memory_space<vmem>>, %arg4: memref<1x2x128xf32, #tpu.memory_space<vmem>>) attributes {dimension_semantics = [#tpu.dimension_semantics<parallel>], iteration_bounds = array<i64: 1>, scalar_prefetch = 0 : i64, scratch_operands = 0 : i64, tpu.core_type = #tpu.core_type<tc>, window_params = [{transform_indices = @transform_0, window_bounds = array<i64: 392, 16>}, {pipeline_mode = #tpu.pipeline_mode<synchronous>, transform_indices = @transform_1, window_bounds = array<i64: 16, 128>}, {transform_indices = @transform_2, window_bounds = array<i64: 392, 128>}, {transform_indices = @transform_3, window_bounds = array<i64: 1, 2, 128>}]} {
    %c0 = arith.constant 0 : index
    %c0_0 = arith.constant 0 : index
    %0 = vector.load %arg1[%c0, %c0_0] : memref<392x16xbf16, #tpu.memory_space<vmem>>, vector<392x16xbf16>
    %c0_1 = arith.constant 0 : index
    %c0_2 = arith.constant 0 : index
    %1 = vector.load %arg2[%c0_1, %c0_2] : memref<16x128xbf16, #tpu.memory_space<vmem>>, vector<16x128xbf16>
    %cst = arith.constant dense<0.000000e+00> : vector<392x128xf32>
    %2 = tpu.matmul %0, %1, %cst {dimension_numbers = #tpu.dot_dimension_numbers<[1], [0], [0], [1], [0, 0, 1, 1], [], []>} : vector<392x16xbf16>, vector<16x128xbf16>, vector<392x128xf32> -> vector<392x128xf32>
    %c0_3 = arith.constant 0 : index
    %c0_4 = arith.constant 0 : index
    %3 = vector.load %arg3[%c0_3, %c0_4] : memref<392x128xf32, #tpu.memory_space<vmem>>, vector<392x128xf32>
    tpu.vector_store %arg3[%c0_3, %c0_4], %2 {strides = array<i32>} : memref<392x128xf32, #tpu.memory_space<vmem>>, vector<392x128xf32>,
    %cst_5 = arith.constant dense<0.000000e+00> : vector<128xf32>
    %4 = vector.multi_reduction <add>, %2, %cst_5 [0] : vector<392x128xf32> to vector<128xf32>
    %5 = vector.shape_cast %4 : vector<128xf32> to vector<1x128xf32>
    %6 = arith.mulf %2, %2 : vector<392x128xf32>
    %cst_6 = arith.constant dense<0.000000e+00> : vector<128xf32>
    %7 = vector.multi_reduction <add>, %6, %cst_6 [0] : vector<392x128xf32> to vector<128xf32>
    %8 = vector.shape_cast %7 : vector<128xf32> to vector<1x128xf32>
    %9 = tpu.concatenate %5, %8 in 0 : vector<1x128xf32>, vector<1x128xf32> -> vector<2x128xf32>
    %10 = vector.shape_cast %9 : vector<2x128xf32> to vector<1x2x128xf32>
    %c0_7 = arith.constant 0 : index
    %c0_8 = arith.constant 0 : index
    %c0_9 = arith.constant 0 : index
    %11 = vector.load %arg4[%c0_7, %c0_8, %c0_9] : memref<1x2x128xf32, #tpu.memory_space<vmem>>, vector<1x2x128xf32>
    tpu.vector_store %arg4[%c0_7, %c0_8, %c0_9], %10 {strides = array<i32>} : memref<1x2x128xf32, #tpu.memory_space<vmem>>, vector<1x2x128xf32>,
    return
  }
  func.func @transform_0(%arg0: i32) -> (i32, i32) {
    %c0_i32 = arith.constant 0 : i32
    %c0_i32_0 = arith.constant 0 : i32
    return %arg0, %c0_i32 : i32, i32
  }
  func.func @transform_1(%arg0: i32) -> (i32, i32) {
    %c0_i32 = arith.constant 0 : i32
    %c0_i32_0 = arith.constant 0 : i32
    %c0_i32_1 = arith.constant 0 : i32
    return %c0_i32, %c0_i32_0 : i32, i32
  }
  func.func @transform_2(%arg0: i32) -> (i32, i32) {
    %c0_i32 = arith.constant 0 : i32
    %c0_i32_0 = arith.constant 0 : i32
    return %arg0, %c0_i32 : i32, i32
  }
  func.func @transform_3(%arg0: i32) -> (i32, i32, i32) {
    %c0_i32 = arith.constant 0 : i32
    %c0_i32_0 = arith.constant 0 : i32
    %c0_i32_1 = arith.constant 0 : i32
    return %arg0, %c0_i32, %c0_i32_0 : i32, i32, i32
  }
}

module attributes {stable_mosaic.version = 11 : i64} {
  func.func @_bn_act_kernel(%arg0: i32, %arg1: memref<392x128xf32, #tpu.memory_space<vmem>>, %arg2: memref<1x128xf32, #tpu.memory_space<vmem>>, %arg3: memref<1x128xf32, #tpu.memory_space<vmem>>, %arg4: memref<392x128xf32, #tpu.memory_space<vmem>>) attributes {dimension_semantics = [#tpu.dimension_semantics<parallel>], iteration_bounds = array<i64: 1>, scalar_prefetch = 0 : i64, scratch_operands = 0 : i64, tpu.core_type = #tpu.core_type<tc>, window_params = [{transform_indices = @transform_0, window_bounds = array<i64: 392, 128>}, {pipeline_mode = #tpu.pipeline_mode<synchronous>, transform_indices = @transform_1, window_bounds = array<i64: 1, 128>}, {pipeline_mode = #tpu.pipeline_mode<synchronous>, transform_indices = @transform_2, window_bounds = array<i64: 1, 128>}, {transform_indices = @transform_3, window_bounds = array<i64: 392, 128>}]} {
    %c0 = arith.constant 0 : index
    %c0_0 = arith.constant 0 : index
    %0 = vector.load %arg1[%c0, %c0_0] : memref<392x128xf32, #tpu.memory_space<vmem>>, vector<392x128xf32>
    %c0_1 = arith.constant 0 : index
    %c0_2 = arith.constant 0 : index
    %1 = vector.load %arg2[%c0_1, %c0_2] : memref<1x128xf32, #tpu.memory_space<vmem>>, vector<1x128xf32>
    %2 = vector.broadcast %1 : vector<1x128xf32> to vector<392x128xf32>
    %3 = arith.mulf %0, %2 : vector<392x128xf32>
    %c0_3 = arith.constant 0 : index
    %c0_4 = arith.constant 0 : index
    %4 = vector.load %arg3[%c0_3, %c0_4] : memref<1x128xf32, #tpu.memory_space<vmem>>, vector<1x128xf32>
    %5 = vector.broadcast %4 : vector<1x128xf32> to vector<392x128xf32>
    %6 = arith.addf %3, %5 : vector<392x128xf32>
    %cst = arith.constant 5.000000e-02 : f32
    %7 = vector.broadcast %cst : f32 to vector<392x128xf32>
    %8 = arith.mulf %7, %6 : vector<392x128xf32>
    %9 = arith.maximumf %6, %8 : vector<392x128xf32>
    %c0_5 = arith.constant 0 : index
    %c0_6 = arith.constant 0 : index
    %10 = vector.load %arg4[%c0_5, %c0_6] : memref<392x128xf32, #tpu.memory_space<vmem>>, vector<392x128xf32>
    tpu.vector_store %arg4[%c0_5, %c0_6], %9 {strides = array<i32>} : memref<392x128xf32, #tpu.memory_space<vmem>>, vector<392x128xf32>,
    return
  }
  func.func @transform_0(%arg0: i32) -> (i32, i32) {
    %c0_i32 = arith.constant 0 : i32
    %c0_i32_0 = arith.constant 0 : i32
    return %arg0, %c0_i32 : i32, i32
  }
  func.func @transform_1(%arg0: i32) -> (i32, i32) {
    %c0_i32 = arith.constant 0 : i32
    %c0_i32_0 = arith.constant 0 : i32
    %c0_i32_1 = arith.constant 0 : i32
    return %c0_i32, %c0_i32_0 : i32, i32
  }
  func.func @transform_2(%arg0: i32) -> (i32, i32) {
    %c0_i32 = arith.constant 0 : i32
    %c0_i32_0 = arith.constant 0 : i32
    %c0_i32_1 = arith.constant 0 : i32
    return %c0_i32, %c0_i32_0 : i32, i32
  }
  func.func @transform_3(%arg0: i32) -> (i32, i32) {
    %c0_i32 = arith.constant 0 : i32
    %c0_i32_0 = arith.constant 0 : i32
    return %arg0, %c0_i32 : i32, i32
  }
}

module attributes {stable_mosaic.version = 11 : i64} {
  func.func @_matmul_stats_kernel(%arg0: i32, %arg1: memref<104x256xbf16, #tpu.memory_space<vmem>>, %arg2: memref<256x128xbf16, #tpu.memory_space<vmem>>, %arg3: memref<104x128xf32, #tpu.memory_space<vmem>>, %arg4: memref<1x2x128xf32, #tpu.memory_space<vmem>>) attributes {dimension_semantics = [#tpu.dimension_semantics<parallel>], iteration_bounds = array<i64: 1>, scalar_prefetch = 0 : i64, scratch_operands = 0 : i64, tpu.core_type = #tpu.core_type<tc>, window_params = [{transform_indices = @transform_0, window_bounds = array<i64: 104, 256>}, {pipeline_mode = #tpu.pipeline_mode<synchronous>, transform_indices = @transform_1, window_bounds = array<i64: 256, 128>}, {transform_indices = @transform_2, window_bounds = array<i64: 104, 128>}, {transform_indices = @transform_3, window_bounds = array<i64: 1, 2, 128>}]} {
    %c0 = arith.constant 0 : index
    %c0_0 = arith.constant 0 : index
    %0 = vector.load %arg1[%c0, %c0_0] : memref<104x256xbf16, #tpu.memory_space<vmem>>, vector<104x256xbf16>
    %c0_1 = arith.constant 0 : index
    %c0_2 = arith.constant 0 : index
    %1 = vector.load %arg2[%c0_1, %c0_2] : memref<256x128xbf16, #tpu.memory_space<vmem>>, vector<256x128xbf16>
    %cst = arith.constant dense<0.000000e+00> : vector<104x128xf32>
    %2 = tpu.matmul %0, %1, %cst {dimension_numbers = #tpu.dot_dimension_numbers<[1], [0], [0], [1], [0, 0, 1, 1], [], []>} : vector<104x256xbf16>, vector<256x128xbf16>, vector<104x128xf32> -> vector<104x128xf32>
    %c0_3 = arith.constant 0 : index
    %c0_4 = arith.constant 0 : index
    %3 = vector.load %arg3[%c0_3, %c0_4] : memref<104x128xf32, #tpu.memory_space<vmem>>, vector<104x128xf32>
    tpu.vector_store %arg3[%c0_3, %c0_4], %2 {strides = array<i32>} : memref<104x128xf32, #tpu.memory_space<vmem>>, vector<104x128xf32>,
    %cst_5 = arith.constant dense<0.000000e+00> : vector<128xf32>
    %4 = vector.multi_reduction <add>, %2, %cst_5 [0] : vector<104x128xf32> to vector<128xf32>
    %5 = vector.shape_cast %4 : vector<128xf32> to vector<1x128xf32>
    %6 = arith.mulf %2, %2 : vector<104x128xf32>
    %cst_6 = arith.constant dense<0.000000e+00> : vector<128xf32>
    %7 = vector.multi_reduction <add>, %6, %cst_6 [0] : vector<104x128xf32> to vector<128xf32>
    %8 = vector.shape_cast %7 : vector<128xf32> to vector<1x128xf32>
    %9 = tpu.concatenate %5, %8 in 0 : vector<1x128xf32>, vector<1x128xf32> -> vector<2x128xf32>
    %10 = vector.shape_cast %9 : vector<2x128xf32> to vector<1x2x128xf32>
    %c0_7 = arith.constant 0 : index
    %c0_8 = arith.constant 0 : index
    %c0_9 = arith.constant 0 : index
    %11 = vector.load %arg4[%c0_7, %c0_8, %c0_9] : memref<1x2x128xf32, #tpu.memory_space<vmem>>, vector<1x2x128xf32>
    tpu.vector_store %arg4[%c0_7, %c0_8, %c0_9], %10 {strides = array<i32>} : memref<1x2x128xf32, #tpu.memory_space<vmem>>, vector<1x2x128xf32>,
    return
  }
  func.func @transform_0(%arg0: i32) -> (i32, i32) {
    %c0_i32 = arith.constant 0 : i32
    %c0_i32_0 = arith.constant 0 : i32
    return %arg0, %c0_i32 : i32, i32
  }
  func.func @transform_1(%arg0: i32) -> (i32, i32) {
    %c0_i32 = arith.constant 0 : i32
    %c0_i32_0 = arith.constant 0 : i32
    %c0_i32_1 = arith.constant 0 : i32
    return %c0_i32, %c0_i32_0 : i32, i32
  }
  func.func @transform_2(%arg0: i32) -> (i32, i32) {
    %c0_i32 = arith.constant 0 : i32
    %c0_i32_0 = arith.constant 0 : i32
    return %arg0, %c0_i32 : i32, i32
  }
  func.func @transform_3(%arg0: i32) -> (i32, i32, i32) {
    %c0_i32 = arith.constant 0 : i32
    %c0_i32_0 = arith.constant 0 : i32
    %c0_i32_1 = arith.constant 0 : i32
    return %arg0, %c0_i32, %c0_i32_0 : i32, i32, i32
  }
}

module attributes {stable_mosaic.version = 11 : i64} {
  func.func @_bn_act_kernel(%arg0: i32, %arg1: memref<104x128xf32, #tpu.memory_space<vmem>>, %arg2: memref<1x128xf32, #tpu.memory_space<vmem>>, %arg3: memref<1x128xf32, #tpu.memory_space<vmem>>, %arg4: memref<104x128xf32, #tpu.memory_space<vmem>>) attributes {dimension_semantics = [#tpu.dimension_semantics<parallel>], iteration_bounds = array<i64: 1>, scalar_prefetch = 0 : i64, scratch_operands = 0 : i64, tpu.core_type = #tpu.core_type<tc>, window_params = [{transform_indices = @transform_0, window_bounds = array<i64: 104, 128>}, {pipeline_mode = #tpu.pipeline_mode<synchronous>, transform_indices = @transform_1, window_bounds = array<i64: 1, 128>}, {pipeline_mode = #tpu.pipeline_mode<synchronous>, transform_indices = @transform_2, window_bounds = array<i64: 1, 128>}, {transform_indices = @transform_3, window_bounds = array<i64: 104, 128>}]} {
    %c0 = arith.constant 0 : index
    %c0_0 = arith.constant 0 : index
    %0 = vector.load %arg1[%c0, %c0_0] : memref<104x128xf32, #tpu.memory_space<vmem>>, vector<104x128xf32>
    %c0_1 = arith.constant 0 : index
    %c0_2 = arith.constant 0 : index
    %1 = vector.load %arg2[%c0_1, %c0_2] : memref<1x128xf32, #tpu.memory_space<vmem>>, vector<1x128xf32>
    %2 = vector.broadcast %1 : vector<1x128xf32> to vector<104x128xf32>
    %3 = arith.mulf %0, %2 : vector<104x128xf32>
    %c0_3 = arith.constant 0 : index
    %c0_4 = arith.constant 0 : index
    %4 = vector.load %arg3[%c0_3, %c0_4] : memref<1x128xf32, #tpu.memory_space<vmem>>, vector<1x128xf32>
    %5 = vector.broadcast %4 : vector<1x128xf32> to vector<104x128xf32>
    %6 = arith.addf %3, %5 : vector<104x128xf32>
    %cst = arith.constant 5.000000e-02 : f32
    %7 = vector.broadcast %cst : f32 to vector<104x128xf32>
    %8 = arith.mulf %7, %6 : vector<104x128xf32>
    %9 = arith.maximumf %6, %8 : vector<104x128xf32>
    %c0_5 = arith.constant 0 : index
    %c0_6 = arith.constant 0 : index
    %10 = vector.load %arg4[%c0_5, %c0_6] : memref<104x128xf32, #tpu.memory_space<vmem>>, vector<104x128xf32>
    tpu.vector_store %arg4[%c0_5, %c0_6], %9 {strides = array<i32>} : memref<104x128xf32, #tpu.memory_space<vmem>>, vector<104x128xf32>,
    return
  }
  func.func @transform_0(%arg0: i32) -> (i32, i32) {
    %c0_i32 = arith.constant 0 : i32
    %c0_i32_0 = arith.constant 0 : i32
    return %arg0, %c0_i32 : i32, i32
  }
  func.func @transform_1(%arg0: i32) -> (i32, i32) {
    %c0_i32 = arith.constant 0 : i32
    %c0_i32_0 = arith.constant 0 : i32
    %c0_i32_1 = arith.constant 0 : i32
    return %c0_i32, %c0_i32_0 : i32, i32
  }
  func.func @transform_2(%arg0: i32) -> (i32, i32) {
    %c0_i32 = arith.constant 0 : i32
    %c0_i32_0 = arith.constant 0 : i32
    %c0_i32_1 = arith.constant 0 : i32
    return %c0_i32, %c0_i32_0 : i32, i32
  }
  func.func @transform_3(%arg0: i32) -> (i32, i32) {
    %c0_i32 = arith.constant 0 : i32
    %c0_i32_0 = arith.constant 0 : i32
    return %arg0, %c0_i32 : i32, i32
  }
}

module attributes {stable_mosaic.version = 11 : i64} {
  func.func @_matmul_stats_kernel(%arg0: i32, %arg1: memref<104x384xbf16, #tpu.memory_space<vmem>>, %arg2: memref<384x128xbf16, #tpu.memory_space<vmem>>, %arg3: memref<104x128xf32, #tpu.memory_space<vmem>>, %arg4: memref<1x2x128xf32, #tpu.memory_space<vmem>>) attributes {dimension_semantics = [#tpu.dimension_semantics<parallel>], iteration_bounds = array<i64: 1>, scalar_prefetch = 0 : i64, scratch_operands = 0 : i64, tpu.core_type = #tpu.core_type<tc>, window_params = [{transform_indices = @transform_0, window_bounds = array<i64: 104, 384>}, {pipeline_mode = #tpu.pipeline_mode<synchronous>, transform_indices = @transform_1, window_bounds = array<i64: 384, 128>}, {transform_indices = @transform_2, window_bounds = array<i64: 104, 128>}, {transform_indices = @transform_3, window_bounds = array<i64: 1, 2, 128>}]} {
    %c0 = arith.constant 0 : index
    %c0_0 = arith.constant 0 : index
    %0 = vector.load %arg1[%c0, %c0_0] : memref<104x384xbf16, #tpu.memory_space<vmem>>, vector<104x384xbf16>
    %c0_1 = arith.constant 0 : index
    %c0_2 = arith.constant 0 : index
    %1 = vector.load %arg2[%c0_1, %c0_2] : memref<384x128xbf16, #tpu.memory_space<vmem>>, vector<384x128xbf16>
    %cst = arith.constant dense<0.000000e+00> : vector<104x128xf32>
    %2 = tpu.matmul %0, %1, %cst {dimension_numbers = #tpu.dot_dimension_numbers<[1], [0], [0], [1], [0, 0, 1, 1], [], []>} : vector<104x384xbf16>, vector<384x128xbf16>, vector<104x128xf32> -> vector<104x128xf32>
    %c0_3 = arith.constant 0 : index
    %c0_4 = arith.constant 0 : index
    %3 = vector.load %arg3[%c0_3, %c0_4] : memref<104x128xf32, #tpu.memory_space<vmem>>, vector<104x128xf32>
    tpu.vector_store %arg3[%c0_3, %c0_4], %2 {strides = array<i32>} : memref<104x128xf32, #tpu.memory_space<vmem>>, vector<104x128xf32>,
    %cst_5 = arith.constant dense<0.000000e+00> : vector<128xf32>
    %4 = vector.multi_reduction <add>, %2, %cst_5 [0] : vector<104x128xf32> to vector<128xf32>
    %5 = vector.shape_cast %4 : vector<128xf32> to vector<1x128xf32>
    %6 = arith.mulf %2, %2 : vector<104x128xf32>
    %cst_6 = arith.constant dense<0.000000e+00> : vector<128xf32>
    %7 = vector.multi_reduction <add>, %6, %cst_6 [0] : vector<104x128xf32> to vector<128xf32>
    %8 = vector.shape_cast %7 : vector<128xf32> to vector<1x128xf32>
    %9 = tpu.concatenate %5, %8 in 0 : vector<1x128xf32>, vector<1x128xf32> -> vector<2x128xf32>
    %10 = vector.shape_cast %9 : vector<2x128xf32> to vector<1x2x128xf32>
    %c0_7 = arith.constant 0 : index
    %c0_8 = arith.constant 0 : index
    %c0_9 = arith.constant 0 : index
    %11 = vector.load %arg4[%c0_7, %c0_8, %c0_9] : memref<1x2x128xf32, #tpu.memory_space<vmem>>, vector<1x2x128xf32>
    tpu.vector_store %arg4[%c0_7, %c0_8, %c0_9], %10 {strides = array<i32>} : memref<1x2x128xf32, #tpu.memory_space<vmem>>, vector<1x2x128xf32>,
    return
  }
  func.func @transform_0(%arg0: i32) -> (i32, i32) {
    %c0_i32 = arith.constant 0 : i32
    %c0_i32_0 = arith.constant 0 : i32
    return %arg0, %c0_i32 : i32, i32
  }
  func.func @transform_1(%arg0: i32) -> (i32, i32) {
    %c0_i32 = arith.constant 0 : i32
    %c0_i32_0 = arith.constant 0 : i32
    %c0_i32_1 = arith.constant 0 : i32
    return %c0_i32, %c0_i32_0 : i32, i32
  }
  func.func @transform_2(%arg0: i32) -> (i32, i32) {
    %c0_i32 = arith.constant 0 : i32
    %c0_i32_0 = arith.constant 0 : i32
    return %arg0, %c0_i32 : i32, i32
  }
  func.func @transform_3(%arg0: i32) -> (i32, i32, i32) {
    %c0_i32 = arith.constant 0 : i32
    %c0_i32_0 = arith.constant 0 : i32
    %c0_i32_1 = arith.constant 0 : i32
    return %arg0, %c0_i32, %c0_i32_0 : i32, i32, i32
  }
}

module attributes {stable_mosaic.version = 11 : i64} {
  func.func @_matmul_stats_kernel(%arg0: i32, %arg1: memref<392x384xbf16, #tpu.memory_space<vmem>>, %arg2: memref<384x128xbf16, #tpu.memory_space<vmem>>, %arg3: memref<392x128xf32, #tpu.memory_space<vmem>>, %arg4: memref<1x2x128xf32, #tpu.memory_space<vmem>>) attributes {dimension_semantics = [#tpu.dimension_semantics<parallel>], iteration_bounds = array<i64: 1>, scalar_prefetch = 0 : i64, scratch_operands = 0 : i64, tpu.core_type = #tpu.core_type<tc>, window_params = [{transform_indices = @transform_0, window_bounds = array<i64: 392, 384>}, {pipeline_mode = #tpu.pipeline_mode<synchronous>, transform_indices = @transform_1, window_bounds = array<i64: 384, 128>}, {transform_indices = @transform_2, window_bounds = array<i64: 392, 128>}, {transform_indices = @transform_3, window_bounds = array<i64: 1, 2, 128>}]} {
    %c0 = arith.constant 0 : index
    %c0_0 = arith.constant 0 : index
    %0 = vector.load %arg1[%c0, %c0_0] : memref<392x384xbf16, #tpu.memory_space<vmem>>, vector<392x384xbf16>
    %c0_1 = arith.constant 0 : index
    %c0_2 = arith.constant 0 : index
    %1 = vector.load %arg2[%c0_1, %c0_2] : memref<384x128xbf16, #tpu.memory_space<vmem>>, vector<384x128xbf16>
    %cst = arith.constant dense<0.000000e+00> : vector<392x128xf32>
    %2 = tpu.matmul %0, %1, %cst {dimension_numbers = #tpu.dot_dimension_numbers<[1], [0], [0], [1], [0, 0, 1, 1], [], []>} : vector<392x384xbf16>, vector<384x128xbf16>, vector<392x128xf32> -> vector<392x128xf32>
    %c0_3 = arith.constant 0 : index
    %c0_4 = arith.constant 0 : index
    %3 = vector.load %arg3[%c0_3, %c0_4] : memref<392x128xf32, #tpu.memory_space<vmem>>, vector<392x128xf32>
    tpu.vector_store %arg3[%c0_3, %c0_4], %2 {strides = array<i32>} : memref<392x128xf32, #tpu.memory_space<vmem>>, vector<392x128xf32>,
    %cst_5 = arith.constant dense<0.000000e+00> : vector<128xf32>
    %4 = vector.multi_reduction <add>, %2, %cst_5 [0] : vector<392x128xf32> to vector<128xf32>
    %5 = vector.shape_cast %4 : vector<128xf32> to vector<1x128xf32>
    %6 = arith.mulf %2, %2 : vector<392x128xf32>
    %cst_6 = arith.constant dense<0.000000e+00> : vector<128xf32>
    %7 = vector.multi_reduction <add>, %6, %cst_6 [0] : vector<392x128xf32> to vector<128xf32>
    %8 = vector.shape_cast %7 : vector<128xf32> to vector<1x128xf32>
    %9 = tpu.concatenate %5, %8 in 0 : vector<1x128xf32>, vector<1x128xf32> -> vector<2x128xf32>
    %10 = vector.shape_cast %9 : vector<2x128xf32> to vector<1x2x128xf32>
    %c0_7 = arith.constant 0 : index
    %c0_8 = arith.constant 0 : index
    %c0_9 = arith.constant 0 : index
    %11 = vector.load %arg4[%c0_7, %c0_8, %c0_9] : memref<1x2x128xf32, #tpu.memory_space<vmem>>, vector<1x2x128xf32>
    tpu.vector_store %arg4[%c0_7, %c0_8, %c0_9], %10 {strides = array<i32>} : memref<1x2x128xf32, #tpu.memory_space<vmem>>, vector<1x2x128xf32>,
    return
  }
  func.func @transform_0(%arg0: i32) -> (i32, i32) {
    %c0_i32 = arith.constant 0 : i32
    %c0_i32_0 = arith.constant 0 : i32
    return %arg0, %c0_i32 : i32, i32
  }
  func.func @transform_1(%arg0: i32) -> (i32, i32) {
    %c0_i32 = arith.constant 0 : i32
    %c0_i32_0 = arith.constant 0 : i32
    %c0_i32_1 = arith.constant 0 : i32
    return %c0_i32, %c0_i32_0 : i32, i32
  }
  func.func @transform_2(%arg0: i32) -> (i32, i32) {
    %c0_i32 = arith.constant 0 : i32
    %c0_i32_0 = arith.constant 0 : i32
    return %arg0, %c0_i32 : i32, i32
  }
  func.func @transform_3(%arg0: i32) -> (i32, i32, i32) {
    %c0_i32 = arith.constant 0 : i32
    %c0_i32_0 = arith.constant 0 : i32
    %c0_i32_1 = arith.constant 0 : i32
    return %arg0, %c0_i32, %c0_i32_0 : i32, i32, i32
  }
}

module attributes {stable_mosaic.version = 11 : i64} {
  func.func @_matmul_stats_kernel(%arg0: i32, %arg1: memref<1024x512xbf16, #tpu.memory_space<vmem>>, %arg2: memref<512x128xbf16, #tpu.memory_space<vmem>>, %arg3: memref<1024x128xf32, #tpu.memory_space<vmem>>, %arg4: memref<1x2x128xf32, #tpu.memory_space<vmem>>) attributes {dimension_semantics = [#tpu.dimension_semantics<parallel>], iteration_bounds = array<i64: 2>, scalar_prefetch = 0 : i64, scratch_operands = 0 : i64, tpu.core_type = #tpu.core_type<tc>, window_params = [{transform_indices = @transform_0, window_bounds = array<i64: 1024, 512>}, {pipeline_mode = #tpu.pipeline_mode<synchronous>, transform_indices = @transform_1, window_bounds = array<i64: 512, 128>}, {transform_indices = @transform_2, window_bounds = array<i64: 1024, 128>}, {transform_indices = @transform_3, window_bounds = array<i64: 1, 2, 128>}]} {
    %c0 = arith.constant 0 : index
    %c0_0 = arith.constant 0 : index
    %0 = vector.load %arg1[%c0, %c0_0] : memref<1024x512xbf16, #tpu.memory_space<vmem>>, vector<1024x512xbf16>
    %c0_1 = arith.constant 0 : index
    %c0_2 = arith.constant 0 : index
    %1 = vector.load %arg2[%c0_1, %c0_2] : memref<512x128xbf16, #tpu.memory_space<vmem>>, vector<512x128xbf16>
    %cst = arith.constant dense<0.000000e+00> : vector<1024x128xf32>
    %2 = tpu.matmul %0, %1, %cst {dimension_numbers = #tpu.dot_dimension_numbers<[1], [0], [0], [1], [0, 0, 1, 1], [], []>} : vector<1024x512xbf16>, vector<512x128xbf16>, vector<1024x128xf32> -> vector<1024x128xf32>
    %c0_3 = arith.constant 0 : index
    %c0_4 = arith.constant 0 : index
    %3 = vector.load %arg3[%c0_3, %c0_4] : memref<1024x128xf32, #tpu.memory_space<vmem>>, vector<1024x128xf32>
    tpu.vector_store %arg3[%c0_3, %c0_4], %2 {strides = array<i32>} : memref<1024x128xf32, #tpu.memory_space<vmem>>, vector<1024x128xf32>,
    %cst_5 = arith.constant dense<0.000000e+00> : vector<128xf32>
    %4 = vector.multi_reduction <add>, %2, %cst_5 [0] : vector<1024x128xf32> to vector<128xf32>
    %5 = vector.shape_cast %4 : vector<128xf32> to vector<1x128xf32>
    %6 = arith.mulf %2, %2 : vector<1024x128xf32>
    %cst_6 = arith.constant dense<0.000000e+00> : vector<128xf32>
    %7 = vector.multi_reduction <add>, %6, %cst_6 [0] : vector<1024x128xf32> to vector<128xf32>
    %8 = vector.shape_cast %7 : vector<128xf32> to vector<1x128xf32>
    %9 = tpu.concatenate %5, %8 in 0 : vector<1x128xf32>, vector<1x128xf32> -> vector<2x128xf32>
    %10 = vector.shape_cast %9 : vector<2x128xf32> to vector<1x2x128xf32>
    %c0_7 = arith.constant 0 : index
    %c0_8 = arith.constant 0 : index
    %c0_9 = arith.constant 0 : index
    %11 = vector.load %arg4[%c0_7, %c0_8, %c0_9] : memref<1x2x128xf32, #tpu.memory_space<vmem>>, vector<1x2x128xf32>
    tpu.vector_store %arg4[%c0_7, %c0_8, %c0_9], %10 {strides = array<i32>} : memref<1x2x128xf32, #tpu.memory_space<vmem>>, vector<1x2x128xf32>,
    return
  }
  func.func @transform_0(%arg0: i32) -> (i32, i32) {
    %c0_i32 = arith.constant 0 : i32
    %c0_i32_0 = arith.constant 0 : i32
    return %arg0, %c0_i32 : i32, i32
  }
  func.func @transform_1(%arg0: i32) -> (i32, i32) {
    %c0_i32 = arith.constant 0 : i32
    %c0_i32_0 = arith.constant 0 : i32
    %c0_i32_1 = arith.constant 0 : i32
    return %c0_i32, %c0_i32_0 : i32, i32
  }
  func.func @transform_2(%arg0: i32) -> (i32, i32) {
    %c0_i32 = arith.constant 0 : i32
    %c0_i32_0 = arith.constant 0 : i32
    return %arg0, %c0_i32 : i32, i32
  }
  func.func @transform_3(%arg0: i32) -> (i32, i32, i32) {
    %c0_i32 = arith.constant 0 : i32
    %c0_i32_0 = arith.constant 0 : i32
    %c0_i32_1 = arith.constant 0 : i32
    return %arg0, %c0_i32, %c0_i32_0 : i32, i32, i32
  }
}

module attributes {stable_mosaic.version = 11 : i64} {
  func.func @_bn_act_kernel(%arg0: i32, %arg1: memref<1024x128xf32, #tpu.memory_space<vmem>>, %arg2: memref<1x128xf32, #tpu.memory_space<vmem>>, %arg3: memref<1x128xf32, #tpu.memory_space<vmem>>, %arg4: memref<1024x128xf32, #tpu.memory_space<vmem>>) attributes {dimension_semantics = [#tpu.dimension_semantics<parallel>], iteration_bounds = array<i64: 2>, scalar_prefetch = 0 : i64, scratch_operands = 0 : i64, tpu.core_type = #tpu.core_type<tc>, window_params = [{transform_indices = @transform_0, window_bounds = array<i64: 1024, 128>}, {pipeline_mode = #tpu.pipeline_mode<synchronous>, transform_indices = @transform_1, window_bounds = array<i64: 1, 128>}, {pipeline_mode = #tpu.pipeline_mode<synchronous>, transform_indices = @transform_2, window_bounds = array<i64: 1, 128>}, {transform_indices = @transform_3, window_bounds = array<i64: 1024, 128>}]} {
    %c0 = arith.constant 0 : index
    %c0_0 = arith.constant 0 : index
    %0 = vector.load %arg1[%c0, %c0_0] : memref<1024x128xf32, #tpu.memory_space<vmem>>, vector<1024x128xf32>
    %c0_1 = arith.constant 0 : index
    %c0_2 = arith.constant 0 : index
    %1 = vector.load %arg2[%c0_1, %c0_2] : memref<1x128xf32, #tpu.memory_space<vmem>>, vector<1x128xf32>
    %2 = vector.broadcast %1 : vector<1x128xf32> to vector<1024x128xf32>
    %3 = arith.mulf %0, %2 : vector<1024x128xf32>
    %c0_3 = arith.constant 0 : index
    %c0_4 = arith.constant 0 : index
    %4 = vector.load %arg3[%c0_3, %c0_4] : memref<1x128xf32, #tpu.memory_space<vmem>>, vector<1x128xf32>
    %5 = vector.broadcast %4 : vector<1x128xf32> to vector<1024x128xf32>
    %6 = arith.addf %3, %5 : vector<1024x128xf32>
    %cst = arith.constant 5.000000e-02 : f32
    %7 = vector.broadcast %cst : f32 to vector<1024x128xf32>
    %8 = arith.mulf %7, %6 : vector<1024x128xf32>
    %9 = arith.maximumf %6, %8 : vector<1024x128xf32>
    %c0_5 = arith.constant 0 : index
    %c0_6 = arith.constant 0 : index
    %10 = vector.load %arg4[%c0_5, %c0_6] : memref<1024x128xf32, #tpu.memory_space<vmem>>, vector<1024x128xf32>
    tpu.vector_store %arg4[%c0_5, %c0_6], %9 {strides = array<i32>} : memref<1024x128xf32, #tpu.memory_space<vmem>>, vector<1024x128xf32>,
    return
  }
  func.func @transform_0(%arg0: i32) -> (i32, i32) {
    %c0_i32 = arith.constant 0 : i32
    %c0_i32_0 = arith.constant 0 : i32
    return %arg0, %c0_i32 : i32, i32
  }
  func.func @transform_1(%arg0: i32) -> (i32, i32) {
    %c0_i32 = arith.constant 0 : i32
    %c0_i32_0 = arith.constant 0 : i32
    %c0_i32_1 = arith.constant 0 : i32
    return %c0_i32, %c0_i32_0 : i32, i32
  }
  func.func @transform_2(%arg0: i32) -> (i32, i32) {
    %c0_i32 = arith.constant 0 : i32
    %c0_i32_0 = arith.constant 0 : i32
    %c0_i32_1 = arith.constant 0 : i32
    return %c0_i32, %c0_i32_0 : i32, i32
  }
  func.func @transform_3(%arg0: i32) -> (i32, i32) {
    %c0_i32 = arith.constant 0 : i32
    %c0_i32_0 = arith.constant 0 : i32
    return %arg0, %c0_i32 : i32, i32
  }
}

module attributes {stable_mosaic.version = 11 : i64} {
  func.func @_matmul_tanh_kernel(%arg0: i32, %arg1: memref<1024x512xbf16, #tpu.memory_space<vmem>>, %arg2: memref<512x128xbf16, #tpu.memory_space<vmem>>, %arg3: memref<1024x128xf32, #tpu.memory_space<vmem>>) attributes {dimension_semantics = [#tpu.dimension_semantics<parallel>], iteration_bounds = array<i64: 2>, scalar_prefetch = 0 : i64, scratch_operands = 0 : i64, tpu.core_type = #tpu.core_type<tc>, window_params = [{transform_indices = @transform_0, window_bounds = array<i64: 1024, 512>}, {pipeline_mode = #tpu.pipeline_mode<synchronous>, transform_indices = @transform_1, window_bounds = array<i64: 512, 128>}, {transform_indices = @transform_2, window_bounds = array<i64: 1024, 128>}]} {
    %c0 = arith.constant 0 : index
    %c0_0 = arith.constant 0 : index
    %0 = vector.load %arg1[%c0, %c0_0] : memref<1024x512xbf16, #tpu.memory_space<vmem>>, vector<1024x512xbf16>
    %c0_1 = arith.constant 0 : index
    %c0_2 = arith.constant 0 : index
    %1 = vector.load %arg2[%c0_1, %c0_2] : memref<512x128xbf16, #tpu.memory_space<vmem>>, vector<512x128xbf16>
    %cst = arith.constant dense<0.000000e+00> : vector<1024x128xf32>
    %2 = tpu.matmul %0, %1, %cst {dimension_numbers = #tpu.dot_dimension_numbers<[1], [0], [0], [1], [0, 0, 1, 1], [], []>} : vector<1024x512xbf16>, vector<512x128xbf16>, vector<1024x128xf32> -> vector<1024x128xf32>
    %3 = math.tanh %2 : vector<1024x128xf32>
    %c0_3 = arith.constant 0 : index
    %c0_4 = arith.constant 0 : index
    %4 = vector.load %arg3[%c0_3, %c0_4] : memref<1024x128xf32, #tpu.memory_space<vmem>>, vector<1024x128xf32>
    tpu.vector_store %arg3[%c0_3, %c0_4], %3 {strides = array<i32>} : memref<1024x128xf32, #tpu.memory_space<vmem>>, vector<1024x128xf32>,
    return
  }
  func.func @transform_0(%arg0: i32) -> (i32, i32) {
    %c0_i32 = arith.constant 0 : i32
    %c0_i32_0 = arith.constant 0 : i32
    return %arg0, %c0_i32 : i32, i32
  }
  func.func @transform_1(%arg0: i32) -> (i32, i32) {
    %c0_i32 = arith.constant 0 : i32
    %c0_i32_0 = arith.constant 0 : i32
    %c0_i32_1 = arith.constant 0 : i32
    return %c0_i32, %c0_i32_0 : i32, i32
  }
  func.func @transform_2(%arg0: i32) -> (i32, i32) {
    %c0_i32 = arith.constant 0 : i32
    %c0_i32_0 = arith.constant 0 : i32
    return %arg0, %c0_i32 : i32, i32
  }
}

</mosaic_0001>

<bundles_post_ra>
// kernel: number_noise_simulation.14
= control target key start
LH: loop header
LB: loop body
LE: loop exit
PB: predicated region body
PF: predicated region fallthrough
CT: control target
= control target key end

     0   :  { %s750_s0 = inlined_call_operand.vmem [shape: f32[392,128], index: 0, kind: input, shape index: {}]   ;;  %s751_s1 = inlined_call_operand.vmem [shape: f32[1,128], index: 1, kind: input, shape index: {}]   ;;  %s752_s2 = inlined_call_operand.vmem [shape: f32[1,128], index: 2, kind: input, shape index: {}]   ;;  %s753_s3 = inlined_call_operand.vmem [shape: f32[392,128], index: 3, kind: output, shape index: {}]  }
   0x1   :  { %v14_v0 = vld [vmem:[%s750_s0] sm:$0xff]  ;;  %v15_v4 = vld [vmem:[%s750_s0 + $0x8] sm:$0xff]  ;;  %v16_v5 = vld [vmem:[%s750_s0 + $0x10] sm:$0xff] }
   0x2   :  { %v354_v1 = vld [vmem:[%s751_s1] ss:$0 sm:$0xff]  ;;  %v17_v6 = vld [vmem:[%s750_s0 + $0x18] sm:$0xff]  ;;  %v19_v11 = vld [vmem:[%s750_s0 + $0x28] sm:$0xff] }
   0x3   :  { %v359_v2 = vld [vmem:[%s752_s2] ss:$0 sm:$0xff]  ;;  %v70_v3 = vmul.f32 %v354_v1, %v14_v0  ;;  %v71_v7 = vmul.f32 %v354_v1, %v15_v4  ;;  %v72_v8 = vmul.f32 %v354_v1, %v16_v5  ;;  %v73_v9 = vmul.f32 %v354_v1, %v17_v6  ;;  %v20_v12 = vld [vmem:[%s750_s0 + $0x30] sm:$0xff]  ;;  %v21_v17 = vld [vmem:[%s750_s0 + $0x38] sm:$0xff] }
   0x4   :  { %v18_v10 = vld [vmem:[%s750_s0 + $0x20] sm:$0xff]  ;;  %v75_v15 = vmul.f32 %v354_v1, %v19_v11  ;;  %v76_v16 = vmul.f32 %v354_v1, %v20_v12  ;;  %v77_v21 = vmul.f32 %v354_v1, %v21_v17  ;;  %v23_v27 = vld [vmem:[%s750_s0 + $0x48] sm:$0xff]  ;;  %v24_v28 = vld [vmem:[%s750_s0 + $0x50] sm:$0xff] }
   0x5   :  { %v126_v13 = vadd.f32 %v359_v2, %v70_v3  ;;  %v74_v14 = vmul.f32 %v354_v1, %v18_v10  ;;  %v127_v18 = vadd.f32 %v359_v2, %v71_v7  ;;  %v128_v19 = vadd.f32 %v359_v2, %v72_v8  ;;  %v22_v22 = vld [vmem:[%s750_s0 + $0x40] sm:$0xff]  ;;  %v25_v29 = vld [vmem:[%s750_s0 + $0x58] sm:$0xff]  ;;  %v27_v43 = vld [vmem:[%s750_s0 + $0x68] sm:$0xff] }
   0x6   :  { %v129_v20 = vadd.f32 %v359_v2, %v73_v9  ;;  %v131_v25 = vadd.f32 %v359_v2, %v75_v15  ;;  %v132_v26 = vadd.f32 %v359_v2, %v76_v16  ;;  %v133_v33 = vadd.f32 %v359_v2, %v77_v21  ;;  %v26_v42 = vld [vmem:[%s750_s0 + $0x60] sm:$0xff]  ;;  %v28_v44 = vld [vmem:[%s750_s0 + $0x70] sm:$0xff]  ;;  %v29_v49 = vld [vmem:[%s750_s0 + $0x78] sm:$0xff] }
   0x7   :  { %v175_v23 = vmul.f32 0.05, %v126_v13  ;;  %v130_v24 = vadd.f32 %v359_v2, %v74_v14  ;;  %v176_v30 = vmul.f32 0.05, %v127_v18  ;;  %v177_v31 = vmul.f32 0.05, %v128_v19 }
   0x8   :  { %v178_v32 = vmul.f32 0.05, %v129_v20  ;;  %v180_v36 = vmul.f32 0.05, %v131_v25  ;;  %v181_v37 = vmul.f32 0.05, %v132_v26  ;;  %v78_v48 = vmul.f32 %v354_v1, %v22_v22 }
   0x9   :  { %v224_v34 = vmax.f32 %v126_v13, %v175_v23  ;;  %v179_v35 = vmul.f32 0.05, %v130_v24  ;;  %v225_v38 = vmax.f32 %v127_v18, %v176_v30  ;;  %v226_v39 = vmax.f32 %v128_v19, %v177_v31  ;;  %v30_v62 = vld [vmem:[%s750_s0 + $0x80] sm:$0xff]  ;;  %v31_v5 = vld [vmem:[%s750_s0 + $0x88] sm:$0xff]  ;;  %v32_v6 = vld [vmem:[%s750_s0 + $0x90] sm:$0xff] }
   0xa   :  { %v227_v40 = vmax.f32 %v129_v20, %v178_v32  ;;  %v182_v41 = vmul.f32 0.05, %v133_v33  ;;  %v229_v46 = vmax.f32 %v131_v25, %v180_v36  ;;  %v230_v47 = vmax.f32 %v132_v26, %v181_v37  ;;  %v33_v7 = vld [vmem:[%s750_s0 + $0x98] sm:$0xff]  ;;  %v34_v20 = vld [vmem:[%s750_s0 + $0xa0] sm:$0xff]  ;;  %v35_v21 = vld [vmem:[%s750_s0 + $0xa8] sm:$0xff] }
   0xb   :  { %273 = vst [vmem:[%s753_s3] sm:$0xff] %v224_v34  ;;  %v228_v45 = vmax.f32 %v130_v24, %v179_v35  ;;  %274 = vst [vmem:[%s753_s3 + $0x8] sm:$0xff] %v225_v38  ;;  %v79_v51 = vmul.f32 %v354_v1, %v23_v27  ;;  %v80_v52 = vmul.f32 %v354_v1, %v24_v28  ;;  %v36_v22 = vld [vmem:[%s750_s0 + $0xb0] sm:$0xff]  ;;  %v37_v27 = vld [vmem:[%s750_s0 + $0xb8] sm:$0xff] }
   0xc   :  { %275 = vst [vmem:[%s753_s3 + $0x10] sm:$0xff] %v226_v39  ;;  %276 = vst [vmem:[%s753_s3 + $0x18] sm:$0xff] %v227_v40  ;;  %v231_v50 = vmax.f32 %v133_v33, %v182_v41  ;;  %v81_v53 = vmul.f32 %v354_v1, %v25_v29  ;;  %v134_v54 = vadd.f32 %v359_v2, %v78_v48  ;;  %v38_v40 = vld [vmem:[%s750_s0 + $0xc0] sm:$0xff] }
   0xd   :  { %277 = vst [vmem:[%s753_s3 + $0x20] sm:$0xff] %v228_v45  ;;  %278 = vst [vmem:[%s753_s3 + $0x28] sm:$0xff] %v229_v46  ;;  %v82_v55 = vmul.f32 %v354_v1, %v26_v42  ;;  %v83_v56 = vmul.f32 %v354_v1, %v27_v43  ;;  %v84_v57 = vmul.f32 %v354_v1, %v28_v44  ;;  %v39_v45 = vld [vmem:[%s750_s0 + $0xc8] sm:$0xff]  ;;  %v40_v46 = vld [vmem:[%s750_s0 + $0xd0] sm:$0xff] }
   0xe   :  { %279 = vst [vmem:[%s753_s3 + $0x30] sm:$0xff] %v230_v47  ;;  %280 = vst [vmem:[%s753_s3 + $0x38] sm:$0xff] %v231_v50  ;;  %v135_v58 = vadd.f32 %v359_v2, %v79_v51  ;;  %v136_v59 = vadd.f32 %v359_v2, %v80_v52  ;;  %v137_v60 = vadd.f32 %v359_v2, %v81_v53  ;;  %v183_v63 = vmul.f32 0.05, %v134_v54  ;;  %v41_v47 = vld [vmem:[%s750_s0 + $0xd8] sm:$0xff] }
   0xf   :  { %v85_v61 = vmul.f32 %v354_v1, %v29_v49  ;;  %v138_v0 = vadd.f32 %v359_v2, %v82_v55  ;;  %v139_v3 = vadd.f32 %v359_v2, %v83_v56  ;;  %v140_v4 = vadd.f32 %v359_v2, %v84_v57 }
  0x10   :  { %v184_v8 = vmul.f32 0.05, %v135_v58  ;;  %v185_v9 = vmul.f32 0.05, %v136_v59  ;;  %v186_v10 = vmul.f32 0.05, %v137_v60  ;;  %v232_v12 = vmax.f32 %v134_v54, %v183_v63 }
  0x11   :  { %v141_v11 = vadd.f32 %v359_v2, %v85_v61  ;;  %v187_v13 = vmul.f32 0.05, %v138_v0  ;;  %v188_v14 = vmul.f32 0.05, %v139_v3  ;;  %v189_v15 = vmul.f32 0.05, %v140_v4 }
  0x12   :  { %v233_v16 = vmax.f32 %v135_v58, %v184_v8  ;;  %v234_v17 = vmax.f32 %v136_v59, %v185_v9  ;;  %v235_v18 = vmax.f32 %v137_v60, %v186_v10  ;;  %281 = vst [vmem:[%s753_s3 + $0x40] sm:$0xff] %v232_v12  ;;  %v86_v26 = vmul.f32 %v354_v1, %v30_v62  ;;  %v42_v60 = vld [vmem:[%s750_s0 + $0xe0] sm:$0xff]  ;;  %v43_v61 = vld [vmem:[%s750_s0 + $0xe8] sm:$0xff]  ;;  %v44_v62 = vld [vmem:[%s750_s0 + $0xf0] sm:$0xff] }
  0x13   :  { %v190_v19 = vmul.f32 0.05, %v141_v11  ;;  %v236_v23 = vmax.f32 %v138_v0, %v187_v13  ;;  %v237_v24 = vmax.f32 %v139_v3, %v188_v14  ;;  %v238_v25 = vmax.f32 %v140_v4, %v189_v15 }
  0x14   :  { %282 = vst [vmem:[%s753_s3 + $0x48] sm:$0xff] %v233_v16  ;;  %283 = vst [vmem:[%s753_s3 + $0x50] sm:$0xff] %v234_v17  ;;  %v87_v29 = vmul.f32 %v354_v1, %v31_v5  ;;  %v88_v30 = vmul.f32 %v354_v1, %v32_v6  ;;  %v89_v31 = vmul.f32 %v354_v1, %v33_v7  ;;  %v45_v5 = vld [vmem:[%s750_s0 + $0xf8] sm:$0xff] }
  0x15   :  { %284 = vst [vmem:[%s753_s3 + $0x58] sm:$0xff] %v235_v18  ;;  %v239_v28 = vmax.f32 %v141_v11, %v190_v19  ;;  %285 = vst [vmem:[%s753_s3 + $0x60] sm:$0xff] %v236_v23  ;;  %v142_v32 = vadd.f32 %v359_v2, %v86_v26  ;;  %v90_v33 = vmul.f32 %v354_v1, %v34_v20  ;;  %v46_v18 = vld [vmem:[%s750_s0 + $0x100] sm:$0xff]  ;;  %v47_v23 = vld [vmem:[%s750_s0 + $0x108] sm:$0xff] }
  0x16   :  { %286 = vst [vmem:[%s753_s3 + $0x68] sm:$0xff] %v237_v24  ;;  %287 = vst [vmem:[%s753_s3 + $0x70] sm:$0xff] %v238_v25  ;;  %v91_v34 = vmul.f32 %v354_v1, %v35_v21  ;;  %v92_v35 = vmul.f32 %v354_v1, %v36_v22  ;;  %v143_v36 = vadd.f32 %v359_v2, %v87_v29  ;;  %v48_v24 = vld [vmem:[%s750_s0 + $0x110] sm:$0xff]  ;;  %v49_v25 = vld [vmem:[%s750_s0 + $0x118] sm:$0xff] }
  0x17   :  { %288 = vst [vmem:[%s753_s3 + $0x78] sm:$0xff] %v239_v28  ;;  %v144_v37 = vadd.f32 %v359_v2, %v88_v30  ;;  %v145_v38 = vadd.f32 %v359_v2, %v89_v31  ;;  %v93_v39 = vmul.f32 %v354_v1, %v37_v27  ;;  %v191_v41 = vmul.f32 0.05, %v142_v32 }
  0x18   :  { %v146_v42 = vadd.f32 %v359_v2, %v90_v33  ;;  %v147_v43 = vadd.f32 %v359_v2, %v91_v34  ;;  %v148_v44 = vadd.f32 %v359_v2, %v92_v35  ;;  %v192_v48 = vmul.f32 0.05, %v143_v36 }
  0x19   :  { %v193_v49 = vmul.f32 0.05, %v144_v37  ;;  %v194_v50 = vmul.f32 0.05, %v145_v38  ;;  %v149_v51 = vadd.f32 %v359_v2, %v93_v39  ;;  %v240_v52 = vmax.f32 %v142_v32, %v191_v41  ;;  %v51_v39 = vld [vmem:[%s750_s0 + $0x128] sm:$0xff] }
  0x1a   :  { %v195_v53 = vmul.f32 0.05, %v146_v42  ;;  %v196_v54 = vmul.f32 0.05, %v147_v43  ;;  %v197_v55 = vmul.f32 0.05, %v148_v44  ;;  %v241_v56 = vmax.f32 %v143_v36, %v192_v48 }
  0x1b   :  { %v242_v57 = vmax.f32 %v144_v37, %v193_v49  ;;  %v243_v58 = vmax.f32 %v145_v38, %v194_v50  ;;  %v198_v59 = vmul.f32 0.05, %v149_v51  ;;  %289 = vst [vmem:[%s753_s3 + $0x80] sm:$0xff] %v240_v52  ;;  %v94_v4 = vmul.f32 %v354_v1, %v38_v40  ;;  %v50_v38 = vld [vmem:[%s750_s0 + $0x120] sm:$0xff]  ;;  %v52_v40 = vld [vmem:[%s750_s0 + $0x130] sm:$0xff] }
  0x1c   :  { %v244_v63 = vmax.f32 %v146_v42, %v195_v53  ;;  %v245_v0 = vmax.f32 %v147_v43, %v196_v54  ;;  %v246_v3 = vmax.f32 %v148_v44, %v197_v55  ;;  %290 = vst [vmem:[%s753_s3 + $0x88] sm:$0xff] %v241_v56  ;;  %v95_v7 = vmul.f32 %v354_v1, %v39_v45  ;;  %v53_v45 = vld [vmem:[%s750_s0 + $0x138] sm:$0xff] }
  0x1d   :  { %291 = vst [vmem:[%s753_s3 + $0x90] sm:$0xff] %v242_v57  ;;  %292 = vst [vmem:[%s753_s3 + $0x98] sm:$0xff] %v243_v58  ;;  %v247_v6 = vmax.f32 %v149_v51, %v198_v59  ;;  %v96_v8 = vmul.f32 %v354_v1, %v40_v46  ;;  %v97_v9 = vmul.f32 %v354_v1, %v41_v47  ;;  %v54_v58 = vld [vmem:[%s750_s0 + $0x140] sm:$0xff] }
  0x1e   :  { %293 = vst [vmem:[%s753_s3 + $0xa0] sm:$0xff] %v244_v63  ;;  %294 = vst [vmem:[%s753_s3 + $0xa8] sm:$0xff] %v245_v0  ;;  %v150_v10 = vadd.f32 %v359_v2, %v94_v4  ;;  %v98_v11 = vmul.f32 %v354_v1, %v42_v60  ;;  %v99_v12 = vmul.f32 %v354_v1, %v43_v61  ;;  %v55_v63 = vld [vmem:[%s750_s0 + $0x148] sm:$0xff]  ;;  %v56_v0 = vld [vmem:[%s750_s0 + $0x150] sm:$0xff] }
  0x1f   :  { %295 = vst [vmem:[%s753_s3 + $0xb0] sm:$0xff] %v246_v3  ;;  %v100_v13 = vmul.f32 %v354_v1, %v44_v62  ;;  %296 = vst [vmem:[%s753_s3 + $0xb8] sm:$0xff] %v247_v6  ;;  %v151_v14 = vadd.f32 %v359_v2, %v95_v7  ;;  %v152_v15 = vadd.f32 %v359_v2, %v96_v8  ;;  %v57_v3 = vld [vmem:[%s750_s0 + $0x158] sm:$0xff] }
  0x20   :  { %v153_v16 = vadd.f32 %v359_v2, %v97_v9  ;;  %v101_v17 = vmul.f32 %v354_v1, %v45_v5  ;;  %v199_v19 = vmul.f32 0.05, %v150_v10  ;;  %v154_v20 = vadd.f32 %v359_v2, %v98_v11 }
  0x21   :  { %v155_v21 = vadd.f32 %v359_v2, %v99_v12  ;;  %v156_v22 = vadd.f32 %v359_v2, %v100_v13  ;;  %v200_v26 = vmul.f32 0.05, %v151_v14  ;;  %v201_v27 = vmul.f32 0.05, %v152_v15 }
  0x22   :  { %v202_v28 = vmul.f32 0.05, %v153_v16  ;;  %v157_v29 = vadd.f32 %v359_v2, %v101_v17  ;;  %v248_v30 = vmax.f32 %v150_v10, %v199_v19  ;;  %v203_v31 = vmul.f32 0.05, %v154_v20  ;;  %v59_v17 = vld [vmem:[%s750_s0 + $0x168] sm:$0xff] }
  0x23   :  { %v204_v32 = vmul.f32 0.05, %v155_v21  ;;  %v205_v33 = vmul.f32 0.05, %v156_v22  ;;  %v249_v34 = vmax.f32 %v151_v14, %v200_v26  ;;  %v250_v35 = vmax.f32 %v152_v15, %v201_v27 }
  0x24   :  { %v251_v36 = vmax.f32 %v153_v16, %v202_v28  ;;  %v206_v37 = vmul.f32 0.05, %v157_v29  ;;  %297 = vst [vmem:[%s753_s3 + $0xc0] sm:$0xff] %v248_v30  ;;  %v252_v41 = vmax.f32 %v154_v20, %v203_v31  ;;  %v102_v44 = vmul.f32 %v354_v1, %v46_v18  ;;  %v58_v16 = vld [vmem:[%s750_s0 + $0x160] sm:$0xff]  ;;  %v60_v18 = vld [vmem:[%s750_s0 + $0x170] sm:$0xff] }
  0x25   :  { %v253_v42 = vmax.f32 %v155_v21, %v204_v32  ;;  %v254_v43 = vmax.f32 %v156_v22, %v205_v33  ;;  %298 = vst [vmem:[%s753_s3 + $0xc8] sm:$0xff] %v249_v34  ;;  %299 = vst [vmem:[%s753_s3 + $0xd0] sm:$0xff] %v250_v35  ;;  %v103_v47 = vmul.f32 %v354_v1, %v47_v23  ;;  %v61_v23 = vld [vmem:[%s750_s0 + $0x178] sm:$0xff] }
  0x26   :  { %300 = vst [vmem:[%s753_s3 + $0xd8] sm:$0xff] %v251_v36  ;;  %v255_v46 = vmax.f32 %v157_v29, %v206_v37  ;;  %v104_v48 = vmul.f32 %v354_v1, %v48_v24  ;;  %v105_v49 = vmul.f32 %v354_v1, %v49_v25  ;;  %301 = vst [vmem:[%s753_s3 + $0xe0] sm:$0xff] %v252_v41 }
  0x27   :  { %302 = vst [vmem:[%s753_s3 + $0xe8] sm:$0xff] %v253_v42  ;;  %303 = vst [vmem:[%s753_s3 + $0xf0] sm:$0xff] %v254_v43  ;;  %v158_v50 = vadd.f32 %v359_v2, %v102_v44  ;;  %v106_v51 = vmul.f32 %v354_v1, %v50_v38  ;;  %v107_v52 = vmul.f32 %v354_v1, %v51_v39 }
  0x28   :  { %v108_v53 = vmul.f32 %v354_v1, %v52_v40  ;;  %304 = vst [vmem:[%s753_s3 + $0xf8] sm:$0xff] %v255_v46  ;;  %v159_v54 = vadd.f32 %v359_v2, %v103_v47  ;;  %v160_v55 = vadd.f32 %v359_v2, %v104_v48  ;;  %v161_v56 = vadd.f32 %v359_v2, %v105_v49  ;;  %v62_v40 = vld [vmem:[%s750_s0 + $0x180] sm:$0xff] }
  0x29   :  { %v109_v57 = vmul.f32 %v354_v1, %v53_v45  ;;  %v207_v59 = vmul.f32 0.05, %v158_v50  ;;  %v162_v60 = vadd.f32 %v359_v2, %v106_v51  ;;  %v163_v61 = vadd.f32 %v359_v2, %v107_v52 }
  0x2a   :  { %v164_v62 = vadd.f32 %v359_v2, %v108_v53  ;;  %v208_v4 = vmul.f32 0.05, %v159_v54  ;;  %v209_v5 = vmul.f32 0.05, %v160_v55  ;;  %v210_v6 = vmul.f32 0.05, %v161_v56 }
  0x2b   :  { %v165_v7 = vadd.f32 %v359_v2, %v109_v57  ;;  %v256_v8 = vmax.f32 %v158_v50, %v207_v59  ;;  %v211_v9 = vmul.f32 0.05, %v162_v60  ;;  %v212_v10 = vmul.f32 0.05, %v163_v61 }
  0x2c   :  { %v213_v11 = vmul.f32 0.05, %v164_v62  ;;  %v257_v12 = vmax.f32 %v159_v54, %v208_v4  ;;  %v258_v13 = vmax.f32 %v160_v55, %v209_v5  ;;  %v259_v14 = vmax.f32 %v161_v56, %v210_v6 }
  0x2d   :  { %v214_v15 = vmul.f32 0.05, %v165_v7  ;;  %305 = vst [vmem:[%s753_s3 + $0x100] sm:$0xff] %v256_v8  ;;  %v260_v19 = vmax.f32 %v162_v60, %v211_v9  ;;  %v261_v20 = vmax.f32 %v163_v61, %v212_v10  ;;  %v110_v22 = vmul.f32 %v354_v1, %v54_v58 }
  0x2e   :  { %v262_v21 = vmax.f32 %v164_v62, %v213_v11  ;;  %306 = vst [vmem:[%s753_s3 + $0x108] sm:$0xff] %v257_v12  ;;  %307 = vst [vmem:[%s753_s3 + $0x110] sm:$0xff] %v258_v13  ;;  %v111_v25 = vmul.f32 %v354_v1, %v55_v63  ;;  %v112_v26 = vmul.f32 %v354_v1, %v56_v0 }
  0x2f   :  { %308 = vst [vmem:[%s753_s3 + $0x118] sm:$0xff] %v259_v14  ;;  %v263_v24 = vmax.f32 %v165_v7, %v214_v15  ;;  %v113_v27 = vmul.f32 %v354_v1, %v57_v3  ;;  %309 = vst [vmem:[%s753_s3 + $0x120] sm:$0xff] %v260_v19  ;;  %v166_v28 = vadd.f32 %v359_v2, %v110_v22 }
  0x30   :  { %310 = vst [vmem:[%s753_s3 + $0x128] sm:$0xff] %v261_v20  ;;  %311 = vst [vmem:[%s753_s3 + $0x130] sm:$0xff] %v262_v21  ;;  %v114_v29 = vmul.f32 %v354_v1, %v58_v16  ;;  %v115_v30 = vmul.f32 %v354_v1, %v59_v17  ;;  %v116_v31 = vmul.f32 %v354_v1, %v60_v18 }
  0x31   :  { %312 = vst [vmem:[%s753_s3 + $0x138] sm:$0xff] %v263_v24  ;;  %v167_v32 = vadd.f32 %v359_v2, %v111_v25  ;;  %v168_v33 = vadd.f32 %v359_v2, %v112_v26  ;;  %v169_v34 = vadd.f32 %v359_v2, %v113_v27  ;;  %v117_v35 = vmul.f32 %v354_v1, %v61_v23 }
  0x32   :  { %v215_v36 = vmul.f32 0.05, %v166_v28  ;;  %v170_v37 = vadd.f32 %v359_v2, %v114_v29  ;;  %v171_v38 = vadd.f32 %v359_v2, %v115_v30  ;;  %v172_v39 = vadd.f32 %v359_v2, %v116_v31 }
  0x33   :  { %v216_v41 = vmul.f32 0.05, %v167_v32  ;;  %v217_v42 = vmul.f32 0.05, %v168_v33  ;;  %v218_v43 = vmul.f32 0.05, %v169_v34  ;;  %v173_v44 = vadd.f32 %v359_v2, %v117_v35 }
  0x34   :  { %v264_v45 = vmax.f32 %v166_v28, %v215_v36  ;;  %v219_v46 = vmul.f32 0.05, %v170_v37  ;;  %v220_v47 = vmul.f32 0.05, %v171_v38  ;;  %v221_v48 = vmul.f32 0.05, %v172_v39 }
  0x35   :  { %v265_v49 = vmax.f32 %v167_v32, %v216_v41  ;;  %v266_v50 = vmax.f32 %v168_v33, %v217_v42  ;;  %v267_v51 = vmax.f32 %v169_v34, %v218_v43  ;;  %v222_v52 = vmul.f32 0.05, %v173_v44 }
  0x36   :  { %313 = vst [vmem:[%s753_s3 + $0x140] sm:$0xff] %v264_v45  ;;  %v268_v53 = vmax.f32 %v170_v37, %v219_v46  ;;  %v269_v54 = vmax.f32 %v171_v38, %v220_v47  ;;  %v270_v55 = vmax.f32 %v172_v39, %v221_v48  ;;  %v118_v56 = vmul.f32 %v354_v1, %v62_v40 }
  0x37   :  { %314 = vst [vmem:[%s753_s3 + $0x148] sm:$0xff] %v265_v49  ;;  %315 = vst [vmem:[%s753_s3 + $0x150] sm:$0xff] %v266_v50  ;;  %v271_v57 = vmax.f32 %v173_v44, %v222_v52 }
  0x38   :  { %316 = vst [vmem:[%s753_s3 + $0x158] sm:$0xff] %v267_v51  ;;  %317 = vst [vmem:[%s753_s3 + $0x160] sm:$0xff] %v268_v53  ;;  %v174_v1 = vadd.f32 %v359_v2, %v118_v56 }
  0x39   :  { %318 = vst [vmem:[%s753_s3 + $0x168] sm:$0xff] %v269_v54  ;;  %319 = vst [vmem:[%s753_s3 + $0x170] sm:$0xff] %v270_v55 }
  0x3a   :  { %320 = vst [vmem:[%s753_s3 + $0x178] sm:$0xff] %v271_v57  ;;  %v223_v58 = vmul.f32 0.05, %v174_v1 }
  0x3c   :  { %v272_v59 = vmax.f32 %v174_v1, %v223_v58 }
  0x3e   :  { %321 = vst [vmem:[%s753_s3 + $0x180] sm:$0xff] %v272_v59 }

// kernel: number_noise_simulation.13
= control target key start
LH: loop header
LB: loop body
LE: loop exit
PB: predicated region body
PF: predicated region fallthrough
CT: control target
= control target key end

     0   :  { %v928_v0 = vmov 0.0   ;;  %vm929_vm0 = vmmov 0   ;;  %vm194_vm1 = vcmask 130048   ;;  %vm708_vm2 = vcmask 1040384   ;;  %s1483_s1 = inlined_call_operand.vmem [shape: bf16[16,128], index: 1, kind: input, shape index: {}]   ;;  %s1484_s0 = inlined_call_operand.vmem [shape: bf16[392,16], index: 0, kind: input, shape index: {}]   ;;  %s1485_s2 = inlined_call_operand.vmem [shape: f32[392,128], index: 2, kind: output, shape index: {0}]   ;;  %s1486_s3 = inlined_call_operand.vmem [shape: f32[1,2,128], index: 3, kind: output, shape index: {1}]  }
   0x1   :  { %796 = vmatprep.subr.bf16.mxu0 %v928_v0  ;;  %v902_v1 = vld [vmem:[%s1483_s1] sm:$0xff]   ;;  %798 = vmatprep.mubr.msk.bf16.mxu0 %vm929_vm0, %v928_v0  ;;  %v910_v3 = vld [vmem:[%s1484_s0 + $0x68] sm:$0xff]   ;;  %v912_v5 = vld [vmem:[%s1484_s0 + $0x70] sm:$0xff]  }
   0x2   :  { %v903_v2 = vld [vmem:[%s1484_s0] sm:$0xff]   ;;  %898 = vmatprep.subr.bf16.mxu1 %v928_v0  ;;  %850 = vmatprep.mubr.msk.bf16.mxu1 %vm929_vm0, %v928_v0  ;;  %v904_v4 = vld [vmem:[%s1484_s0 + $0x8] sm:$0xff]   ;;  %v905_v6 = vld [vmem:[%s1484_s0 + $0x10] sm:$0xff]  }
   0x3   :  { %797 = vmatpush3.bf16.msra.mxu0 %v902_v1  ;;  %899 = vmatpush3.bf16.msra.mxu1 %v902_v1  ;;  %v914_v7 = vld [vmem:[%s1484_s0 + $0x78] sm:$0xff]   ;;  %v916_v9 = vld [vmem:[%s1484_s0 + $0x80] sm:$0xff]   ;;  %v918_v11 = vld [vmem:[%s1484_s0 + $0x88] sm:$0xff]  }
   0x4   :  { %v906_v8 = vld [vmem:[%s1484_s0 + $0x18] sm:$0xff]   ;;  %v907_v10 = vld [vmem:[%s1484_s0 + $0x20] sm:$0xff]   ;;  %v908_v12 = vld [vmem:[%s1484_s0 + $0x28] sm:$0xff]  }
   0x5   :  { %v920_v13 = vld [vmem:[%s1484_s0 + $0x90] sm:$0xff]   ;;  %v922_v15 = vld [vmem:[%s1484_s0 + $0x98] sm:$0xff]   ;;  %v923_v17 = vld [vmem:[%s1484_s0 + $0xa0] sm:$0xff]  }
   0x6   :  { %799 = vmatmul.mubr.msk.bf16.vlgmr.msra.gmra.mxu0 %vm194_vm1, %v903_v2  ;;  %851 = vmatmul.mubr.msk.bf16.vlgmr.msra.gmra.mxu1 %vm194_vm1, %v910_v3  ;;  %v909_v14 = vld [vmem:[%s1484_s0 + $0x30] sm:$0xff]   ;;  %v911_v16 = vld [vmem:[%s1484_s0 + $0x38] sm:$0xff]   ;;  %v913_v18 = vld [vmem:[%s1484_s0 + $0x40] sm:$0xff]  }
   0x7   :  { %802 = vmatprep.mubr.msk.bf16.mxu0 %vm929_vm0, %v928_v0  ;;  %854 = vmatprep.mubr.msk.bf16.mxu1 %vm929_vm0, %v928_v0  ;;  %v924_v19 = vld [vmem:[%s1484_s0 + $0xa8] sm:$0xff]   ;;  %v925_v21 = vld [vmem:[%s1484_s0 + $0xb0] sm:$0xff]   ;;  %v926_v23 = vld [vmem:[%s1484_s0 + $0xb8] sm:$0xff]  }
   0x8   :  { %v915_v20 = vld [vmem:[%s1484_s0 + $0x48] sm:$0xff]   ;;  %v917_v22 = vld [vmem:[%s1484_s0 + $0x50] sm:$0xff]   ;;  %v919_v24 = vld [vmem:[%s1484_s0 + $0x58] sm:$0xff]  }
   0x9   :  { %v927_v25 = vld [vmem:[%s1484_s0 + $0xc0] ss:$0 sps:$4 sm:$0xff]  }
   0xa   :  { %v921_v26 = vld [vmem:[%s1484_s0 + $0x60] sm:$0xff]  }
   0xe   :  { %803 = vmatmul.mubr.msk.bf16.gmra.mxu0 %vm194_vm1, %v904_v4  ;;  %855 = vmatmul.mubr.msk.bf16.gmra.mxu1 %vm194_vm1, %v912_v5 }
   0xf   :  { %806 = vmatprep.mubr.msk.bf16.mxu0 %vm929_vm0, %v928_v0  ;;  %858 = vmatprep.mubr.msk.bf16.mxu1 %vm929_vm0, %v928_v0 }
  0x16   :  { %807 = vmatmul.mubr.msk.bf16.gmra.mxu0 %vm194_vm1, %v905_v6  ;;  %859 = vmatmul.mubr.msk.bf16.gmra.mxu1 %vm194_vm1, %v914_v7 }
  0x17   :  { %810 = vmatprep.mubr.msk.bf16.mxu0 %vm929_vm0, %v928_v0  ;;  %862 = vmatprep.mubr.msk.bf16.mxu1 %vm929_vm0, %v928_v0 }
  0x1e   :  { %811 = vmatmul.mubr.msk.bf16.gmra.mxu0 %vm194_vm1, %v906_v8  ;;  %863 = vmatmul.mubr.msk.bf16.gmra.mxu1 %vm194_vm1, %v916_v9 }
  0x1f   :  { %814 = vmatprep.mubr.msk.bf16.mxu0 %vm929_vm0, %v928_v0  ;;  %866 = vmatprep.mubr.msk.bf16.mxu1 %vm929_vm0, %v928_v0 }
  0x26   :  { %815 = vmatmul.mubr.msk.bf16.gmra.mxu0 %vm194_vm1, %v907_v10  ;;  %867 = vmatmul.mubr.msk.bf16.gmra.mxu1 %vm194_vm1, %v918_v11 }
  0x27   :  { %818 = vmatprep.mubr.msk.bf16.mxu0 %vm929_vm0, %v928_v0  ;;  %870 = vmatprep.mubr.msk.bf16.mxu1 %vm929_vm0, %v928_v0 }
  0x2e   :  { %819 = vmatmul.mubr.msk.bf16.gmra.mxu0 %vm194_vm1, %v908_v12  ;;  %871 = vmatmul.mubr.msk.bf16.gmra.mxu1 %vm194_vm1, %v920_v13 }
  0x2f   :  { %822 = vmatprep.mubr.msk.bf16.mxu0 %vm929_vm0, %v928_v0  ;;  %874 = vmatprep.mubr.msk.bf16.mxu1 %vm929_vm0, %v928_v0 }
  0x36   :  { %823 = vmatmul.mubr.msk.bf16.gmra.mxu0 %vm194_vm1, %v909_v14  ;;  %875 = vmatmul.mubr.msk.bf16.gmra.mxu1 %vm194_vm1, %v922_v15 }
  0x37   :  { %826 = vmatprep.mubr.msk.bf16.mxu0 %vm929_vm0, %v928_v0  ;;  %878 = vmatprep.mubr.msk.bf16.mxu1 %vm929_vm0, %v928_v0 }
  0x3e   :  { %827 = vmatmul.mubr.msk.bf16.gmra.mxu0 %vm194_vm1, %v911_v16  ;;  %879 = vmatmul.mubr.msk.bf16.gmra.mxu1 %vm194_vm1, %v923_v17 }
  0x3f   :  { %830 = vmatprep.mubr.msk.bf16.mxu0 %vm929_vm0, %v928_v0  ;;  %882 = vmatprep.mubr.msk.bf16.mxu1 %vm929_vm0, %v928_v0 }
  0x46   :  { %831 = vmatmul.mubr.msk.bf16.gmra.mxu0 %vm194_vm1, %v913_v18  ;;  %883 = vmatmul.mubr.msk.bf16.gmra.mxu1 %vm194_vm1, %v924_v19 }
  0x47   :  { %834 = vmatprep.mubr.msk.bf16.mxu0 %vm929_vm0, %v928_v0  ;;  %886 = vmatprep.mubr.msk.bf16.mxu1 %vm929_vm0, %v928_v0 }
  0x4e   :  { %835 = vmatmul.mubr.msk.bf16.gmra.mxu0 %vm194_vm1, %v915_v20  ;;  %887 = vmatmul.mubr.msk.bf16.gmra.mxu1 %vm194_vm1, %v925_v21 }
  0x4f   :  { %838 = vmatprep.mubr.msk.bf16.mxu0 %vm929_vm0, %v928_v0  ;;  %890 = vmatprep.mubr.msk.bf16.mxu1 %vm929_vm0, %v928_v0 }
  0x56   :  { %839 = vmatmul.mubr.msk.bf16.gmra.mxu0 %vm194_vm1, %v917_v22  ;;  %891 = vmatmul.mubr.msk.bf16.gmra.mxu1 %vm194_vm1, %v926_v23 }
  0x57   :  { %842 = vmatprep.mubr.msk.bf16.mxu0 %vm929_vm0, %v928_v0  ;;  %894 = vmatprep.mubr.msk.bf16.mxu1 %vm929_vm0, %v928_v0 }
  0x5e   :  { %843 = vmatmul.mubr.msk.bf16.gmra.mxu0 %vm194_vm1, %v919_v24  ;;  %895 = vmatmul.mubr.msk.bf16.gmra.mxu1 %vm194_vm1, %v927_v25 }
  0x5f   :  { %846 = vmatprep.mubr.msk.bf16.mxu0 %vm929_vm0, %v928_v0 }
  0x66   :  { %847 = vmatmul.mubr.msk.bf16.gmra.mxu0 %vm194_vm1, %v921_v26 }
  0xc6   :  { %v1105_v27 = vpop.f32.mrf.mxu0  ;;  %v1117_v30 = vpop.f32.mrf.mxu1 }
  0xc7   :  { %502 = vst [vmem:[%s1485_s2] sm:$0xff] %v1105_v27  ;;  %528 = vst [vmem:[%s1485_s2 + $0xd0] sm:$0xff] %v1117_v30  ;;  %v605_v15 = vmul.f32 %v1105_v27, %v1105_v27 }
  0xc8   :  { %v800_v28 = vpop.f32.mrf.mxu0  ;;  %v852_v32 = vpop.f32.mrf.mxu1 }
  0xca   :  { %v1111_v29 = vpop.f32.mrf.mxu0  ;;  %v1129_v34 = vpop.f32.mrf.mxu1 }
  0xcb   :  { %503 = vst [vmem:[%s1485_s2 + $0x8] sm:$0xff] %v1111_v29  ;;  %529 = vst [vmem:[%s1485_s2 + $0xd8] sm:$0xff] %v1129_v34  ;;  %v606_v12 = vmul.f32 %v1111_v29, %v1111_v29  ;;  %v551_v16 = vadd.f32 %v1111_v29, %v1105_v27 }
  0xcc   :  { %v801_v31 = vpop.f32.mrf.mxu0  ;;  %v853_v36 = vpop.f32.mrf.mxu1 }
  0xcd   :  { %v654_v20 = vadd.f32 %v606_v12, %v605_v15 }
  0xce   :  { %v1123_v33 = vpop.f32.mrf.mxu0  ;;  %v1141_v38 = vpop.f32.mrf.mxu1 }
  0xcf   :  { %504 = vst [vmem:[%s1485_s2 + $0x10] sm:$0xff] %v1123_v33  ;;  %530 = vst [vmem:[%s1485_s2 + $0xe0] sm:$0xff] %v1141_v38  ;;  %v607_v17 = vmul.f32 %v1123_v33, %v1123_v33  ;;  %v552_v21 = vadd.f32 %v551_v16, %v1123_v33 }
  0xd0   :  { %v804_v35 = vpop.f32.mrf.mxu0  ;;  %v856_v40 = vpop.f32.mrf.mxu1 }
  0xd1   :  { %v655_v25 = vadd.f32 %v654_v20, %v607_v17 }
  0xd2   :  { %v1135_v37 = vpop.f32.mrf.mxu0  ;;  %v1153_v42 = vpop.f32.mrf.mxu1 }
  0xd3   :  { %505 = vst [vmem:[%s1485_s2 + $0x18] sm:$0xff] %v1135_v37  ;;  %531 = vst [vmem:[%s1485_s2 + $0xe8] sm:$0xff] %v1153_v42  ;;  %v608_v22 = vmul.f32 %v1135_v37, %v1135_v37  ;;  %v553_v26 = vadd.f32 %v552_v21, %v1135_v37 }
  0xd4   :  { %v805_v39 = vpop.f32.mrf.mxu0  ;;  %v857_v44 = vpop.f32.mrf.mxu1 }
  0xd5   :  { %v656_v31 = vadd.f32 %v655_v25, %v608_v22 }
  0xd6   :  { %v1147_v41 = vpop.f32.mrf.mxu0  ;;  %v1165_v46 = vpop.f32.mrf.mxu1 }
  0xd7   :  { %506 = vst [vmem:[%s1485_s2 + $0x20] sm:$0xff] %v1147_v41  ;;  %532 = vst [vmem:[%s1485_s2 + $0xf0] sm:$0xff] %v1165_v46  ;;  %v609_v27 = vmul.f32 %v1147_v41, %v1147_v41  ;;  %v554_v32 = vadd.f32 %v553_v26, %v1147_v41 }
  0xd8   :  { %v808_v43 = vpop.f32.mrf.mxu0  ;;  %v860_v48 = vpop.f32.mrf.mxu1 }
  0xd9   :  { %v657_v37 = vadd.f32 %v656_v31, %v609_v27 }
  0xda   :  { %v1159_v45 = vpop.f32.mrf.mxu0  ;;  %v1177_v50 = vpop.f32.mrf.mxu1 }
  0xdb   :  { %507 = vst [vmem:[%s1485_s2 + $0x28] sm:$0xff] %v1159_v45  ;;  %533 = vst [vmem:[%s1485_s2 + $0xf8] sm:$0xff] %v1177_v50  ;;  %v610_v33 = vmul.f32 %v1159_v45, %v1159_v45  ;;  %v555_v39 = vadd.f32 %v554_v32, %v1159_v45 }
  0xdc   :  { %v809_v47 = vpop.f32.mrf.mxu0  ;;  %v861_v52 = vpop.f32.mrf.mxu1 }
  0xdd   :  { %v658_v41 = vadd.f32 %v657_v37, %v610_v33 }
  0xde   :  { %v1171_v49 = vpop.f32.mrf.mxu0  ;;  %v1189_v54 = vpop.f32.mrf.mxu1 }
  0xdf   :  { %508 = vst [vmem:[%s1485_s2 + $0x30] sm:$0xff] %v1171_v49  ;;  %534 = vst [vmem:[%s1485_s2 + $0x100] sm:$0xff] %v1189_v54  ;;  %v611_v40 = vmul.f32 %v1171_v49, %v1171_v49  ;;  %v556_v47 = vadd.f32 %v555_v39, %v1171_v49 }
  0xe0   :  { %v812_v51 = vpop.f32.mrf.mxu0  ;;  %v864_v56 = vpop.f32.mrf.mxu1 }
  0xe1   :  { %v659_v52 = vadd.f32 %v658_v41, %v611_v40 }
  0xe2   :  { %v1183_v53 = vpop.f32.mrf.mxu0  ;;  %v1201_v58 = vpop.f32.mrf.mxu1 }
  0xe3   :  { %509 = vst [vmem:[%s1485_s2 + $0x38] sm:$0xff] %v1183_v53  ;;  %535 = vst [vmem:[%s1485_s2 + $0x108] sm:$0xff] %v1201_v58  ;;  %v612_v45 = vmul.f32 %v1183_v53, %v1183_v53 }
  0xe4   :  { %v813_v55 = vpop.f32.mrf.mxu0  ;;  %v865_v60 = vpop.f32.mrf.mxu1 }
  0xe5   :  { %v557_v55 = vadd.f32 %v556_v47, %v1183_v53  ;;  %v660_v49 = vadd.f32 %v659_v52, %v612_v45 }
  0xe6   :  { %v1195_v57 = vpop.f32.mrf.mxu0  ;;  %v1213_v62 = vpop.f32.mrf.mxu1 }
  0xe7   :  { %510 = vst [vmem:[%s1485_s2 + $0x40] sm:$0xff] %v1195_v57  ;;  %536 = vst [vmem:[%s1485_s2 + $0x110] sm:$0xff] %v1213_v62  ;;  %v613_v56 = vmul.f32 %v1195_v57, %v1195_v57 }
  0xe8   :  { %v816_v59 = vpop.f32.mrf.mxu0  ;;  %v868_v0 = vpop.f32.mrf.mxu1 }
  0xea   :  { %v1207_v61 = vpop.f32.mrf.mxu0  ;;  %v1225_v2 = vpop.f32.mrf.mxu1 }
  0xeb   :  { %511 = vst [vmem:[%s1485_s2 + $0x48] sm:$0xff] %v1207_v61  ;;  %537 = vst [vmem:[%s1485_s2 + $0x118] sm:$0xff] %v1225_v2  ;;  %v614_v53 = vmul.f32 %v1207_v61, %v1207_v61 }
  0xec   :  { %v817_v63 = vpop.f32.mrf.mxu0  ;;  %v869_v4 = vpop.f32.mrf.mxu1 }
  0xed   :  { %v558_v63 = vadd.f32 %v557_v55, %v1195_v57  ;;  %v661_v4 = vadd.f32 %v660_v49, %v613_v56 }
  0xee   :  { %v1219_v1 = vpop.f32.mrf.mxu0  ;;  %v1237_v6 = vpop.f32.mrf.mxu1 }
  0xef   :  { %512 = vst [vmem:[%s1485_s2 + $0x50] sm:$0xff] %v1219_v1  ;;  %538 = vst [vmem:[%s1485_s2 + $0x120] sm:$0xff] %v1237_v6  ;;  %v662_v57 = vadd.f32 %v661_v4, %v614_v53 }
  0xf0   :  { %v820_v3 = vpop.f32.mrf.mxu0  ;;  %v872_v8 = vpop.f32.mrf.mxu1 }
  0xf1   :  { %v615_v8 = vmul.f32 %v1219_v1, %v1219_v1 }
  0xf2   :  { %v1231_v5 = vpop.f32.mrf.mxu0  ;;  %v1249_v10 = vpop.f32.mrf.mxu1 }
  0xf3   :  { %513 = vst [vmem:[%s1485_s2 + $0x58] sm:$0xff] %v1231_v5  ;;  %539 = vst [vmem:[%s1485_s2 + $0x128] sm:$0xff] %v1249_v10  ;;  %v663_v17 = vadd.f32 %v662_v57, %v615_v8 }
  0xf4   :  { %v821_v7 = vpop.f32.mrf.mxu0  ;;  %v873_v13 = vpop.f32.mrf.mxu1 }
  0xf5   :  { %v559_v7 = vadd.f32 %v558_v63, %v1207_v61  ;;  %v616_v61 = vmul.f32 %v1231_v5, %v1231_v5 }
  0xf6   :  { %v1243_v9 = vpop.f32.mrf.mxu0  ;;  %v1269_v18 = vpop.f32.mrf.mxu1 }
  0xf7   :  { %514 = vst [vmem:[%s1485_s2 + $0x60] sm:$0xff] %v1243_v9  ;;  %540 = vst [vmem:[%s1485_s2 + $0x130] sm:$0xff] %v1269_v18  ;;  %v560_v13 = vadd.f32 %v559_v7, %v1219_v1  ;;  %v617_v20 = vmul.f32 %v1243_v9, %v1243_v9  ;;  %v664_v1 = vadd.f32 %v663_v17, %v616_v61 }
  0xf8   :  { %v824_v11 = vpop.f32.mrf.mxu0  ;;  %v876_v23 = vpop.f32.mrf.mxu1 }
  0xf9   :  { %v665_v27 = vadd.f32 %v664_v1, %v617_v20 }
  0xfa   :  { %v1257_v14 = vpop.f32.mrf.mxu0  ;;  %v1287_v28 = vpop.f32.mrf.mxu1 }
  0xfb   :  { %515 = vst [vmem:[%s1485_s2 + $0x68] sm:$0xff] %v1257_v14  ;;  %541 = vst [vmem:[%s1485_s2 + $0x138] sm:$0xff] %v1287_v28 }
  0xfc   :  { %v825_v19 = vpop.f32.mrf.mxu0  ;;  %v877_v35 = vpop.f32.mrf.mxu1 }
  0xfd   :  { %v561_v19 = vadd.f32 %v560_v13, %v1231_v5  ;;  %v618_v5 = vmul.f32 %v1257_v14, %v1257_v14 }
  0xfe   :  { %v1278_v24 = vpop.f32.mrf.mxu0  ;;  %v1302_v43 = vpop.f32.mrf.mxu1 }
  0xff   :  { %516 = vst [vmem:[%s1485_s2 + $0x70] sm:$0xff] %v1278_v24  ;;  %542 = vst [vmem:[%s1485_s2 + $0x140] sm:$0xff] %v1302_v43  ;;  %v562_v23 = vadd.f32 %v561_v19, %v1243_v9  ;;  %v619_v31 = vmul.f32 %v1278_v24, %v1278_v24  ;;  %v666_v9 = vadd.f32 %v665_v27, %v618_v5 }
 0x100   :  { %v828_v29 = vpop.f32.mrf.mxu0  ;;  %v880_v48 = vpop.f32.mrf.mxu1 }
 0x101   :  { %v563_v29 = vadd.f32 %v562_v23, %v1257_v14  ;;  %v667_v40 = vadd.f32 %v666_v9, %v619_v31 }
 0x102   :  { %v363_v36 = vpop.f32.mrf.mxu0  ;;  %v1317_v59 = vpop.f32.mrf.mxu1 }
 0x103   :  { %517 = vst [vmem:[%s1485_s2 + $0x78] sm:$0xff] %v363_v36  ;;  %543 = vst [vmem:[%s1485_s2 + $0x148] sm:$0xff] %v1317_v59  ;;  %v564_v35 = vadd.f32 %v563_v29, %v1278_v24  ;;  %v620_v37 = vmul.f32 %v363_v36, %v363_v36 }
 0x104   :  { %v829_v44 = vpop.f32.mrf.mxu0  ;;  %v881_v0 = vpop.f32.mrf.mxu1 }
 0x105   :  { %v565_v44 = vadd.f32 %v564_v35, %v363_v36  ;;  %v668_v48 = vadd.f32 %v667_v40, %v620_v37 }
 0x106   :  { %v368_v51 = vpop.f32.mrf.mxu0  ;;  %v1332_v11 = vpop.f32.mrf.mxu1 }
 0x107   :  { %518 = vst [vmem:[%s1485_s2 + $0x80] sm:$0xff] %v368_v51  ;;  %544 = vst [vmem:[%s1485_s2 + $0x150] sm:$0xff] %v1332_v11  ;;  %v621_v41 = vmul.f32 %v368_v51, %v368_v51  ;;  %v566_v24 = vadd.f32 %v565_v44, %v368_v51 }
 0x108   :  { %v832_v60 = vpop.f32.mrf.mxu0  ;;  %v884_v15 = vpop.f32.mrf.mxu1 }
 0x109   :  { %v669_v60 = vadd.f32 %v668_v48, %v621_v41 }
 0x10a   :  { %v371_v3 = vpop.f32.mrf.mxu0  ;;  %v1347_v21 = vpop.f32.mrf.mxu1 }
 0x10b   :  { %519 = vst [vmem:[%s1485_s2 + $0x88] sm:$0xff] %v371_v3  ;;  %545 = vst [vmem:[%s1485_s2 + $0x158] sm:$0xff] %v1347_v21  ;;  %v622_v52 = vmul.f32 %v371_v3, %v371_v3  ;;  %v567_v36 = vadd.f32 %v566_v24, %v371_v3 }
 0x10c   :  { %v833_v12 = vpop.f32.mrf.mxu0  ;;  %v885_v25 = vpop.f32.mrf.mxu1 }
 0x10d   :  { %v670_v0 = vadd.f32 %v669_v60, %v622_v52 }
 0x10e   :  { %v376_v16 = vpop.f32.mrf.mxu0  ;;  %v1362_v32 = vpop.f32.mrf.mxu1 }
 0x10f   :  { %520 = vst [vmem:[%s1485_s2 + $0x90] sm:$0xff] %v376_v16  ;;  %546 = vst [vmem:[%s1485_s2 + $0x160] sm:$0xff] %v1362_v32  ;;  %v623_v49 = vmul.f32 %v376_v16, %v376_v16  ;;  %v568_v51 = vadd.f32 %v567_v36, %v376_v16 }
 0x110   :  { %v836_v22 = vpop.f32.mrf.mxu0  ;;  %v888_v14 = vpop.f32.mrf.mxu1 }
 0x111   :  { %v671_v12 = vadd.f32 %v670_v0, %v623_v49  ;;  %v632_v49 = vmul.f32 %v1129_v34, %v1129_v34 }
 0x112   :  { %v379_v26 = vpop.f32.mrf.mxu0  ;;  %v1372_v47 = vpop.f32.mrf.mxu1 }
 0x113   :  { %521 = vst [vmem:[%s1485_s2 + $0x98] sm:$0xff] %v379_v26  ;;  %547 = vst [vmem:[%s1485_s2 + $0x168] sm:$0xff] %v1372_v47  ;;  %v624_v4 = vmul.f32 %v379_v26, %v379_v26  ;;  %v569_v3 = vadd.f32 %v568_v51, %v379_v26  ;;  %v633_v51 = vmul.f32 %v1141_v38, %v1141_v38 }
 0x114   :  { %v837_v33 = vpop.f32.mrf.mxu0  ;;  %v889_v55 = vpop.f32.mrf.mxu1 }
 0x115   :  { %v672_v15 = vadd.f32 %v671_v12, %v624_v4 }
 0x116   :  { %v384_v39 = vpop.f32.mrf.mxu0  ;;  %v1381_v63 = vpop.f32.mrf.mxu1 }
 0x117   :  { %522 = vst [vmem:[%s1485_s2 + $0xa0] sm:$0xff] %v384_v39  ;;  %548 = vst [vmem:[%s1485_s2 + $0x170] sm:$0xff] %v1381_v63  ;;  %v625_v57 = vmul.f32 %v384_v39, %v384_v39  ;;  %v570_v16 = vadd.f32 %v569_v3, %v384_v39 }
 0x118   :  { %v840_v45 = vpop.f32.mrf.mxu0  ;;  %v892_v7 = vpop.f32.mrf.mxu1 }
 0x119   :  { %v673_v22 = vadd.f32 %v672_v15, %v625_v57 }
 0x11a   :  { %v387_v56 = vpop.f32.mrf.mxu0  ;;  %v1390_v13 = vpop.f32.mrf.mxu1 }
 0x11b   :  { %523 = vst [vmem:[%s1485_s2 + $0xa8] sm:$0xff] %v387_v56  ;;  %549 = vst [vmem:[%s1485_s2 + $0x178] sm:$0xff] %v1390_v13  ;;  %v626_v17 = vmul.f32 %v387_v56, %v387_v56  ;;  %v571_v1 = vadd.f32 %v570_v16, %v387_v56  ;;  %v631_v56 = vmul.f32 %v1117_v30, %v1117_v30 }
 0x11c   :  { %v841_v53 = vpop.f32.mrf.mxu0  ;;  %v893_v19 = vpop.f32.mrf.mxu1 }
 0x11d   :  { %v674_v26 = vadd.f32 %v673_v22, %v626_v17 }
 0x11e   :  { %v392_v8 = vpop.f32.mrf.mxu0  ;;  %v1399_v5 = vpop.f32.mrf.mxu1 }
 0x11f   :  { %524 = vst [vmem:[%s1485_s2 + $0xb0] sm:$0xff] %v392_v8  ;;  %v627_v23 = vmul.f32 %v392_v8, %v392_v8  ;;  %550 = vst [vmem:[%s1485_s2 + $0x180] sm:$0xff] %v1399_v5  ;;  %v572_v27 = vadd.f32 %v571_v1, %v392_v8  ;;  %v634_v8 = vmul.f32 %v1153_v42, %v1153_v42 }
 0x120   :  { %v844_v61 = vpop.f32.mrf.mxu0  ;;  %v896_v31 = vpop.f32.mrf.mxu1 }
 0x121   :  { %v675_v9 = vadd.f32 %v674_v26, %v627_v23 }
 0x122   :  { %v395_v20 = vpop.f32.mrf.mxu0  ;;  %v499_v14 = vpop.f32.mrf.mxu1 }
 0x123   :  { %525 = vst [vmem:[%s1485_s2 + $0xb8] sm:$0xff] %v395_v20  ;;  %v628_v29 = vmul.f32 %v395_v20, %v395_v20  ;;  %v573_v35 = vadd.f32 %v572_v27, %v395_v20  ;;  %v644_v14 = vmul.f32 %v1287_v28, %v1287_v28 }
 0x124   :  { %v845_v25 = vpop.f32.mrf.mxu0  ;;  %v897_v41 = vpop.f32.mrf.mxu1 }
 0x125   :  { %v676_v40 = vadd.f32 %v675_v9, %v628_v29  ;;  %v643_v9 = vmul.f32 %v1269_v18, %v1269_v18  ;;  %v646_v41 = vmul.f32 %v1317_v59, %v1317_v59 }
 0x126   :  { %v400_v33 = vpop.f32.mrf.mxu0 }
 0x127   :  { %526 = vst [vmem:[%s1485_s2 + $0xc0] sm:$0xff] %v400_v33  ;;  %v629_v37 = vmul.f32 %v400_v33, %v400_v33  ;;  %v574_v44 = vadd.f32 %v573_v35, %v400_v33 }
 0x128   :  { %v848_v39 = vpop.f32.mrf.mxu0 }
 0x129   :  { %v677_v48 = vadd.f32 %v676_v40, %v629_v37  ;;  %v645_v40 = vmul.f32 %v1302_v43, %v1302_v43 }
 0x12a   :  { %v403_v45 = vpop.f32.mrf.mxu0 }
 0x12b   :  { %527 = vst [vmem:[%s1485_s2 + $0xc8] sm:$0xff] %v403_v45  ;;  %v575_v24 = vadd.f32 %v574_v44, %v403_v45  ;;  %v630_v52 = vmul.f32 %v403_v45, %v403_v45 }
 0x12c   :  { %v849_v55 = vpop.f32.mrf.mxu0 }
 0x12d   :  { %v576_v60 = vadd.f32 %v575_v24, %v1117_v30  ;;  %v678_v36 = vadd.f32 %v677_v48, %v630_v52  ;;  %v635_v30 = vmul.f32 %v1165_v46, %v1165_v46  ;;  %v647_v48 = vmul.f32 %v1332_v11, %v1332_v11 }
 0x12e   :  { %v648_v52 = vmul.f32 %v1347_v21, %v1347_v21 }
 0x12f   :  { %v577_v53 = vadd.f32 %v576_v60, %v1129_v34  ;;  %v679_v0 = vadd.f32 %v678_v36, %v631_v56  ;;  %v636_v34 = vmul.f32 %v1177_v50, %v1177_v50  ;;  %v649_v56 = vmul.f32 %v1362_v32, %v1362_v32 }
 0x130   :  { %v650_v36 = vmul.f32 %v1372_v47, %v1372_v47 }
 0x131   :  { %v578_v4 = vadd.f32 %v577_v53, %v1141_v38  ;;  %v680_v7 = vadd.f32 %v679_v0, %v632_v49  ;;  %v637_v38 = vmul.f32 %v1189_v54, %v1189_v54  ;;  %v651_v53 = vmul.f32 %v1381_v63, %v1381_v63 }
 0x133   :  { %v579_v12 = vadd.f32 %v578_v4, %v1153_v42  ;;  %v681_v3 = vadd.f32 %v680_v7, %v633_v51  ;;  %v638_v42 = vmul.f32 %v1201_v58, %v1201_v58  ;;  %v652_v51 = vmul.f32 %v1390_v13, %v1390_v13 }
 0x135   :  { %v580_v57 = vadd.f32 %v579_v12, %v1165_v46  ;;  %v682_v61 = vadd.f32 %v681_v3, %v634_v8  ;;  %v639_v46 = vmul.f32 %v1213_v62, %v1213_v62 }
 0x137   :  { %v581_v15 = vadd.f32 %v580_v57, %v1177_v50  ;;  %v683_v16 = vadd.f32 %v682_v61, %v635_v30  ;;  %v640_v50 = vmul.f32 %v1225_v2, %v1225_v2 }
 0x139   :  { %v684_v17 = vadd.f32 %v683_v16, %v636_v34  ;;  %v582_v19 = vadd.f32 %v581_v15, %v1189_v54  ;;  %v641_v54 = vmul.f32 %v1237_v6, %v1237_v6 }
 0x13b   :  { %v583_v20 = vadd.f32 %v582_v19, %v1201_v58  ;;  %v685_v22 = vadd.f32 %v684_v17, %v637_v38  ;;  %v642_v58 = vmul.f32 %v1249_v10, %v1249_v10 }
 0x13d   :  { %v584_v1 = vadd.f32 %v583_v20, %v1213_v62  ;;  %v686_v23 = vadd.f32 %v685_v22, %v638_v42 }
 0x13f   :  { %v585_v25 = vadd.f32 %v584_v1, %v1225_v2  ;;  %v687_v26 = vadd.f32 %v686_v23, %v639_v46 }
 0x141   :  { %v586_v27 = vadd.f32 %v585_v25, %v1237_v6  ;;  %v688_v29 = vadd.f32 %v687_v26, %v640_v50 }
 0x143   :  { %v587_v31 = vadd.f32 %v586_v27, %v1249_v10  ;;  %v689_v33 = vadd.f32 %v688_v29, %v641_v54 }
 0x145   :  { %v588_v62 = vadd.f32 %v587_v31, %v1269_v18  ;;  %v690_v35 = vadd.f32 %v689_v33, %v642_v58 }
 0x147   :  { %v691_v2 = vadd.f32 %v690_v35, %v643_v9  ;;  %v589_v37 = vadd.f32 %v588_v62, %v1287_v28 }
 0x149   :  { %v692_v6 = vadd.f32 %v691_v2, %v644_v14  ;;  %v590_v39 = vadd.f32 %v589_v37, %v1302_v43 }
 0x14b   :  { %v693_v10 = vadd.f32 %v692_v6, %v645_v40  ;;  %v591_v44 = vadd.f32 %v590_v39, %v1317_v59 }
 0x14d   :  { %v694_v18 = vadd.f32 %v693_v10, %v646_v41  ;;  %v592_v45 = vadd.f32 %v591_v44, %v1332_v11 }
 0x14f   :  { %v695_v24 = vadd.f32 %v694_v18, %v647_v48  ;;  %v593_v28 = vadd.f32 %v592_v45, %v1347_v21 }
 0x151   :  { %v696_v55 = vadd.f32 %v695_v24, %v648_v52  ;;  %v594_v43 = vadd.f32 %v593_v28, %v1362_v32  ;;  %v653_v32 = vmul.f32 %v1399_v5, %v1399_v5 }
 0x153   :  { %v697_v60 = vadd.f32 %v696_v55, %v649_v56  ;;  %v595_v59 = vadd.f32 %v594_v43, %v1372_v47 }
 0x155   :  { %v698_v49 = vadd.f32 %v697_v60, %v650_v36  ;;  %v596_v11 = vadd.f32 %v595_v59, %v1381_v63 }
 0x157   :  { %v699_v0 = vadd.f32 %v698_v49, %v651_v53  ;;  %v597_v21 = vadd.f32 %v596_v11, %v1390_v13 }
 0x159   :  { %v700_v4 = vadd.f32 %v699_v0, %v652_v51  ;;  %v598_v7 = vadd.f32 %v597_v21, %v1399_v5 }
 0x15b   :  { %v599_v8 = vrot.slane %v598_v7, 4  ;;  %v701_v47 = vadd.f32 %v700_v4, %v653_v32 }
 0x15d   :  { %v600_v12 = vadd.f32 %v599_v8, %v598_v7  ;;  %v702_v3 = vrot.slane %v701_v47, 4 }
 0x15f   :  { %v601_v30 = vrot.slane %v600_v12, 2  ;;  %v703_v57 = vadd.f32 %v702_v3, %v701_v47 }
 0x161   :  { %v602_v61 = vadd.f32 %v601_v30, %v600_v12  ;;  %v704_v63 = vrot.slane %v703_v57, 2 }
 0x163   :  { %v603_v34 = vrot.slane %v602_v61, 1  ;;  %v705_v15 = vadd.f32 %v704_v63, %v703_v57 }
 0x165   :  { %v706_v16 = vrot.slane %v705_v15, 1  ;;  %v604_v38 = vadd.f32 %v603_v34, %v602_v61 }
 0x167   :  { %v707_v13 = vadd.f32 %v706_v16, %v705_v15 }
 0x169   :  { %v709_v17 = vsel %vm708_vm2, %v604_v38, %v707_v13 }
 0x16a   :  { %710 = vst [vmem:[%s1486_s3] sm:$0x3] %v709_v17 }

// kernel: number_noise_simulation.16
= control target key start
LH: loop header
LB: loop body
LE: loop exit
PB: predicated region body
PF: predicated region fallthrough
CT: control target
= control target key end

     0   :  { %s231_s0 = inlined_call_operand.vmem [shape: f32[104,128], index: 0, kind: input, shape index: {}]   ;;  %s232_s1 = inlined_call_operand.vmem [shape: f32[1,128], index: 1, kind: input, shape index: {}]   ;;  %s233_s2 = inlined_call_operand.vmem [shape: f32[1,128], index: 2, kind: input, shape index: {}]   ;;  %s234_s3 = inlined_call_operand.vmem [shape: f32[104,128], index: 3, kind: output, shape index: {}]  }
   0x1   :  { %v14_v0 = vld [vmem:[%s231_s0] sm:$0xff]  ;;  %v15_v4 = vld [vmem:[%s231_s0 + $0x8] sm:$0xff]  ;;  %v16_v5 = vld [vmem:[%s231_s0 + $0x10] sm:$0xff] }
   0x2   :  { %v110_v1 = vld [vmem:[%s232_s1] ss:$0 sm:$0xff]  ;;  %v17_v6 = vld [vmem:[%s231_s0 + $0x18] sm:$0xff]  ;;  %v19_v11 = vld [vmem:[%s231_s0 + $0x28] sm:$0xff] }
   0x3   :  { %v141_v2 = vld [vmem:[%s233_s2] ss:$0 sm:$0xff]  ;;  %v34_v3 = vmul.f32 %v110_v1, %v14_v0  ;;  %v35_v7 = vmul.f32 %v110_v1, %v15_v4  ;;  %v36_v8 = vmul.f32 %v110_v1, %v16_v5  ;;  %v37_v9 = vmul.f32 %v110_v1, %v17_v6  ;;  %v20_v12 = vld [vmem:[%s231_s0 + $0x30] sm:$0xff]  ;;  %v21_v17 = vld [vmem:[%s231_s0 + $0x38] sm:$0xff] }
   0x4   :  { %v18_v10 = vld [vmem:[%s231_s0 + $0x20] sm:$0xff]  ;;  %v39_v15 = vmul.f32 %v110_v1, %v19_v11  ;;  %v40_v16 = vmul.f32 %v110_v1, %v20_v12  ;;  %v41_v21 = vmul.f32 %v110_v1, %v21_v17  ;;  %v23_v27 = vld [vmem:[%s231_s0 + $0x48] sm:$0xff]  ;;  %v24_v28 = vld [vmem:[%s231_s0 + $0x50] sm:$0xff] }
   0x5   :  { %v54_v13 = vadd.f32 %v141_v2, %v34_v3  ;;  %v38_v14 = vmul.f32 %v110_v1, %v18_v10  ;;  %v55_v18 = vadd.f32 %v141_v2, %v35_v7  ;;  %v56_v19 = vadd.f32 %v141_v2, %v36_v8  ;;  %v22_v22 = vld [vmem:[%s231_s0 + $0x40] sm:$0xff]  ;;  %v25_v29 = vld [vmem:[%s231_s0 + $0x58] sm:$0xff] }
   0x6   :  { %v57_v20 = vadd.f32 %v141_v2, %v37_v9  ;;  %v59_v25 = vadd.f32 %v141_v2, %v39_v15  ;;  %v60_v26 = vadd.f32 %v141_v2, %v40_v16  ;;  %v61_v33 = vadd.f32 %v141_v2, %v41_v21  ;;  %v26_v42 = vld [vmem:[%s231_s0 + $0x60] sm:$0xff] }
   0x7   :  { %v67_v23 = vmul.f32 0.05, %v54_v13  ;;  %v58_v24 = vadd.f32 %v141_v2, %v38_v14  ;;  %v68_v30 = vmul.f32 0.05, %v55_v18  ;;  %v69_v31 = vmul.f32 0.05, %v56_v19 }
   0x8   :  { %v70_v32 = vmul.f32 0.05, %v57_v20  ;;  %v72_v36 = vmul.f32 0.05, %v59_v25  ;;  %v73_v37 = vmul.f32 0.05, %v60_v26  ;;  %v42_v46 = vmul.f32 %v110_v1, %v22_v22 }
   0x9   :  { %v80_v34 = vmax.f32 %v54_v13, %v67_v23  ;;  %v71_v35 = vmul.f32 0.05, %v58_v24  ;;  %v81_v38 = vmax.f32 %v55_v18, %v68_v30  ;;  %v82_v39 = vmax.f32 %v56_v19, %v69_v31 }
   0xa   :  { %v83_v40 = vmax.f32 %v57_v20, %v70_v32  ;;  %v74_v41 = vmul.f32 0.05, %v61_v33  ;;  %v85_v44 = vmax.f32 %v59_v25, %v72_v36  ;;  %v86_v45 = vmax.f32 %v60_v26, %v73_v37 }
   0xb   :  { %93 = vst [vmem:[%s234_s3] sm:$0xff] %v80_v34  ;;  %v84_v43 = vmax.f32 %v58_v24, %v71_v35  ;;  %94 = vst [vmem:[%s234_s3 + $0x8] sm:$0xff] %v81_v38  ;;  %v43_v48 = vmul.f32 %v110_v1, %v23_v27  ;;  %v44_v49 = vmul.f32 %v110_v1, %v24_v28 }
   0xc   :  { %95 = vst [vmem:[%s234_s3 + $0x10] sm:$0xff] %v82_v39  ;;  %96 = vst [vmem:[%s234_s3 + $0x18] sm:$0xff] %v83_v40  ;;  %v87_v47 = vmax.f32 %v61_v33, %v74_v41  ;;  %v45_v50 = vmul.f32 %v110_v1, %v25_v29  ;;  %v62_v51 = vadd.f32 %v141_v2, %v42_v46 }
   0xd   :  { %97 = vst [vmem:[%s234_s3 + $0x20] sm:$0xff] %v84_v43  ;;  %98 = vst [vmem:[%s234_s3 + $0x28] sm:$0xff] %v85_v44  ;;  %v46_v52 = vmul.f32 %v110_v1, %v26_v42  ;;  %v63_v53 = vadd.f32 %v141_v2, %v43_v48  ;;  %v64_v54 = vadd.f32 %v141_v2, %v44_v49 }
   0xe   :  { %99 = vst [vmem:[%s234_s3 + $0x30] sm:$0xff] %v86_v45  ;;  %100 = vst [vmem:[%s234_s3 + $0x38] sm:$0xff] %v87_v47  ;;  %v65_v55 = vadd.f32 %v141_v2, %v45_v50  ;;  %v75_v56 = vmul.f32 0.05, %v62_v51 }
   0xf   :  { %v66_v57 = vadd.f32 %v141_v2, %v46_v52  ;;  %v76_v58 = vmul.f32 0.05, %v63_v53  ;;  %v77_v59 = vmul.f32 0.05, %v64_v54 }
  0x10   :  { %v78_v60 = vmul.f32 0.05, %v65_v55  ;;  %v88_v61 = vmax.f32 %v62_v51, %v75_v56 }
  0x11   :  { %v79_v62 = vmul.f32 0.05, %v66_v57  ;;  %v89_v63 = vmax.f32 %v63_v53, %v76_v58  ;;  %v90_v0 = vmax.f32 %v64_v54, %v77_v59 }
  0x12   :  { %v91_v1 = vmax.f32 %v65_v55, %v78_v60  ;;  %101 = vst [vmem:[%s234_s3 + $0x40] sm:$0xff] %v88_v61 }
  0x13   :  { %v92_v3 = vmax.f32 %v66_v57, %v79_v62  ;;  %102 = vst [vmem:[%s234_s3 + $0x48] sm:$0xff] %v89_v63  ;;  %103 = vst [vmem:[%s234_s3 + $0x50] sm:$0xff] %v90_v0 }
  0x14   :  { %104 = vst [vmem:[%s234_s3 + $0x58] sm:$0xff] %v91_v1 }
  0x15   :  { %105 = vst [vmem:[%s234_s3 + $0x60] sm:$0xff] %v92_v3 }

// kernel: number_noise_simulation.15
= control target key start
LH: loop header
LB: loop body
LE: loop exit
PB: predicated region body
PF: predicated region fallthrough
CT: control target
= control target key end

     0   :  { %vm372_vm0 = vcmask 1040384   ;;  %s684_s1 = inlined_call_operand.vmem [shape: bf16[256,128], index: 1, kind: input, shape index: {}]   ;;  %s685_s0 = inlined_call_operand.vmem [shape: bf16[104,256], index: 0, kind: input, shape index: {}]   ;;  %s686_s2 = inlined_call_operand.vmem [shape: f32[104,128], index: 2, kind: output, shape index: {0}]   ;;  %s687_s3 = inlined_call_operand.vmem [shape: f32[1,2,128], index: 3, kind: output, shape index: {1}]  }
   0x1   :  { %v487_v0 = vld [vmem:[%s684_s1 + $0x78] sm:$0xff]   ;;  %v489_v2 = vld [vmem:[%s684_s1 + $0x70] sm:$0xff]   ;;  %v491_v4 = vld [vmem:[%s684_s1 + $0x68] sm:$0xff]  }
   0x2   :  { %v488_v1 = vld [vmem:[%s684_s1 + $0x38] sm:$0xff]   ;;  %413 = vmatprep.subr.bf16.mxu0 %v487_v0  ;;  %471 = vmatprep.subr.bf16.mxu1 %v487_v0  ;;  %v490_v3 = vld [vmem:[%s684_s1 + $0x30] sm:$0xff]   ;;  %v492_v5 = vld [vmem:[%s684_s1 + $0x28] sm:$0xff]  }
   0x3   :  { %414 = vmatpush3.bf16.msra.mxu0 %v488_v1  ;;  %479 = vmatpush3.bf16.msra.mxu1 %v488_v1  ;;  %v493_v6 = vld [vmem:[%s684_s1 + $0x60] sm:$0xff]   ;;  %v495_v8 = vld [vmem:[%s684_s1 + $0x58] sm:$0xff]   ;;  %v497_v10 = vld [vmem:[%s684_s1 + $0x50] sm:$0xff]  }
   0x4   :  { %415 = vmatprep.subr.bf16.mxu0 %v489_v2  ;;  %472 = vmatprep.subr.bf16.mxu1 %v489_v2  ;;  %v494_v7 = vld [vmem:[%s684_s1 + $0x20] sm:$0xff]   ;;  %v496_v9 = vld [vmem:[%s684_s1 + $0x18] sm:$0xff]   ;;  %v498_v12 = vld [vmem:[%s684_s1 + $0x10] sm:$0xff]  }
   0x5   :  { %v505_v11 = vld [vmem:[%s685_s0 + $0x4] ss:$8 sps:$4 sm:$0xff]   ;;  %v503_v18 = vld [vmem:[%s685_s0] ss:$8 sps:$4 sm:$0xff]   ;;  %v506_v19 = vld [vmem:[%s685_s0 + $0x14] ss:$8 sps:$4 sm:$0xff]  }
   0x6   :  { %254 = vmatprep.mubr.bf16.mxu0 %v505_v11  ;;  %v499_v13 = vld [vmem:[%s684_s1 + $0x48] sm:$0xff]   ;;  %v501_v16 = vld [vmem:[%s684_s1 + $0x40] sm:$0xff]   ;;  %v517_v21 = vld [vmem:[%s685_s0 + $0x54] ss:$8 sps:$4 sm:$0xff]  }
   0x7   :  { %416 = vmatpush3.bf16.msra.mxu0 %v490_v3  ;;  %480 = vmatpush3.bf16.msra.mxu1 %v490_v3  ;;  %v513_v14 = vld [vmem:[%s685_s0 + $0x44] ss:$8 sps:$4 sm:$0xff]   ;;  %v511_v20 = vld [vmem:[%s685_s0 + $0x40] ss:$8 sps:$4 sm:$0xff]   ;;  %v508_v23 = vld [vmem:[%s685_s0 + $0x10] ss:$8 sps:$4 sm:$0xff]  }
   0x8   :  { %417 = vmatprep.subr.bf16.mxu0 %v491_v4  ;;  %473 = vmatprep.subr.bf16.mxu1 %v491_v4  ;;  %v500_v15 = vld [vmem:[%s684_s1 + $0x8] sm:$0xff]   ;;  %v502_v17 = vld [vmem:[%s684_s1] sm:$0xff]   ;;  %v520_v25 = vld [vmem:[%s685_s0 + $0x50] ss:$8 sps:$4 sm:$0xff]  }
   0x9   :  { %286 = vmatprep.mubr.bf16.mxu1 %v513_v14  ;;  %v26_v22 = vld [vmem:[%s685_s0 + $0x60] sm:$0xff]  ;;  %v515_v28 = vld [vmem:[%s685_s0 + $0x34] ss:$8 sps:$4 sm:$0xff]   ;;  %v519_v30 = vld [vmem:[%s685_s0 + $0x30] ss:$8 sps:$4 sm:$0xff]  }
   0xa   :  { %v509_v24 = vld [vmem:[%s685_s0 + $0x24] ss:$8 sps:$4 sm:$0xff]   ;;  %v396_v26 = vcombine.high %v26_v22, %v26_v22  ;;  %v514_v27 = vld [vmem:[%s685_s0 + $0x20] ss:$8 sps:$4 sm:$0xff]   ;;  %v395_v29 = vcombine.low %v26_v22, %v26_v22 }
   0xb   :  { %418 = vmatpush3.bf16.msra.mxu0 %v492_v5  ;;  %481 = vmatpush3.bf16.msra.mxu1 %v492_v5 }
   0xc   :  { %419 = vmatprep.subr.bf16.mxu0 %v493_v6  ;;  %474 = vmatprep.subr.bf16.mxu1 %v493_v6 }
   0xf   :  { %420 = vmatpush3.bf16.msra.mxu0 %v494_v7  ;;  %482 = vmatpush3.bf16.msra.mxu1 %v494_v7 }
  0x10   :  { %421 = vmatprep.subr.bf16.mxu0 %v495_v8  ;;  %475 = vmatprep.subr.bf16.mxu1 %v495_v8 }
  0x13   :  { %422 = vmatpush3.bf16.msra.mxu0 %v496_v9  ;;  %483 = vmatpush3.bf16.msra.mxu1 %v496_v9 }
  0x14   :  { %423 = vmatprep.subr.bf16.mxu0 %v497_v10  ;;  %476 = vmatprep.subr.bf16.mxu1 %v497_v10 }
  0x17   :  { %424 = vmatpush3.bf16.msra.mxu0 %v498_v12  ;;  %484 = vmatpush3.bf16.msra.mxu1 %v498_v12 }
  0x18   :  { %425 = vmatprep.subr.bf16.mxu0 %v499_v13  ;;  %477 = vmatprep.subr.bf16.mxu1 %v499_v13 }
  0x1b   :  { %426 = vmatpush3.bf16.msra.mxu0 %v500_v15  ;;  %485 = vmatpush3.bf16.msra.mxu1 %v500_v15 }
  0x1c   :  { %427 = vmatprep.subr.bf16.mxu0 %v501_v16  ;;  %478 = vmatprep.subr.bf16.mxu1 %v501_v16 }
  0x1f   :  { %428 = vmatpush3.bf16.msra.mxu0 %v502_v17  ;;  %486 = vmatpush3.bf16.msra.mxu1 %v502_v17 }
  0x22   :  { %255 = vmatmul.mubr.bf16.vlgmr.msra.gmra.mxu0 %v503_v18  ;;  %287 = vmatmul.mubr.bf16.vlgmr.msra.gmra.mxu1 %v511_v20 }
  0x23   :  { %262 = vmatprep.mubr.bf16.mxu0 %v506_v19  ;;  %294 = vmatprep.mubr.bf16.mxu1 %v517_v21 }
  0x2a   :  { %263 = vmatmul.mubr.bf16.gmra.mxu0 %v508_v23  ;;  %295 = vmatmul.mubr.bf16.gmra.mxu1 %v520_v25 }
  0x2b   :  { %270 = vmatprep.mubr.bf16.mxu0 %v509_v24  ;;  %302 = vmatprep.mubr.bf16.mxu1 %v396_v26 }
  0x32   :  { %271 = vmatmul.mubr.bf16.gmra.mxu0 %v514_v27  ;;  %303 = vmatmul.mubr.bf16.gmra.mxu1 %v395_v29 }
  0x33   :  { %278 = vmatprep.mubr.bf16.mxu0 %v515_v28 }
  0x3a   :  { %279 = vmatmul.mubr.bf16.gmra.mxu0 %v519_v30 }
  0xe2   :  { %v429_v31 = vpop.f32.mrf.mxu0  ;;  %v453_v32 = vpop.f32.mrf.mxu1 }
  0xe4   :  { %v430_v33 = vpop.f32.mrf.mxu0  ;;  %v454_v35 = vpop.f32.mrf.mxu1 }
  0xe5   :  { %v431_v34 = vadd.f32 %v430_v33, %v429_v31  ;;  %v630_v37 = vadd.f32 %v454_v35, %v453_v32 }
  0xe6   :  { %v432_v36 = vpop.f32.mrf.mxu0  ;;  %v456_v38 = vpop.f32.mrf.mxu1 }
  0xe7   :  { %310 = vst [vmem:[%s686_s2] sm:$0xff] %v431_v34  ;;  %318 = vst [vmem:[%s686_s2 + $0x40] sm:$0xff] %v630_v37  ;;  %v341_v63 = vmul.f32 %v431_v34, %v431_v34  ;;  %v349_v29 = vmul.f32 %v630_v37, %v630_v37 }
  0xe8   :  { %v433_v39 = vpop.f32.mrf.mxu0  ;;  %v457_v41 = vpop.f32.mrf.mxu1 }
  0xe9   :  { %v434_v40 = vadd.f32 %v433_v39, %v432_v36  ;;  %v639_v43 = vadd.f32 %v457_v41, %v456_v38 }
  0xea   :  { %v435_v42 = vpop.f32.mrf.mxu0  ;;  %v459_v44 = vpop.f32.mrf.mxu1 }
  0xeb   :  { %311 = vst [vmem:[%s686_s2 + $0x8] sm:$0xff] %v434_v40  ;;  %319 = vst [vmem:[%s686_s2 + $0x48] sm:$0xff] %v639_v43  ;;  %v342_v58 = vmul.f32 %v434_v40, %v434_v40  ;;  %v323_v0 = vadd.f32 %v434_v40, %v431_v34  ;;  %v350_v32 = vmul.f32 %v639_v43, %v639_v43 }
  0xec   :  { %v436_v45 = vpop.f32.mrf.mxu0  ;;  %v460_v47 = vpop.f32.mrf.mxu1 }
  0xed   :  { %v437_v46 = vadd.f32 %v436_v45, %v435_v42  ;;  %v461_v49 = vadd.f32 %v460_v47, %v459_v44  ;;  %v354_v4 = vadd.f32 %v342_v58, %v341_v63 }
  0xee   :  { %v438_v48 = vpop.f32.mrf.mxu0  ;;  %v462_v50 = vpop.f32.mrf.mxu1 }
  0xef   :  { %312 = vst [vmem:[%s686_s2 + $0x10] sm:$0xff] %v437_v46  ;;  %320 = vst [vmem:[%s686_s2 + $0x50] sm:$0xff] %v461_v49  ;;  %v343_v1 = vmul.f32 %v437_v46, %v437_v46  ;;  %v324_v5 = vadd.f32 %v437_v46, %v323_v0  ;;  %v351_v35 = vmul.f32 %v461_v49, %v461_v49 }
  0xf0   :  { %v439_v51 = vpop.f32.mrf.mxu0  ;;  %v463_v53 = vpop.f32.mrf.mxu1 }
  0xf1   :  { %v440_v52 = vadd.f32 %v439_v51, %v438_v48  ;;  %v464_v55 = vadd.f32 %v463_v53, %v462_v50  ;;  %v355_v10 = vadd.f32 %v354_v4, %v343_v1 }
  0xf2   :  { %v441_v54 = vpop.f32.mrf.mxu0  ;;  %v465_v56 = vpop.f32.mrf.mxu1 }
  0xf3   :  { %313 = vst [vmem:[%s686_s2 + $0x18] sm:$0xff] %v440_v52  ;;  %321 = vst [vmem:[%s686_s2 + $0x58] sm:$0xff] %v464_v55  ;;  %v344_v6 = vmul.f32 %v440_v52, %v440_v52  ;;  %v325_v11 = vadd.f32 %v440_v52, %v324_v5  ;;  %v352_v40 = vmul.f32 %v464_v55, %v464_v55 }
  0xf4   :  { %v442_v57 = vpop.f32.mrf.mxu0  ;;  %v466_v60 = vpop.f32.mrf.mxu1 }
  0xf5   :  { %v443_v59 = vadd.f32 %v442_v57, %v441_v54  ;;  %v467_v62 = vadd.f32 %v466_v60, %v465_v56  ;;  %v356_v14 = vadd.f32 %v355_v10, %v344_v6 }
  0xf6   :  { %v444_v61 = vpop.f32.mrf.mxu0  ;;  %v468_v2 = vpop.f32.mrf.mxu1 }
  0xf7   :  { %314 = vst [vmem:[%s686_s2 + $0x20] sm:$0xff] %v443_v59  ;;  %322 = vst [vmem:[%s686_s2 + $0x60] sm:$0xff] %v467_v62  ;;  %v345_v12 = vmul.f32 %v443_v59, %v443_v59  ;;  %v326_v15 = vadd.f32 %v443_v59, %v325_v11  ;;  %v353_v45 = vmul.f32 %v467_v62, %v467_v62 }
  0xf8   :  { %v445_v3 = vpop.f32.mrf.mxu0  ;;  %v469_v8 = vpop.f32.mrf.mxu1 }
  0xf9   :  { %v446_v7 = vadd.f32 %v445_v3, %v444_v61  ;;  %v357_v19 = vadd.f32 %v356_v14, %v345_v12 }
  0xfa   :  { %v447_v9 = vpop.f32.mrf.mxu0 }
  0xfb   :  { %315 = vst [vmem:[%s686_s2 + $0x28] sm:$0xff] %v446_v7  ;;  %v346_v16 = vmul.f32 %v446_v7, %v446_v7  ;;  %v327_v20 = vadd.f32 %v446_v7, %v326_v15 }
  0xfc   :  { %v448_v13 = vpop.f32.mrf.mxu0 }
  0xfd   :  { %v449_v17 = vadd.f32 %v448_v13, %v447_v9  ;;  %v358_v23 = vadd.f32 %v357_v19, %v346_v16 }
  0xfe   :  { %v450_v18 = vpop.f32.mrf.mxu0 }
  0xff   :  { %316 = vst [vmem:[%s686_s2 + $0x30] sm:$0xff] %v449_v17  ;;  %v347_v21 = vmul.f32 %v449_v17, %v449_v17  ;;  %v328_v24 = vadd.f32 %v449_v17, %v327_v20 }
 0x100   :  { %v451_v22 = vpop.f32.mrf.mxu0 }
 0x101   :  { %v452_v25 = vadd.f32 %v451_v22, %v450_v18  ;;  %v359_v26 = vadd.f32 %v358_v23, %v347_v21 }
 0x103   :  { %317 = vst [vmem:[%s686_s2 + $0x38] sm:$0xff] %v452_v25  ;;  %v329_v27 = vadd.f32 %v452_v25, %v328_v24  ;;  %v348_v28 = vmul.f32 %v452_v25, %v452_v25 }
 0x105   :  { %v330_v30 = vadd.f32 %v630_v37, %v329_v27  ;;  %v360_v31 = vadd.f32 %v359_v26, %v348_v28 }
 0x107   :  { %v361_v33 = vadd.f32 %v360_v31, %v349_v29  ;;  %v331_v34 = vadd.f32 %v639_v43, %v330_v30 }
 0x109   :  { %v332_v36 = vadd.f32 %v461_v49, %v331_v34  ;;  %v362_v38 = vadd.f32 %v361_v33, %v350_v32 }
 0x10b   :  { %v333_v39 = vadd.f32 %v464_v55, %v332_v36  ;;  %v363_v41 = vadd.f32 %v362_v38, %v351_v35 }
 0x10d   :  { %v364_v42 = vadd.f32 %v363_v41, %v352_v40  ;;  %v334_v44 = vadd.f32 %v467_v62, %v333_v39 }
 0x10f   :  { %v335_v46 = vrot.slane %v334_v44, 4  ;;  %v365_v47 = vadd.f32 %v364_v42, %v353_v45 }
 0x111   :  { %v336_v48 = vadd.f32 %v335_v46, %v334_v44  ;;  %v366_v37 = vrot.slane %v365_v47, 4 }
 0x113   :  { %v337_v50 = vrot.slane %v336_v48, 2  ;;  %v367_v51 = vadd.f32 %v366_v37, %v365_v47 }
 0x115   :  { %v338_v52 = vadd.f32 %v337_v50, %v336_v48  ;;  %v368_v53 = vrot.slane %v367_v51, 2 }
 0x117   :  { %v339_v54 = vrot.slane %v338_v52, 1  ;;  %v369_v56 = vadd.f32 %v368_v53, %v367_v51 }
 0x119   :  { %v370_v43 = vrot.slane %v369_v56, 1  ;;  %v340_v49 = vadd.f32 %v339_v54, %v338_v52 }
 0x11b   :  { %v371_v57 = vadd.f32 %v370_v43, %v369_v56 }
 0x11d   :  { %v373_v58 = vsel %vm372_vm0, %v340_v49, %v371_v57 }
 0x11e   :  { %374 = vst [vmem:[%s687_s3] sm:$0x3] %v373_v58 }

// kernel: number_noise_simulation.17
= control target key start
LH: loop header
LB: loop body
LE: loop exit
PB: predicated region body
PF: predicated region fallthrough
CT: control target
= control target key end

     0   :  { %v803_v0 = vmov 0.0   ;;  %vm804_vm0 = vmmov 0   ;;  %vm577_vm1 = vcmask 1040384   ;;  %s1021_s1 = inlined_call_operand.vmem [shape: bf16[384,128], index: 1, kind: input, shape index: {}]   ;;  %s1022_s0 = inlined_call_operand.vmem [shape: bf16[104,384], index: 0, kind: input, shape index: {}]   ;;  %s1023_s2 = inlined_call_operand.vmem [shape: f32[104,128], index: 2, kind: output, shape index: {0}]   ;;  %s1024_s3 = inlined_call_operand.vmem [shape: f32[1,2,128], index: 3, kind: output, shape index: {1}]  }
   0x1   :  { %706 = vmatprep.subr.bf16.mxu1 %v803_v0  ;;  %v752_v1 = vld [vmem:[%s1021_s1 + $0x78] sm:$0xff]   ;;  %722 = vmatprep.mubr.msk.bf16.mxu1 %vm804_vm0, %v803_v0  ;;  %v755_v4 = vld [vmem:[%s1021_s1 + $0x70] sm:$0xff]   ;;  %v758_v7 = vld [vmem:[%s1021_s1 + $0x68] sm:$0xff]  }
   0x2   :  { %v753_v2 = vld [vmem:[%s1021_s1 + $0xb8] sm:$0xff]   ;;  %633 = vmatprep.subr.bf16.mxu0 %v752_v1  ;;  %v756_v5 = vld [vmem:[%s1021_s1 + $0xb0] sm:$0xff]   ;;  %v759_v8 = vld [vmem:[%s1021_s1 + $0xa8] sm:$0xff]  }
   0x3   :  { %v754_v3 = vld [vmem:[%s1021_s1 + $0x38] sm:$0xff]   ;;  %707 = vmatpush3.bf16.msra.mxu1 %v753_v2  ;;  %v757_v6 = vld [vmem:[%s1021_s1 + $0x30] sm:$0xff]   ;;  %v760_v9 = vld [vmem:[%s1021_s1 + $0x28] sm:$0xff]  }
   0x4   :  { %634 = vmatpush3.bf16.msra.mxu0 %v754_v3  ;;  %708 = vmatprep.subr.bf16.mxu1 %v803_v0  ;;  %v761_v10 = vld [vmem:[%s1021_s1 + $0x60] sm:$0xff]   ;;  %v764_v13 = vld [vmem:[%s1021_s1 + $0x58] sm:$0xff]   ;;  %v767_v16 = vld [vmem:[%s1021_s1 + $0x50] sm:$0xff]  }
   0x5   :  { %635 = vmatprep.subr.bf16.mxu0 %v755_v4  ;;  %v762_v11 = vld [vmem:[%s1021_s1 + $0xa0] sm:$0xff]   ;;  %v765_v14 = vld [vmem:[%s1021_s1 + $0x98] sm:$0xff]   ;;  %v768_v17 = vld [vmem:[%s1021_s1 + $0x90] sm:$0xff]  }
   0x6   :  { %v763_v12 = vld [vmem:[%s1021_s1 + $0x20] sm:$0xff]   ;;  %v766_v15 = vld [vmem:[%s1021_s1 + $0x18] sm:$0xff]   ;;  %v769_v18 = vld [vmem:[%s1021_s1 + $0x10] sm:$0xff]  }
   0x7   :  { %709 = vmatpush3.bf16.msra.mxu1 %v756_v5  ;;  %v770_v19 = vld [vmem:[%s1021_s1 + $0x48] sm:$0xff]   ;;  %v773_v22 = vld [vmem:[%s1021_s1 + $0x40] sm:$0xff]   ;;  %v787_v33 = vld [vmem:[%s1022_s0 + $0x30] ss:$12 sps:$4 sm:$0xff]  }
   0x8   :  { %636 = vmatpush3.bf16.msra.mxu0 %v757_v6  ;;  %710 = vmatprep.subr.bf16.mxu1 %v803_v0  ;;  %v771_v20 = vld [vmem:[%s1021_s1 + $0x88] sm:$0xff]   ;;  %v778_v23 = vld [vmem:[%s1022_s0 + $0x4] ss:$12 sps:$4 sm:$0xff]   ;;  %v784_v31 = vld [vmem:[%s1022_s0 + $0x34] ss:$12 sps:$4 sm:$0xff]  }
   0x9   :  { %637 = vmatprep.subr.bf16.mxu0 %v758_v7  ;;  %v772_v21 = vld [vmem:[%s1021_s1 + $0x8] sm:$0xff]   ;;  %v774_v24 = vld [vmem:[%s1021_s1 + $0x80] sm:$0xff]   ;;  %371 = vmatprep.mubr.bf16.mxu0 %v778_v23  ;;  %v790_v35 = vld [vmem:[%s1022_s0 + $0x50] ss:$12 sps:$4 sm:$0xff]  }
   0xa   :  { %v775_v25 = vld [vmem:[%s1021_s1] sm:$0xff]   ;;  %v779_v26 = vld [vmem:[%s1022_s0 + $0x8] ss:$12 sps:$4 sm:$0xff]   ;;  %v788_v34 = vld [vmem:[%s1022_s0 + $0x4c] ss:$12 sps:$4 sm:$0xff]  }
   0xb   :  { %711 = vmatpush3.bf16.msra.mxu1 %v759_v8  ;;  %v776_v27 = vld [vmem:[%s1022_s0] ss:$12 sps:$4 sm:$0xff]   ;;  %v780_v28 = vld [vmem:[%s1022_s0 + $0x1c] ss:$12 sps:$4 sm:$0xff]   ;;  %v783_v30 = vld [vmem:[%s1022_s0 + $0x18] ss:$12 sps:$4 sm:$0xff]  }
   0xc   :  { %638 = vmatpush3.bf16.msra.mxu0 %v760_v9  ;;  %712 = vmatprep.subr.bf16.mxu1 %v803_v0  ;;  %v782_v29 = vld [vmem:[%s1022_s0 + $0x20] ss:$12 sps:$4 sm:$0xff]   ;;  %v786_v32 = vld [vmem:[%s1022_s0 + $0x38] ss:$12 sps:$4 sm:$0xff]   ;;  %v791_v36 = vld [vmem:[%s1022_s0 + $0x48] ss:$12 sps:$4 sm:$0xff]  }
   0xd   :  { %639 = vmatprep.subr.bf16.mxu0 %v761_v10  ;;  %v792_v37 = vld [vmem:[%s1022_s0 + $0x64] ss:$12 sps:$4 sm:$0xff]   ;;  %v794_v38 = vld [vmem:[%s1022_s0 + $0x68] ss:$12 sps:$4 sm:$0xff]   ;;  %v795_v39 = vld [vmem:[%s1022_s0 + $0x60] ss:$12 sps:$4 sm:$0xff]  }
   0xe   :  { %v796_v40 = vld [vmem:[%s1022_s0 + $0x7c] ss:$12 sps:$4 sm:$0xff]   ;;  %v38_v41 = vld [vmem:[%s1022_s0 + $0x90] sm:$0xff]  ;;  %v798_v42 = vld [vmem:[%s1022_s0 + $0x80] ss:$12 sps:$4 sm:$0xff]  }
   0xf   :  { %713 = vmatpush3.bf16.msra.mxu1 %v762_v11  ;;  %v799_v43 = vld [vmem:[%s1022_s0 + $0x78] ss:$12 sps:$4 sm:$0xff]   ;;  %v607_v44 = vcombine.high %v38_v41, %v38_v41  ;;  %v606_v46 = vcombine.low %v38_v41, %v38_v41 }
  0x10   :  { %640 = vmatpush3.bf16.msra.mxu0 %v763_v12  ;;  %714 = vmatprep.subr.bf16.mxu1 %v803_v0  ;;  %v801_v45 = vld [vmem:[%s1022_s0 + $0x98] ss:$0 sps:$4 sm:$0xff]  }
  0x11   :  { %641 = vmatprep.subr.bf16.mxu0 %v764_v13 }
  0x13   :  { %715 = vmatpush3.bf16.msra.mxu1 %v765_v14 }
  0x14   :  { %642 = vmatpush3.bf16.msra.mxu0 %v766_v15  ;;  %716 = vmatprep.subr.bf16.mxu1 %v803_v0 }
  0x15   :  { %643 = vmatprep.subr.bf16.mxu0 %v767_v16 }
  0x17   :  { %717 = vmatpush3.bf16.msra.mxu1 %v768_v17 }
  0x18   :  { %644 = vmatpush3.bf16.msra.mxu0 %v769_v18  ;;  %718 = vmatprep.subr.bf16.mxu1 %v803_v0 }
  0x19   :  { %645 = vmatprep.subr.bf16.mxu0 %v770_v19 }
  0x1b   :  { %719 = vmatpush3.bf16.msra.mxu1 %v771_v20 }
  0x1c   :  { %646 = vmatpush3.bf16.msra.mxu0 %v772_v21  ;;  %720 = vmatprep.subr.bf16.mxu1 %v803_v0 }
  0x1d   :  { %647 = vmatprep.subr.bf16.mxu0 %v773_v22 }
  0x1f   :  { %721 = vmatpush3.bf16.msra.mxu1 %v774_v24 }
  0x20   :  { %648 = vmatpush3.bf16.msra.mxu0 %v775_v25 }
  0x22   :  { %723 = vmatmul.mubr.bf16.vlgmr.msra.gmra.mxu1 %v779_v26 }
  0x23   :  { %372 = vmatmul.mubr.bf16.vlgmr.msra.gmra.mxu0 %v776_v27  ;;  %726 = vmatprep.mubr.msk.bf16.mxu1 %vm804_vm0, %v803_v0 }
  0x24   :  { %379 = vmatprep.mubr.bf16.mxu0 %v780_v28 }
  0x2a   :  { %727 = vmatmul.mubr.bf16.gmra.mxu1 %v782_v29 }
  0x2b   :  { %380 = vmatmul.mubr.bf16.gmra.mxu0 %v783_v30  ;;  %730 = vmatprep.mubr.msk.bf16.mxu1 %vm804_vm0, %v803_v0 }
  0x2c   :  { %387 = vmatprep.mubr.bf16.mxu0 %v784_v31 }
  0x32   :  { %731 = vmatmul.mubr.bf16.gmra.mxu1 %v786_v32 }
  0x33   :  { %388 = vmatmul.mubr.bf16.gmra.mxu0 %v787_v33  ;;  %734 = vmatprep.mubr.msk.bf16.mxu1 %vm804_vm0, %v803_v0 }
  0x34   :  { %395 = vmatprep.mubr.bf16.mxu0 %v788_v34 }
  0x3a   :  { %735 = vmatmul.mubr.bf16.gmra.mxu1 %v790_v35 }
  0x3b   :  { %396 = vmatmul.mubr.bf16.gmra.mxu0 %v791_v36  ;;  %738 = vmatprep.mubr.msk.bf16.mxu1 %vm804_vm0, %v803_v0 }
  0x3c   :  { %403 = vmatprep.mubr.bf16.mxu0 %v792_v37 }
  0x42   :  { %739 = vmatmul.mubr.bf16.gmra.mxu1 %v794_v38 }
  0x43   :  { %404 = vmatmul.mubr.bf16.gmra.mxu0 %v795_v39  ;;  %742 = vmatprep.mubr.msk.bf16.mxu1 %vm804_vm0, %v803_v0 }
  0x44   :  { %411 = vmatprep.mubr.bf16.mxu0 %v796_v40 }
  0x4a   :  { %743 = vmatmul.mubr.bf16.gmra.mxu1 %v798_v42 }
  0x4b   :  { %412 = vmatmul.mubr.bf16.gmra.mxu0 %v799_v43  ;;  %746 = vmatprep.mubr.msk.bf16.mxu1 %vm804_vm0, %v803_v0 }
  0x4c   :  { %419 = vmatprep.mubr.bf16.mxu0 %v607_v44 }
  0x52   :  { %747 = vmatmul.mubr.bf16.gmra.mxu1 %v801_v45 }
  0x53   :  { %420 = vmatmul.mubr.bf16.gmra.mxu0 %v606_v46 }
  0xe2   :  { %v461_v47 = vpop.f32.mrf.mxu1 }
  0xe3   :  { %v649_v48 = vpop.f32.mrf.mxu0 }
  0xe4   :  { %v724_v49 = vpop.f32.mrf.mxu1 }
  0xe5   :  { %v650_v50 = vpop.f32.mrf.mxu0 }
  0xe6   :  { %v651_v51 = vadd.f32 %v650_v50, %v649_v48  ;;  %v464_v52 = vpop.f32.mrf.mxu1 }
  0xe7   :  { %v652_v53 = vpop.f32.mrf.mxu0 }
  0xe8   :  { %v462_v54 = vadd.f32 %v651_v51, %v461_v47  ;;  %v725_v55 = vpop.f32.mrf.mxu1 }
  0xe9   :  { %v653_v56 = vpop.f32.mrf.mxu0 }
  0xea   :  { %515 = vst [vmem:[%s1023_s2] sm:$0xff] %v462_v54  ;;  %v654_v57 = vadd.f32 %v653_v56, %v652_v53  ;;  %v469_v58 = vpop.f32.mrf.mxu1  ;;  %v546_v33 = vmul.f32 %v462_v54, %v462_v54 }
  0xeb   :  { %v655_v59 = vpop.f32.mrf.mxu0 }
  0xec   :  { %v465_v60 = vadd.f32 %v654_v57, %v464_v52  ;;  %v728_v61 = vpop.f32.mrf.mxu1 }
  0xed   :  { %v656_v62 = vpop.f32.mrf.mxu0 }
  0xee   :  { %516 = vst [vmem:[%s1023_s2 + $0x8] sm:$0xff] %v465_v60  ;;  %v657_v63 = vadd.f32 %v656_v62, %v655_v59  ;;  %v472_v0 = vpop.f32.mrf.mxu1  ;;  %v547_v29 = vmul.f32 %v465_v60, %v465_v60  ;;  %v528_v34 = vadd.f32 %v465_v60, %v462_v54 }
  0xef   :  { %v658_v1 = vpop.f32.mrf.mxu0 }
  0xf0   :  { %v470_v2 = vadd.f32 %v657_v63, %v469_v58  ;;  %v729_v3 = vpop.f32.mrf.mxu1  ;;  %v559_v39 = vadd.f32 %v547_v29, %v546_v33 }
  0xf1   :  { %v659_v4 = vpop.f32.mrf.mxu0 }
  0xf2   :  { %517 = vst [vmem:[%s1023_s2 + $0x10] sm:$0xff] %v470_v2  ;;  %v660_v5 = vadd.f32 %v659_v4, %v658_v1  ;;  %v477_v6 = vpop.f32.mrf.mxu1  ;;  %v548_v35 = vmul.f32 %v470_v2, %v470_v2  ;;  %v529_v40 = vadd.f32 %v528_v34, %v470_v2 }
  0xf3   :  { %v661_v7 = vpop.f32.mrf.mxu0 }
  0xf4   :  { %v473_v8 = vadd.f32 %v660_v5, %v472_v0  ;;  %v732_v9 = vpop.f32.mrf.mxu1  ;;  %v560_v45 = vadd.f32 %v559_v39, %v548_v35 }
  0xf5   :  { %v662_v10 = vpop.f32.mrf.mxu0 }
  0xf6   :  { %518 = vst [vmem:[%s1023_s2 + $0x18] sm:$0xff] %v473_v8  ;;  %v663_v11 = vadd.f32 %v662_v10, %v661_v7  ;;  %v480_v12 = vpop.f32.mrf.mxu1  ;;  %v549_v41 = vmul.f32 %v473_v8, %v473_v8  ;;  %v530_v46 = vadd.f32 %v529_v40, %v473_v8 }
  0xf7   :  { %v664_v13 = vpop.f32.mrf.mxu0 }
  0xf8   :  { %v478_v14 = vadd.f32 %v663_v11, %v477_v6  ;;  %v733_v15 = vpop.f32.mrf.mxu1  ;;  %v561_v51 = vadd.f32 %v560_v45, %v549_v41 }
  0xf9   :  { %v665_v16 = vpop.f32.mrf.mxu0 }
  0xfa   :  { %519 = vst [vmem:[%s1023_s2 + $0x20] sm:$0xff] %v478_v14  ;;  %v666_v17 = vadd.f32 %v665_v16, %v664_v13  ;;  %v485_v18 = vpop.f32.mrf.mxu1  ;;  %v550_v47 = vmul.f32 %v478_v14, %v478_v14  ;;  %v531_v52 = vadd.f32 %v530_v46, %v478_v14 }
  0xfb   :  { %v667_v19 = vpop.f32.mrf.mxu0 }
  0xfc   :  { %v481_v20 = vadd.f32 %v666_v17, %v480_v12  ;;  %v736_v21 = vpop.f32.mrf.mxu1  ;;  %v562_v57 = vadd.f32 %v561_v51, %v550_v47 }
  0xfd   :  { %v668_v22 = vpop.f32.mrf.mxu0 }
  0xfe   :  { %520 = vst [vmem:[%s1023_s2 + $0x28] sm:$0xff] %v481_v20  ;;  %v669_v23 = vadd.f32 %v668_v22, %v667_v19  ;;  %v488_v24 = vpop.f32.mrf.mxu1  ;;  %v551_v53 = vmul.f32 %v481_v20, %v481_v20  ;;  %v532_v58 = vadd.f32 %v531_v52, %v481_v20 }
  0xff   :  { %v670_v25 = vpop.f32.mrf.mxu0 }
 0x100   :  { %v486_v26 = vadd.f32 %v669_v23, %v485_v18  ;;  %v737_v27 = vpop.f32.mrf.mxu1  ;;  %v563_v63 = vadd.f32 %v562_v57, %v551_v53 }
 0x101   :  { %v671_v28 = vpop.f32.mrf.mxu0 }
 0x102   :  { %521 = vst [vmem:[%s1023_s2 + $0x30] sm:$0xff] %v486_v26  ;;  %v672_v30 = vadd.f32 %v671_v28, %v670_v25  ;;  %v493_v31 = vpop.f32.mrf.mxu1  ;;  %v552_v59 = vmul.f32 %v486_v26, %v486_v26  ;;  %v533_v0 = vadd.f32 %v532_v58, %v486_v26 }
 0x103   :  { %v673_v32 = vpop.f32.mrf.mxu0 }
 0x104   :  { %v489_v36 = vadd.f32 %v672_v30, %v488_v24  ;;  %v740_v37 = vpop.f32.mrf.mxu1  ;;  %v564_v5 = vadd.f32 %v563_v63, %v552_v59 }
 0x105   :  { %v674_v38 = vpop.f32.mrf.mxu0 }
 0x106   :  { %522 = vst [vmem:[%s1023_s2 + $0x38] sm:$0xff] %v489_v36  ;;  %v675_v42 = vadd.f32 %v674_v38, %v673_v32  ;;  %v496_v43 = vpop.f32.mrf.mxu1  ;;  %v553_v1 = vmul.f32 %v489_v36, %v489_v36  ;;  %v534_v6 = vadd.f32 %v533_v0, %v489_v36 }
 0x107   :  { %v676_v44 = vpop.f32.mrf.mxu0 }
 0x108   :  { %v494_v48 = vadd.f32 %v675_v42, %v493_v31  ;;  %v741_v49 = vpop.f32.mrf.mxu1  ;;  %v565_v11 = vadd.f32 %v564_v5, %v553_v1 }
 0x109   :  { %v677_v50 = vpop.f32.mrf.mxu0 }
 0x10a   :  { %523 = vst [vmem:[%s1023_s2 + $0x40] sm:$0xff] %v494_v48  ;;  %v678_v54 = vadd.f32 %v677_v50, %v676_v44  ;;  %v501_v55 = vpop.f32.mrf.mxu1  ;;  %v554_v7 = vmul.f32 %v494_v48, %v494_v48  ;;  %v535_v12 = vadd.f32 %v534_v6, %v494_v48 }
 0x10b   :  { %v679_v56 = vpop.f32.mrf.mxu0 }
 0x10c   :  { %v497_v60 = vadd.f32 %v678_v54, %v496_v43  ;;  %v744_v61 = vpop.f32.mrf.mxu1  ;;  %v566_v17 = vadd.f32 %v565_v11, %v554_v7 }
 0x10d   :  { %v680_v62 = vpop.f32.mrf.mxu0 }
 0x10e   :  { %524 = vst [vmem:[%s1023_s2 + $0x48] sm:$0xff] %v497_v60  ;;  %v681_v2 = vadd.f32 %v680_v62, %v679_v56  ;;  %v504_v3 = vpop.f32.mrf.mxu1  ;;  %v555_v13 = vmul.f32 %v497_v60, %v497_v60  ;;  %v536_v18 = vadd.f32 %v535_v12, %v497_v60 }
 0x10f   :  { %v682_v4 = vpop.f32.mrf.mxu0 }
 0x110   :  { %v502_v8 = vadd.f32 %v681_v2, %v501_v55  ;;  %v745_v9 = vpop.f32.mrf.mxu1  ;;  %v567_v23 = vadd.f32 %v566_v17, %v555_v13 }
 0x111   :  { %v683_v10 = vpop.f32.mrf.mxu0 }
 0x112   :  { %525 = vst [vmem:[%s1023_s2 + $0x50] sm:$0xff] %v502_v8  ;;  %v684_v14 = vadd.f32 %v683_v10, %v682_v4  ;;  %v509_v15 = vpop.f32.mrf.mxu1  ;;  %v556_v19 = vmul.f32 %v502_v8, %v502_v8  ;;  %v537_v24 = vadd.f32 %v536_v18, %v502_v8 }
 0x113   :  { %v685_v16 = vpop.f32.mrf.mxu0 }
 0x114   :  { %v505_v20 = vadd.f32 %v684_v14, %v504_v3  ;;  %v748_v21 = vpop.f32.mrf.mxu1  ;;  %v568_v29 = vadd.f32 %v567_v23, %v556_v19 }
 0x115   :  { %v686_v22 = vpop.f32.mrf.mxu0 }
 0x116   :  { %526 = vst [vmem:[%s1023_s2 + $0x58] sm:$0xff] %v505_v20  ;;  %v557_v25 = vmul.f32 %v505_v20, %v505_v20  ;;  %v687_v26 = vadd.f32 %v686_v22, %v685_v16  ;;  %v512_v27 = vpop.f32.mrf.mxu1  ;;  %v538_v30 = vadd.f32 %v537_v24, %v505_v20 }
 0x117   :  { %v688_v28 = vpop.f32.mrf.mxu0 }
 0x118   :  { %v510_v31 = vadd.f32 %v687_v26, %v509_v15  ;;  %v749_v32 = vpop.f32.mrf.mxu1  ;;  %v569_v34 = vadd.f32 %v568_v29, %v557_v25 }
 0x119   :  { %v689_v33 = vpop.f32.mrf.mxu0 }
 0x11a   :  { %527 = vst [vmem:[%s1023_s2 + $0x60] sm:$0xff] %v510_v31  ;;  %v539_v35 = vadd.f32 %v538_v30, %v510_v31  ;;  %v558_v36 = vmul.f32 %v510_v31, %v510_v31 }
 0x11c   :  { %v540_v37 = vrot.slane %v539_v35, 4  ;;  %v570_v38 = vadd.f32 %v569_v34, %v558_v36 }
 0x11e   :  { %v541_v39 = vadd.f32 %v540_v37, %v539_v35  ;;  %v571_v40 = vrot.slane %v570_v38, 4 }
 0x120   :  { %v542_v41 = vrot.slane %v541_v39, 2  ;;  %v572_v42 = vadd.f32 %v571_v40, %v570_v38 }
 0x122   :  { %v543_v43 = vadd.f32 %v542_v41, %v541_v39  ;;  %v573_v44 = vrot.slane %v572_v42, 2 }
 0x124   :  { %v544_v45 = vrot.slane %v543_v43, 1  ;;  %v574_v46 = vadd.f32 %v573_v44, %v572_v42 }
 0x126   :  { %v575_v47 = vrot.slane %v574_v46, 1  ;;  %v545_v48 = vadd.f32 %v544_v45, %v543_v43 }
 0x128   :  { %v576_v49 = vadd.f32 %v575_v47, %v574_v46 }
 0x12a   :  { %v578_v50 = vsel %vm577_vm1, %v545_v48, %v576_v49 }
 0x12b   :  { %579 = vst [vmem:[%s1024_s3] sm:$0x3] %v578_v50 }

// kernel: number_noise_simulation.21
= control target key start
LH: loop header
LB: loop body
LE: loop exit
PB: predicated region body
PF: predicated region fallthrough
CT: control target
= control target key end

     0   :  { %v1754_v0 = vmov 0   ;;  %v1755_v2 = vmov 0.0   ;;  %vm1756_vm0 = vmmov 0   ;;  %vm1369_vm1 = vcmask 1040384   ;;  %s2469_s1 = inlined_call_operand.vmem [shape: bf16[384,128], index: 1, kind: input, shape index: {}]   ;;  %s2470_s0 = inlined_call_operand.vmem [shape: bf16[392,384], index: 0, kind: input, shape index: {}]   ;;  %s2471_s2 = inlined_call_operand.vmem [shape: f32[392,128], index: 2, kind: output, shape index: {0}]   ;;  %s2472_s3 = inlined_call_operand.vmem [shape: f32[1,2,128], index: 3, kind: output, shape index: {1}]  }
   0x1   :  { %699 = vmatprep.subr.bf16.mxu0 %v1754_v0  ;;  %v1631_v1 = vld [vmem:[%s2469_s1 + $0x38] sm:$0xff]   ;;  %1512 = vmatprep.subr.bf16.mxu1 %v1755_v2  ;;  %v1632_v3 = vld [vmem:[%s2469_s1 + $0x30] sm:$0xff]   ;;  %v1633_v4 = vld [vmem:[%s2469_s1 + $0x28] sm:$0xff]  }
   0x2   :  { %1528 = vmatprep.mubr.msk.bf16.mxu1 %vm1756_vm0, %v1755_v2  ;;  %700 = vmatpush1.bf16.msra.mxu0 %v1631_v1  ;;  %v1638_v5 = vld [vmem:[%s2469_s1 + $0xb8] sm:$0xff]   ;;  %v1640_v6 = vld [vmem:[%s2469_s1 + $0xb0] sm:$0xff]   ;;  %v1634_v7 = vld [vmem:[%s2469_s1 + $0x20] sm:$0xff]  }
   0x3   :  { %701 = vmatprep.subr.bf16.mxu0 %v1754_v0  ;;  %1513 = vmatpush3.bf16.msra.mxu1 %v1638_v5  ;;  %v1642_v8 = vld [vmem:[%s2469_s1 + $0xa8] sm:$0xff]   ;;  %v1635_v9 = vld [vmem:[%s2469_s1 + $0x18] sm:$0xff]   ;;  %v1644_v10 = vld [vmem:[%s2469_s1 + $0xa0] sm:$0xff]  }
   0x4   :  { %1514 = vmatprep.subr.bf16.mxu1 %v1755_v2  ;;  %v1636_v11 = vld [vmem:[%s2469_s1 + $0x10] sm:$0xff]   ;;  %v1646_v12 = vld [vmem:[%s2469_s1 + $0x98] sm:$0xff]   ;;  %v1637_v13 = vld [vmem:[%s2469_s1 + $0x8] sm:$0xff]  }
   0x5   :  { %v1639_v14 = vld [vmem:[%s2469_s1] sm:$0xff]   ;;  %v1648_v15 = vld [vmem:[%s2469_s1 + $0x90] sm:$0xff]   ;;  %v1650_v17 = vld [vmem:[%s2469_s1 + $0x88] sm:$0xff]  }
   0x6   :  { %702 = vmatpush1.bf16.msra.mxu0 %v1632_v3  ;;  %v1658_v16 = vld [vmem:[%s2470_s0 + $0x4] ss:$12 sps:$4 sm:$0xff]   ;;  %v1641_v18 = vld [vmem:[%s2469_s1 + $0x78] sm:$0xff]   ;;  %v1654_v21 = vld [vmem:[%s2470_s0 + $0x8] ss:$12 sps:$4 sm:$0xff]  }
   0x7   :  { %703 = vmatprep.subr.bf16.mxu0 %v1754_v0  ;;  %1515 = vmatpush3.bf16.msra.mxu1 %v1640_v6  ;;  %v1652_v19 = vld [vmem:[%s2469_s1 + $0x80] sm:$0xff]   ;;  %v1643_v20 = vld [vmem:[%s2469_s1 + $0x70] sm:$0xff]   ;;  %v1645_v22 = vld [vmem:[%s2469_s1 + $0x68] sm:$0xff]  }
   0x8   :  { %1516 = vmatprep.subr.bf16.mxu1 %v1755_v2  ;;  %731 = vmatprep.mubr.bf16.mxu0 %v1658_v16  ;;  %v1647_v23 = vld [vmem:[%s2469_s1 + $0x60] sm:$0xff]   ;;  %v1649_v25 = vld [vmem:[%s2469_s1 + $0x58] sm:$0xff]   ;;  %v1651_v26 = vld [vmem:[%s2469_s1 + $0x50] sm:$0xff]  }
   0x9   :  { %v1659_v24 = vld [vmem:[%s2470_s0 + $0x20] ss:$12 sps:$4 sm:$0xff]   ;;  %v1663_v27 = vld [vmem:[%s2470_s0 + $0x38] ss:$12 sps:$4 sm:$0xff]   ;;  %v1667_v30 = vld [vmem:[%s2470_s0 + $0x50] ss:$12 sps:$4 sm:$0xff]  }
   0xa   :  { %704 = vmatpush1.bf16.msra.mxu0 %v1633_v4  ;;  %v1653_v28 = vld [vmem:[%s2469_s1 + $0x48] sm:$0xff]   ;;  %v1655_v29 = vld [vmem:[%s2469_s1 + $0x40] sm:$0xff]   ;;  %v1666_v37 = vld [vmem:[%s2470_s0 + $0x30] ss:$12 sps:$4 sm:$0xff]  }
   0xb   :  { %705 = vmatprep.subr.bf16.mxu0 %v1754_v0  ;;  %1517 = vmatpush3.bf16.msra.mxu1 %v1642_v8  ;;  %v1656_v31 = vld [vmem:[%s2470_s0] ss:$12 sps:$4 sm:$0xff]   ;;  %v1660_v32 = vld [vmem:[%s2470_s0 + $0x1c] ss:$12 sps:$4 sm:$0xff]   ;;  %v1662_v34 = vld [vmem:[%s2470_s0 + $0x18] ss:$12 sps:$4 sm:$0xff]  }
   0xc   :  { %1518 = vmatprep.subr.bf16.mxu1 %v1755_v2  ;;  %v1671_v33 = vld [vmem:[%s2470_s0 + $0x68] ss:$12 sps:$4 sm:$0xff]   ;;  %v1675_v36 = vld [vmem:[%s2470_s0 + $0x80] ss:$12 sps:$4 sm:$0xff]   ;;  %v1679_v39 = vld [vmem:[%s2470_s0 + $0x98] ss:$12 sps:$4 sm:$0xff]  }
   0xd   :  { %v1664_v35 = vld [vmem:[%s2470_s0 + $0x34] ss:$12 sps:$4 sm:$0xff]   ;;  %v1668_v38 = vld [vmem:[%s2470_s0 + $0x4c] ss:$12 sps:$4 sm:$0xff]   ;;  %v1672_v41 = vld [vmem:[%s2470_s0 + $0x64] ss:$12 sps:$4 sm:$0xff]  }
   0xe   :  { %706 = vmatpush1.bf16.msra.mxu0 %v1634_v7  ;;  %v1670_v40 = vld [vmem:[%s2470_s0 + $0x48] ss:$12 sps:$4 sm:$0xff]   ;;  %v1683_v42 = vld [vmem:[%s2470_s0 + $0xb0] ss:$12 sps:$4 sm:$0xff]   ;;  %v1674_v43 = vld [vmem:[%s2470_s0 + $0x60] ss:$12 sps:$4 sm:$0xff]  }
   0xf   :  { %707 = vmatprep.subr.bf16.mxu0 %v1754_v0  ;;  %1519 = vmatpush3.bf16.msra.mxu1 %v1644_v10  ;;  %v1676_v44 = vld [vmem:[%s2470_s0 + $0x7c] ss:$12 sps:$4 sm:$0xff]   ;;  %v1678_v46 = vld [vmem:[%s2470_s0 + $0x78] ss:$12 sps:$4 sm:$0xff]   ;;  %v1680_v47 = vld [vmem:[%s2470_s0 + $0x94] ss:$12 sps:$4 sm:$0xff]  }
  0x10   :  { %1520 = vmatprep.subr.bf16.mxu1 %v1755_v2  ;;  %v1687_v45 = vld [vmem:[%s2470_s0 + $0xc8] ss:$12 sps:$4 sm:$0xff]   ;;  %v1691_v48 = vld [vmem:[%s2470_s0 + $0xe0] ss:$12 sps:$4 sm:$0xff]   ;;  %v1682_v49 = vld [vmem:[%s2470_s0 + $0x90] ss:$12 sps:$4 sm:$0xff]  }
  0x11   :  { %v1684_v50 = vld [vmem:[%s2470_s0 + $0xac] ss:$12 sps:$4 sm:$0xff]   ;;  %v1686_v52 = vld [vmem:[%s2470_s0 + $0xa8] ss:$12 sps:$4 sm:$0xff]   ;;  %v1688_v53 = vld [vmem:[%s2470_s0 + $0xc4] ss:$12 sps:$4 sm:$0xff]  }
  0x12   :  { %708 = vmatpush1.bf16.msra.mxu0 %v1635_v9  ;;  %v1695_v51 = vld [vmem:[%s2470_s0 + $0xf8] ss:$12 sps:$4 sm:$0xff]   ;;  %v1699_v54 = vld [vmem:[%s2470_s0 + $0x110] ss:$12 sps:$4 sm:$0xff]   ;;  %v1690_v55 = vld [vmem:[%s2470_s0 + $0xc0] ss:$12 sps:$4 sm:$0xff]  }
  0x13   :  { %709 = vmatprep.subr.bf16.mxu0 %v1754_v0  ;;  %1521 = vmatpush3.bf16.msra.mxu1 %v1646_v12  ;;  %v1692_v56 = vld [vmem:[%s2470_s0 + $0xdc] ss:$12 sps:$4 sm:$0xff]   ;;  %v1694_v58 = vld [vmem:[%s2470_s0 + $0xd8] ss:$12 sps:$4 sm:$0xff]   ;;  %v1696_v59 = vld [vmem:[%s2470_s0 + $0xf4] ss:$12 sps:$4 sm:$0xff]  }
  0x14   :  { %1522 = vmatprep.subr.bf16.mxu1 %v1755_v2  ;;  %v1703_v57 = vld [vmem:[%s2470_s0 + $0x128] ss:$12 sps:$4 sm:$0xff]   ;;  %v1707_v60 = vld [vmem:[%s2470_s0 + $0x140] ss:$12 sps:$4 sm:$0xff]   ;;  %v1698_v61 = vld [vmem:[%s2470_s0 + $0xf0] ss:$12 sps:$4 sm:$0xff]  }
  0x15   :  { %v1700_v62 = vld [vmem:[%s2470_s0 + $0x10c] ss:$12 sps:$4 sm:$0xff]   ;;  %v1704_v1 = vld [vmem:[%s2470_s0 + $0x124] ss:$12 sps:$4 sm:$0xff]   ;;  %v1708_v5 = vld [vmem:[%s2470_s0 + $0x13c] ss:$12 sps:$4 sm:$0xff]  }
  0x16   :  { %710 = vmatpush1.bf16.msra.mxu0 %v1636_v11  ;;  %v1711_v63 = vld [vmem:[%s2470_s0 + $0x158] ss:$12 sps:$4 sm:$0xff]   ;;  %v1715_v3 = vld [vmem:[%s2470_s0 + $0x170] ss:$12 sps:$4 sm:$0xff]   ;;  %v1706_v4 = vld [vmem:[%s2470_s0 + $0x120] ss:$12 sps:$4 sm:$0xff]  }
  0x17   :  { %711 = vmatprep.subr.bf16.mxu0 %v1754_v0  ;;  %1523 = vmatpush3.bf16.msra.mxu1 %v1648_v15  ;;  %v1719_v6 = vld [vmem:[%s2470_s0 + $0x188] ss:$12 sps:$4 sm:$0xff]   ;;  %v1710_v7 = vld [vmem:[%s2470_s0 + $0x138] ss:$12 sps:$4 sm:$0xff]   ;;  %v1723_v9 = vld [vmem:[%s2470_s0 + $0x1a0] ss:$12 sps:$4 sm:$0xff]  }
  0x18   :  { %1524 = vmatprep.subr.bf16.mxu1 %v1755_v2  ;;  %v1712_v8 = vld [vmem:[%s2470_s0 + $0x154] ss:$12 sps:$4 sm:$0xff]   ;;  %v1714_v10 = vld [vmem:[%s2470_s0 + $0x150] ss:$12 sps:$4 sm:$0xff]   ;;  %v1716_v11 = vld [vmem:[%s2470_s0 + $0x16c] ss:$12 sps:$4 sm:$0xff]  }
  0x19   :  { %v1727_v12 = vld [vmem:[%s2470_s0 + $0x1b8] ss:$12 sps:$4 sm:$0xff]   ;;  %v1731_v15 = vld [vmem:[%s2470_s0 + $0x1d0] ss:$12 sps:$4 sm:$0xff]   ;;  %v1722_v16 = vld [vmem:[%s2470_s0 + $0x180] ss:$12 sps:$4 sm:$0xff]  }
  0x1a   :  { %712 = vmatpush1.bf16.msra.mxu0 %v1637_v13  ;;  %v1718_v13 = vld [vmem:[%s2470_s0 + $0x168] ss:$12 sps:$4 sm:$0xff]  }
  0x1b   :  { %713 = vmatprep.subr.bf16.mxu0 %v1754_v0  ;;  %1525 = vmatpush3.bf16.msra.mxu1 %v1650_v17  ;;  %v1724_v17 = vld [vmem:[%s2470_s0 + $0x19c] ss:$12 sps:$4 sm:$0xff]  }
  0x1c   :  { %1526 = vmatprep.subr.bf16.mxu1 %v1755_v2 }
  0x1e   :  { %714 = vmatpush1.bf16.msra.mxu0 %v1639_v14  ;;  %v1720_v14 = vld [vmem:[%s2470_s0 + $0x184] ss:$12 sps:$4 sm:$0xff]  }
  0x1f   :  { %715 = vmatprep.subr.bf16.mxu0 %v1754_v0  ;;  %1527 = vmatpush3.bf16.msra.mxu1 %v1652_v19  ;;  %v1726_v19 = vld [vmem:[%s2470_s0 + $0x198] ss:$12 sps:$4 sm:$0xff]  }
  0x22   :  { %716 = vmatpush2.bf16.msra.mxu0 %v1641_v18  ;;  %1529 = vmatmul.mubr.bf16.vlgmr.msra.gmra.mxu1 %v1654_v21  ;;  %v1735_v18 = vld [vmem:[%s2470_s0 + $0x1e8] ss:$12 sps:$4 sm:$0xff]   ;;  %v1739_v21 = vld [vmem:[%s2470_s0 + $0x200] ss:$12 sps:$4 sm:$0xff]  }
  0x23   :  { %717 = vmatprep.subr.bf16.mxu0 %v1754_v0  ;;  %1532 = vmatprep.mubr.msk.bf16.mxu1 %vm1756_vm0, %v1755_v2 }
  0x26   :  { %718 = vmatpush2.bf16.msra.mxu0 %v1643_v20  ;;  %v1728_v20 = vld [vmem:[%s2470_s0 + $0x1b4] ss:$12 sps:$4 sm:$0xff]  }
  0x27   :  { %719 = vmatprep.subr.bf16.mxu0 %v1754_v0 }
  0x2a   :  { %720 = vmatpush2.bf16.msra.mxu0 %v1645_v22  ;;  %1533 = vmatmul.mubr.bf16.gmra.mxu1 %v1659_v24  ;;  %v1730_v22 = vld [vmem:[%s2470_s0 + $0x1b0] ss:$12 sps:$4 sm:$0xff]   ;;  %v1743_v24 = vld [vmem:[%s2470_s0 + $0x218] ss:$12 sps:$4 sm:$0xff]  }
  0x2b   :  { %721 = vmatprep.subr.bf16.mxu0 %v1754_v0  ;;  %1536 = vmatprep.mubr.msk.bf16.mxu1 %vm1756_vm0, %v1755_v2 }
  0x2e   :  { %722 = vmatpush2.bf16.msra.mxu0 %v1647_v23  ;;  %v1732_v23 = vld [vmem:[%s2470_s0 + $0x1cc] ss:$12 sps:$4 sm:$0xff]  }
  0x2f   :  { %723 = vmatprep.subr.bf16.mxu0 %v1754_v0 }
  0x32   :  { %724 = vmatpush2.bf16.msra.mxu0 %v1649_v25  ;;  %1537 = vmatmul.mubr.bf16.gmra.mxu1 %v1663_v27  ;;  %v1734_v25 = vld [vmem:[%s2470_s0 + $0x1c8] ss:$12 sps:$4 sm:$0xff]   ;;  %v1747_v27 = vld [vmem:[%s2470_s0 + $0x230] ss:$12 sps:$4 sm:$0xff]  }
  0x33   :  { %725 = vmatprep.subr.bf16.mxu0 %v1754_v0  ;;  %1540 = vmatprep.mubr.msk.bf16.mxu1 %vm1756_vm0, %v1755_v2 }
  0x36   :  { %726 = vmatpush2.bf16.msra.mxu0 %v1651_v26  ;;  %v1736_v26 = vld [vmem:[%s2470_s0 + $0x1e4] ss:$12 sps:$4 sm:$0xff]  }
  0x37   :  { %727 = vmatprep.subr.bf16.mxu0 %v1754_v0 }
  0x3a   :  { %728 = vmatpush2.bf16.msra.mxu0 %v1653_v28  ;;  %1541 = vmatmul.mubr.bf16.gmra.mxu1 %v1667_v30  ;;  %v1738_v28 = vld [vmem:[%s2470_s0 + $0x1e0] ss:$12 sps:$4 sm:$0xff]   ;;  %v1751_v30 = vld [vmem:[%s2470_s0 + $0x248] ss:$0 sps:$4 sm:$0xff]  }
  0x3b   :  { %729 = vmatprep.subr.bf16.mxu0 %v1754_v0  ;;  %1544 = vmatprep.mubr.msk.bf16.mxu1 %vm1756_vm0, %v1755_v2  ;;  %v1702_v0 = vld [vmem:[%s2470_s0 + $0x108] ss:$12 sps:$4 sm:$0xff]  }
  0x3e   :  { %730 = vmatpush2.bf16.msra.mxu0 %v1655_v29  ;;  %v1740_v29 = vld [vmem:[%s2470_s0 + $0x1fc] ss:$12 sps:$4 sm:$0xff]  }
  0x41   :  { %732 = vmatmul.mubr.bf16.vlgmr.msra.gmra.mxu0 %v1656_v31  ;;  %v1742_v31 = vld [vmem:[%s2470_s0 + $0x1f8] ss:$12 sps:$4 sm:$0xff]  }
  0x42   :  { %739 = vmatprep.mubr.bf16.mxu0 %v1660_v32  ;;  %1545 = vmatmul.mubr.bf16.gmra.mxu1 %v1671_v33  ;;  %v1744_v32 = vld [vmem:[%s2470_s0 + $0x214] ss:$12 sps:$4 sm:$0xff]  }
  0x43   :  { %1548 = vmatprep.mubr.msk.bf16.mxu1 %vm1756_vm0, %v1755_v2 }
  0x49   :  { %740 = vmatmul.mubr.bf16.gmra.mxu0 %v1662_v34 }
  0x4a   :  { %747 = vmatprep.mubr.bf16.mxu0 %v1664_v35  ;;  %1549 = vmatmul.mubr.bf16.gmra.mxu1 %v1675_v36  ;;  %v1748_v36 = vld [vmem:[%s2470_s0 + $0x22c] ss:$12 sps:$4 sm:$0xff]  }
  0x4b   :  { %1552 = vmatprep.mubr.msk.bf16.mxu1 %vm1756_vm0, %v1755_v2 }
  0x51   :  { %748 = vmatmul.mubr.bf16.gmra.mxu0 %v1666_v37 }
  0x52   :  { %755 = vmatprep.mubr.bf16.mxu0 %v1668_v38  ;;  %1553 = vmatmul.mubr.bf16.gmra.mxu1 %v1679_v39 }
  0x53   :  { %1556 = vmatprep.mubr.msk.bf16.mxu1 %vm1756_vm0, %v1755_v2 }
  0x59   :  { %756 = vmatmul.mubr.bf16.gmra.mxu0 %v1670_v40  ;;  %v110_v40 = vld [vmem:[%s2470_s0 + $0x240] sm:$0xff] }
  0x5a   :  { %763 = vmatprep.mubr.bf16.mxu0 %v1672_v41  ;;  %1557 = vmatmul.mubr.bf16.gmra.mxu1 %v1683_v42  ;;  %v1750_v42 = vld [vmem:[%s2470_s0 + $0x228] ss:$12 sps:$4 sm:$0xff]  }
  0x5b   :  { %1560 = vmatprep.mubr.msk.bf16.mxu1 %vm1756_vm0, %v1755_v2 }
  0x61   :  { %764 = vmatmul.mubr.bf16.gmra.mxu0 %v1674_v43  ;;  %v1453_v43 = vcombine.high %v110_v40, %v110_v40 }
  0x62   :  { %771 = vmatprep.mubr.bf16.mxu0 %v1676_v44  ;;  %1561 = vmatmul.mubr.bf16.gmra.mxu1 %v1687_v45 }
  0x63   :  { %1564 = vmatprep.mubr.msk.bf16.mxu1 %vm1756_vm0, %v1755_v2 }
  0x69   :  { %772 = vmatmul.mubr.bf16.gmra.mxu0 %v1678_v46 }
  0x6a   :  { %779 = vmatprep.mubr.bf16.mxu0 %v1680_v47  ;;  %1565 = vmatmul.mubr.bf16.gmra.mxu1 %v1691_v48  ;;  %v1452_v48 = vcombine.low %v110_v40, %v110_v40 }
  0x6b   :  { %1568 = vmatprep.mubr.msk.bf16.mxu1 %vm1756_vm0, %v1755_v2 }
  0x71   :  { %780 = vmatmul.mubr.bf16.gmra.mxu0 %v1682_v49 }
  0x72   :  { %787 = vmatprep.mubr.bf16.mxu0 %v1684_v50  ;;  %1569 = vmatmul.mubr.bf16.gmra.mxu1 %v1695_v51 }
  0x73   :  { %1572 = vmatprep.mubr.msk.bf16.mxu1 %vm1756_vm0, %v1755_v2 }
  0x79   :  { %788 = vmatmul.mubr.bf16.gmra.mxu0 %v1686_v52 }
  0x7a   :  { %795 = vmatprep.mubr.bf16.mxu0 %v1688_v53  ;;  %1573 = vmatmul.mubr.bf16.gmra.mxu1 %v1699_v54 }
  0x7b   :  { %1576 = vmatprep.mubr.msk.bf16.mxu1 %vm1756_vm0, %v1755_v2 }
  0x81   :  { %796 = vmatmul.mubr.bf16.gmra.mxu0 %v1690_v55 }
  0x82   :  { %803 = vmatprep.mubr.bf16.mxu0 %v1692_v56  ;;  %1577 = vmatmul.mubr.bf16.gmra.mxu1 %v1703_v57 }
  0x83   :  { %1580 = vmatprep.mubr.msk.bf16.mxu1 %vm1756_vm0, %v1755_v2 }
  0x89   :  { %804 = vmatmul.mubr.bf16.gmra.mxu0 %v1694_v58 }
  0x8a   :  { %811 = vmatprep.mubr.bf16.mxu0 %v1696_v59  ;;  %1581 = vmatmul.mubr.bf16.gmra.mxu1 %v1707_v60 }
  0x8b   :  { %1584 = vmatprep.mubr.msk.bf16.mxu1 %vm1756_vm0, %v1755_v2 }
  0x91   :  { %812 = vmatmul.mubr.bf16.gmra.mxu0 %v1698_v61 }
  0x92   :  { %819 = vmatprep.mubr.bf16.mxu0 %v1700_v62  ;;  %1585 = vmatmul.mubr.bf16.gmra.mxu1 %v1711_v63 }
  0x93   :  { %1588 = vmatprep.mubr.msk.bf16.mxu1 %vm1756_vm0, %v1755_v2 }
  0x99   :  { %820 = vmatmul.mubr.bf16.gmra.mxu0 %v1702_v0 }
  0x9a   :  { %827 = vmatprep.mubr.bf16.mxu0 %v1704_v1  ;;  %1589 = vmatmul.mubr.bf16.gmra.mxu1 %v1715_v3 }
  0x9b   :  { %1592 = vmatprep.mubr.msk.bf16.mxu1 %vm1756_vm0, %v1755_v2 }
  0xa1   :  { %828 = vmatmul.mubr.bf16.gmra.mxu0 %v1706_v4 }
  0xa2   :  { %835 = vmatprep.mubr.bf16.mxu0 %v1708_v5  ;;  %1593 = vmatmul.mubr.bf16.gmra.mxu1 %v1719_v6 }
  0xa3   :  { %1596 = vmatprep.mubr.msk.bf16.mxu1 %vm1756_vm0, %v1755_v2 }
  0xa9   :  { %836 = vmatmul.mubr.bf16.gmra.mxu0 %v1710_v7 }
  0xaa   :  { %843 = vmatprep.mubr.bf16.mxu0 %v1712_v8  ;;  %1597 = vmatmul.mubr.bf16.gmra.mxu1 %v1723_v9 }
  0xab   :  { %1600 = vmatprep.mubr.msk.bf16.mxu1 %vm1756_vm0, %v1755_v2 }
  0xb1   :  { %844 = vmatmul.mubr.bf16.gmra.mxu0 %v1714_v10 }
  0xb2   :  { %851 = vmatprep.mubr.bf16.mxu0 %v1716_v11  ;;  %1601 = vmatmul.mubr.bf16.gmra.mxu1 %v1727_v12 }
  0xb3   :  { %1604 = vmatprep.mubr.msk.bf16.mxu1 %vm1756_vm0, %v1755_v2 }
  0xb9   :  { %852 = vmatmul.mubr.bf16.gmra.mxu0 %v1718_v13 }
  0xba   :  { %859 = vmatprep.mubr.bf16.mxu0 %v1720_v14  ;;  %1605 = vmatmul.mubr.bf16.gmra.mxu1 %v1731_v15 }
  0xbb   :  { %1608 = vmatprep.mubr.msk.bf16.mxu1 %vm1756_vm0, %v1755_v2 }
  0xc1   :  { %860 = vmatmul.mubr.bf16.gmra.mxu0 %v1722_v16 }
  0xc2   :  { %867 = vmatprep.mubr.bf16.mxu0 %v1724_v17  ;;  %1609 = vmatmul.mubr.bf16.gmra.mxu1 %v1735_v18 }
  0xc3   :  { %1612 = vmatprep.mubr.msk.bf16.mxu1 %vm1756_vm0, %v1755_v2 }
  0xc9   :  { %868 = vmatmul.mubr.bf16.gmra.mxu0 %v1726_v19 }
  0xca   :  { %875 = vmatprep.mubr.bf16.mxu0 %v1728_v20  ;;  %1613 = vmatmul.mubr.bf16.gmra.mxu1 %v1739_v21 }
  0xcb   :  { %1616 = vmatprep.mubr.msk.bf16.mxu1 %vm1756_vm0, %v1755_v2 }
  0xd1   :  { %876 = vmatmul.mubr.bf16.gmra.mxu0 %v1730_v22 }
  0xd2   :  { %883 = vmatprep.mubr.bf16.mxu0 %v1732_v23  ;;  %1617 = vmatmul.mubr.bf16.gmra.mxu1 %v1743_v24 }
  0xd3   :  { %1620 = vmatprep.mubr.msk.bf16.mxu1 %vm1756_vm0, %v1755_v2 }
  0xd9   :  { %884 = vmatmul.mubr.bf16.gmra.mxu0 %v1734_v25 }
  0xda   :  { %891 = vmatprep.mubr.bf16.mxu0 %v1736_v26  ;;  %1621 = vmatmul.mubr.bf16.gmra.mxu1 %v1747_v27 }
  0xdb   :  { %1624 = vmatprep.mubr.msk.bf16.mxu1 %vm1756_vm0, %v1755_v2  ;;  %v1746_v2 = vld [vmem:[%s2470_s0 + $0x210] ss:$12 sps:$4 sm:$0xff]  }
  0xe1   :  { %892 = vmatmul.mubr.bf16.gmra.mxu0 %v1738_v28 }
  0xe2   :  { %899 = vmatprep.mubr.bf16.mxu0 %v1740_v29  ;;  %v965_v33 = vpop.f32.mrf.mxu1  ;;  %1625 = vmatmul.mubr.bf16.gmra.mxu1 %v1751_v30 }
  0xe4   :  { %v1530_v34 = vpop.f32.mrf.mxu1 }
  0xe6   :  { %v968_v35 = vpop.f32.mrf.mxu1 }
  0xe8   :  { %v1531_v37 = vpop.f32.mrf.mxu1 }
  0xe9   :  { %900 = vmatmul.mubr.bf16.gmra.mxu0 %v1742_v31 }
  0xea   :  { %907 = vmatprep.mubr.bf16.mxu0 %v1744_v32  ;;  %v973_v38 = vpop.f32.mrf.mxu1 }
  0xec   :  { %v1534_v39 = vpop.f32.mrf.mxu1 }
  0xee   :  { %v976_v41 = vpop.f32.mrf.mxu1 }
  0xf0   :  { %v1535_v44 = vpop.f32.mrf.mxu1 }
  0xf1   :  { %908 = vmatmul.mubr.bf16.gmra.mxu0 %v1746_v2 }
  0xf2   :  { %915 = vmatprep.mubr.bf16.mxu0 %v1748_v36  ;;  %v981_v45 = vpop.f32.mrf.mxu1 }
  0xf4   :  { %v1538_v46 = vpop.f32.mrf.mxu1 }
  0xf6   :  { %v984_v47 = vpop.f32.mrf.mxu1 }
  0xf8   :  { %v1539_v49 = vpop.f32.mrf.mxu1 }
  0xf9   :  { %916 = vmatmul.mubr.bf16.gmra.mxu0 %v1750_v42 }
  0xfa   :  { %923 = vmatprep.mubr.bf16.mxu0 %v1453_v43  ;;  %v989_v50 = vpop.f32.mrf.mxu1 }
  0xfc   :  { %v1542_v53 = vpop.f32.mrf.mxu1 }
  0xfe   :  { %v992_v55 = vpop.f32.mrf.mxu1 }
 0x100   :  { %v1543_v58 = vpop.f32.mrf.mxu1 }
 0x101   :  { %v733_v51 = vpop.f32.mrf.mxu0  ;;  %924 = vmatmul.mubr.bf16.gmra.mxu0 %v1452_v48 }
 0x102   :  { %v966_v52 = vadd.f32 %v965_v33, %v733_v51  ;;  %v997_v63 = vpop.f32.mrf.mxu1 }
 0x103   :  { %v735_v54 = vpop.f32.mrf.mxu0 }
 0x104   :  { %1163 = vst [vmem:[%s2471_s2] sm:$0xff] %v966_v52  ;;  %v1266_v60 = vmul.f32 %v966_v52, %v966_v52  ;;  %v1546_v4 = vpop.f32.mrf.mxu1 }
 0x105   :  { %v736_v56 = vpop.f32.mrf.mxu0 }
 0x106   :  { %v969_v57 = vadd.f32 %v968_v35, %v736_v56  ;;  %v1000_v8 = vpop.f32.mrf.mxu1 }
 0x107   :  { %v738_v59 = vpop.f32.mrf.mxu0 }
 0x108   :  { %1164 = vst [vmem:[%s2471_s2 + $0x8] sm:$0xff] %v969_v57  ;;  %v1212_v61 = vadd.f32 %v969_v57, %v966_v52  ;;  %v1267_v62 = vmul.f32 %v969_v57, %v969_v57  ;;  %v1547_v12 = vpop.f32.mrf.mxu1 }
 0x109   :  { %v741_v0 = vpop.f32.mrf.mxu0 }
 0x10a   :  { %v1315_v1 = vadd.f32 %v1267_v62, %v1266_v60  ;;  %v974_v3 = vadd.f32 %v973_v38, %v741_v0  ;;  %v1005_v16 = vpop.f32.mrf.mxu1 }
 0x10b   :  { %v743_v5 = vpop.f32.mrf.mxu0 }
 0x10c   :  { %1165 = vst [vmem:[%s2471_s2 + $0x10] sm:$0xff] %v974_v3  ;;  %v1213_v6 = vadd.f32 %v1212_v61, %v974_v3  ;;  %v1268_v7 = vmul.f32 %v974_v3, %v974_v3  ;;  %v1550_v20 = vpop.f32.mrf.mxu1 }
 0x10d   :  { %v744_v9 = vpop.f32.mrf.mxu0 }
 0x10e   :  { %v1316_v10 = vadd.f32 %v1315_v1, %v1268_v7  ;;  %v977_v11 = vadd.f32 %v976_v41, %v744_v9  ;;  %v1008_v24 = vpop.f32.mrf.mxu1 }
 0x10f   :  { %v746_v13 = vpop.f32.mrf.mxu0 }
 0x110   :  { %1166 = vst [vmem:[%s2471_s2 + $0x18] sm:$0xff] %v977_v11  ;;  %v1214_v14 = vadd.f32 %v1213_v6, %v977_v11  ;;  %v1269_v15 = vmul.f32 %v977_v11, %v977_v11  ;;  %v1551_v28 = vpop.f32.mrf.mxu1 }
 0x111   :  { %v749_v17 = vpop.f32.mrf.mxu0 }
 0x112   :  { %v1317_v18 = vadd.f32 %v1316_v10, %v1269_v15  ;;  %v982_v19 = vadd.f32 %v981_v45, %v749_v17  ;;  %v1013_v32 = vpop.f32.mrf.mxu1 }
 0x113   :  { %v751_v21 = vpop.f32.mrf.mxu0 }
 0x114   :  { %1167 = vst [vmem:[%s2471_s2 + $0x20] sm:$0xff] %v982_v19  ;;  %v1215_v22 = vadd.f32 %v1214_v14, %v982_v19  ;;  %v1270_v23 = vmul.f32 %v982_v19, %v982_v19  ;;  %v1554_v2 = vpop.f32.mrf.mxu1 }
 0x115   :  { %v752_v25 = vpop.f32.mrf.mxu0 }
 0x116   :  { %v1318_v26 = vadd.f32 %v1317_v18, %v1270_v23  ;;  %v985_v27 = vadd.f32 %v984_v47, %v752_v25  ;;  %v1016_v39 = vpop.f32.mrf.mxu1 }
 0x117   :  { %v754_v29 = vpop.f32.mrf.mxu0 }
 0x118   :  { %1168 = vst [vmem:[%s2471_s2 + $0x28] sm:$0xff] %v985_v27  ;;  %v1216_v30 = vadd.f32 %v1215_v22, %v985_v27  ;;  %v1271_v31 = vmul.f32 %v985_v27, %v985_v27  ;;  %v1555_v43 = vpop.f32.mrf.mxu1 }
 0x119   :  { %v757_v33 = vpop.f32.mrf.mxu0 }
 0x11a   :  { %v1319_v34 = vadd.f32 %v1318_v26, %v1271_v31  ;;  %v990_v35 = vadd.f32 %v989_v50, %v757_v33  ;;  %v1021_v47 = vpop.f32.mrf.mxu1 }
 0x11b   :  { %v759_v36 = vpop.f32.mrf.mxu0 }
 0x11c   :  { %1169 = vst [vmem:[%s2471_s2 + $0x30] sm:$0xff] %v990_v35  ;;  %v1217_v37 = vadd.f32 %v1216_v30, %v990_v35  ;;  %v1272_v38 = vmul.f32 %v990_v35, %v990_v35  ;;  %v1558_v51 = vpop.f32.mrf.mxu1 }
 0x11d   :  { %v760_v40 = vpop.f32.mrf.mxu0 }
 0x11e   :  { %v1320_v41 = vadd.f32 %v1319_v34, %v1272_v38  ;;  %v993_v42 = vadd.f32 %v992_v55, %v760_v40  ;;  %v1024_v55 = vpop.f32.mrf.mxu1 }
 0x11f   :  { %v762_v44 = vpop.f32.mrf.mxu0 }
 0x120   :  { %1170 = vst [vmem:[%s2471_s2 + $0x38] sm:$0xff] %v993_v42  ;;  %v1218_v45 = vadd.f32 %v1217_v37, %v993_v42  ;;  %v1273_v46 = vmul.f32 %v993_v42, %v993_v42  ;;  %v1559_v59 = vpop.f32.mrf.mxu1 }
 0x121   :  { %v765_v48 = vpop.f32.mrf.mxu0 }
 0x122   :  { %v1321_v49 = vadd.f32 %v1320_v41, %v1273_v46  ;;  %v998_v50 = vadd.f32 %v997_v63, %v765_v48  ;;  %v1029_v63 = vpop.f32.mrf.mxu1 }
 0x123   :  { %v767_v52 = vpop.f32.mrf.mxu0 }
 0x124   :  { %1171 = vst [vmem:[%s2471_s2 + $0x40] sm:$0xff] %v998_v50  ;;  %v1219_v53 = vadd.f32 %v1218_v45, %v998_v50  ;;  %v1274_v54 = vmul.f32 %v998_v50, %v998_v50  ;;  %v1562_v4 = vpop.f32.mrf.mxu1 }
 0x125   :  { %v768_v56 = vpop.f32.mrf.mxu0 }
 0x126   :  { %v1322_v57 = vadd.f32 %v1321_v49, %v1274_v54  ;;  %v1001_v58 = vadd.f32 %v1000_v8, %v768_v56  ;;  %v1032_v8 = vpop.f32.mrf.mxu1 }
 0x127   :  { %v770_v60 = vpop.f32.mrf.mxu0 }
 0x128   :  { %1172 = vst [vmem:[%s2471_s2 + $0x48] sm:$0xff] %v1001_v58  ;;  %v1220_v61 = vadd.f32 %v1219_v53, %v1001_v58  ;;  %v1275_v62 = vmul.f32 %v1001_v58, %v1001_v58  ;;  %v1563_v12 = vpop.f32.mrf.mxu1 }
 0x129   :  { %v773_v0 = vpop.f32.mrf.mxu0 }
 0x12a   :  { %v1323_v1 = vadd.f32 %v1322_v57, %v1275_v62  ;;  %v1006_v3 = vadd.f32 %v1005_v16, %v773_v0  ;;  %v1037_v16 = vpop.f32.mrf.mxu1 }
 0x12b   :  { %v775_v5 = vpop.f32.mrf.mxu0 }
 0x12c   :  { %1173 = vst [vmem:[%s2471_s2 + $0x50] sm:$0xff] %v1006_v3  ;;  %v1221_v6 = vadd.f32 %v1220_v61, %v1006_v3  ;;  %v1276_v7 = vmul.f32 %v1006_v3, %v1006_v3  ;;  %v1566_v20 = vpop.f32.mrf.mxu1 }
 0x12d   :  { %v776_v9 = vpop.f32.mrf.mxu0 }
 0x12e   :  { %v1324_v10 = vadd.f32 %v1323_v1, %v1276_v7  ;;  %v1009_v11 = vadd.f32 %v1008_v24, %v776_v9  ;;  %v1040_v24 = vpop.f32.mrf.mxu1 }
 0x12f   :  { %v778_v13 = vpop.f32.mrf.mxu0 }
 0x130   :  { %1174 = vst [vmem:[%s2471_s2 + $0x58] sm:$0xff] %v1009_v11  ;;  %v1222_v14 = vadd.f32 %v1221_v6, %v1009_v11  ;;  %v1277_v15 = vmul.f32 %v1009_v11, %v1009_v11  ;;  %v1567_v28 = vpop.f32.mrf.mxu1 }
 0x131   :  { %v781_v17 = vpop.f32.mrf.mxu0 }
 0x132   :  { %v1325_v18 = vadd.f32 %v1324_v10, %v1277_v15  ;;  %v1014_v19 = vadd.f32 %v1013_v32, %v781_v17  ;;  %v1045_v32 = vpop.f32.mrf.mxu1 }
 0x133   :  { %v783_v21 = vpop.f32.mrf.mxu0 }
 0x134   :  { %1175 = vst [vmem:[%s2471_s2 + $0x60] sm:$0xff] %v1014_v19  ;;  %v1223_v22 = vadd.f32 %v1222_v14, %v1014_v19  ;;  %v1278_v23 = vmul.f32 %v1014_v19, %v1014_v19  ;;  %v1570_v2 = vpop.f32.mrf.mxu1 }
 0x135   :  { %v784_v25 = vpop.f32.mrf.mxu0 }
 0x136   :  { %v1326_v26 = vadd.f32 %v1325_v18, %v1278_v23  ;;  %v1017_v27 = vadd.f32 %v1016_v39, %v784_v25  ;;  %v1048_v39 = vpop.f32.mrf.mxu1 }
 0x137   :  { %v786_v29 = vpop.f32.mrf.mxu0 }
 0x138   :  { %1176 = vst [vmem:[%s2471_s2 + $0x68] sm:$0xff] %v1017_v27  ;;  %v1224_v30 = vadd.f32 %v1223_v22, %v1017_v27  ;;  %v1279_v31 = vmul.f32 %v1017_v27, %v1017_v27  ;;  %v1571_v43 = vpop.f32.mrf.mxu1 }
 0x139   :  { %v789_v33 = vpop.f32.mrf.mxu0 }
 0x13a   :  { %v1327_v34 = vadd.f32 %v1326_v26, %v1279_v31  ;;  %v1022_v35 = vadd.f32 %v1021_v47, %v789_v33  ;;  %v1053_v47 = vpop.f32.mrf.mxu1 }
 0x13b   :  { %v791_v36 = vpop.f32.mrf.mxu0 }
 0x13c   :  { %1177 = vst [vmem:[%s2471_s2 + $0x70] sm:$0xff] %v1022_v35  ;;  %v1225_v37 = vadd.f32 %v1224_v30, %v1022_v35  ;;  %v1280_v38 = vmul.f32 %v1022_v35, %v1022_v35  ;;  %v1574_v51 = vpop.f32.mrf.mxu1 }
 0x13d   :  { %v792_v40 = vpop.f32.mrf.mxu0 }
 0x13e   :  { %v1328_v41 = vadd.f32 %v1327_v34, %v1280_v38  ;;  %v1025_v42 = vadd.f32 %v1024_v55, %v792_v40  ;;  %v1056_v55 = vpop.f32.mrf.mxu1 }
 0x13f   :  { %v794_v44 = vpop.f32.mrf.mxu0 }
 0x140   :  { %1178 = vst [vmem:[%s2471_s2 + $0x78] sm:$0xff] %v1025_v42  ;;  %v1226_v45 = vadd.f32 %v1225_v37, %v1025_v42  ;;  %v1281_v46 = vmul.f32 %v1025_v42, %v1025_v42  ;;  %v1575_v59 = vpop.f32.mrf.mxu1 }
 0x141   :  { %v797_v48 = vpop.f32.mrf.mxu0 }
 0x142   :  { %v1329_v49 = vadd.f32 %v1328_v41, %v1281_v46  ;;  %v1030_v50 = vadd.f32 %v1029_v63, %v797_v48  ;;  %v1061_v62 = vpop.f32.mrf.mxu1 }
 0x143   :  { %v799_v52 = vpop.f32.mrf.mxu0 }
 0x144   :  { %1179 = vst [vmem:[%s2471_s2 + $0x80] sm:$0xff] %v1030_v50  ;;  %v1227_v53 = vadd.f32 %v1226_v45, %v1030_v50  ;;  %v1282_v54 = vmul.f32 %v1030_v50, %v1030_v50  ;;  %v1578_v1 = vpop.f32.mrf.mxu1 }
 0x145   :  { %v800_v56 = vpop.f32.mrf.mxu0 }
 0x146   :  { %v2196_v57 = vadd.f32 %v1329_v49, %v1282_v54  ;;  %v2198_v58 = vadd.f32 %v1032_v8, %v800_v56  ;;  %v1064_v4 = vpop.f32.mrf.mxu1 }
 0x147   :  { %v802_v60 = vpop.f32.mrf.mxu0 }
 0x148   :  { %1180 = vst [vmem:[%s2471_s2 + $0x88] sm:$0xff] %v2198_v58  ;;  %v2205_v61 = vadd.f32 %v1227_v53, %v2198_v58  ;;  %v1579_v7 = vpop.f32.mrf.mxu1 }
 0x149   :  { %v805_v63 = vpop.f32.mrf.mxu0 }
 0x14a   :  { %v2207_v0 = vadd.f32 %v1037_v16, %v805_v63  ;;  %v1069_v9 = vpop.f32.mrf.mxu1 }
 0x14b   :  { %v807_v3 = vpop.f32.mrf.mxu0 }
 0x14c   :  { %1181 = vst [vmem:[%s2471_s2 + $0x90] sm:$0xff] %v2207_v0  ;;  %v1582_v12 = vpop.f32.mrf.mxu1 }
 0x14d   :  { %v808_v5 = vpop.f32.mrf.mxu0 }
 0x14e   :  { %v2213_v6 = vadd.f32 %v1040_v24, %v808_v5  ;;  %v1072_v14 = vpop.f32.mrf.mxu1 }
 0x14f   :  { %v810_v8 = vpop.f32.mrf.mxu0 }
 0x150   :  { %1182 = vst [vmem:[%s2471_s2 + $0x98] sm:$0xff] %v2213_v6  ;;  %v1583_v17 = vpop.f32.mrf.mxu1 }
 0x151   :  { %v813_v10 = vpop.f32.mrf.mxu0  ;;  %v1283_v17 = vmul.f32 %v2198_v58, %v2198_v58  ;;  %v1229_v58 = vadd.f32 %v2205_v61, %v2207_v0 }
 0x152   :  { %v2219_v11 = vadd.f32 %v1045_v32, %v813_v10  ;;  %v1077_v19 = vpop.f32.mrf.mxu1 }
 0x153   :  { %v815_v13 = vpop.f32.mrf.mxu0 }
 0x154   :  { %1183 = vst [vmem:[%s2471_s2 + $0xa0] sm:$0xff] %v2219_v11  ;;  %v1586_v22 = vpop.f32.mrf.mxu1 }
 0x155   :  { %v816_v15 = vpop.f32.mrf.mxu0 }
 0x156   :  { %v2225_v16 = vadd.f32 %v1048_v39, %v816_v15  ;;  %v1080_v24 = vpop.f32.mrf.mxu1 }
 0x157   :  { %v818_v18 = vpop.f32.mrf.mxu0 }
 0x158   :  { %1184 = vst [vmem:[%s2471_s2 + $0xa8] sm:$0xff] %v2225_v16  ;;  %v1587_v27 = vpop.f32.mrf.mxu1 }
 0x159   :  { %v821_v20 = vpop.f32.mrf.mxu0  ;;  %v1285_v27 = vmul.f32 %v2213_v6, %v2213_v6 }
 0x15a   :  { %v2231_v21 = vadd.f32 %v1053_v47, %v821_v20  ;;  %v1085_v29 = vpop.f32.mrf.mxu1  ;;  %v1284_v20 = vmul.f32 %v2207_v0, %v2207_v0 }
 0x15b   :  { %v823_v23 = vpop.f32.mrf.mxu0 }
 0x15c   :  { %1185 = vst [vmem:[%s2471_s2 + $0xb0] sm:$0xff] %v2231_v21  ;;  %v1590_v32 = vpop.f32.mrf.mxu1 }
 0x15d   :  { %v824_v25 = vpop.f32.mrf.mxu0  ;;  %v1230_v32 = vadd.f32 %v1229_v58, %v2213_v6 }
 0x15e   :  { %v2237_v26 = vadd.f32 %v1056_v55, %v824_v25  ;;  %v1088_v34 = vpop.f32.mrf.mxu1  ;;  %v1331_v25 = vadd.f32 %v2196_v57, %v1283_v17  ;;  %v1286_v57 = vmul.f32 %v2219_v11, %v2219_v11 }
 0x15f   :  { %v826_v28 = vpop.f32.mrf.mxu0 }
 0x160   :  { %1186 = vst [vmem:[%s2471_s2 + $0xb8] sm:$0xff] %v2237_v26  ;;  %v1591_v36 = vpop.f32.mrf.mxu1 }
 0x161   :  { %v829_v30 = vpop.f32.mrf.mxu0  ;;  %v1287_v36 = vmul.f32 %v2225_v16, %v2225_v16 }
 0x162   :  { %v2243_v31 = vadd.f32 %v1061_v62, %v829_v30  ;;  %v1093_v38 = vpop.f32.mrf.mxu1  ;;  %v1332_v30 = vadd.f32 %v1331_v25, %v1284_v20 }
 0x163   :  { %v831_v33 = vpop.f32.mrf.mxu0 }
 0x164   :  { %1187 = vst [vmem:[%s2471_s2 + $0xc0] sm:$0xff] %v2243_v31  ;;  %v1594_v41 = vpop.f32.mrf.mxu1 }
 0x165   :  { %v832_v35 = vpop.f32.mrf.mxu0  ;;  %v1288_v41 = vmul.f32 %v2231_v21, %v2231_v21 }
 0x166   :  { %v2249_v2 = vadd.f32 %v1064_v4, %v832_v35  ;;  %v1096_v43 = vpop.f32.mrf.mxu1  ;;  %v1231_v35 = vadd.f32 %v1230_v32, %v2219_v11 }
 0x167   :  { %v834_v37 = vpop.f32.mrf.mxu0 }
 0x168   :  { %1188 = vst [vmem:[%s2471_s2 + $0xc8] sm:$0xff] %v2249_v2  ;;  %v1595_v46 = vpop.f32.mrf.mxu1 }
 0x169   :  { %v837_v39 = vpop.f32.mrf.mxu0 }
 0x16a   :  { %v2255_v40 = vadd.f32 %v1069_v9, %v837_v39  ;;  %v1101_v48 = vpop.f32.mrf.mxu1  ;;  %v1232_v39 = vadd.f32 %v1231_v35, %v2225_v16 }
 0x16b   :  { %v839_v42 = vpop.f32.mrf.mxu0 }
 0x16c   :  { %1189 = vst [vmem:[%s2471_s2 + $0xd0] sm:$0xff] %v2255_v40  ;;  %v1598_v51 = vpop.f32.mrf.mxu1  ;;  %v1233_v46 = vadd.f32 %v1232_v39, %v2231_v21 }
 0x16d   :  { %v840_v44 = vpop.f32.mrf.mxu0 }
 0x16e   :  { %v2261_v45 = vadd.f32 %v1072_v14, %v840_v44  ;;  %v1104_v53 = vpop.f32.mrf.mxu1  ;;  %v1234_v51 = vadd.f32 %v1233_v46, %v2237_v26 }
 0x16f   :  { %v842_v47 = vpop.f32.mrf.mxu0 }
 0x170   :  { %1190 = vst [vmem:[%s2471_s2 + $0xd8] sm:$0xff] %v2261_v45  ;;  %v1599_v56 = vpop.f32.mrf.mxu1  ;;  %v1289_v47 = vmul.f32 %v2237_v26, %v2237_v26 }
 0x171   :  { %v845_v49 = vpop.f32.mrf.mxu0 }
 0x172   :  { %v2267_v50 = vadd.f32 %v1077_v19, %v845_v49  ;;  %v1109_v60 = vpop.f32.mrf.mxu1 }
 0x173   :  { %v847_v52 = vpop.f32.mrf.mxu0 }
 0x174   :  { %1191 = vst [vmem:[%s2471_s2 + $0xe0] sm:$0xff] %v2267_v50  ;;  %v1602_v1 = vpop.f32.mrf.mxu1  ;;  %v1290_v52 = vmul.f32 %v2243_v31, %v2243_v31  ;;  %v1294_v20 = vmul.f32 %v2267_v50, %v2267_v50 }
 0x175   :  { %v848_v54 = vpop.f32.mrf.mxu0 }
 0x176   :  { %v2273_v55 = vadd.f32 %v1080_v24, %v848_v54  ;;  %v2285_v4 = vpop.f32.mrf.mxu1 }
 0x177   :  { %v850_v59 = vpop.f32.mrf.mxu0 }
 0x178   :  { %1192 = vst [vmem:[%s2471_s2 + $0xe8] sm:$0xff] %v2273_v55  ;;  %v1603_v8 = vpop.f32.mrf.mxu1  ;;  %v1235_v59 = vadd.f32 %v1234_v51, %v2243_v31 }
 0x179   :  { %v853_v62 = vpop.f32.mrf.mxu0 }
 0x17a   :  { %v2279_v63 = vadd.f32 %v1085_v29, %v853_v62  ;;  %v2293_v10 = vpop.f32.mrf.mxu1  ;;  %v1291_v62 = vmul.f32 %v2249_v2, %v2249_v2 }
 0x17b   :  { %v855_v3 = vpop.f32.mrf.mxu0 }
 0x17c   :  { %1193 = vst [vmem:[%s2471_s2 + $0xf0] sm:$0xff] %v2279_v63  ;;  %v1606_v14 = vpop.f32.mrf.mxu1  ;;  %v1296_v32 = vmul.f32 %v2279_v63, %v2279_v63 }
 0x17d   :  { %v856_v5 = vpop.f32.mrf.mxu0 }
 0x17e   :  { %v2287_v7 = vadd.f32 %v1088_v34, %v856_v5  ;;  %v2303_v18 = vpop.f32.mrf.mxu1  ;;  %v1333_v34 = vadd.f32 %v1332_v30, %v1285_v27  ;;  %v1292_v5 = vmul.f32 %v2255_v40, %v2255_v40  ;;  %v1295_v27 = vmul.f32 %v2273_v55, %v2273_v55 }
 0x17f   :  { %v858_v9 = vpop.f32.mrf.mxu0 }
 0x180   :  { %1194 = vst [vmem:[%s2471_s2 + $0xf8] sm:$0xff] %v2287_v7  ;;  %v1607_v23 = vpop.f32.mrf.mxu1  ;;  %v1297_v35 = vmul.f32 %v2287_v7, %v2287_v7 }
 0x181   :  { %v861_v12 = vpop.f32.mrf.mxu0 }
 0x182   :  { %v2295_v13 = vadd.f32 %v1093_v38, %v861_v12  ;;  %v2318_v28 = vpop.f32.mrf.mxu1  ;;  %v1334_v38 = vadd.f32 %v1333_v34, %v1286_v57 }
 0x183   :  { %v863_v15 = vpop.f32.mrf.mxu0 }
 0x184   :  { %1195 = vst [vmem:[%s2471_s2 + $0x100] sm:$0xff] %v2295_v13  ;;  %v1610_v61 = vpop.f32.mrf.mxu1  ;;  %v1335_v44 = vadd.f32 %v1334_v38, %v1287_v36  ;;  %v1293_v15 = vmul.f32 %v2261_v45, %v2261_v45 }
 0x185   :  { %v864_v19 = vpop.f32.mrf.mxu0 }
 0x186   :  { %v2307_v22 = vadd.f32 %v1096_v43, %v864_v19  ;;  %v2332_v37 = vpop.f32.mrf.mxu1  ;;  %v1336_v49 = vadd.f32 %v1335_v44, %v1288_v41 }
 0x187   :  { %v866_v24 = vpop.f32.mrf.mxu0 }
 0x188   :  { %1196 = vst [vmem:[%s2471_s2 + $0x108] sm:$0xff] %v2307_v22  ;;  %v1611_v11 = vpop.f32.mrf.mxu1  ;;  %v1337_v56 = vadd.f32 %v1336_v49, %v1289_v47  ;;  %v1299_v44 = vmul.f32 %v2307_v22, %v2307_v22 }
 0x189   :  { %v869_v29 = vpop.f32.mrf.mxu0 }
 0x18a   :  { %v2323_v33 = vadd.f32 %v1101_v48, %v869_v29  ;;  %v2346_v48 = vpop.f32.mrf.mxu1  ;;  %v1338_v3 = vadd.f32 %v1337_v56, %v1290_v52 }
 0x18b   :  { %v871_v0 = vpop.f32.mrf.mxu0 }
 0x18c   :  { %1197 = vst [vmem:[%s2471_s2 + $0x110] sm:$0xff] %v2323_v33  ;;  %v1614_v21 = vpop.f32.mrf.mxu1  ;;  %v1339_v12 = vadd.f32 %v1338_v3, %v1291_v62 }
 0x18d   :  { %v872_v6 = vpop.f32.mrf.mxu0 }
 0x18e   :  { %v2337_v42 = vadd.f32 %v1104_v53, %v872_v6  ;;  %v2360_v1 = vpop.f32.mrf.mxu1  ;;  %v1340_v19 = vadd.f32 %v1339_v12, %v1292_v5 }
 0x18f   :  { %v874_v43 = vpop.f32.mrf.mxu0 }
 0x190   :  { %1198 = vst [vmem:[%s2471_s2 + $0x118] sm:$0xff] %v2337_v42  ;;  %v1615_v31 = vpop.f32.mrf.mxu1  ;;  %v1341_v25 = vadd.f32 %v1340_v19, %v1293_v15 }
 0x191   :  { %v877_v16 = vpop.f32.mrf.mxu0 }
 0x192   :  { %v2351_v53 = vadd.f32 %v1109_v60, %v877_v16  ;;  %v1236_v60 = vadd.f32 %v1235_v59, %v2249_v2  ;;  %v2375_v2 = vpop.f32.mrf.mxu1  ;;  %v1342_v30 = vadd.f32 %v1341_v25, %v1294_v20 }
 0x193   :  { %v879_v54 = vpop.f32.mrf.mxu0 }
 0x194   :  { %1199 = vst [vmem:[%s2471_s2 + $0x120] sm:$0xff] %v2351_v53  ;;  %v1237_v14 = vadd.f32 %v1236_v60, %v2255_v40  ;;  %v1618_v40 = vpop.f32.mrf.mxu1  ;;  %v1343_v0 = vadd.f32 %v1342_v30, %v1295_v27  ;;  %v1301_v54 = vmul.f32 %v2337_v42, %v2337_v42 }
 0x195   :  { %v880_v26 = vpop.f32.mrf.mxu0 }
 0x196   :  { %v2366_v8 = vadd.f32 %v2285_v4, %v880_v26  ;;  %v1238_v4 = vadd.f32 %v1237_v14, %v2261_v45  ;;  %v2390_v45 = vpop.f32.mrf.mxu1  ;;  %v1344_v6 = vadd.f32 %v1343_v0, %v1296_v32 }
 0x197   :  { %v882_v9 = vpop.f32.mrf.mxu0 }
 0x198   :  { %1200 = vst [vmem:[%s2471_s2 + $0x128] sm:$0xff] %v2366_v8  ;;  %v1239_v58 = vadd.f32 %v1238_v4, %v2267_v50  ;;  %v1619_v50 = vpop.f32.mrf.mxu1  ;;  %v1345_v11 = vadd.f32 %v1344_v6, %v1297_v35  ;;  %v1303_v31 = vmul.f32 %v2366_v8, %v2366_v8 }
 0x199   :  { %v885_v17 = vpop.f32.mrf.mxu0 }
 0x19a   :  { %v2381_v23 = vadd.f32 %v2293_v10, %v885_v17  ;;  %v1240_v10 = vadd.f32 %v1239_v58, %v2273_v55  ;;  %v2402_v36 = vpop.f32.mrf.mxu1 }
 0x19b   :  { %v887_v24 = vpop.f32.mrf.mxu0 }
 0x19c   :  { %1201 = vst [vmem:[%s2471_s2 + $0x130] sm:$0xff] %v2381_v23  ;;  %v1241_v34 = vadd.f32 %v1240_v10, %v2279_v63  ;;  %v1622_v41 = vpop.f32.mrf.mxu1 }
 0x19d   :  { %v888_v29 = vpop.f32.mrf.mxu0 }
 0x19e   :  { %v1121_v57 = vadd.f32 %v2303_v18, %v888_v29  ;;  %v1242_v38 = vadd.f32 %v1241_v34, %v2287_v7  ;;  %v1298_v18 = vmul.f32 %v2295_v13, %v2295_v13  ;;  %v2414_v46 = vpop.f32.mrf.mxu1 }
 0x19f   :  { %v890_v61 = vpop.f32.mrf.mxu0 }
 0x1a0   :  { %1202 = vst [vmem:[%s2471_s2 + $0x138] sm:$0xff] %v1121_v57  ;;  %v1243_v43 = vadd.f32 %v1242_v38, %v2295_v13  ;;  %v1346_v47 = vadd.f32 %v1345_v11, %v1298_v18  ;;  %v1623_v51 = vpop.f32.mrf.mxu1  ;;  %v1305_v20 = vmul.f32 %v1121_v57, %v1121_v57 }
 0x1a1   :  { %v893_v55 = vpop.f32.mrf.mxu0 }
 0x1a2   :  { %v1126_v39 = vadd.f32 %v2318_v28, %v893_v55  ;;  %v1244_v16 = vadd.f32 %v1243_v43, %v2307_v22  ;;  %v1300_v28 = vmul.f32 %v2323_v33, %v2323_v33  ;;  %v1347_v52 = vadd.f32 %v1346_v47, %v1299_v44  ;;  %v2426_v56 = vpop.f32.mrf.mxu1 }
 0x1a3   :  { %v895_v63 = vpop.f32.mrf.mxu0 }
 0x1a4   :  { %1203 = vst [vmem:[%s2471_s2 + $0x140] sm:$0xff] %v1126_v39  ;;  %v1245_v21 = vadd.f32 %v1244_v16, %v2323_v33  ;;  %v1348_v59 = vadd.f32 %v1347_v52, %v1300_v28  ;;  %v1626_v3 = vpop.f32.mrf.mxu1  ;;  %v1306_v58 = vmul.f32 %v1126_v39, %v1126_v39 }
 0x1a5   :  { %v896_v7 = vpop.f32.mrf.mxu0 }
 0x1a6   :  { %v1129_v49 = vadd.f32 %v2332_v37, %v896_v7  ;;  %v1246_v62 = vadd.f32 %v1245_v21, %v2337_v42  ;;  %v1302_v37 = vmul.f32 %v2351_v53, %v2351_v53  ;;  %v1349_v60 = vadd.f32 %v1348_v59, %v1301_v54  ;;  %v1160_v9 = vpop.f32.mrf.mxu1 }
 0x1a7   :  { %v898_v13 = vpop.f32.mrf.mxu0 }
 0x1a8   :  { %1204 = vst [vmem:[%s2471_s2 + $0x148] sm:$0xff] %v1129_v49  ;;  %v1247_v5 = vadd.f32 %v1246_v62, %v2351_v53  ;;  %v1350_v42 = vadd.f32 %v1349_v60, %v1302_v37  ;;  %v1627_v17 = vpop.f32.mrf.mxu1 }
 0x1a9   :  { %v901_v22 = vpop.f32.mrf.mxu0 }
 0x1aa   :  { %v1134_v26 = vadd.f32 %v2346_v48, %v901_v22  ;;  %v1248_v14 = vadd.f32 %v1247_v5, %v2366_v8  ;;  %v1304_v48 = vmul.f32 %v2381_v23, %v2381_v23  ;;  %v1351_v53 = vadd.f32 %v1350_v42, %v1303_v31 }
 0x1ab   :  { %v903_v33 = vpop.f32.mrf.mxu0 }
 0x1ac   :  { %1205 = vst [vmem:[%s2471_s2 + $0x150] sm:$0xff] %v1134_v26  ;;  %v1249_v4 = vadd.f32 %v1248_v14, %v2381_v23  ;;  %v1352_v24 = vadd.f32 %v1351_v53, %v1304_v48  ;;  %v1308_v50 = vmul.f32 %v1134_v26, %v1134_v26 }
 0x1ad   :  { %v904_v12 = vpop.f32.mrf.mxu0 }
 0x1ae   :  { %v1137_v15 = vadd.f32 %v2360_v1, %v904_v12  ;;  %v1250_v25 = vadd.f32 %v1249_v4, %v1121_v57  ;;  %v1353_v29 = vadd.f32 %v1352_v24, %v1305_v20  ;;  %v1307_v1 = vmul.f32 %v1129_v49, %v1129_v49 }
 0x1af   :  { %v906_v19 = vpop.f32.mrf.mxu0 }
 0x1b0   :  { %1206 = vst [vmem:[%s2471_s2 + $0x158] sm:$0xff] %v1137_v15  ;;  %v1251_v30 = vadd.f32 %v1250_v25, %v1126_v39  ;;  %v1354_v10 = vadd.f32 %v1353_v29, %v1306_v58  ;;  %v1309_v35 = vmul.f32 %v1137_v15, %v1137_v15 }
 0x1b1   :  { %v909_v40 = vpop.f32.mrf.mxu0 }
 0x1b2   :  { %v1142_v8 = vadd.f32 %v2375_v2, %v909_v40  ;;  %v1252_v32 = vadd.f32 %v1251_v30, %v1129_v49  ;;  %v1355_v34 = vadd.f32 %v1354_v10, %v1307_v1 }
 0x1b3   :  { %v911_v27 = vpop.f32.mrf.mxu0 }
 0x1b4   :  { %1207 = vst [vmem:[%s2471_s2 + $0x160] sm:$0xff] %v1142_v8  ;;  %v1253_v57 = vadd.f32 %v1252_v32, %v1134_v26  ;;  %v1356_v55 = vadd.f32 %v1355_v34, %v1308_v50  ;;  %v1310_v38 = vmul.f32 %v1142_v8, %v1142_v8 }
 0x1b5   :  { %v912_v23 = vpop.f32.mrf.mxu0 }
 0x1b6   :  { %v1145_v61 = vadd.f32 %v2390_v45, %v912_v23  ;;  %v1254_v6 = vadd.f32 %v1253_v57, %v1137_v15  ;;  %v1357_v41 = vadd.f32 %v1356_v55, %v1309_v35 }
 0x1b7   :  { %v914_v0 = vpop.f32.mrf.mxu0 }
 0x1b8   :  { %1208 = vst [vmem:[%s2471_s2 + $0x168] sm:$0xff] %v1145_v61  ;;  %v1255_v63 = vadd.f32 %v1254_v6, %v1142_v8  ;;  %v1311_v11 = vmul.f32 %v1145_v61, %v1145_v61  ;;  %v1358_v43 = vadd.f32 %v1357_v41, %v1310_v38 }
 0x1b9   :  { %v917_v2 = vpop.f32.mrf.mxu0 }
 0x1ba   :  { %v1150_v18 = vadd.f32 %v2402_v36, %v917_v2  ;;  %v1256_v44 = vadd.f32 %v1255_v63, %v1145_v61  ;;  %v1359_v28 = vadd.f32 %v1358_v43, %v1311_v11 }
 0x1bb   :  { %v919_v39 = vpop.f32.mrf.mxu0 }
 0x1bc   :  { %1209 = vst [vmem:[%s2471_s2 + $0x170] sm:$0xff] %v1150_v18  ;;  %v1312_v7 = vmul.f32 %v1150_v18, %v1150_v18  ;;  %v1257_v49 = vadd.f32 %v1256_v44, %v1150_v18 }
 0x1bd   :  { %v920_v45 = vpop.f32.mrf.mxu0 }
 0x1be   :  { %v1153_v47 = vadd.f32 %v2414_v46, %v920_v45  ;;  %v1360_v13 = vadd.f32 %v1359_v28, %v1312_v7 }
 0x1bf   :  { %v922_v16 = vpop.f32.mrf.mxu0 }
 0x1c0   :  { %1210 = vst [vmem:[%s2471_s2 + $0x178] sm:$0xff] %v1153_v47  ;;  %v1313_v36 = vmul.f32 %v1153_v47, %v1153_v47  ;;  %v1258_v52 = vadd.f32 %v1257_v49, %v1153_v47 }
 0x1c1   :  { %v925_v51 = vpop.f32.mrf.mxu0 }
 0x1c2   :  { %v1158_v21 = vadd.f32 %v2426_v56, %v925_v51  ;;  %v1361_v22 = vadd.f32 %v1360_v13, %v1313_v36 }
 0x1c3   :  { %v927_v54 = vpop.f32.mrf.mxu0 }
 0x1c4   :  { %1211 = vst [vmem:[%s2471_s2 + $0x180] sm:$0xff] %v1158_v21  ;;  %v1259_v46 = vadd.f32 %v1258_v52, %v1158_v21  ;;  %v1314_v59 = vmul.f32 %v1158_v21, %v1158_v21 }
 0x1c5   :  { %v928_v62 = vpop.f32.mrf.mxu0 }
 0x1c6   :  { %v1260_v37 = vrot.slane %v1259_v46, 4  ;;  %v1362_v26 = vadd.f32 %v1361_v22, %v1314_v59 }
 0x1c7   :  { %v929_v3 = vpop.f32.mrf.mxu0 }
 0x1c8   :  { %v1261_v33 = vadd.f32 %v1260_v37, %v1259_v46  ;;  %v1363_v60 = vrot.slane %v1362_v26, 4 }
 0x1ca   :  { %v1262_v5 = vrot.slane %v1261_v33, 2  ;;  %v1364_v31 = vadd.f32 %v1363_v60, %v1362_v26 }
 0x1cc   :  { %v1263_v9 = vadd.f32 %v1262_v5, %v1261_v33  ;;  %v1365_v12 = vrot.slane %v1364_v31, 2 }
 0x1ce   :  { %v1264_v42 = vrot.slane %v1263_v9, 1  ;;  %v1366_v56 = vadd.f32 %v1365_v12, %v1364_v31 }
 0x1d0   :  { %v1367_v14 = vrot.slane %v1366_v56, 1  ;;  %v1265_v48 = vadd.f32 %v1264_v42, %v1263_v9 }
 0x1d2   :  { %v1368_v15 = vadd.f32 %v1367_v14, %v1366_v56 }
 0x1d4   :  { %v1370_v17 = vsel %vm1369_vm1, %v1265_v48, %v1368_v15 }
 0x1d5   :  { %1371 = vst [vmem:[%s2472_s3] sm:$0x3] %v1370_v17 }

// kernel: number_noise_simulation.24
= control target key start
LH: loop header
LB: loop body
LE: loop exit
PB: predicated region body
PF: predicated region fallthrough
CT: control target
= control target key end

     0   :  { %s1063_s12 = smov 0   ;;  %s1623_s0 = inlined_call_operand.vmem [shape: f32[2048,128], index: 0, kind: input, shape index: {}]   ;;  %s1624_s1 = inlined_call_operand.vmem [shape: f32[1,128], index: 1, kind: input, shape index: {}]   ;;  %s1625_s2 = inlined_call_operand.vmem [shape: f32[1,128], index: 2, kind: input, shape index: {}]   ;;  %s1626_s3 = inlined_call_operand.vmem [shape: f32[2048,128], index: 3, kind: output, shape index: {}]  }
   0x1 LB: > { %s1012_s13 = sadd.s32 4294967295, %s1041_s12   ;;  %p1016_p0 = scmp.ge.s32.totalorder %s1041_s12, 1  ;;  %s1041_s12 = sphi %s1063_s12, %s13_s12  }
   0x2   : > { %p138_p1 = scmp.lt.s32.totalorder %s1041_s12, 3 }
   0x4   : > { %p139_p2 = pnand %p1016_p0, %p138_p1 }
   0x5   : > { %s1017_s14 = sshll.u32 (!%p139_p2), %s1012_s13, 7 }
   0x6   : > { %142 = sbr.rel (%p139_p2) target bundleno = 162 (0xa2), region = 32  ;;  %p163_p3 = scmp.lt.s32.totalorder (!%p139_p2), %s1017_s14, 255 }
   0xb   : > { %s1628_s14 = smov (!%p163_p3, %s1017_s14), 255  ;;  %v1077_v0 = vld [vmem:[%s1624_s1] ss:$0 sm:$0xff] }
   0xc   : > { %s1018_s15 = sshll.u32 %s1628_s14, 3  ;;  %v1089_v1 = vld [vmem:[%s1625_s2] ss:$0 sm:$0xff] }
   0xd   : > { %s1084_s20 = scalar_lea.vmem %s1623_s0, %s1018_s15  ;;  %s1122_s25 = scalar_lea.vmem %s1626_s3, %s1018_s15 }
   0xe   : > { %v174_v2 = vld [vmem:[%s1084_s20] sm:$0xff]  ;;  %v175_v3 = vld [vmem:[%s1084_s20 + $0x8] sm:$0xff]  ;;  %v176_v4 = vld [vmem:[%s1084_s20 + $0x10] sm:$0xff] }
   0xf   : > { %v309_v5 = vmul.f32 %v1077_v0, %v174_v2  ;;  %v310_v6 = vmul.f32 %v1077_v0, %v175_v3  ;;  %v311_v7 = vmul.f32 %v1077_v0, %v176_v4  ;;  %v177_v8 = vld [vmem:[%s1084_s20 + $0x18] sm:$0xff]  ;;  %v178_v9 = vld [vmem:[%s1084_s20 + $0x20] sm:$0xff]  ;;  %v179_v10 = vld [vmem:[%s1084_s20 + $0x28] sm:$0xff] }
  0x10   : > { %v312_v11 = vmul.f32 %v1077_v0, %v177_v8  ;;  %v313_v12 = vmul.f32 %v1077_v0, %v178_v9  ;;  %v314_v13 = vmul.f32 %v1077_v0, %v179_v10  ;;  %v180_v14 = vld [vmem:[%s1084_s20 + $0x30] sm:$0xff]  ;;  %v181_v15 = vld [vmem:[%s1084_s20 + $0x38] sm:$0xff]  ;;  %v182_v24 = vld [vmem:[%s1084_s20 + $0x40] sm:$0xff] }
  0x11   : > { %v444_v16 = vadd.f32 %v1089_v1, %v309_v5  ;;  %v445_v17 = vadd.f32 %v1089_v1, %v310_v6  ;;  %v446_v18 = vadd.f32 %v1089_v1, %v311_v7  ;;  %v315_v19 = vmul.f32 %v1077_v0, %v180_v14  ;;  %v183_v25 = vld [vmem:[%s1084_s20 + $0x48] sm:$0xff]  ;;  %v184_v26 = vld [vmem:[%s1084_s20 + $0x50] sm:$0xff]  ;;  %v185_v39 = vld [vmem:[%s1084_s20 + $0x58] sm:$0xff] }
  0x12   : > { %v447_v20 = vadd.f32 %v1089_v1, %v312_v11  ;;  %v448_v21 = vadd.f32 %v1089_v1, %v313_v12  ;;  %v449_v22 = vadd.f32 %v1089_v1, %v314_v13  ;;  %v316_v23 = vmul.f32 %v1077_v0, %v181_v15  ;;  %v186_v40 = vld [vmem:[%s1084_s20 + $0x60] sm:$0xff]  ;;  %v187_v41 = vld [vmem:[%s1084_s20 + $0x68] sm:$0xff]  ;;  %v188_v46 = vld [vmem:[%s1084_s20 + $0x70] sm:$0xff] }
  0x13   : > { %v572_v27 = vmul.f32 0.05, %v444_v16  ;;  %v573_v28 = vmul.f32 0.05, %v445_v17  ;;  %v574_v29 = vmul.f32 0.05, %v446_v18  ;;  %v450_v30 = vadd.f32 %v1089_v1, %v315_v19 }
  0x14   : > { %v575_v31 = vmul.f32 0.05, %v447_v20  ;;  %v576_v32 = vmul.f32 0.05, %v448_v21  ;;  %v577_v33 = vmul.f32 0.05, %v449_v22  ;;  %v451_v34 = vadd.f32 %v1089_v1, %v316_v23 }
  0x15   : > { %v700_v35 = vmax.f32 %v444_v16, %v572_v27  ;;  %v701_v36 = vmax.f32 %v445_v17, %v573_v28  ;;  %v702_v37 = vmax.f32 %v446_v18, %v574_v29  ;;  %v578_v38 = vmul.f32 0.05, %v450_v30  ;;  %v189_v51 = vld [vmem:[%s1084_s20 + $0x78] sm:$0xff]  ;;  %v190_v2 = vld [vmem:[%s1084_s20 + $0x80] sm:$0xff]  ;;  %v191_v3 = vld [vmem:[%s1084_s20 + $0x88] sm:$0xff] }
  0x16   : > { %v703_v42 = vmax.f32 %v447_v20, %v575_v31  ;;  %v704_v43 = vmax.f32 %v448_v21, %v576_v32  ;;  %v705_v44 = vmax.f32 %v449_v22, %v577_v33  ;;  %v579_v45 = vmul.f32 0.05, %v451_v34  ;;  %v192_v4 = vld [vmem:[%s1084_s20 + $0x90] sm:$0xff]  ;;  %v193_v17 = vld [vmem:[%s1084_s20 + $0x98] sm:$0xff]  ;;  %v194_v18 = vld [vmem:[%s1084_s20 + $0xa0] sm:$0xff] }
  0x17   : > { %828 = vst [vmem:[%s1122_s25] sm:$0xff] %v700_v35  ;;  %829 = vst [vmem:[%s1122_s25 + $0x8] sm:$0xff] %v701_v36  ;;  %v706_v47 = vmax.f32 %v450_v30, %v578_v38  ;;  %v317_v48 = vmul.f32 %v1077_v0, %v182_v24  ;;  %v318_v49 = vmul.f32 %v1077_v0, %v183_v25  ;;  %v195_v19 = vld [vmem:[%s1084_s20 + $0xa8] sm:$0xff]  ;;  %v196_v24 = vld [vmem:[%s1084_s20 + $0xb0] sm:$0xff] }
  0x18   : > { %830 = vst [vmem:[%s1122_s25 + $0x10] sm:$0xff] %v702_v37  ;;  %v319_v50 = vmul.f32 %v1077_v0, %v184_v26  ;;  %831 = vst [vmem:[%s1122_s25 + $0x18] sm:$0xff] %v703_v42  ;;  %v707_v52 = vmax.f32 %v451_v34, %v579_v45  ;;  %v320_v53 = vmul.f32 %v1077_v0, %v185_v39  ;;  %v197_v29 = vld [vmem:[%s1084_s20 + $0xb8] sm:$0xff]  ;;  %v198_v42 = vld [vmem:[%s1084_s20 + $0xc0] sm:$0xff] }
  0x19   : > { %832 = vst [vmem:[%s1122_s25 + $0x20] sm:$0xff] %v704_v43  ;;  %833 = vst [vmem:[%s1122_s25 + $0x28] sm:$0xff] %v705_v44  ;;  %v321_v54 = vmul.f32 %v1077_v0, %v186_v40  ;;  %v322_v55 = vmul.f32 %v1077_v0, %v187_v41  ;;  %v452_v56 = vadd.f32 %v1089_v1, %v317_v48  ;;  %v199_v43 = vld [vmem:[%s1084_s20 + $0xc8] sm:$0xff]  ;;  %v200_v44 = vld [vmem:[%s1084_s20 + $0xd0] sm:$0xff] }
  0x1a   : > { %834 = vst [vmem:[%s1122_s25 + $0x30] sm:$0xff] %v706_v47  ;;  %v453_v57 = vadd.f32 %v1089_v1, %v318_v49  ;;  %v454_v58 = vadd.f32 %v1089_v1, %v319_v50  ;;  %v323_v59 = vmul.f32 %v1077_v0, %v188_v46  ;;  %835 = vst [vmem:[%s1122_s25 + $0x38] sm:$0xff] %v707_v52 }
  0x1b   : > { %v455_v60 = vadd.f32 %v1089_v1, %v320_v53  ;;  %v456_v61 = vadd.f32 %v1089_v1, %v321_v54  ;;  %v457_v62 = vadd.f32 %v1089_v1, %v322_v55  ;;  %v324_v63 = vmul.f32 %v1077_v0, %v189_v51 }
  0x1c   : > { %v580_v5 = vmul.f32 0.05, %v452_v56  ;;  %v581_v6 = vmul.f32 0.05, %v453_v57  ;;  %v582_v7 = vmul.f32 0.05, %v454_v58  ;;  %v458_v8 = vadd.f32 %v1089_v1, %v323_v59 }
  0x1d   : > { %v583_v9 = vmul.f32 0.05, %v455_v60  ;;  %v584_v10 = vmul.f32 0.05, %v456_v61  ;;  %v585_v11 = vmul.f32 0.05, %v457_v62  ;;  %v459_v12 = vadd.f32 %v1089_v1, %v324_v63 }
  0x1e   : > { %v708_v13 = vmax.f32 %v452_v56, %v580_v5  ;;  %v709_v14 = vmax.f32 %v453_v57, %v581_v6  ;;  %v710_v15 = vmax.f32 %v454_v58, %v582_v7  ;;  %v586_v16 = vmul.f32 0.05, %v458_v8  ;;  %v201_v57 = vld [vmem:[%s1084_s20 + $0xd8] sm:$0xff]  ;;  %v202_v58 = vld [vmem:[%s1084_s20 + $0xe0] sm:$0xff]  ;;  %v203_v59 = vld [vmem:[%s1084_s20 + $0xe8] sm:$0xff] }
  0x1f   : > { %v711_v20 = vmax.f32 %v455_v60, %v583_v9  ;;  %v712_v21 = vmax.f32 %v456_v61, %v584_v10  ;;  %v713_v22 = vmax.f32 %v457_v62, %v585_v11  ;;  %v587_v23 = vmul.f32 0.05, %v459_v12  ;;  %v205_v7 = vld [vmem:[%s1084_s20 + $0xf8] sm:$0xff] }
  0x20   : > { %836 = vst [vmem:[%s1122_s25 + $0x40] sm:$0xff] %v708_v13  ;;  %837 = vst [vmem:[%s1122_s25 + $0x48] sm:$0xff] %v709_v14  ;;  %v714_v25 = vmax.f32 %v458_v8, %v586_v16  ;;  %v325_v26 = vmul.f32 %v1077_v0, %v190_v2  ;;  %v326_v27 = vmul.f32 %v1077_v0, %v191_v3  ;;  %v204_v2 = vld [vmem:[%s1084_s20 + $0xf0] sm:$0xff] }
  0x21   : > { %838 = vst [vmem:[%s1122_s25 + $0x50] sm:$0xff] %v710_v15  ;;  %v327_v28 = vmul.f32 %v1077_v0, %v192_v4  ;;  %839 = vst [vmem:[%s1122_s25 + $0x58] sm:$0xff] %v711_v20  ;;  %v715_v30 = vmax.f32 %v459_v12, %v587_v23  ;;  %v328_v31 = vmul.f32 %v1077_v0, %v193_v17  ;;  %v206_v20 = vld [vmem:[%s1084_s20 + $0x100] sm:$0xff] }
  0x22   : > { %840 = vst [vmem:[%s1122_s25 + $0x60] sm:$0xff] %v712_v21  ;;  %841 = vst [vmem:[%s1122_s25 + $0x68] sm:$0xff] %v713_v22  ;;  %v329_v32 = vmul.f32 %v1077_v0, %v194_v18  ;;  %v330_v33 = vmul.f32 %v1077_v0, %v195_v19  ;;  %v460_v34 = vadd.f32 %v1089_v1, %v325_v26  ;;  %v207_v21 = vld [vmem:[%s1084_s20 + $0x108] sm:$0xff]  ;;  %v208_v22 = vld [vmem:[%s1084_s20 + $0x110] sm:$0xff] }
  0x23   : > { %842 = vst [vmem:[%s1122_s25 + $0x70] sm:$0xff] %v714_v25  ;;  %v461_v35 = vadd.f32 %v1089_v1, %v326_v27  ;;  %v462_v36 = vadd.f32 %v1089_v1, %v327_v28  ;;  %v331_v37 = vmul.f32 %v1077_v0, %v196_v24  ;;  %843 = vst [vmem:[%s1122_s25 + $0x78] sm:$0xff] %v715_v30 }
  0x24   : > { %v463_v38 = vadd.f32 %v1089_v1, %v328_v31  ;;  %v464_v39 = vadd.f32 %v1089_v1, %v329_v32  ;;  %v465_v40 = vadd.f32 %v1089_v1, %v330_v33  ;;  %v332_v41 = vmul.f32 %v1077_v0, %v197_v29 }
  0x25   : > { %v588_v45 = vmul.f32 0.05, %v460_v34  ;;  %v589_v46 = vmul.f32 0.05, %v461_v35  ;;  %v590_v47 = vmul.f32 0.05, %v462_v36  ;;  %v466_v48 = vadd.f32 %v1089_v1, %v331_v37 }
  0x26   : > { %v591_v49 = vmul.f32 0.05, %v463_v38  ;;  %v592_v50 = vmul.f32 0.05, %v464_v39  ;;  %v593_v51 = vmul.f32 0.05, %v465_v40  ;;  %v467_v52 = vadd.f32 %v1089_v1, %v332_v41 }
  0x27   : > { %v716_v53 = vmax.f32 %v460_v34, %v588_v45  ;;  %v717_v54 = vmax.f32 %v461_v35, %v589_v46  ;;  %v718_v55 = vmax.f32 %v462_v36, %v590_v47  ;;  %v594_v56 = vmul.f32 0.05, %v466_v48  ;;  %v209_v35 = vld [vmem:[%s1084_s20 + $0x118] sm:$0xff]  ;;  %v210_v36 = vld [vmem:[%s1084_s20 + $0x120] sm:$0xff]  ;;  %v211_v37 = vld [vmem:[%s1084_s20 + $0x128] sm:$0xff] }
  0x28   : > { %v719_v60 = vmax.f32 %v463_v38, %v591_v49  ;;  %v720_v61 = vmax.f32 %v464_v39, %v592_v50  ;;  %v721_v62 = vmax.f32 %v465_v40, %v593_v51  ;;  %v595_v63 = vmul.f32 0.05, %v467_v52  ;;  %v213_v47 = vld [vmem:[%s1084_s20 + $0x138] sm:$0xff] }
  0x29   : > { %844 = vst [vmem:[%s1122_s25 + $0x80] sm:$0xff] %v716_v53  ;;  %845 = vst [vmem:[%s1122_s25 + $0x88] sm:$0xff] %v717_v54  ;;  %v722_v3 = vmax.f32 %v466_v48, %v594_v56  ;;  %v333_v4 = vmul.f32 %v1077_v0, %v198_v42  ;;  %v334_v5 = vmul.f32 %v1077_v0, %v199_v43  ;;  %v212_v42 = vld [vmem:[%s1084_s20 + $0x130] sm:$0xff] }
  0x2a   : > { %846 = vst [vmem:[%s1122_s25 + $0x90] sm:$0xff] %v718_v55  ;;  %v335_v6 = vmul.f32 %v1077_v0, %v200_v44  ;;  %847 = vst [vmem:[%s1122_s25 + $0x98] sm:$0xff] %v719_v60  ;;  %v723_v8 = vmax.f32 %v467_v52, %v595_v63  ;;  %v336_v9 = vmul.f32 %v1077_v0, %v201_v57  ;;  %v214_v60 = vld [vmem:[%s1084_s20 + $0x140] sm:$0xff] }
  0x2b   : > { %848 = vst [vmem:[%s1122_s25 + $0xa0] sm:$0xff] %v720_v61  ;;  %849 = vst [vmem:[%s1122_s25 + $0xa8] sm:$0xff] %v721_v62  ;;  %v337_v10 = vmul.f32 %v1077_v0, %v202_v58  ;;  %v338_v11 = vmul.f32 %v1077_v0, %v203_v59  ;;  %v468_v12 = vadd.f32 %v1089_v1, %v333_v4  ;;  %v215_v61 = vld [vmem:[%s1084_s20 + $0x148] sm:$0xff]  ;;  %v216_v62 = vld [vmem:[%s1084_s20 + $0x150] sm:$0xff] }
  0x2c   : > { %850 = vst [vmem:[%s1122_s25 + $0xb0] sm:$0xff] %v722_v3  ;;  %v469_v13 = vadd.f32 %v1089_v1, %v334_v5  ;;  %v470_v14 = vadd.f32 %v1089_v1, %v335_v6  ;;  %v339_v15 = vmul.f32 %v1077_v0, %v204_v2  ;;  %851 = vst [vmem:[%s1122_s25 + $0xb8] sm:$0xff] %v723_v8 }
  0x2d   : > { %v471_v16 = vadd.f32 %v1089_v1, %v336_v9  ;;  %v472_v17 = vadd.f32 %v1089_v1, %v337_v10  ;;  %v473_v18 = vadd.f32 %v1089_v1, %v338_v11  ;;  %v340_v19 = vmul.f32 %v1077_v0, %v205_v7 }
  0x2e   : > { %v596_v23 = vmul.f32 0.05, %v468_v12  ;;  %v597_v24 = vmul.f32 0.05, %v469_v13  ;;  %v598_v25 = vmul.f32 0.05, %v470_v14  ;;  %v474_v26 = vadd.f32 %v1089_v1, %v339_v15 }
  0x2f   : > { %v599_v27 = vmul.f32 0.05, %v471_v16  ;;  %v600_v28 = vmul.f32 0.05, %v472_v17  ;;  %v601_v29 = vmul.f32 0.05, %v473_v18  ;;  %v475_v30 = vadd.f32 %v1089_v1, %v340_v19 }
  0x30   : > { %v724_v31 = vmax.f32 %v468_v12, %v596_v23  ;;  %v725_v32 = vmax.f32 %v469_v13, %v597_v24  ;;  %v726_v33 = vmax.f32 %v470_v14, %v598_v25  ;;  %v602_v34 = vmul.f32 0.05, %v474_v26  ;;  %v217_v13 = vld [vmem:[%s1084_s20 + $0x158] sm:$0xff]  ;;  %v218_v14 = vld [vmem:[%s1084_s20 + $0x160] sm:$0xff]  ;;  %v219_v15 = vld [vmem:[%s1084_s20 + $0x168] sm:$0xff] }
  0x31   : > { %v727_v38 = vmax.f32 %v471_v16, %v599_v27  ;;  %v728_v39 = vmax.f32 %v472_v17, %v600_v28  ;;  %v729_v40 = vmax.f32 %v473_v18, %v601_v29  ;;  %v603_v41 = vmul.f32 0.05, %v475_v30  ;;  %v221_v25 = vld [vmem:[%s1084_s20 + $0x178] sm:$0xff] }
  0x32   : > { %852 = vst [vmem:[%s1122_s25 + $0xc0] sm:$0xff] %v724_v31  ;;  %853 = vst [vmem:[%s1122_s25 + $0xc8] sm:$0xff] %v725_v32  ;;  %v730_v43 = vmax.f32 %v474_v26, %v602_v34  ;;  %v341_v44 = vmul.f32 %v1077_v0, %v206_v20  ;;  %v342_v45 = vmul.f32 %v1077_v0, %v207_v21  ;;  %v220_v20 = vld [vmem:[%s1084_s20 + $0x170] sm:$0xff] }
  0x33   : > { %854 = vst [vmem:[%s1122_s25 + $0xd0] sm:$0xff] %v726_v33  ;;  %v343_v46 = vmul.f32 %v1077_v0, %v208_v22  ;;  %855 = vst [vmem:[%s1122_s25 + $0xd8] sm:$0xff] %v727_v38  ;;  %v731_v48 = vmax.f32 %v475_v30, %v603_v41  ;;  %v344_v49 = vmul.f32 %v1077_v0, %v209_v35  ;;  %v222_v38 = vld [vmem:[%s1084_s20 + $0x180] sm:$0xff] }
  0x34   : > { %856 = vst [vmem:[%s1122_s25 + $0xe0] sm:$0xff] %v728_v39  ;;  %857 = vst [vmem:[%s1122_s25 + $0xe8] sm:$0xff] %v729_v40  ;;  %v345_v50 = vmul.f32 %v1077_v0, %v210_v36  ;;  %v346_v51 = vmul.f32 %v1077_v0, %v211_v37  ;;  %v476_v52 = vadd.f32 %v1089_v1, %v341_v44  ;;  %v223_v39 = vld [vmem:[%s1084_s20 + $0x188] sm:$0xff]  ;;  %v224_v40 = vld [vmem:[%s1084_s20 + $0x190] sm:$0xff] }
  0x35   : > { %858 = vst [vmem:[%s1122_s25 + $0xf0] sm:$0xff] %v730_v43  ;;  %v477_v53 = vadd.f32 %v1089_v1, %v342_v45  ;;  %v478_v54 = vadd.f32 %v1089_v1, %v343_v46  ;;  %v347_v55 = vmul.f32 %v1077_v0, %v212_v42  ;;  %859 = vst [vmem:[%s1122_s25 + $0xf8] sm:$0xff] %v731_v48 }
  0x36   : > { %v479_v56 = vadd.f32 %v1089_v1, %v344_v49  ;;  %v480_v57 = vadd.f32 %v1089_v1, %v345_v50  ;;  %v481_v58 = vadd.f32 %v1089_v1, %v346_v51  ;;  %v348_v59 = vmul.f32 %v1077_v0, %v213_v47 }
  0x37   : > { %v604_v63 = vmul.f32 0.05, %v476_v52  ;;  %v605_v2 = vmul.f32 0.05, %v477_v53  ;;  %v606_v3 = vmul.f32 0.05, %v478_v54  ;;  %v482_v4 = vadd.f32 %v1089_v1, %v347_v55 }
  0x38   : > { %v607_v5 = vmul.f32 0.05, %v479_v56  ;;  %v608_v6 = vmul.f32 0.05, %v480_v57  ;;  %v609_v7 = vmul.f32 0.05, %v481_v58  ;;  %v483_v8 = vadd.f32 %v1089_v1, %v348_v59 }
  0x39   : > { %v732_v9 = vmax.f32 %v476_v52, %v604_v63  ;;  %v733_v10 = vmax.f32 %v477_v53, %v605_v2  ;;  %v734_v11 = vmax.f32 %v478_v54, %v606_v3  ;;  %v610_v12 = vmul.f32 0.05, %v482_v4  ;;  %v225_v53 = vld [vmem:[%s1084_s20 + $0x198] sm:$0xff]  ;;  %v226_v54 = vld [vmem:[%s1084_s20 + $0x1a0] sm:$0xff]  ;;  %v227_v55 = vld [vmem:[%s1084_s20 + $0x1a8] sm:$0xff] }
  0x3a   : > { %v735_v16 = vmax.f32 %v479_v56, %v607_v5  ;;  %v736_v17 = vmax.f32 %v480_v57, %v608_v6  ;;  %v737_v18 = vmax.f32 %v481_v58, %v609_v7  ;;  %v611_v19 = vmul.f32 0.05, %v483_v8  ;;  %v229_v3 = vld [vmem:[%s1084_s20 + $0x1b8] sm:$0xff] }
  0x3b   : > { %860 = vst [vmem:[%s1122_s25 + $0x100] sm:$0xff] %v732_v9  ;;  %861 = vst [vmem:[%s1122_s25 + $0x108] sm:$0xff] %v733_v10  ;;  %v738_v21 = vmax.f32 %v482_v4, %v610_v12  ;;  %v349_v22 = vmul.f32 %v1077_v0, %v214_v60  ;;  %v350_v23 = vmul.f32 %v1077_v0, %v215_v61  ;;  %v228_v60 = vld [vmem:[%s1084_s20 + $0x1b0] sm:$0xff] }
  0x3c   : > { %862 = vst [vmem:[%s1122_s25 + $0x110] sm:$0xff] %v734_v11  ;;  %v351_v24 = vmul.f32 %v1077_v0, %v216_v62  ;;  %863 = vst [vmem:[%s1122_s25 + $0x118] sm:$0xff] %v735_v16  ;;  %v739_v26 = vmax.f32 %v483_v8, %v611_v19  ;;  %v352_v27 = vmul.f32 %v1077_v0, %v217_v13  ;;  %v230_v16 = vld [vmem:[%s1084_s20 + $0x1c0] sm:$0xff] }
  0x3d   : > { %864 = vst [vmem:[%s1122_s25 + $0x120] sm:$0xff] %v736_v17  ;;  %865 = vst [vmem:[%s1122_s25 + $0x128] sm:$0xff] %v737_v18  ;;  %v353_v28 = vmul.f32 %v1077_v0, %v218_v14  ;;  %v354_v29 = vmul.f32 %v1077_v0, %v219_v15  ;;  %v484_v30 = vadd.f32 %v1089_v1, %v349_v22  ;;  %v231_v17 = vld [vmem:[%s1084_s20 + $0x1c8] sm:$0xff]  ;;  %v232_v18 = vld [vmem:[%s1084_s20 + $0x1d0] sm:$0xff] }
  0x3e   : > { %866 = vst [vmem:[%s1122_s25 + $0x130] sm:$0xff] %v738_v21  ;;  %v485_v31 = vadd.f32 %v1089_v1, %v350_v23  ;;  %v486_v32 = vadd.f32 %v1089_v1, %v351_v24  ;;  %v355_v33 = vmul.f32 %v1077_v0, %v220_v20  ;;  %867 = vst [vmem:[%s1122_s25 + $0x138] sm:$0xff] %v739_v26 }
  0x3f   : > { %v487_v34 = vadd.f32 %v1089_v1, %v352_v27  ;;  %v488_v35 = vadd.f32 %v1089_v1, %v353_v28  ;;  %v489_v36 = vadd.f32 %v1089_v1, %v354_v29  ;;  %v356_v37 = vmul.f32 %v1077_v0, %v221_v25 }
  0x40   : > { %v612_v41 = vmul.f32 0.05, %v484_v30  ;;  %v613_v42 = vmul.f32 0.05, %v485_v31  ;;  %v614_v43 = vmul.f32 0.05, %v486_v32  ;;  %v490_v44 = vadd.f32 %v1089_v1, %v355_v33 }
  0x41   : > { %v615_v45 = vmul.f32 0.05, %v487_v34  ;;  %v616_v46 = vmul.f32 0.05, %v488_v35  ;;  %v617_v47 = vmul.f32 0.05, %v489_v36  ;;  %v491_v48 = vadd.f32 %v1089_v1, %v356_v37 }
  0x42   : > { %v740_v49 = vmax.f32 %v484_v30, %v612_v41  ;;  %v741_v50 = vmax.f32 %v485_v31, %v613_v42  ;;  %v742_v51 = vmax.f32 %v486_v32, %v614_v43  ;;  %v618_v52 = vmul.f32 0.05, %v490_v44  ;;  %v233_v31 = vld [vmem:[%s1084_s20 + $0x1d8] sm:$0xff]  ;;  %v234_v32 = vld [vmem:[%s1084_s20 + $0x1e0] sm:$0xff]  ;;  %v235_v33 = vld [vmem:[%s1084_s20 + $0x1e8] sm:$0xff] }
  0x43   : > { %v743_v56 = vmax.f32 %v487_v34, %v615_v45  ;;  %v744_v57 = vmax.f32 %v488_v35, %v616_v46  ;;  %v745_v58 = vmax.f32 %v489_v36, %v617_v47  ;;  %v619_v59 = vmul.f32 0.05, %v491_v48  ;;  %v237_v43 = vld [vmem:[%s1084_s20 + $0x1f8] sm:$0xff] }
  0x44   : > { %868 = vst [vmem:[%s1122_s25 + $0x140] sm:$0xff] %v740_v49  ;;  %869 = vst [vmem:[%s1122_s25 + $0x148] sm:$0xff] %v741_v50  ;;  %v746_v61 = vmax.f32 %v490_v44, %v618_v52  ;;  %v357_v62 = vmul.f32 %v1077_v0, %v222_v38  ;;  %v358_v63 = vmul.f32 %v1077_v0, %v223_v39  ;;  %v236_v38 = vld [vmem:[%s1084_s20 + $0x1f0] sm:$0xff] }
  0x45   : > { %870 = vst [vmem:[%s1122_s25 + $0x150] sm:$0xff] %v742_v51  ;;  %v359_v2 = vmul.f32 %v1077_v0, %v224_v40  ;;  %871 = vst [vmem:[%s1122_s25 + $0x158] sm:$0xff] %v743_v56  ;;  %v747_v4 = vmax.f32 %v491_v48, %v619_v59  ;;  %v360_v5 = vmul.f32 %v1077_v0, %v225_v53  ;;  %v238_v56 = vld [vmem:[%s1084_s20 + $0x200] sm:$0xff] }
  0x46   : > { %872 = vst [vmem:[%s1122_s25 + $0x160] sm:$0xff] %v744_v57  ;;  %873 = vst [vmem:[%s1122_s25 + $0x168] sm:$0xff] %v745_v58  ;;  %v361_v6 = vmul.f32 %v1077_v0, %v226_v54  ;;  %v362_v7 = vmul.f32 %v1077_v0, %v227_v55  ;;  %v492_v8 = vadd.f32 %v1089_v1, %v357_v62  ;;  %v239_v57 = vld [vmem:[%s1084_s20 + $0x208] sm:$0xff]  ;;  %v240_v58 = vld [vmem:[%s1084_s20 + $0x210] sm:$0xff] }
  0x47   : > { %874 = vst [vmem:[%s1122_s25 + $0x170] sm:$0xff] %v746_v61  ;;  %v493_v9 = vadd.f32 %v1089_v1, %v358_v63  ;;  %v494_v10 = vadd.f32 %v1089_v1, %v359_v2  ;;  %v363_v11 = vmul.f32 %v1077_v0, %v228_v60  ;;  %875 = vst [vmem:[%s1122_s25 + $0x178] sm:$0xff] %v747_v4 }
  0x48   : > { %v495_v12 = vadd.f32 %v1089_v1, %v360_v5  ;;  %v496_v13 = vadd.f32 %v1089_v1, %v361_v6  ;;  %v497_v14 = vadd.f32 %v1089_v1, %v362_v7  ;;  %v364_v15 = vmul.f32 %v1077_v0, %v229_v3 }
  0x49   : > { %v620_v19 = vmul.f32 0.05, %v492_v8  ;;  %v621_v20 = vmul.f32 0.05, %v493_v9  ;;  %v622_v21 = vmul.f32 0.05, %v494_v10  ;;  %v498_v22 = vadd.f32 %v1089_v1, %v363_v11 }
  0x4a   : > { %v623_v23 = vmul.f32 0.05, %v495_v12  ;;  %v624_v24 = vmul.f32 0.05, %v496_v13  ;;  %v625_v25 = vmul.f32 0.05, %v497_v14  ;;  %v499_v26 = vadd.f32 %v1089_v1, %v364_v15 }
  0x4b   : > { %v748_v27 = vmax.f32 %v492_v8, %v620_v19  ;;  %v749_v28 = vmax.f32 %v493_v9, %v621_v20  ;;  %v750_v29 = vmax.f32 %v494_v10, %v622_v21  ;;  %v626_v30 = vmul.f32 0.05, %v498_v22  ;;  %v241_v9 = vld [vmem:[%s1084_s20 + $0x218] sm:$0xff]  ;;  %v242_v10 = vld [vmem:[%s1084_s20 + $0x220] sm:$0xff]  ;;  %v243_v11 = vld [vmem:[%s1084_s20 + $0x228] sm:$0xff] }
  0x4c   : > { %v751_v34 = vmax.f32 %v495_v12, %v623_v23  ;;  %v752_v35 = vmax.f32 %v496_v13, %v624_v24  ;;  %v753_v36 = vmax.f32 %v497_v14, %v625_v25  ;;  %v627_v37 = vmul.f32 0.05, %v499_v26  ;;  %v245_v21 = vld [vmem:[%s1084_s20 + $0x238] sm:$0xff] }
  0x4d   : > { %876 = vst [vmem:[%s1122_s25 + $0x180] sm:$0xff] %v748_v27  ;;  %877 = vst [vmem:[%s1122_s25 + $0x188] sm:$0xff] %v749_v28  ;;  %v754_v39 = vmax.f32 %v498_v22, %v626_v30  ;;  %v365_v40 = vmul.f32 %v1077_v0, %v230_v16  ;;  %v366_v41 = vmul.f32 %v1077_v0, %v231_v17  ;;  %v244_v16 = vld [vmem:[%s1084_s20 + $0x230] sm:$0xff] }
  0x4e   : > { %878 = vst [vmem:[%s1122_s25 + $0x190] sm:$0xff] %v750_v29  ;;  %v367_v42 = vmul.f32 %v1077_v0, %v232_v18  ;;  %879 = vst [vmem:[%s1122_s25 + $0x198] sm:$0xff] %v751_v34  ;;  %v755_v44 = vmax.f32 %v499_v26, %v627_v37  ;;  %v368_v45 = vmul.f32 %v1077_v0, %v233_v31  ;;  %v246_v34 = vld [vmem:[%s1084_s20 + $0x240] sm:$0xff] }
  0x4f   : > { %880 = vst [vmem:[%s1122_s25 + $0x1a0] sm:$0xff] %v752_v35  ;;  %881 = vst [vmem:[%s1122_s25 + $0x1a8] sm:$0xff] %v753_v36  ;;  %v369_v46 = vmul.f32 %v1077_v0, %v234_v32  ;;  %v370_v47 = vmul.f32 %v1077_v0, %v235_v33  ;;  %v500_v48 = vadd.f32 %v1089_v1, %v365_v40  ;;  %v247_v35 = vld [vmem:[%s1084_s20 + $0x248] sm:$0xff]  ;;  %v248_v36 = vld [vmem:[%s1084_s20 + $0x250] sm:$0xff] }
  0x50   : > { %882 = vst [vmem:[%s1122_s25 + $0x1b0] sm:$0xff] %v754_v39  ;;  %v501_v49 = vadd.f32 %v1089_v1, %v366_v41  ;;  %v502_v50 = vadd.f32 %v1089_v1, %v367_v42  ;;  %v371_v51 = vmul.f32 %v1077_v0, %v236_v38  ;;  %883 = vst [vmem:[%s1122_s25 + $0x1b8] sm:$0xff] %v755_v44 }
  0x51   : > { %v503_v52 = vadd.f32 %v1089_v1, %v368_v45  ;;  %v504_v53 = vadd.f32 %v1089_v1, %v369_v46  ;;  %v505_v54 = vadd.f32 %v1089_v1, %v370_v47  ;;  %v372_v55 = vmul.f32 %v1077_v0, %v237_v43 }
  0x52   : > { %v628_v59 = vmul.f32 0.05, %v500_v48  ;;  %v629_v60 = vmul.f32 0.05, %v501_v49  ;;  %v630_v61 = vmul.f32 0.05, %v502_v50  ;;  %v506_v62 = vadd.f32 %v1089_v1, %v371_v51 }
  0x53   : > { %v631_v63 = vmul.f32 0.05, %v503_v52  ;;  %v632_v2 = vmul.f32 0.05, %v504_v53  ;;  %v633_v3 = vmul.f32 0.05, %v505_v54  ;;  %v507_v4 = vadd.f32 %v1089_v1, %v372_v55 }
  0x54   : > { %v756_v5 = vmax.f32 %v500_v48, %v628_v59  ;;  %v757_v6 = vmax.f32 %v501_v49, %v629_v60  ;;  %v758_v7 = vmax.f32 %v502_v50, %v630_v61  ;;  %v634_v8 = vmul.f32 0.05, %v506_v62  ;;  %v249_v49 = vld [vmem:[%s1084_s20 + $0x258] sm:$0xff]  ;;  %v250_v50 = vld [vmem:[%s1084_s20 + $0x260] sm:$0xff]  ;;  %v251_v51 = vld [vmem:[%s1084_s20 + $0x268] sm:$0xff] }
  0x55   : > { %v759_v12 = vmax.f32 %v503_v52, %v631_v63  ;;  %v760_v13 = vmax.f32 %v504_v53, %v632_v2  ;;  %v761_v14 = vmax.f32 %v505_v54, %v633_v3  ;;  %v635_v15 = vmul.f32 0.05, %v507_v4  ;;  %v253_v61 = vld [vmem:[%s1084_s20 + $0x278] sm:$0xff] }
  0x56   : > { %884 = vst [vmem:[%s1122_s25 + $0x1c0] sm:$0xff] %v756_v5  ;;  %885 = vst [vmem:[%s1122_s25 + $0x1c8] sm:$0xff] %v757_v6  ;;  %v762_v17 = vmax.f32 %v506_v62, %v634_v8  ;;  %v373_v18 = vmul.f32 %v1077_v0, %v238_v56  ;;  %v374_v19 = vmul.f32 %v1077_v0, %v239_v57  ;;  %v252_v56 = vld [vmem:[%s1084_s20 + $0x270] sm:$0xff] }
  0x57   : > { %886 = vst [vmem:[%s1122_s25 + $0x1d0] sm:$0xff] %v758_v7  ;;  %v375_v20 = vmul.f32 %v1077_v0, %v240_v58  ;;  %887 = vst [vmem:[%s1122_s25 + $0x1d8] sm:$0xff] %v759_v12  ;;  %v763_v22 = vmax.f32 %v507_v4, %v635_v15  ;;  %v376_v23 = vmul.f32 %v1077_v0, %v241_v9  ;;  %v254_v12 = vld [vmem:[%s1084_s20 + $0x280] sm:$0xff] }
  0x58   : > { %888 = vst [vmem:[%s1122_s25 + $0x1e0] sm:$0xff] %v760_v13  ;;  %889 = vst [vmem:[%s1122_s25 + $0x1e8] sm:$0xff] %v761_v14  ;;  %v377_v24 = vmul.f32 %v1077_v0, %v242_v10  ;;  %v378_v25 = vmul.f32 %v1077_v0, %v243_v11  ;;  %v508_v26 = vadd.f32 %v1089_v1, %v373_v18  ;;  %v255_v13 = vld [vmem:[%s1084_s20 + $0x288] sm:$0xff]  ;;  %v256_v14 = vld [vmem:[%s1084_s20 + $0x290] sm:$0xff] }
  0x59   : > { %890 = vst [vmem:[%s1122_s25 + $0x1f0] sm:$0xff] %v762_v17  ;;  %v509_v27 = vadd.f32 %v1089_v1, %v374_v19  ;;  %v510_v28 = vadd.f32 %v1089_v1, %v375_v20  ;;  %v379_v29 = vmul.f32 %v1077_v0, %v244_v16  ;;  %891 = vst [vmem:[%s1122_s25 + $0x1f8] sm:$0xff] %v763_v22 }
  0x5a   : > { %v511_v30 = vadd.f32 %v1089_v1, %v376_v23  ;;  %v512_v31 = vadd.f32 %v1089_v1, %v377_v24  ;;  %v513_v32 = vadd.f32 %v1089_v1, %v378_v25  ;;  %v380_v33 = vmul.f32 %v1077_v0, %v245_v21 }
  0x5b   : > { %v636_v37 = vmul.f32 0.05, %v508_v26  ;;  %v637_v38 = vmul.f32 0.05, %v509_v27  ;;  %v638_v39 = vmul.f32 0.05, %v510_v28  ;;  %v514_v40 = vadd.f32 %v1089_v1, %v379_v29 }
  0x5c   : > { %v639_v41 = vmul.f32 0.05, %v511_v30  ;;  %v640_v42 = vmul.f32 0.05, %v512_v31  ;;  %v641_v43 = vmul.f32 0.05, %v513_v32  ;;  %v515_v44 = vadd.f32 %v1089_v1, %v380_v33 }
  0x5d   : > { %v764_v45 = vmax.f32 %v508_v26, %v636_v37  ;;  %v765_v46 = vmax.f32 %v509_v27, %v637_v38  ;;  %v766_v47 = vmax.f32 %v510_v28, %v638_v39  ;;  %v642_v48 = vmul.f32 0.05, %v514_v40  ;;  %v257_v27 = vld [vmem:[%s1084_s20 + $0x298] sm:$0xff]  ;;  %v258_v28 = vld [vmem:[%s1084_s20 + $0x2a0] sm:$0xff]  ;;  %v259_v29 = vld [vmem:[%s1084_s20 + $0x2a8] sm:$0xff] }
  0x5e   : > { %v767_v52 = vmax.f32 %v511_v30, %v639_v41  ;;  %v768_v53 = vmax.f32 %v512_v31, %v640_v42  ;;  %v769_v54 = vmax.f32 %v513_v32, %v641_v43  ;;  %v643_v55 = vmul.f32 0.05, %v515_v44  ;;  %v261_v39 = vld [vmem:[%s1084_s20 + $0x2b8] sm:$0xff] }
  0x5f   : > { %892 = vst [vmem:[%s1122_s25 + $0x200] sm:$0xff] %v764_v45  ;;  %893 = vst [vmem:[%s1122_s25 + $0x208] sm:$0xff] %v765_v46  ;;  %v770_v57 = vmax.f32 %v514_v40, %v642_v48  ;;  %v381_v58 = vmul.f32 %v1077_v0, %v246_v34  ;;  %v382_v59 = vmul.f32 %v1077_v0, %v247_v35  ;;  %v260_v34 = vld [vmem:[%s1084_s20 + $0x2b0] sm:$0xff] }
  0x60   : > { %894 = vst [vmem:[%s1122_s25 + $0x210] sm:$0xff] %v766_v47  ;;  %v383_v60 = vmul.f32 %v1077_v0, %v248_v36  ;;  %895 = vst [vmem:[%s1122_s25 + $0x218] sm:$0xff] %v767_v52  ;;  %v771_v62 = vmax.f32 %v515_v44, %v643_v55  ;;  %v384_v63 = vmul.f32 %v1077_v0, %v249_v49  ;;  %v262_v52 = vld [vmem:[%s1084_s20 + $0x2c0] sm:$0xff] }
  0x61   : > { %896 = vst [vmem:[%s1122_s25 + $0x220] sm:$0xff] %v768_v53  ;;  %897 = vst [vmem:[%s1122_s25 + $0x228] sm:$0xff] %v769_v54  ;;  %v385_v2 = vmul.f32 %v1077_v0, %v250_v50  ;;  %v386_v3 = vmul.f32 %v1077_v0, %v251_v51  ;;  %v516_v4 = vadd.f32 %v1089_v1, %v381_v58  ;;  %v263_v53 = vld [vmem:[%s1084_s20 + $0x2c8] sm:$0xff]  ;;  %v264_v54 = vld [vmem:[%s1084_s20 + $0x2d0] sm:$0xff] }
  0x62   : > { %898 = vst [vmem:[%s1122_s25 + $0x230] sm:$0xff] %v770_v57  ;;  %v517_v5 = vadd.f32 %v1089_v1, %v382_v59  ;;  %v518_v6 = vadd.f32 %v1089_v1, %v383_v60  ;;  %v387_v7 = vmul.f32 %v1077_v0, %v252_v56  ;;  %899 = vst [vmem:[%s1122_s25 + $0x238] sm:$0xff] %v771_v62 }
  0x63   : > { %v519_v8 = vadd.f32 %v1089_v1, %v384_v63  ;;  %v520_v9 = vadd.f32 %v1089_v1, %v385_v2  ;;  %v521_v10 = vadd.f32 %v1089_v1, %v386_v3  ;;  %v388_v11 = vmul.f32 %v1077_v0, %v253_v61 }
  0x64   : > { %v644_v15 = vmul.f32 0.05, %v516_v4  ;;  %v645_v16 = vmul.f32 0.05, %v517_v5  ;;  %v646_v17 = vmul.f32 0.05, %v518_v6  ;;  %v522_v18 = vadd.f32 %v1089_v1, %v387_v7 }
  0x65   : > { %v647_v19 = vmul.f32 0.05, %v519_v8  ;;  %v648_v20 = vmul.f32 0.05, %v520_v9  ;;  %v649_v21 = vmul.f32 0.05, %v521_v10  ;;  %v523_v22 = vadd.f32 %v1089_v1, %v388_v11 }
  0x66   : > { %v772_v23 = vmax.f32 %v516_v4, %v644_v15  ;;  %v773_v24 = vmax.f32 %v517_v5, %v645_v16  ;;  %v774_v25 = vmax.f32 %v518_v6, %v646_v17  ;;  %v650_v26 = vmul.f32 0.05, %v522_v18  ;;  %v265_v5 = vld [vmem:[%s1084_s20 + $0x2d8] sm:$0xff]  ;;  %v267_v6 = vld [vmem:[%s1084_s20 + $0x2e8] sm:$0xff]  ;;  %v268_v11 = vld [vmem:[%s1084_s20 + $0x2f0] sm:$0xff] }
  0x67   : > { %v775_v30 = vmax.f32 %v519_v8, %v647_v19  ;;  %v776_v31 = vmax.f32 %v520_v9, %v648_v20  ;;  %v777_v32 = vmax.f32 %v521_v10, %v649_v21  ;;  %v651_v33 = vmul.f32 0.05, %v523_v22  ;;  %v269_v17 = vld [vmem:[%s1084_s20 + $0x2f8] sm:$0xff] }
  0x68   : > { %900 = vst [vmem:[%s1122_s25 + $0x240] sm:$0xff] %v772_v23  ;;  %901 = vst [vmem:[%s1122_s25 + $0x248] sm:$0xff] %v773_v24  ;;  %v778_v35 = vmax.f32 %v522_v18, %v650_v26  ;;  %v389_v36 = vmul.f32 %v1077_v0, %v254_v12  ;;  %v390_v37 = vmul.f32 %v1077_v0, %v255_v13  ;;  %v1460_v13 = vld [vmem:[%s1624_s1] ss:$0 sm:$0xff] }
  0x69   : > { %902 = vst [vmem:[%s1122_s25 + $0x250] sm:$0xff] %v774_v25  ;;  %v391_v38 = vmul.f32 %v1077_v0, %v256_v14  ;;  %903 = vst [vmem:[%s1122_s25 + $0x258] sm:$0xff] %v775_v30  ;;  %v779_v40 = vmax.f32 %v523_v22, %v651_v33  ;;  %v392_v41 = vmul.f32 %v1077_v0, %v257_v27  ;;  %v270_v30 = vld [vmem:[%s1084_s20 + $0x300] sm:$0xff] }
  0x6a   : > { %904 = vst [vmem:[%s1122_s25 + $0x260] sm:$0xff] %v776_v31  ;;  %905 = vst [vmem:[%s1122_s25 + $0x268] sm:$0xff] %v777_v32  ;;  %v393_v42 = vmul.f32 %v1077_v0, %v258_v28  ;;  %v394_v43 = vmul.f32 %v1077_v0, %v259_v29  ;;  %v524_v44 = vadd.f32 %v1089_v1, %v389_v36  ;;  %v271_v31 = vld [vmem:[%s1084_s20 + $0x308] sm:$0xff]  ;;  %v272_v32 = vld [vmem:[%s1084_s20 + $0x310] sm:$0xff] }
  0x6b   : > { %906 = vst [vmem:[%s1122_s25 + $0x270] sm:$0xff] %v778_v35  ;;  %v525_v45 = vadd.f32 %v1089_v1, %v390_v37  ;;  %v526_v46 = vadd.f32 %v1089_v1, %v391_v38  ;;  %v395_v47 = vmul.f32 %v1077_v0, %v260_v34  ;;  %907 = vst [vmem:[%s1122_s25 + $0x278] sm:$0xff] %v779_v40 }
  0x6c   : > { %v527_v48 = vadd.f32 %v1089_v1, %v392_v41  ;;  %v528_v49 = vadd.f32 %v1089_v1, %v393_v42  ;;  %v529_v50 = vadd.f32 %v1089_v1, %v394_v43  ;;  %v396_v51 = vmul.f32 %v1077_v0, %v261_v39  ;;  %v1447_v0 = vld [vmem:[%s1625_s2] ss:$0 sm:$0xff] }
  0x6d   : > { %v652_v55 = vmul.f32 0.05, %v524_v44  ;;  %v653_v56 = vmul.f32 0.05, %v525_v45  ;;  %v654_v57 = vmul.f32 0.05, %v526_v46  ;;  %v530_v58 = vadd.f32 %v1089_v1, %v395_v47 }
  0x6e   : > { %v655_v59 = vmul.f32 0.05, %v527_v48  ;;  %v656_v60 = vmul.f32 0.05, %v528_v49  ;;  %v657_v61 = vmul.f32 0.05, %v529_v50  ;;  %v531_v62 = vadd.f32 %v1447_v0, %v396_v51 }
  0x6f   : > { %v780_v63 = vmax.f32 %v524_v44, %v652_v55  ;;  %v781_v2 = vmax.f32 %v525_v45, %v653_v56  ;;  %v782_v3 = vmax.f32 %v526_v46, %v654_v57  ;;  %v658_v4 = vmul.f32 0.05, %v530_v58  ;;  %v266_v1 = vld [vmem:[%s1084_s20 + $0x2e0] sm:$0xff]  ;;  %v273_v45 = vld [vmem:[%s1084_s20 + $0x318] sm:$0xff]  ;;  %v275_v47 = vld [vmem:[%s1084_s20 + $0x328] sm:$0xff] }
  0x70   : > { %v783_v7 = vmax.f32 %v527_v48, %v655_v59  ;;  %v784_v8 = vmax.f32 %v528_v49, %v656_v60  ;;  %v785_v9 = vmax.f32 %v529_v50, %v657_v61  ;;  %v659_v10 = vmul.f32 0.05, %v531_v62  ;;  %v274_v46 = vld [vmem:[%s1084_s20 + $0x320] sm:$0xff]  ;;  %v277_v57 = vld [vmem:[%s1084_s20 + $0x338] sm:$0xff] }
  0x71   : > { %908 = vst [vmem:[%s1122_s25 + $0x280] sm:$0xff] %v780_v63  ;;  %909 = vst [vmem:[%s1122_s25 + $0x288] sm:$0xff] %v781_v2  ;;  %v786_v12 = vmax.f32 %v530_v58, %v658_v4  ;;  %v397_v14 = vmul.f32 %v1460_v13, %v262_v52  ;;  %v398_v15 = vmul.f32 %v1460_v13, %v263_v53  ;;  %v276_v52 = vld [vmem:[%s1084_s20 + $0x330] sm:$0xff] }
  0x72   : > { %910 = vst [vmem:[%s1122_s25 + $0x290] sm:$0xff] %v782_v3  ;;  %v399_v16 = vmul.f32 %v1460_v13, %v264_v54  ;;  %911 = vst [vmem:[%s1122_s25 + $0x298] sm:$0xff] %v783_v7  ;;  %v787_v18 = vmax.f32 %v531_v62, %v659_v10  ;;  %v400_v19 = vmul.f32 %v1460_v13, %v265_v5  ;;  %v278_v7 = vld [vmem:[%s1084_s20 + $0x340] sm:$0xff] }
  0x73   : > { %912 = vst [vmem:[%s1122_s25 + $0x2a0] sm:$0xff] %v784_v8  ;;  %913 = vst [vmem:[%s1122_s25 + $0x2a8] sm:$0xff] %v785_v9  ;;  %v401_v20 = vmul.f32 %v1460_v13, %v266_v1  ;;  %v402_v21 = vmul.f32 %v1460_v13, %v267_v6  ;;  %v532_v22 = vadd.f32 %v1447_v0, %v397_v14  ;;  %v279_v8 = vld [vmem:[%s1084_s20 + $0x348] sm:$0xff]  ;;  %v280_v9 = vld [vmem:[%s1084_s20 + $0x350] sm:$0xff] }
  0x74   : > { %914 = vst [vmem:[%s1122_s25 + $0x2b0] sm:$0xff] %v786_v12  ;;  %v533_v23 = vadd.f32 %v1447_v0, %v398_v15  ;;  %v534_v24 = vadd.f32 %v1447_v0, %v399_v16  ;;  %v403_v25 = vmul.f32 %v1460_v13, %v268_v11  ;;  %915 = vst [vmem:[%s1122_s25 + $0x2b8] sm:$0xff] %v787_v18 }
  0x75   : > { %v535_v26 = vadd.f32 %v1447_v0, %v400_v19  ;;  %v536_v27 = vadd.f32 %v1447_v0, %v401_v20  ;;  %v537_v28 = vadd.f32 %v1447_v0, %v402_v21  ;;  %v404_v29 = vmul.f32 %v1460_v13, %v269_v17 }
  0x76   : > { %v660_v33 = vmul.f32 0.05, %v532_v22  ;;  %v661_v34 = vmul.f32 0.05, %v533_v23  ;;  %v662_v35 = vmul.f32 0.05, %v534_v24  ;;  %v538_v36 = vadd.f32 %v1447_v0, %v403_v25 }
  0x77   : > { %v663_v37 = vmul.f32 0.05, %v535_v26  ;;  %v664_v38 = vmul.f32 0.05, %v536_v27  ;;  %v665_v39 = vmul.f32 0.05, %v537_v28  ;;  %v539_v40 = vadd.f32 %v1447_v0, %v404_v29 }
  0x78   : > { %v788_v41 = vmax.f32 %v532_v22, %v660_v33  ;;  %v789_v42 = vmax.f32 %v533_v23, %v661_v34  ;;  %v790_v43 = vmax.f32 %v534_v24, %v662_v35  ;;  %v666_v44 = vmul.f32 0.05, %v538_v36  ;;  %v281_v23 = vld [vmem:[%s1084_s20 + $0x358] sm:$0xff]  ;;  %v282_v24 = vld [vmem:[%s1084_s20 + $0x360] sm:$0xff]  ;;  %v283_v25 = vld [vmem:[%s1084_s20 + $0x368] sm:$0xff] }
  0x79   : > { %v791_v48 = vmax.f32 %v535_v26, %v663_v37  ;;  %v792_v49 = vmax.f32 %v536_v27, %v664_v38  ;;  %v793_v50 = vmax.f32 %v537_v28, %v665_v39  ;;  %v667_v51 = vmul.f32 0.05, %v539_v40  ;;  %v285_v35 = vld [vmem:[%s1084_s20 + $0x378] sm:$0xff] }
  0x7a   : > { %916 = vst [vmem:[%s1122_s25 + $0x2c0] sm:$0xff] %v788_v41  ;;  %917 = vst [vmem:[%s1122_s25 + $0x2c8] sm:$0xff] %v789_v42  ;;  %v794_v53 = vmax.f32 %v538_v36, %v666_v44  ;;  %v405_v54 = vmul.f32 %v1460_v13, %v270_v30  ;;  %v406_v55 = vmul.f32 %v1460_v13, %v271_v31  ;;  %v284_v30 = vld [vmem:[%s1084_s20 + $0x370] sm:$0xff] }
  0x7b   : > { %918 = vst [vmem:[%s1122_s25 + $0x2d0] sm:$0xff] %v790_v43  ;;  %v407_v56 = vmul.f32 %v1460_v13, %v272_v32  ;;  %919 = vst [vmem:[%s1122_s25 + $0x2d8] sm:$0xff] %v791_v48  ;;  %v795_v58 = vmax.f32 %v539_v40, %v667_v51  ;;  %v408_v59 = vmul.f32 %v1460_v13, %v273_v45  ;;  %v286_v48 = vld [vmem:[%s1084_s20 + $0x380] sm:$0xff] }
  0x7c   : > { %920 = vst [vmem:[%s1122_s25 + $0x2e0] sm:$0xff] %v792_v49  ;;  %921 = vst [vmem:[%s1122_s25 + $0x2e8] sm:$0xff] %v793_v50  ;;  %v409_v60 = vmul.f32 %v1460_v13, %v274_v46  ;;  %v410_v61 = vmul.f32 %v1460_v13, %v275_v47  ;;  %v540_v62 = vadd.f32 %v1447_v0, %v405_v54  ;;  %v287_v49 = vld [vmem:[%s1084_s20 + $0x388] sm:$0xff]  ;;  %v288_v50 = vld [vmem:[%s1084_s20 + $0x390] sm:$0xff] }
  0x7d   : > { %922 = vst [vmem:[%s1122_s25 + $0x2f0] sm:$0xff] %v794_v53  ;;  %v541_v63 = vadd.f32 %v1447_v0, %v406_v55  ;;  %v542_v2 = vadd.f32 %v1447_v0, %v407_v56  ;;  %v411_v3 = vmul.f32 %v1460_v13, %v276_v52  ;;  %923 = vst [vmem:[%s1122_s25 + $0x2f8] sm:$0xff] %v795_v58 }
  0x7e   : > { %v543_v4 = vadd.f32 %v1447_v0, %v408_v59  ;;  %v544_v5 = vadd.f32 %v1447_v0, %v409_v60  ;;  %v545_v1 = vadd.f32 %v1447_v0, %v410_v61  ;;  %v412_v6 = vmul.f32 %v1460_v13, %v277_v57 }
  0x7f   : > { %v668_v10 = vmul.f32 0.05, %v540_v62  ;;  %v669_v11 = vmul.f32 0.05, %v541_v63  ;;  %v670_v12 = vmul.f32 0.05, %v542_v2  ;;  %v546_v14 = vadd.f32 %v1447_v0, %v411_v3 }
  0x80   : > { %v671_v15 = vmul.f32 0.05, %v543_v4  ;;  %v672_v16 = vmul.f32 0.05, %v544_v5  ;;  %v673_v17 = vmul.f32 0.05, %v545_v1  ;;  %v547_v18 = vadd.f32 %v1447_v0, %v412_v6 }
  0x81   : > { %v796_v19 = vmax.f32 %v540_v62, %v668_v10  ;;  %v797_v20 = vmax.f32 %v541_v63, %v669_v11  ;;  %v798_v21 = vmax.f32 %v542_v2, %v670_v12  ;;  %v674_v22 = vmul.f32 0.05, %v546_v14  ;;  %v289_v63 = vld [vmem:[%s1084_s20 + $0x398] sm:$0xff]  ;;  %v290_v2 = vld [vmem:[%s1084_s20 + $0x3a0] sm:$0xff]  ;;  %v291_v3 = vld [vmem:[%s1084_s20 + $0x3a8] sm:$0xff] }
  0x82   : > { %v799_v26 = vmax.f32 %v543_v4, %v671_v15  ;;  %v800_v27 = vmax.f32 %v544_v5, %v672_v16  ;;  %v801_v28 = vmax.f32 %v545_v1, %v673_v17  ;;  %v675_v29 = vmul.f32 0.05, %v547_v18  ;;  %v293_v12 = vld [vmem:[%s1084_s20 + $0x3b8] sm:$0xff] }
  0x83   : > { %924 = vst [vmem:[%s1122_s25 + $0x300] sm:$0xff] %v796_v19  ;;  %925 = vst [vmem:[%s1122_s25 + $0x308] sm:$0xff] %v797_v20  ;;  %v802_v31 = vmax.f32 %v546_v14, %v674_v22  ;;  %v413_v32 = vmul.f32 %v1460_v13, %v278_v7  ;;  %v414_v33 = vmul.f32 %v1460_v13, %v279_v8  ;;  %v292_v7 = vld [vmem:[%s1084_s20 + $0x3b0] sm:$0xff] }
  0x84   : > { %926 = vst [vmem:[%s1122_s25 + $0x310] sm:$0xff] %v798_v21  ;;  %v415_v34 = vmul.f32 %v1460_v13, %v280_v9  ;;  %927 = vst [vmem:[%s1122_s25 + $0x318] sm:$0xff] %v799_v26  ;;  %v803_v36 = vmax.f32 %v547_v18, %v675_v29  ;;  %v416_v37 = vmul.f32 %v1460_v13, %v281_v23  ;;  %v294_v26 = vld [vmem:[%s1084_s20 + $0x3c0] sm:$0xff] }
  0x85   : > { %928 = vst [vmem:[%s1122_s25 + $0x320] sm:$0xff] %v800_v27  ;;  %929 = vst [vmem:[%s1122_s25 + $0x328] sm:$0xff] %v801_v28  ;;  %v417_v38 = vmul.f32 %v1460_v13, %v282_v24  ;;  %v418_v39 = vmul.f32 %v1460_v13, %v283_v25  ;;  %v548_v40 = vadd.f32 %v1447_v0, %v413_v32  ;;  %v295_v27 = vld [vmem:[%s1084_s20 + $0x3c8] sm:$0xff]  ;;  %v296_v28 = vld [vmem:[%s1084_s20 + $0x3d0] sm:$0xff] }
  0x86   : > { %930 = vst [vmem:[%s1122_s25 + $0x330] sm:$0xff] %v802_v31  ;;  %v549_v41 = vadd.f32 %v1447_v0, %v414_v33  ;;  %v550_v42 = vadd.f32 %v1447_v0, %v415_v34  ;;  %v419_v43 = vmul.f32 %v1460_v13, %v284_v30  ;;  %931 = vst [vmem:[%s1122_s25 + $0x338] sm:$0xff] %v803_v36 }
  0x87   : > { %v551_v44 = vadd.f32 %v1447_v0, %v416_v37  ;;  %v552_v45 = vadd.f32 %v1447_v0, %v417_v38  ;;  %v553_v46 = vadd.f32 %v1447_v0, %v418_v39  ;;  %v420_v47 = vmul.f32 %v1460_v13, %v285_v35 }
  0x88   : > { %v676_v51 = vmul.f32 0.05, %v548_v40  ;;  %v677_v52 = vmul.f32 0.05, %v549_v41  ;;  %v678_v53 = vmul.f32 0.05, %v550_v42  ;;  %v554_v54 = vadd.f32 %v1447_v0, %v419_v43 }
  0x89   : > { %v679_v55 = vmul.f32 0.05, %v551_v44  ;;  %v680_v56 = vmul.f32 0.05, %v552_v45  ;;  %v681_v57 = vmul.f32 0.05, %v553_v46  ;;  %v555_v58 = vadd.f32 %v1447_v0, %v420_v47 }
  0x8a   : > { %v804_v59 = vmax.f32 %v548_v40, %v676_v51  ;;  %v805_v60 = vmax.f32 %v549_v41, %v677_v52  ;;  %v806_v61 = vmax.f32 %v550_v42, %v678_v53  ;;  %v682_v62 = vmul.f32 0.05, %v554_v54  ;;  %v297_v41 = vld [vmem:[%s1084_s20 + $0x3d8] sm:$0xff]  ;;  %v298_v42 = vld [vmem:[%s1084_s20 + $0x3e0] sm:$0xff]  ;;  %v299_v43 = vld [vmem:[%s1084_s20 + $0x3e8] sm:$0xff] }
  0x8b   : > { %v807_v4 = vmax.f32 %v551_v44, %v679_v55  ;;  %v808_v5 = vmax.f32 %v552_v45, %v680_v56  ;;  %v809_v1 = vmax.f32 %v553_v46, %v681_v57  ;;  %v683_v6 = vmul.f32 0.05, %v555_v58  ;;  %v301_v53 = vld [vmem:[%s1084_s20 + $0x3f8] sm:$0xff] }
  0x8c   : > { %932 = vst [vmem:[%s1122_s25 + $0x340] sm:$0xff] %v804_v59  ;;  %933 = vst [vmem:[%s1122_s25 + $0x348] sm:$0xff] %v805_v60  ;;  %v810_v8 = vmax.f32 %v554_v54, %v682_v62  ;;  %v421_v9 = vmul.f32 %v1460_v13, %v286_v48  ;;  %v422_v10 = vmul.f32 %v1460_v13, %v287_v49  ;;  %v300_v48 = vld [vmem:[%s1084_s20 + $0x3f0] sm:$0xff] }
  0x8d   : > { %934 = vst [vmem:[%s1122_s25 + $0x350] sm:$0xff] %v806_v61  ;;  %v423_v11 = vmul.f32 %v1460_v13, %v288_v50  ;;  %935 = vst [vmem:[%s1122_s25 + $0x358] sm:$0xff] %v807_v4  ;;  %v811_v14 = vmax.f32 %v555_v58, %v683_v6  ;;  %v424_v15 = vmul.f32 %v1460_v13, %v289_v63 }
  0x8e   : > { %936 = vst [vmem:[%s1122_s25 + $0x360] sm:$0xff] %v808_v5  ;;  %937 = vst [vmem:[%s1122_s25 + $0x368] sm:$0xff] %v809_v1  ;;  %v425_v16 = vmul.f32 %v1460_v13, %v290_v2  ;;  %v426_v17 = vmul.f32 %v1460_v13, %v291_v3  ;;  %v556_v18 = vadd.f32 %v1447_v0, %v421_v9 }
  0x8f   : > { %938 = vst [vmem:[%s1122_s25 + $0x370] sm:$0xff] %v810_v8  ;;  %v557_v19 = vadd.f32 %v1447_v0, %v422_v10  ;;  %v558_v20 = vadd.f32 %v1447_v0, %v423_v11  ;;  %v427_v21 = vmul.f32 %v1460_v13, %v292_v7  ;;  %939 = vst [vmem:[%s1122_s25 + $0x378] sm:$0xff] %v811_v14 }
  0x90   : > { %v559_v22 = vadd.f32 %v1447_v0, %v424_v15  ;;  %v560_v23 = vadd.f32 %v1447_v0, %v425_v16  ;;  %v561_v24 = vadd.f32 %v1447_v0, %v426_v17  ;;  %v428_v25 = vmul.f32 %v1460_v13, %v293_v12 }
  0x91   : > { %v684_v29 = vmul.f32 0.05, %v556_v18  ;;  %v685_v30 = vmul.f32 0.05, %v557_v19  ;;  %v686_v31 = vmul.f32 0.05, %v558_v20  ;;  %v562_v32 = vadd.f32 %v1447_v0, %v427_v21 }
  0x92   : > { %v687_v33 = vmul.f32 0.05, %v559_v22  ;;  %v688_v34 = vmul.f32 0.05, %v560_v23  ;;  %v689_v35 = vmul.f32 0.05, %v561_v24  ;;  %v563_v36 = vadd.f32 %v1447_v0, %v428_v25 }
  0x93   : > { %v812_v37 = vmax.f32 %v556_v18, %v684_v29  ;;  %v813_v38 = vmax.f32 %v557_v19, %v685_v30  ;;  %v814_v39 = vmax.f32 %v558_v20, %v686_v31  ;;  %v690_v40 = vmul.f32 0.05, %v562_v32 }
  0x94   : > { %v815_v44 = vmax.f32 %v559_v22, %v687_v33  ;;  %v816_v45 = vmax.f32 %v560_v23, %v688_v34  ;;  %v817_v46 = vmax.f32 %v561_v24, %v689_v35  ;;  %v691_v47 = vmul.f32 0.05, %v563_v36 }
  0x95   : > { %940 = vst [vmem:[%s1122_s25 + $0x380] sm:$0xff] %v812_v37  ;;  %941 = vst [vmem:[%s1122_s25 + $0x388] sm:$0xff] %v813_v38  ;;  %v818_v49 = vmax.f32 %v562_v32, %v690_v40  ;;  %v429_v50 = vmul.f32 %v1460_v13, %v294_v26  ;;  %v430_v51 = vmul.f32 %v1460_v13, %v295_v27 }
  0x96   : > { %942 = vst [vmem:[%s1122_s25 + $0x390] sm:$0xff] %v814_v39  ;;  %v431_v52 = vmul.f32 %v1460_v13, %v296_v28  ;;  %943 = vst [vmem:[%s1122_s25 + $0x398] sm:$0xff] %v815_v44  ;;  %v819_v54 = vmax.f32 %v563_v36, %v691_v47  ;;  %v432_v55 = vmul.f32 %v1460_v13, %v297_v41 }
  0x97   : > { %944 = vst [vmem:[%s1122_s25 + $0x3a0] sm:$0xff] %v816_v45  ;;  %945 = vst [vmem:[%s1122_s25 + $0x3a8] sm:$0xff] %v817_v46  ;;  %v433_v56 = vmul.f32 %v1460_v13, %v298_v42  ;;  %v434_v57 = vmul.f32 %v1460_v13, %v299_v43  ;;  %v564_v58 = vadd.f32 %v1447_v0, %v429_v50 }
  0x98   : > { %946 = vst [vmem:[%s1122_s25 + $0x3b0] sm:$0xff] %v818_v49  ;;  %v565_v59 = vadd.f32 %v1447_v0, %v430_v51  ;;  %v566_v60 = vadd.f32 %v1447_v0, %v431_v52  ;;  %v435_v61 = vmul.f32 %v1460_v13, %v300_v48  ;;  %947 = vst [vmem:[%s1122_s25 + $0x3b8] sm:$0xff] %v819_v54 }
  0x99   : > { %v567_v62 = vadd.f32 %v1447_v0, %v432_v55  ;;  %v568_v63 = vadd.f32 %v1447_v0, %v433_v56  ;;  %v569_v2 = vadd.f32 %v1447_v0, %v434_v57  ;;  %v436_v3 = vmul.f32 %v1460_v13, %v301_v53 }
  0x9a   : > { %v692_v4 = vmul.f32 0.05, %v564_v58  ;;  %v693_v5 = vmul.f32 0.05, %v565_v59  ;;  %v694_v1 = vmul.f32 0.05, %v566_v60  ;;  %v570_v6 = vadd.f32 %v1447_v0, %v435_v61 }
  0x9b   : > { %v695_v7 = vmul.f32 0.05, %v567_v62  ;;  %v696_v8 = vmul.f32 0.05, %v568_v63  ;;  %v697_v9 = vmul.f32 0.05, %v569_v2  ;;  %v571_v10 = vadd.f32 %v1447_v0, %v436_v3 }
  0x9c   : > { %v820_v11 = vmax.f32 %v564_v58, %v692_v4  ;;  %v821_v12 = vmax.f32 %v565_v59, %v693_v5  ;;  %v822_v13 = vmax.f32 %v566_v60, %v694_v1  ;;  %v698_v14 = vmul.f32 0.05, %v570_v6 }
  0x9d   : > { %v823_v15 = vmax.f32 %v567_v62, %v695_v7  ;;  %v824_v16 = vmax.f32 %v568_v63, %v696_v8  ;;  %v825_v17 = vmax.f32 %v569_v2, %v697_v9  ;;  %v699_v18 = vmul.f32 0.05, %v571_v10 }
  0x9e   : > { %948 = vst [vmem:[%s1122_s25 + $0x3c0] sm:$0xff] %v820_v11  ;;  %949 = vst [vmem:[%s1122_s25 + $0x3c8] sm:$0xff] %v821_v12  ;;  %v826_v19 = vmax.f32 %v570_v6, %v698_v14 }
  0x9f   : > { %950 = vst [vmem:[%s1122_s25 + $0x3d0] sm:$0xff] %v822_v13  ;;  %951 = vst [vmem:[%s1122_s25 + $0x3d8] sm:$0xff] %v823_v15  ;;  %v827_v20 = vmax.f32 %v571_v10, %v699_v18 }
  0xa0   : > { %952 = vst [vmem:[%s1122_s25 + $0x3e0] sm:$0xff] %v824_v16  ;;  %953 = vst [vmem:[%s1122_s25 + $0x3e8] sm:$0xff] %v825_v17 }
  0xa1   : > { %954 = vst [vmem:[%s1122_s25 + $0x3f0] sm:$0xff] %v826_v19  ;;  %955 = vst [vmem:[%s1122_s25 + $0x3f8] sm:$0xff] %v827_v20 }
  0xa2 PF: > { %s13_s12 = sadd.s32 1, %s1041_s12  }
  0xa3   : > { %p10_p4 = scmp.ge.s32.totalorder %s13_s12, 4  }
  0xa5   :  { %12 = sbr.rel (!%p10_p4) target bundleno = 1 (0x1), region = 62 }

// kernel: number_noise_simulation.23
= control target key start
LH: loop header
LB: loop body
LE: loop exit
PB: predicated region body
PF: predicated region fallthrough
CT: control target
= control target key end

     0   :  { %s4439_s12 = smov 0   ;;  %s5122_s0 = inlined_call_operand.vmem [shape: bf16[2048,512], index: 0, kind: input, shape index: {}]   ;;  %s5123_s1 = inlined_call_operand.vmem [shape: bf16[512,128], index: 1, kind: input, shape index: {}]   ;;  %s5124_s2 = inlined_call_operand.vmem [shape: f32[2048,128], index: 2, kind: output, shape index: {0}]   ;;  %s5125_s3 = inlined_call_operand.vmem [shape: f32[2,2,128], index: 3, kind: output, shape index: {1}]  }
   0x1 LB: > { %s4445_s13 = sadd.s32 4294967295, %s4416_s12   ;;  %p3687_p0 = scmp.ge.s32.totalorder %s4416_s12, 1  ;;  %s4416_s12 = sphi %s4439_s12, %s14_s12  }
   0x2   : > { %p142_p1 = scmp.lt.s32.totalorder %s4416_s12, 3 }
   0x4   : > { %p143_p2 = pnand %p3687_p0, %p142_p1 }
   0x5   : > { %s3688_s7 = sshll.u32 (!%p143_p2), %s4445_s13, 7  ;;  %p184_p4 = scmp.lt.s32.totalorder (!%p143_p2), %s4445_s13, 1 }
   0x6   : > { %146 = sbr.rel (%p143_p2) target bundleno = 797 (0x31d), region = 28  ;;  %p172_p3 = scmp.lt.s32.totalorder (!%p143_p2), %s3688_s7, 255 }
   0xb   : > { %v3994_v0 = vld [vmem:[%s5123_s1 + $0x38] sm:$0xff]   ;;  %v4418_v1 = vmov 0   ;;  %v3996_v3 = vld [vmem:[%s5123_s1 + $0x30] sm:$0xff]   ;;  %v3998_v5 = vld [vmem:[%s5123_s1 + $0x28] sm:$0xff]   ;;  %s5127_s7 = smov (!%p172_p3, %s3688_s7), 255  ;;  %s5129_s13 = smov (!%p184_p4, %s4445_s13), 1 }
   0xc   : > { %1981 = vmatprep.subr.bf16.mxu0 %v4418_v1  ;;  %2526 = vmatprep.subr.bf16.mxu1 %v4418_v1  ;;  %v3995_v2 = vld [vmem:[%s5123_s1 + $0xb8] sm:$0xff]   ;;  %v3997_v4 = vld [vmem:[%s5123_s1 + $0xb0] sm:$0xff]   ;;  %v3999_v6 = vld [vmem:[%s5123_s1 + $0xa8] sm:$0xff]   ;;  %s3984_s22 = sshll.u32 %s5127_s7, 4  ;;  %s3692_s9 = sshll.u32 %s5127_s7, 3  ;;  %vm3593_vm0 = vcmask 1040384  }
   0xd   : > { %1982 = vmatpush1.bf16.msra.mxu0 %v3994_v0  ;;  %2527 = vmatpush1.bf16.msra.mxu1 %v3995_v2  ;;  %v4000_v7 = vld [vmem:[%s5123_s1 + $0x20] sm:$0xff]   ;;  %v4002_v9 = vld [vmem:[%s5123_s1 + $0x18] sm:$0xff]   ;;  %v4004_v11 = vld [vmem:[%s5123_s1 + $0x10] sm:$0xff]   ;;  %s4523_s27 = scalar_lea.vmem %s5122_s0, %s3984_s22  ;;  %s4692_s14 = scalar_lea.vmem %s5124_s2, %s3692_s9 }
   0xe   : > { %1983 = vmatprep.subr.bf16.mxu0 %v4418_v1  ;;  %2528 = vmatprep.subr.bf16.mxu1 %v4418_v1  ;;  %v4001_v8 = vld [vmem:[%s5123_s1 + $0xa0] sm:$0xff]   ;;  %v4003_v10 = vld [vmem:[%s5123_s1 + $0x98] sm:$0xff]   ;;  %v4005_v12 = vld [vmem:[%s5123_s1 + $0x90] sm:$0xff]   ;;  %s3693_s7 = sshll.u32 %s5129_s13, 1 }
   0xf   : > { %v4006_v13 = vld [vmem:[%s5123_s1 + $0x8] sm:$0xff]   ;;  %v4008_v15 = vld [vmem:[%s5123_s1] sm:$0xff]   ;;  %v4010_v17 = vld [vmem:[%s5123_s1 + $0x78] sm:$0xff]   ;;  %s187_s16 = scalar_lea.vmem %s5125_s3, %s3693_s7 }
  0x10   : > { %v4007_v14 = vld [vmem:[%s5123_s1 + $0x88] sm:$0xff]   ;;  %v4009_v16 = vld [vmem:[%s5123_s1 + $0x80] sm:$0xff]   ;;  %v4011_v18 = vld [vmem:[%s5123_s1 + $0xf8] sm:$0xff]  }
  0x11   : > { %1984 = vmatpush1.bf16.msra.mxu0 %v3996_v3  ;;  %2529 = vmatpush1.bf16.msra.mxu1 %v3997_v4  ;;  %v4028_v19 = vld [vmem:[%s4523_s27 + $0x4] ss:$16 sps:$4 sm:$0xff]   ;;  %v4031_v21 = vld [vmem:[%s4523_s27 + $0xc] ss:$16 sps:$4 sm:$0xff]   ;;  %v4026_v35 = vld [vmem:[%s4523_s27] ss:$16 sps:$4 sm:$0xff]  }
  0x12   : > { %1985 = vmatprep.subr.bf16.mxu0 %v4418_v1  ;;  %2530 = vmatprep.subr.bf16.mxu1 %v4418_v1  ;;  %v4012_v20 = vld [vmem:[%s5123_s1 + $0x70] sm:$0xff]   ;;  %v4014_v23 = vld [vmem:[%s5123_s1 + $0x68] sm:$0xff]   ;;  %v4016_v25 = vld [vmem:[%s5123_s1 + $0x60] sm:$0xff]  }
  0x13   : > { %v4013_v22 = vld [vmem:[%s5123_s1 + $0xf0] sm:$0xff]   ;;  %2013 = vmatprep.mubr.bf16.mxu0 %v4028_v19  ;;  %2558 = vmatprep.mubr.bf16.mxu1 %v4031_v21  ;;  %v4015_v24 = vld [vmem:[%s5123_s1 + $0xe8] sm:$0xff]   ;;  %v4017_v26 = vld [vmem:[%s5123_s1 + $0xe0] sm:$0xff]  }
  0x14   : > { %v4018_v27 = vld [vmem:[%s5123_s1 + $0x58] sm:$0xff]   ;;  %v4020_v29 = vld [vmem:[%s5123_s1 + $0x50] sm:$0xff]   ;;  %v4022_v31 = vld [vmem:[%s5123_s1 + $0x48] sm:$0xff]  }
  0x15   : > { %1986 = vmatpush1.bf16.msra.mxu0 %v3998_v5  ;;  %2531 = vmatpush1.bf16.msra.mxu1 %v3999_v6  ;;  %v4019_v28 = vld [vmem:[%s5123_s1 + $0xd8] sm:$0xff]   ;;  %v4021_v30 = vld [vmem:[%s5123_s1 + $0xd0] sm:$0xff]   ;;  %v4023_v32 = vld [vmem:[%s5123_s1 + $0xc8] sm:$0xff]  }
  0x16   : > { %1987 = vmatprep.subr.bf16.mxu0 %v4418_v1  ;;  %2532 = vmatprep.subr.bf16.mxu1 %v4418_v1  ;;  %v4024_v33 = vld [vmem:[%s5123_s1 + $0x40] sm:$0xff]   ;;  %v4029_v36 = vld [vmem:[%s4523_s27 + $0x8] ss:$16 sps:$4 sm:$0xff]   ;;  %v4034_v38 = vld [vmem:[%s4523_s27 + $0x2c] ss:$16 sps:$4 sm:$0xff]  }
  0x17   : > { %v4025_v34 = vld [vmem:[%s5123_s1 + $0xc0] sm:$0xff]   ;;  %v4037_v40 = vld [vmem:[%s4523_s27 + $0x28] ss:$16 sps:$4 sm:$0xff]   ;;  %v4040_v42 = vld [vmem:[%s4523_s27 + $0x4c] ss:$16 sps:$4 sm:$0xff]  }
  0x18   : > { %v4032_v37 = vld [vmem:[%s4523_s27 + $0x24] ss:$16 sps:$4 sm:$0xff]   ;;  %v4036_v39 = vld [vmem:[%s4523_s27 + $0x20] ss:$16 sps:$4 sm:$0xff]   ;;  %v4043_v44 = vld [vmem:[%s4523_s27 + $0x48] ss:$16 sps:$4 sm:$0xff]  }
  0x19   : > { %1988 = vmatpush1.bf16.msra.mxu0 %v4000_v7  ;;  %2533 = vmatpush1.bf16.msra.mxu1 %v4001_v8  ;;  %v4038_v41 = vld [vmem:[%s4523_s27 + $0x44] ss:$16 sps:$4 sm:$0xff]   ;;  %v4042_v43 = vld [vmem:[%s4523_s27 + $0x40] ss:$16 sps:$4 sm:$0xff]   ;;  %v4046_v46 = vld [vmem:[%s4523_s27 + $0x6c] ss:$16 sps:$4 sm:$0xff]  }
  0x1a   : > { %1989 = vmatprep.subr.bf16.mxu0 %v4418_v1  ;;  %2534 = vmatprep.subr.bf16.mxu1 %v4418_v1  ;;  %v4044_v45 = vld [vmem:[%s4523_s27 + $0x64] ss:$16 sps:$4 sm:$0xff]   ;;  %v4048_v47 = vld [vmem:[%s4523_s27 + $0x60] ss:$16 sps:$4 sm:$0xff]   ;;  %v4049_v48 = vld [vmem:[%s4523_s27 + $0x68] ss:$16 sps:$4 sm:$0xff]  }
  0x1b   : > { %v4050_v49 = vld [vmem:[%s4523_s27 + $0x84] ss:$16 sps:$4 sm:$0xff]   ;;  %v4052_v50 = vld [vmem:[%s4523_s27 + $0x8c] ss:$16 sps:$4 sm:$0xff]   ;;  %v4054_v51 = vld [vmem:[%s4523_s27 + $0x80] ss:$16 sps:$4 sm:$0xff]  }
  0x1c   : > { %v4055_v52 = vld [vmem:[%s4523_s27 + $0x88] ss:$16 sps:$4 sm:$0xff]   ;;  %v4056_v53 = vld [vmem:[%s4523_s27 + $0xa4] ss:$16 sps:$4 sm:$0xff]   ;;  %v4058_v54 = vld [vmem:[%s4523_s27 + $0xac] ss:$16 sps:$4 sm:$0xff]  }
  0x1d   : > { %1990 = vmatpush1.bf16.msra.mxu0 %v4002_v9  ;;  %2535 = vmatpush1.bf16.msra.mxu1 %v4003_v10  ;;  %v4060_v55 = vld [vmem:[%s4523_s27 + $0xa0] ss:$16 sps:$4 sm:$0xff]   ;;  %v4061_v56 = vld [vmem:[%s4523_s27 + $0xa8] ss:$16 sps:$4 sm:$0xff]   ;;  %v4062_v57 = vld [vmem:[%s4523_s27 + $0xc4] ss:$16 sps:$4 sm:$0xff]  }
  0x1e   : > { %1991 = vmatprep.subr.bf16.mxu0 %v4418_v1  ;;  %2536 = vmatprep.subr.bf16.mxu1 %v4418_v1  ;;  %v4064_v58 = vld [vmem:[%s4523_s27 + $0xcc] ss:$16 sps:$4 sm:$0xff]   ;;  %v4066_v59 = vld [vmem:[%s4523_s27 + $0xc0] ss:$16 sps:$4 sm:$0xff]   ;;  %v4067_v60 = vld [vmem:[%s4523_s27 + $0xc8] ss:$16 sps:$4 sm:$0xff]  }
  0x1f   : > { %v4068_v61 = vld [vmem:[%s4523_s27 + $0xe4] ss:$16 sps:$4 sm:$0xff]   ;;  %v4070_v62 = vld [vmem:[%s4523_s27 + $0xec] ss:$16 sps:$4 sm:$0xff]   ;;  %v4072_v63 = vld [vmem:[%s4523_s27 + $0xe0] ss:$16 sps:$4 sm:$0xff]  }
  0x20   : > { %v4073_v0 = vld [vmem:[%s4523_s27 + $0xe8] ss:$16 sps:$4 sm:$0xff]   ;;  %v4076_v2 = vld [vmem:[%s4523_s27 + $0x10c] ss:$16 sps:$4 sm:$0xff]   ;;  %v4078_v3 = vld [vmem:[%s4523_s27 + $0x100] ss:$16 sps:$4 sm:$0xff]  }
  0x21   : > { %1992 = vmatpush1.bf16.msra.mxu0 %v4004_v11  ;;  %2537 = vmatpush1.bf16.msra.mxu1 %v4005_v12  ;;  %v4079_v4 = vld [vmem:[%s4523_s27 + $0x108] ss:$16 sps:$4 sm:$0xff]   ;;  %v4080_v5 = vld [vmem:[%s4523_s27 + $0x124] ss:$16 sps:$4 sm:$0xff]   ;;  %v4082_v6 = vld [vmem:[%s4523_s27 + $0x12c] ss:$16 sps:$4 sm:$0xff]  }
  0x22   : > { %1993 = vmatprep.subr.bf16.mxu0 %v4418_v1  ;;  %2538 = vmatprep.subr.bf16.mxu1 %v4418_v1  ;;  %v4084_v7 = vld [vmem:[%s4523_s27 + $0x120] ss:$16 sps:$4 sm:$0xff]   ;;  %v4085_v8 = vld [vmem:[%s4523_s27 + $0x128] ss:$16 sps:$4 sm:$0xff]   ;;  %v4086_v9 = vld [vmem:[%s4523_s27 + $0x144] ss:$16 sps:$4 sm:$0xff]  }
  0x23   : > { %v4088_v10 = vld [vmem:[%s4523_s27 + $0x14c] ss:$16 sps:$4 sm:$0xff]   ;;  %v4090_v11 = vld [vmem:[%s4523_s27 + $0x140] ss:$16 sps:$4 sm:$0xff]   ;;  %v4091_v12 = vld [vmem:[%s4523_s27 + $0x148] ss:$16 sps:$4 sm:$0xff]  }
  0x24   : > { %v4102_v19 = vld [vmem:[%s4523_s27 + $0x180] ss:$16 sps:$4 sm:$0xff]   ;;  %v4104_v21 = vld [vmem:[%s4523_s27 + $0x1a4] ss:$16 sps:$4 sm:$0xff]  }
  0x25   : > { %1994 = vmatpush1.bf16.msra.mxu0 %v4006_v13  ;;  %2539 = vmatpush1.bf16.msra.mxu1 %v4007_v14  ;;  %v4092_v13 = vld [vmem:[%s4523_s27 + $0x164] ss:$16 sps:$4 sm:$0xff]   ;;  %v4094_v14 = vld [vmem:[%s4523_s27 + $0x16c] ss:$16 sps:$4 sm:$0xff]  }
  0x26   : > { %1995 = vmatprep.subr.bf16.mxu0 %v4418_v1  ;;  %2540 = vmatprep.subr.bf16.mxu1 %v4418_v1 }
  0x29   : > { %1996 = vmatpush1.bf16.msra.mxu0 %v4008_v15  ;;  %2541 = vmatpush1.bf16.msra.mxu1 %v4009_v16  ;;  %v4096_v15 = vld [vmem:[%s4523_s27 + $0x160] ss:$16 sps:$4 sm:$0xff]   ;;  %v4097_v16 = vld [vmem:[%s4523_s27 + $0x168] ss:$16 sps:$4 sm:$0xff]  }
  0x2a   : > { %1997 = vmatprep.subr.bf16.mxu0 %v4418_v1  ;;  %2542 = vmatprep.subr.bf16.mxu1 %v4418_v1 }
  0x2d   : > { %1998 = vmatpush2.bf16.msra.mxu0 %v4010_v17  ;;  %2543 = vmatpush2.bf16.msra.mxu1 %v4011_v18  ;;  %v4098_v17 = vld [vmem:[%s4523_s27 + $0x184] ss:$16 sps:$4 sm:$0xff]   ;;  %v4100_v18 = vld [vmem:[%s4523_s27 + $0x18c] ss:$16 sps:$4 sm:$0xff]  }
  0x2e   : > { %1999 = vmatprep.subr.bf16.mxu0 %v4418_v1  ;;  %2544 = vmatprep.subr.bf16.mxu1 %v4418_v1 }
  0x31   : > { %2000 = vmatpush2.bf16.msra.mxu0 %v4012_v20  ;;  %2545 = vmatpush2.bf16.msra.mxu1 %v4013_v22  ;;  %v4103_v20 = vld [vmem:[%s4523_s27 + $0x188] ss:$16 sps:$4 sm:$0xff]   ;;  %v4106_v22 = vld [vmem:[%s4523_s27 + $0x1ac] ss:$16 sps:$4 sm:$0xff]  }
  0x32   : > { %2001 = vmatprep.subr.bf16.mxu0 %v4418_v1  ;;  %2546 = vmatprep.subr.bf16.mxu1 %v4418_v1 }
  0x35   : > { %2002 = vmatpush2.bf16.msra.mxu0 %v4014_v23  ;;  %2547 = vmatpush2.bf16.msra.mxu1 %v4015_v24  ;;  %v4108_v23 = vld [vmem:[%s4523_s27 + $0x1a0] ss:$16 sps:$4 sm:$0xff]   ;;  %v4109_v24 = vld [vmem:[%s4523_s27 + $0x1a8] ss:$16 sps:$4 sm:$0xff]  }
  0x36   : > { %2003 = vmatprep.subr.bf16.mxu0 %v4418_v1  ;;  %2548 = vmatprep.subr.bf16.mxu1 %v4418_v1 }
  0x39   : > { %2004 = vmatpush2.bf16.msra.mxu0 %v4016_v25  ;;  %2549 = vmatpush2.bf16.msra.mxu1 %v4017_v26  ;;  %v4110_v25 = vld [vmem:[%s4523_s27 + $0x1c4] ss:$16 sps:$4 sm:$0xff]   ;;  %v4112_v26 = vld [vmem:[%s4523_s27 + $0x1cc] ss:$16 sps:$4 sm:$0xff]  }
  0x3a   : > { %2005 = vmatprep.subr.bf16.mxu0 %v4418_v1  ;;  %2550 = vmatprep.subr.bf16.mxu1 %v4418_v1 }
  0x3d   : > { %2006 = vmatpush2.bf16.msra.mxu0 %v4018_v27  ;;  %2551 = vmatpush2.bf16.msra.mxu1 %v4019_v28  ;;  %v4114_v27 = vld [vmem:[%s4523_s27 + $0x1c0] ss:$16 sps:$4 sm:$0xff]   ;;  %v4115_v28 = vld [vmem:[%s4523_s27 + $0x1c8] ss:$16 sps:$4 sm:$0xff]  }
  0x3e   : > { %2007 = vmatprep.subr.bf16.mxu0 %v4418_v1  ;;  %2552 = vmatprep.subr.bf16.mxu1 %v4418_v1 }
  0x41   : > { %2008 = vmatpush2.bf16.msra.mxu0 %v4020_v29  ;;  %2553 = vmatpush2.bf16.msra.mxu1 %v4021_v30  ;;  %v4116_v29 = vld [vmem:[%s4523_s27 + $0x1e4] ss:$16 sps:$4 sm:$0xff]   ;;  %v4118_v30 = vld [vmem:[%s4523_s27 + $0x1ec] ss:$16 sps:$4 sm:$0xff]  }
  0x42   : > { %2009 = vmatprep.subr.bf16.mxu0 %v4418_v1  ;;  %2554 = vmatprep.subr.bf16.mxu1 %v4418_v1 }
  0x45   : > { %2010 = vmatpush2.bf16.msra.mxu0 %v4022_v31  ;;  %2555 = vmatpush2.bf16.msra.mxu1 %v4023_v32  ;;  %v4120_v31 = vld [vmem:[%s4523_s27 + $0x1e0] ss:$16 sps:$4 sm:$0xff]   ;;  %v4121_v32 = vld [vmem:[%s4523_s27 + $0x1e8] ss:$16 sps:$4 sm:$0xff]  }
  0x46   : > { %2011 = vmatprep.subr.bf16.mxu0 %v4418_v1  ;;  %2556 = vmatprep.subr.bf16.mxu1 %v4418_v1  ;;  %v4074_v1 = vld [vmem:[%s4523_s27 + $0x104] ss:$16 sps:$4 sm:$0xff]  }
  0x49   : > { %2012 = vmatpush2.bf16.msra.mxu0 %v4024_v33  ;;  %2557 = vmatpush2.bf16.msra.mxu1 %v4025_v34  ;;  %v4122_v33 = vld [vmem:[%s4523_s27 + $0x204] ss:$16 sps:$4 sm:$0xff]   ;;  %v4124_v34 = vld [vmem:[%s4523_s27 + $0x20c] ss:$16 sps:$4 sm:$0xff]  }
  0x4c   : > { %2014 = vmatmul.mubr.bf16.vlgmr.msra.gmra.mxu0 %v4026_v35  ;;  %2559 = vmatmul.mubr.bf16.vlgmr.msra.gmra.mxu1 %v4029_v36  ;;  %v4126_v35 = vld [vmem:[%s4523_s27 + $0x200] ss:$16 sps:$4 sm:$0xff]   ;;  %v4127_v36 = vld [vmem:[%s4523_s27 + $0x208] ss:$16 sps:$4 sm:$0xff]  }
  0x4d   : > { %2021 = vmatprep.mubr.bf16.mxu0 %v4032_v37  ;;  %2566 = vmatprep.mubr.bf16.mxu1 %v4034_v38  ;;  %v4128_v37 = vld [vmem:[%s4523_s27 + $0x224] ss:$16 sps:$4 sm:$0xff]   ;;  %v4130_v38 = vld [vmem:[%s4523_s27 + $0x22c] ss:$16 sps:$4 sm:$0xff]  }
  0x54   : > { %2022 = vmatmul.mubr.bf16.gmra.mxu0 %v4036_v39  ;;  %2567 = vmatmul.mubr.bf16.gmra.mxu1 %v4037_v40  ;;  %v4132_v39 = vld [vmem:[%s4523_s27 + $0x220] ss:$16 sps:$4 sm:$0xff]   ;;  %v4133_v40 = vld [vmem:[%s4523_s27 + $0x228] ss:$16 sps:$4 sm:$0xff]  }
  0x55   : > { %2029 = vmatprep.mubr.bf16.mxu0 %v4038_v41  ;;  %2574 = vmatprep.mubr.bf16.mxu1 %v4040_v42  ;;  %v4134_v41 = vld [vmem:[%s4523_s27 + $0x244] ss:$16 sps:$4 sm:$0xff]   ;;  %v4136_v42 = vld [vmem:[%s4523_s27 + $0x24c] ss:$16 sps:$4 sm:$0xff]  }
  0x5c   : > { %2030 = vmatmul.mubr.bf16.gmra.mxu0 %v4042_v43  ;;  %2575 = vmatmul.mubr.bf16.gmra.mxu1 %v4043_v44  ;;  %v4138_v43 = vld [vmem:[%s4523_s27 + $0x240] ss:$16 sps:$4 sm:$0xff]   ;;  %v4139_v44 = vld [vmem:[%s4523_s27 + $0x248] ss:$16 sps:$4 sm:$0xff]  }
  0x5d   : > { %2037 = vmatprep.mubr.bf16.mxu0 %v4044_v45  ;;  %2582 = vmatprep.mubr.bf16.mxu1 %v4046_v46  ;;  %v4140_v45 = vld [vmem:[%s4523_s27 + $0x264] ss:$16 sps:$4 sm:$0xff]   ;;  %v4142_v46 = vld [vmem:[%s4523_s27 + $0x26c] ss:$16 sps:$4 sm:$0xff]  }
  0x64   : > { %2038 = vmatmul.mubr.bf16.gmra.mxu0 %v4048_v47  ;;  %2583 = vmatmul.mubr.bf16.gmra.mxu1 %v4049_v48  ;;  %v4144_v47 = vld [vmem:[%s4523_s27 + $0x260] ss:$16 sps:$4 sm:$0xff]   ;;  %v4145_v48 = vld [vmem:[%s4523_s27 + $0x268] ss:$16 sps:$4 sm:$0xff]  }
  0x65   : > { %2045 = vmatprep.mubr.bf16.mxu0 %v4050_v49  ;;  %2590 = vmatprep.mubr.bf16.mxu1 %v4052_v50  ;;  %v4146_v49 = vld [vmem:[%s4523_s27 + $0x284] ss:$16 sps:$4 sm:$0xff]   ;;  %v4148_v50 = vld [vmem:[%s4523_s27 + $0x28c] ss:$16 sps:$4 sm:$0xff]  }
  0x6c   : > { %2046 = vmatmul.mubr.bf16.gmra.mxu0 %v4054_v51  ;;  %2591 = vmatmul.mubr.bf16.gmra.mxu1 %v4055_v52  ;;  %v4150_v51 = vld [vmem:[%s4523_s27 + $0x280] ss:$16 sps:$4 sm:$0xff]   ;;  %v4151_v52 = vld [vmem:[%s4523_s27 + $0x288] ss:$16 sps:$4 sm:$0xff]  }
  0x6d   : > { %2053 = vmatprep.mubr.bf16.mxu0 %v4056_v53  ;;  %2598 = vmatprep.mubr.bf16.mxu1 %v4058_v54  ;;  %v4152_v53 = vld [vmem:[%s4523_s27 + $0x2a4] ss:$16 sps:$4 sm:$0xff]   ;;  %v4154_v54 = vld [vmem:[%s4523_s27 + $0x2ac] ss:$16 sps:$4 sm:$0xff]  }
  0x74   : > { %2054 = vmatmul.mubr.bf16.gmra.mxu0 %v4060_v55  ;;  %2599 = vmatmul.mubr.bf16.gmra.mxu1 %v4061_v56  ;;  %v4156_v55 = vld [vmem:[%s4523_s27 + $0x2a0] ss:$16 sps:$4 sm:$0xff]   ;;  %v4157_v56 = vld [vmem:[%s4523_s27 + $0x2a8] ss:$16 sps:$4 sm:$0xff]  }
  0x75   : > { %2061 = vmatprep.mubr.bf16.mxu0 %v4062_v57  ;;  %2606 = vmatprep.mubr.bf16.mxu1 %v4064_v58  ;;  %v4158_v57 = vld [vmem:[%s4523_s27 + $0x2c4] ss:$16 sps:$4 sm:$0xff]   ;;  %v4160_v58 = vld [vmem:[%s4523_s27 + $0x2cc] ss:$16 sps:$4 sm:$0xff]  }
  0x7c   : > { %2062 = vmatmul.mubr.bf16.gmra.mxu0 %v4066_v59  ;;  %2607 = vmatmul.mubr.bf16.gmra.mxu1 %v4067_v60  ;;  %v4162_v59 = vld [vmem:[%s4523_s27 + $0x2c0] ss:$16 sps:$4 sm:$0xff]   ;;  %v4163_v60 = vld [vmem:[%s4523_s27 + $0x2c8] ss:$16 sps:$4 sm:$0xff]  }
  0x7d   : > { %2069 = vmatprep.mubr.bf16.mxu0 %v4068_v61  ;;  %2614 = vmatprep.mubr.bf16.mxu1 %v4070_v62  ;;  %v4164_v61 = vld [vmem:[%s4523_s27 + $0x2e4] ss:$16 sps:$4 sm:$0xff]   ;;  %v4166_v62 = vld [vmem:[%s4523_s27 + $0x2ec] ss:$16 sps:$4 sm:$0xff]  }
  0x84   : > { %2070 = vmatmul.mubr.bf16.gmra.mxu0 %v4072_v63  ;;  %2615 = vmatmul.mubr.bf16.gmra.mxu1 %v4073_v0  ;;  %v4168_v63 = vld [vmem:[%s4523_s27 + $0x2e0] ss:$16 sps:$4 sm:$0xff]   ;;  %v4169_v0 = vld [vmem:[%s4523_s27 + $0x2e8] ss:$16 sps:$4 sm:$0xff]  }
  0x85   : > { %2077 = vmatprep.mubr.bf16.mxu0 %v4074_v1  ;;  %2622 = vmatprep.mubr.bf16.mxu1 %v4076_v2  ;;  %v4170_v1 = vld [vmem:[%s4523_s27 + $0x304] ss:$16 sps:$4 sm:$0xff]   ;;  %v4172_v2 = vld [vmem:[%s4523_s27 + $0x30c] ss:$16 sps:$4 sm:$0xff]  }
  0x8c   : > { %2078 = vmatmul.mubr.bf16.gmra.mxu0 %v4078_v3  ;;  %2623 = vmatmul.mubr.bf16.gmra.mxu1 %v4079_v4  ;;  %v4174_v3 = vld [vmem:[%s4523_s27 + $0x300] ss:$16 sps:$4 sm:$0xff]   ;;  %v4175_v4 = vld [vmem:[%s4523_s27 + $0x308] ss:$16 sps:$4 sm:$0xff]  }
  0x8d   : > { %2085 = vmatprep.mubr.bf16.mxu0 %v4080_v5  ;;  %2630 = vmatprep.mubr.bf16.mxu1 %v4082_v6  ;;  %v4176_v5 = vld [vmem:[%s4523_s27 + $0x324] ss:$16 sps:$4 sm:$0xff]   ;;  %v4178_v6 = vld [vmem:[%s4523_s27 + $0x32c] ss:$16 sps:$4 sm:$0xff]  }
  0x94   : > { %2086 = vmatmul.mubr.bf16.gmra.mxu0 %v4084_v7  ;;  %2631 = vmatmul.mubr.bf16.gmra.mxu1 %v4085_v8 }
  0x95   : > { %2093 = vmatprep.mubr.bf16.mxu0 %v4086_v9  ;;  %2638 = vmatprep.mubr.bf16.mxu1 %v4088_v10 }
  0x9c   : > { %2094 = vmatmul.mubr.bf16.gmra.mxu0 %v4090_v11  ;;  %2639 = vmatmul.mubr.bf16.gmra.mxu1 %v4091_v12 }
  0x9d   : > { %2101 = vmatprep.mubr.bf16.mxu0 %v4092_v13  ;;  %2646 = vmatprep.mubr.bf16.mxu1 %v4094_v14  ;;  %v4180_v13 = vld [vmem:[%s4523_s27 + $0x320] ss:$16 sps:$4 sm:$0xff]  }
  0xa4   : > { %2102 = vmatmul.mubr.bf16.gmra.mxu0 %v4096_v15  ;;  %2647 = vmatmul.mubr.bf16.gmra.mxu1 %v4097_v16  ;;  %v4181_v15 = vld [vmem:[%s4523_s27 + $0x328] ss:$16 sps:$4 sm:$0xff]   ;;  %v4182_v16 = vld [vmem:[%s4523_s27 + $0x344] ss:$16 sps:$4 sm:$0xff]  }
  0xa5   : > { %2109 = vmatprep.mubr.bf16.mxu0 %v4098_v17  ;;  %2654 = vmatprep.mubr.bf16.mxu1 %v4100_v18 }
  0xac   : > { %2110 = vmatmul.mubr.bf16.gmra.mxu0 %v4102_v19  ;;  %2655 = vmatmul.mubr.bf16.gmra.mxu1 %v4103_v20  ;;  %v4184_v19 = vld [vmem:[%s4523_s27 + $0x34c] ss:$16 sps:$4 sm:$0xff]  }
  0xad   : > { %2117 = vmatprep.mubr.bf16.mxu0 %v4104_v21  ;;  %2662 = vmatprep.mubr.bf16.mxu1 %v4106_v22 }
  0xb4   : > { %2118 = vmatmul.mubr.bf16.gmra.mxu0 %v4108_v23  ;;  %2663 = vmatmul.mubr.bf16.gmra.mxu1 %v4109_v24 }
  0xb5   : > { %2125 = vmatprep.mubr.bf16.mxu0 %v4110_v25  ;;  %2670 = vmatprep.mubr.bf16.mxu1 %v4112_v26 }
  0xbc   : > { %2126 = vmatmul.mubr.bf16.gmra.mxu0 %v4114_v27  ;;  %2671 = vmatmul.mubr.bf16.gmra.mxu1 %v4115_v28 }
  0xbd   : > { %2133 = vmatprep.mubr.bf16.mxu0 %v4116_v29  ;;  %2678 = vmatprep.mubr.bf16.mxu1 %v4118_v30 }
  0xc4   : > { %2134 = vmatmul.mubr.bf16.gmra.mxu0 %v4120_v31  ;;  %2679 = vmatmul.mubr.bf16.gmra.mxu1 %v4121_v32 }
  0xc5   : > { %2141 = vmatprep.mubr.bf16.mxu0 %v4122_v33  ;;  %2686 = vmatprep.mubr.bf16.mxu1 %v4124_v34  ;;  %v4186_v33 = vld [vmem:[%s4523_s27 + $0x340] ss:$16 sps:$4 sm:$0xff]  }
  0xcc   : > { %2142 = vmatmul.mubr.bf16.gmra.mxu0 %v4126_v35  ;;  %2687 = vmatmul.mubr.bf16.gmra.mxu1 %v4127_v36  ;;  %v4187_v35 = vld [vmem:[%s4523_s27 + $0x348] ss:$16 sps:$4 sm:$0xff]   ;;  %v4188_v36 = vld [vmem:[%s4523_s27 + $0x364] ss:$16 sps:$4 sm:$0xff]  }
  0xcd   : > { %2149 = vmatprep.mubr.bf16.mxu0 %v4128_v37  ;;  %2694 = vmatprep.mubr.bf16.mxu1 %v4130_v38 }
  0xd4   : > { %2150 = vmatmul.mubr.bf16.gmra.mxu0 %v4132_v39  ;;  %2695 = vmatmul.mubr.bf16.gmra.mxu1 %v4133_v40  ;;  %v4190_v40 = vld [vmem:[%s4523_s27 + $0x36c] ss:$16 sps:$4 sm:$0xff]  }
  0xd5   : > { %2157 = vmatprep.mubr.bf16.mxu0 %v4134_v41  ;;  %2702 = vmatprep.mubr.bf16.mxu1 %v4136_v42 }
  0xdc   : > { %2158 = vmatmul.mubr.bf16.gmra.mxu0 %v4138_v43  ;;  %2703 = vmatmul.mubr.bf16.gmra.mxu1 %v4139_v44 }
  0xdd   : > { %2165 = vmatprep.mubr.bf16.mxu0 %v4140_v45  ;;  %2710 = vmatprep.mubr.bf16.mxu1 %v4142_v46 }
  0xe4   : > { %2166 = vmatmul.mubr.bf16.gmra.mxu0 %v4144_v47  ;;  %2711 = vmatmul.mubr.bf16.gmra.mxu1 %v4145_v48 }
  0xe5   : > { %2173 = vmatprep.mubr.bf16.mxu0 %v4146_v49  ;;  %2718 = vmatprep.mubr.bf16.mxu1 %v4148_v50 }
  0xec   : > { %2174 = vmatmul.mubr.bf16.gmra.mxu0 %v4150_v51  ;;  %2719 = vmatmul.mubr.bf16.gmra.mxu1 %v4151_v52 }
  0xed   : > { %2181 = vmatprep.mubr.bf16.mxu0 %v4152_v53  ;;  %2726 = vmatprep.mubr.bf16.mxu1 %v4154_v54  ;;  %v4192_v53 = vld [vmem:[%s4523_s27 + $0x360] ss:$16 sps:$4 sm:$0xff]  }
  0xf4   : > { %2182 = vmatmul.mubr.bf16.gmra.mxu0 %v4156_v55  ;;  %2727 = vmatmul.mubr.bf16.gmra.mxu1 %v4157_v56  ;;  %v4193_v55 = vld [vmem:[%s4523_s27 + $0x368] ss:$16 sps:$4 sm:$0xff]   ;;  %v4196_v56 = vld [vmem:[%s4523_s27 + $0x384] ss:$16 sps:$4 sm:$0xff]  }
  0xf5   : > { %2189 = vmatprep.mubr.bf16.mxu0 %v4158_v57  ;;  %2734 = vmatprep.mubr.bf16.mxu1 %v4160_v58 }
  0xfc   : > { %2190 = vmatmul.mubr.bf16.gmra.mxu0 %v4162_v59  ;;  %2735 = vmatmul.mubr.bf16.gmra.mxu1 %v4163_v60  ;;  %v4199_v60 = vld [vmem:[%s4523_s27 + $0x38c] ss:$16 sps:$4 sm:$0xff]  }
  0xfd   : > { %2197 = vmatprep.mubr.bf16.mxu0 %v4164_v61  ;;  %2742 = vmatprep.mubr.bf16.mxu1 %v4166_v62 }
 0x104   : > { %2198 = vmatmul.mubr.bf16.gmra.mxu0 %v4168_v63  ;;  %2743 = vmatmul.mubr.bf16.gmra.mxu1 %v4169_v0 }
 0x105   : > { %2205 = vmatprep.mubr.bf16.mxu0 %v4170_v1  ;;  %2750 = vmatprep.mubr.bf16.mxu1 %v4172_v2 }
 0x10c   : > { %v2015_v7 = vpop.f32.mrf.mxu0  ;;  %2206 = vmatmul.mubr.bf16.gmra.mxu0 %v4174_v3  ;;  %v2560_v8 = vpop.f32.mrf.mxu1  ;;  %2751 = vmatmul.mubr.bf16.gmra.mxu1 %v4175_v4 }
 0x10d   : > { %2213 = vmatprep.mubr.bf16.mxu0 %v4176_v5  ;;  %v2561_v9 = vadd.f32 %v2560_v8, %v2015_v7  ;;  %2758 = vmatprep.mubr.bf16.mxu1 %v4178_v6 }
 0x10e   : > { %v2017_v10 = vpop.f32.mrf.mxu0  ;;  %v2562_v11 = vpop.f32.mrf.mxu1 }
 0x10f   : > { %3071 = vst [vmem:[%s4692_s14] sm:$0xff] %v2561_v9  ;;  %v3332_v21 = vmul.f32 %v2561_v9, %v2561_v9  ;;  %v4197_v11 = vld [vmem:[%s4523_s27 + $0x388] ss:$16 sps:$4 sm:$0xff]  }
 0x110   : > { %v2018_v12 = vpop.f32.mrf.mxu0  ;;  %v2563_v14 = vpop.f32.mrf.mxu1 }
 0x111   : > { %v2564_v17 = vadd.f32 %v2563_v14, %v2018_v12  ;;  %v4202_v12 = vld [vmem:[%s4523_s27 + $0x3a4] ss:$16 sps:$4 sm:$0xff]  }
 0x112   : > { %v2020_v18 = vpop.f32.mrf.mxu0  ;;  %v2565_v20 = vpop.f32.mrf.mxu1 }
 0x113   : > { %3072 = vst [vmem:[%s4692_s14 + $0x8] sm:$0xff] %v2564_v17  ;;  %v3199_v22 = vadd.f32 %v2564_v17, %v2561_v9  ;;  %v3333_v23 = vmul.f32 %v2564_v17, %v2564_v17  ;;  %v4194_v9 = vld [vmem:[%s4523_s27 + $0x380] ss:$16 sps:$4 sm:$0xff]  }
 0x114   : > { %v2023_v24 = vpop.f32.mrf.mxu0  ;;  %2214 = vmatmul.mubr.bf16.gmra.mxu0 %v4180_v13  ;;  %v2568_v25 = vpop.f32.mrf.mxu1  ;;  %2759 = vmatmul.mubr.bf16.gmra.mxu1 %v4181_v15 }
 0x115   : > { %2221 = vmatprep.mubr.bf16.mxu0 %v4182_v16  ;;  %v3460_v26 = vadd.f32 %v3333_v23, %v3332_v21  ;;  %v2569_v27 = vadd.f32 %v2568_v25, %v2023_v24  ;;  %2766 = vmatprep.mubr.bf16.mxu1 %v4184_v19  ;;  %v4205_v16 = vld [vmem:[%s4523_s27 + $0x3ac] ss:$16 sps:$4 sm:$0xff]  }
 0x116   : > { %v2025_v28 = vpop.f32.mrf.mxu0  ;;  %v2570_v29 = vpop.f32.mrf.mxu1 }
 0x117   : > { %3073 = vst [vmem:[%s4692_s14 + $0x10] sm:$0xff] %v2569_v27  ;;  %v3200_v30 = vadd.f32 %v3199_v22, %v2569_v27  ;;  %v3334_v31 = vmul.f32 %v2569_v27, %v2569_v27  ;;  %v4200_v29 = vld [vmem:[%s4523_s27 + $0x3a0] ss:$16 sps:$4 sm:$0xff]  }
 0x118   : > { %v2026_v32 = vpop.f32.mrf.mxu0  ;;  %v2571_v34 = vpop.f32.mrf.mxu1 }
 0x119   : > { %v3461_v37 = vadd.f32 %v3460_v26, %v3334_v31  ;;  %v2572_v38 = vadd.f32 %v2571_v34, %v2026_v32  ;;  %v4203_v31 = vld [vmem:[%s4523_s27 + $0x3a8] ss:$16 sps:$4 sm:$0xff]   ;;  %v4208_v32 = vld [vmem:[%s4523_s27 + $0x3c4] ss:$16 sps:$4 sm:$0xff]  }
 0x11a   : > { %v2028_v39 = vpop.f32.mrf.mxu0  ;;  %v2573_v41 = vpop.f32.mrf.mxu1 }
 0x11b   : > { %3074 = vst [vmem:[%s4692_s14 + $0x18] sm:$0xff] %v2572_v38  ;;  %v3201_v42 = vadd.f32 %v3200_v30, %v2572_v38  ;;  %v3335_v43 = vmul.f32 %v2572_v38, %v2572_v38 }
 0x11c   : > { %v2031_v44 = vpop.f32.mrf.mxu0  ;;  %2222 = vmatmul.mubr.bf16.gmra.mxu0 %v4186_v33  ;;  %v2576_v45 = vpop.f32.mrf.mxu1  ;;  %2767 = vmatmul.mubr.bf16.gmra.mxu1 %v4187_v35 }
 0x11d   : > { %2229 = vmatprep.mubr.bf16.mxu0 %v4188_v36  ;;  %v3462_v46 = vadd.f32 %v3461_v37, %v3335_v43  ;;  %v2577_v47 = vadd.f32 %v2576_v45, %v2031_v44  ;;  %2774 = vmatprep.mubr.bf16.mxu1 %v4190_v40  ;;  %v4211_v36 = vld [vmem:[%s4523_s27 + $0x3cc] ss:$16 sps:$4 sm:$0xff]  }
 0x11e   : > { %v2033_v48 = vpop.f32.mrf.mxu0  ;;  %v2578_v49 = vpop.f32.mrf.mxu1 }
 0x11f   : > { %3075 = vst [vmem:[%s4692_s14 + $0x20] sm:$0xff] %v2577_v47  ;;  %v3202_v50 = vadd.f32 %v3201_v42, %v2577_v47  ;;  %v3336_v51 = vmul.f32 %v2577_v47, %v2577_v47  ;;  %v4206_v49 = vld [vmem:[%s4523_s27 + $0x3c0] ss:$16 sps:$4 sm:$0xff]  }
 0x120   : > { %v2034_v52 = vpop.f32.mrf.mxu0  ;;  %v2579_v54 = vpop.f32.mrf.mxu1 }
 0x121   : > { %v3463_v57 = vadd.f32 %v3462_v46, %v3336_v51  ;;  %v2580_v58 = vadd.f32 %v2579_v54, %v2034_v52  ;;  %v4209_v51 = vld [vmem:[%s4523_s27 + $0x3c8] ss:$16 sps:$4 sm:$0xff]   ;;  %v4214_v52 = vld [vmem:[%s4523_s27 + $0x3e4] ss:$16 sps:$4 sm:$0xff]  }
 0x122   : > { %v2036_v59 = vpop.f32.mrf.mxu0  ;;  %v2581_v61 = vpop.f32.mrf.mxu1 }
 0x123   : > { %3076 = vst [vmem:[%s4692_s14 + $0x28] sm:$0xff] %v2580_v58  ;;  %v3203_v62 = vadd.f32 %v3202_v50, %v2580_v58  ;;  %v3337_v63 = vmul.f32 %v2580_v58, %v2580_v58 }
 0x124   : > { %v2039_v0 = vpop.f32.mrf.mxu0  ;;  %2230 = vmatmul.mubr.bf16.gmra.mxu0 %v4192_v53  ;;  %v2584_v1 = vpop.f32.mrf.mxu1  ;;  %2775 = vmatmul.mubr.bf16.gmra.mxu1 %v4193_v55 }
 0x125   : > { %2237 = vmatprep.mubr.bf16.mxu0 %v4196_v56  ;;  %v3464_v2 = vadd.f32 %v3463_v57, %v3337_v63  ;;  %v2585_v3 = vadd.f32 %v2584_v1, %v2039_v0  ;;  %2782 = vmatprep.mubr.bf16.mxu1 %v4199_v60  ;;  %v4217_v56 = vld [vmem:[%s4523_s27 + $0x3ec] ss:$16 sps:$4 sm:$0xff]  }
 0x126   : > { %v2041_v4 = vpop.f32.mrf.mxu0  ;;  %v2586_v5 = vpop.f32.mrf.mxu1 }
 0x127   : > { %3077 = vst [vmem:[%s4692_s14 + $0x30] sm:$0xff] %v2585_v3  ;;  %v3204_v6 = vadd.f32 %v3203_v62, %v2585_v3  ;;  %v3338_v7 = vmul.f32 %v2585_v3, %v2585_v3  ;;  %v4212_v5 = vld [vmem:[%s4523_s27 + $0x3e0] ss:$16 sps:$4 sm:$0xff]  }
 0x128   : > { %v2042_v8 = vpop.f32.mrf.mxu0  ;;  %v2587_v10 = vpop.f32.mrf.mxu1 }
 0x129   : > { %v3465_v13 = vadd.f32 %v3464_v2, %v3338_v7  ;;  %v2588_v14 = vadd.f32 %v2587_v10, %v2042_v8  ;;  %v4215_v7 = vld [vmem:[%s4523_s27 + $0x3e8] ss:$16 sps:$4 sm:$0xff]   ;;  %v4220_v8 = vld [vmem:[%s4523_s27 + $0x404] ss:$16 sps:$4 sm:$0xff]  }
 0x12a   : > { %v2044_v15 = vpop.f32.mrf.mxu0  ;;  %v2589_v17 = vpop.f32.mrf.mxu1 }
 0x12b   : > { %3078 = vst [vmem:[%s4692_s14 + $0x38] sm:$0xff] %v2588_v14  ;;  %v3205_v18 = vadd.f32 %v3204_v6, %v2588_v14  ;;  %v3339_v19 = vmul.f32 %v2588_v14, %v2588_v14 }
 0x12c   : > { %v2047_v20 = vpop.f32.mrf.mxu0  ;;  %2238 = vmatmul.mubr.bf16.gmra.mxu0 %v4194_v9  ;;  %v2592_v21 = vpop.f32.mrf.mxu1  ;;  %2783 = vmatmul.mubr.bf16.gmra.mxu1 %v4197_v11 }
 0x12d   : > { %2245 = vmatprep.mubr.bf16.mxu0 %v4202_v12  ;;  %v3466_v22 = vadd.f32 %v3465_v13, %v3339_v19  ;;  %v2593_v23 = vadd.f32 %v2592_v21, %v2047_v20  ;;  %2790 = vmatprep.mubr.bf16.mxu1 %v4205_v16  ;;  %v4223_v12 = vld [vmem:[%s4523_s27 + $0x40c] ss:$16 sps:$4 sm:$0xff]  }
 0x12e   : > { %v2049_v24 = vpop.f32.mrf.mxu0  ;;  %v2594_v25 = vpop.f32.mrf.mxu1 }
 0x12f   : > { %3079 = vst [vmem:[%s4692_s14 + $0x40] sm:$0xff] %v2593_v23  ;;  %v3206_v26 = vadd.f32 %v3205_v18, %v2593_v23  ;;  %v3340_v27 = vmul.f32 %v2593_v23, %v2593_v23  ;;  %v4218_v25 = vld [vmem:[%s4523_s27 + $0x400] ss:$16 sps:$4 sm:$0xff]  }
 0x130   : > { %v2050_v28 = vpop.f32.mrf.mxu0  ;;  %v2595_v30 = vpop.f32.mrf.mxu1 }
 0x131   : > { %v3467_v33 = vadd.f32 %v3466_v22, %v3340_v27  ;;  %v2596_v34 = vadd.f32 %v2595_v30, %v2050_v28  ;;  %v4221_v27 = vld [vmem:[%s4523_s27 + $0x408] ss:$16 sps:$4 sm:$0xff]   ;;  %v4226_v28 = vld [vmem:[%s4523_s27 + $0x424] ss:$16 sps:$4 sm:$0xff]  }
 0x132   : > { %v2052_v35 = vpop.f32.mrf.mxu0  ;;  %v2597_v37 = vpop.f32.mrf.mxu1 }
 0x133   : > { %3080 = vst [vmem:[%s4692_s14 + $0x48] sm:$0xff] %v2596_v34  ;;  %v3207_v38 = vadd.f32 %v3206_v26, %v2596_v34  ;;  %v3341_v39 = vmul.f32 %v2596_v34, %v2596_v34 }
 0x134   : > { %v2055_v40 = vpop.f32.mrf.mxu0  ;;  %2246 = vmatmul.mubr.bf16.gmra.mxu0 %v4200_v29  ;;  %v2600_v41 = vpop.f32.mrf.mxu1  ;;  %2791 = vmatmul.mubr.bf16.gmra.mxu1 %v4203_v31 }
 0x135   : > { %2253 = vmatprep.mubr.bf16.mxu0 %v4208_v32  ;;  %v3468_v42 = vadd.f32 %v3467_v33, %v3341_v39  ;;  %v2601_v43 = vadd.f32 %v2600_v41, %v2055_v40  ;;  %2798 = vmatprep.mubr.bf16.mxu1 %v4211_v36  ;;  %v4229_v32 = vld [vmem:[%s4523_s27 + $0x42c] ss:$16 sps:$4 sm:$0xff]  }
 0x136   : > { %v2057_v44 = vpop.f32.mrf.mxu0  ;;  %v2602_v45 = vpop.f32.mrf.mxu1 }
 0x137   : > { %3081 = vst [vmem:[%s4692_s14 + $0x50] sm:$0xff] %v2601_v43  ;;  %v3208_v46 = vadd.f32 %v3207_v38, %v2601_v43  ;;  %v3342_v47 = vmul.f32 %v2601_v43, %v2601_v43  ;;  %v4224_v45 = vld [vmem:[%s4523_s27 + $0x420] ss:$16 sps:$4 sm:$0xff]  }
 0x138   : > { %v2058_v48 = vpop.f32.mrf.mxu0  ;;  %v2603_v50 = vpop.f32.mrf.mxu1 }
 0x139   : > { %v3469_v53 = vadd.f32 %v3468_v42, %v3342_v47  ;;  %v2604_v54 = vadd.f32 %v2603_v50, %v2058_v48  ;;  %v4227_v47 = vld [vmem:[%s4523_s27 + $0x428] ss:$16 sps:$4 sm:$0xff]   ;;  %v4232_v48 = vld [vmem:[%s4523_s27 + $0x444] ss:$16 sps:$4 sm:$0xff]  }
 0x13a   : > { %v2060_v55 = vpop.f32.mrf.mxu0  ;;  %v2605_v57 = vpop.f32.mrf.mxu1 }
 0x13b   : > { %3082 = vst [vmem:[%s4692_s14 + $0x58] sm:$0xff] %v2604_v54  ;;  %v3209_v58 = vadd.f32 %v3208_v46, %v2604_v54  ;;  %v3343_v59 = vmul.f32 %v2604_v54, %v2604_v54 }
 0x13c   : > { %v2063_v60 = vpop.f32.mrf.mxu0  ;;  %2254 = vmatmul.mubr.bf16.gmra.mxu0 %v4206_v49  ;;  %v2608_v61 = vpop.f32.mrf.mxu1  ;;  %2799 = vmatmul.mubr.bf16.gmra.mxu1 %v4209_v51 }
 0x13d   : > { %2261 = vmatprep.mubr.bf16.mxu0 %v4214_v52  ;;  %v3470_v62 = vadd.f32 %v3469_v53, %v3343_v59  ;;  %v2609_v63 = vadd.f32 %v2608_v61, %v2063_v60  ;;  %2806 = vmatprep.mubr.bf16.mxu1 %v4217_v56  ;;  %v4235_v52 = vld [vmem:[%s4523_s27 + $0x44c] ss:$16 sps:$4 sm:$0xff]  }
 0x13e   : > { %v2065_v0 = vpop.f32.mrf.mxu0  ;;  %v2610_v1 = vpop.f32.mrf.mxu1 }
 0x13f   : > { %3083 = vst [vmem:[%s4692_s14 + $0x60] sm:$0xff] %v2609_v63  ;;  %v3210_v2 = vadd.f32 %v3209_v58, %v2609_v63  ;;  %v3344_v3 = vmul.f32 %v2609_v63, %v2609_v63  ;;  %v4230_v1 = vld [vmem:[%s4523_s27 + $0x440] ss:$16 sps:$4 sm:$0xff]  }
 0x140   : > { %v2066_v4 = vpop.f32.mrf.mxu0  ;;  %v2611_v6 = vpop.f32.mrf.mxu1 }
 0x141   : > { %v3471_v9 = vadd.f32 %v3470_v62, %v3344_v3  ;;  %v2612_v10 = vadd.f32 %v2611_v6, %v2066_v4  ;;  %v4233_v3 = vld [vmem:[%s4523_s27 + $0x448] ss:$16 sps:$4 sm:$0xff]   ;;  %v4238_v4 = vld [vmem:[%s4523_s27 + $0x464] ss:$16 sps:$4 sm:$0xff]  }
 0x142   : > { %v2068_v11 = vpop.f32.mrf.mxu0  ;;  %v2613_v13 = vpop.f32.mrf.mxu1 }
 0x143   : > { %3084 = vst [vmem:[%s4692_s14 + $0x68] sm:$0xff] %v2612_v10  ;;  %v3211_v14 = vadd.f32 %v3210_v2, %v2612_v10  ;;  %v3345_v15 = vmul.f32 %v2612_v10, %v2612_v10 }
 0x144   : > { %v2071_v16 = vpop.f32.mrf.mxu0  ;;  %2262 = vmatmul.mubr.bf16.gmra.mxu0 %v4212_v5  ;;  %v2616_v17 = vpop.f32.mrf.mxu1  ;;  %2807 = vmatmul.mubr.bf16.gmra.mxu1 %v4215_v7 }
 0x145   : > { %2269 = vmatprep.mubr.bf16.mxu0 %v4220_v8  ;;  %v3472_v18 = vadd.f32 %v3471_v9, %v3345_v15  ;;  %v2617_v19 = vadd.f32 %v2616_v17, %v2071_v16  ;;  %2814 = vmatprep.mubr.bf16.mxu1 %v4223_v12  ;;  %v4241_v8 = vld [vmem:[%s4523_s27 + $0x46c] ss:$16 sps:$4 sm:$0xff]  }
 0x146   : > { %v2073_v20 = vpop.f32.mrf.mxu0  ;;  %v2618_v21 = vpop.f32.mrf.mxu1 }
 0x147   : > { %3085 = vst [vmem:[%s4692_s14 + $0x70] sm:$0xff] %v2617_v19  ;;  %v3212_v22 = vadd.f32 %v3211_v14, %v2617_v19  ;;  %v3346_v23 = vmul.f32 %v2617_v19, %v2617_v19  ;;  %v4236_v21 = vld [vmem:[%s4523_s27 + $0x460] ss:$16 sps:$4 sm:$0xff]  }
 0x148   : > { %v2074_v24 = vpop.f32.mrf.mxu0  ;;  %v2619_v26 = vpop.f32.mrf.mxu1 }
 0x149   : > { %v3473_v29 = vadd.f32 %v3472_v18, %v3346_v23  ;;  %v2620_v30 = vadd.f32 %v2619_v26, %v2074_v24  ;;  %v4239_v23 = vld [vmem:[%s4523_s27 + $0x468] ss:$16 sps:$4 sm:$0xff]   ;;  %v4244_v24 = vld [vmem:[%s4523_s27 + $0x484] ss:$16 sps:$4 sm:$0xff]  }
 0x14a   : > { %v2076_v31 = vpop.f32.mrf.mxu0  ;;  %v2621_v33 = vpop.f32.mrf.mxu1 }
 0x14b   : > { %3086 = vst [vmem:[%s4692_s14 + $0x78] sm:$0xff] %v2620_v30  ;;  %v3213_v34 = vadd.f32 %v3212_v22, %v2620_v30  ;;  %v3347_v35 = vmul.f32 %v2620_v30, %v2620_v30 }
 0x14c   : > { %v2079_v36 = vpop.f32.mrf.mxu0  ;;  %2270 = vmatmul.mubr.bf16.gmra.mxu0 %v4218_v25  ;;  %v2624_v37 = vpop.f32.mrf.mxu1  ;;  %2815 = vmatmul.mubr.bf16.gmra.mxu1 %v4221_v27 }
 0x14d   : > { %2277 = vmatprep.mubr.bf16.mxu0 %v4226_v28  ;;  %v3474_v38 = vadd.f32 %v3473_v29, %v3347_v35  ;;  %v2625_v39 = vadd.f32 %v2624_v37, %v2079_v36  ;;  %2822 = vmatprep.mubr.bf16.mxu1 %v4229_v32  ;;  %v4247_v28 = vld [vmem:[%s4523_s27 + $0x48c] ss:$16 sps:$4 sm:$0xff]  }
 0x14e   : > { %v2081_v40 = vpop.f32.mrf.mxu0  ;;  %v2626_v41 = vpop.f32.mrf.mxu1 }
 0x14f   : > { %3087 = vst [vmem:[%s4692_s14 + $0x80] sm:$0xff] %v2625_v39  ;;  %v3214_v42 = vadd.f32 %v3213_v34, %v2625_v39  ;;  %v3348_v43 = vmul.f32 %v2625_v39, %v2625_v39  ;;  %v4242_v41 = vld [vmem:[%s4523_s27 + $0x480] ss:$16 sps:$4 sm:$0xff]  }
 0x150   : > { %v2082_v44 = vpop.f32.mrf.mxu0  ;;  %v2627_v46 = vpop.f32.mrf.mxu1 }
 0x151   : > { %v3475_v49 = vadd.f32 %v3474_v38, %v3348_v43  ;;  %v2628_v50 = vadd.f32 %v2627_v46, %v2082_v44  ;;  %v4245_v43 = vld [vmem:[%s4523_s27 + $0x488] ss:$16 sps:$4 sm:$0xff]   ;;  %v4250_v44 = vld [vmem:[%s4523_s27 + $0x4a4] ss:$16 sps:$4 sm:$0xff]  }
 0x152   : > { %v2084_v51 = vpop.f32.mrf.mxu0  ;;  %v2629_v53 = vpop.f32.mrf.mxu1 }
 0x153   : > { %3088 = vst [vmem:[%s4692_s14 + $0x88] sm:$0xff] %v2628_v50  ;;  %v3215_v54 = vadd.f32 %v3214_v42, %v2628_v50  ;;  %v3349_v55 = vmul.f32 %v2628_v50, %v2628_v50 }
 0x154   : > { %v2087_v56 = vpop.f32.mrf.mxu0  ;;  %2278 = vmatmul.mubr.bf16.gmra.mxu0 %v4224_v45  ;;  %v2632_v57 = vpop.f32.mrf.mxu1  ;;  %2823 = vmatmul.mubr.bf16.gmra.mxu1 %v4227_v47 }
 0x155   : > { %2285 = vmatprep.mubr.bf16.mxu0 %v4232_v48  ;;  %v3476_v58 = vadd.f32 %v3475_v49, %v3349_v55  ;;  %v2633_v59 = vadd.f32 %v2632_v57, %v2087_v56  ;;  %2830 = vmatprep.mubr.bf16.mxu1 %v4235_v52  ;;  %v4253_v48 = vld [vmem:[%s4523_s27 + $0x4ac] ss:$16 sps:$4 sm:$0xff]  }
 0x156   : > { %v2089_v60 = vpop.f32.mrf.mxu0  ;;  %v2634_v61 = vpop.f32.mrf.mxu1 }
 0x157   : > { %3089 = vst [vmem:[%s4692_s14 + $0x90] sm:$0xff] %v2633_v59  ;;  %v3216_v62 = vadd.f32 %v3215_v54, %v2633_v59  ;;  %v3350_v63 = vmul.f32 %v2633_v59, %v2633_v59  ;;  %v4248_v61 = vld [vmem:[%s4523_s27 + $0x4a0] ss:$16 sps:$4 sm:$0xff]  }
 0x158   : > { %v2090_v0 = vpop.f32.mrf.mxu0  ;;  %v2635_v2 = vpop.f32.mrf.mxu1 }
 0x159   : > { %v3477_v5 = vadd.f32 %v3476_v58, %v3350_v63  ;;  %v2636_v6 = vadd.f32 %v2635_v2, %v2090_v0  ;;  %v4251_v63 = vld [vmem:[%s4523_s27 + $0x4a8] ss:$16 sps:$4 sm:$0xff]   ;;  %v4256_v0 = vld [vmem:[%s4523_s27 + $0x4c4] ss:$16 sps:$4 sm:$0xff]  }
 0x15a   : > { %v2092_v7 = vpop.f32.mrf.mxu0  ;;  %v2637_v9 = vpop.f32.mrf.mxu1 }
 0x15b   : > { %3090 = vst [vmem:[%s4692_s14 + $0x98] sm:$0xff] %v2636_v6  ;;  %v3217_v10 = vadd.f32 %v3216_v62, %v2636_v6  ;;  %v3351_v11 = vmul.f32 %v2636_v6, %v2636_v6 }
 0x15c   : > { %v2095_v12 = vpop.f32.mrf.mxu0  ;;  %2286 = vmatmul.mubr.bf16.gmra.mxu0 %v4230_v1  ;;  %v2640_v13 = vpop.f32.mrf.mxu1  ;;  %2831 = vmatmul.mubr.bf16.gmra.mxu1 %v4233_v3 }
 0x15d   : > { %2293 = vmatprep.mubr.bf16.mxu0 %v4238_v4  ;;  %v3478_v14 = vadd.f32 %v3477_v5, %v3351_v11  ;;  %v2641_v15 = vadd.f32 %v2640_v13, %v2095_v12  ;;  %2838 = vmatprep.mubr.bf16.mxu1 %v4241_v8  ;;  %v4259_v4 = vld [vmem:[%s4523_s27 + $0x4cc] ss:$16 sps:$4 sm:$0xff]  }
 0x15e   : > { %v2097_v16 = vpop.f32.mrf.mxu0  ;;  %v2642_v17 = vpop.f32.mrf.mxu1 }
 0x15f   : > { %3091 = vst [vmem:[%s4692_s14 + $0xa0] sm:$0xff] %v2641_v15  ;;  %v3218_v18 = vadd.f32 %v3217_v10, %v2641_v15  ;;  %v3352_v19 = vmul.f32 %v2641_v15, %v2641_v15  ;;  %v4254_v17 = vld [vmem:[%s4523_s27 + $0x4c0] ss:$16 sps:$4 sm:$0xff]  }
 0x160   : > { %v2098_v20 = vpop.f32.mrf.mxu0  ;;  %v2643_v22 = vpop.f32.mrf.mxu1 }
 0x161   : > { %v3479_v25 = vadd.f32 %v3478_v14, %v3352_v19  ;;  %v2644_v26 = vadd.f32 %v2643_v22, %v2098_v20  ;;  %v4257_v19 = vld [vmem:[%s4523_s27 + $0x4c8] ss:$16 sps:$4 sm:$0xff]   ;;  %v4262_v20 = vld [vmem:[%s4523_s27 + $0x4e4] ss:$16 sps:$4 sm:$0xff]  }
 0x162   : > { %v2100_v27 = vpop.f32.mrf.mxu0  ;;  %v2645_v29 = vpop.f32.mrf.mxu1 }
 0x163   : > { %3092 = vst [vmem:[%s4692_s14 + $0xa8] sm:$0xff] %v2644_v26  ;;  %v3219_v30 = vadd.f32 %v3218_v18, %v2644_v26  ;;  %v3353_v31 = vmul.f32 %v2644_v26, %v2644_v26 }
 0x164   : > { %v2103_v32 = vpop.f32.mrf.mxu0  ;;  %2294 = vmatmul.mubr.bf16.gmra.mxu0 %v4236_v21  ;;  %v2648_v33 = vpop.f32.mrf.mxu1  ;;  %2839 = vmatmul.mubr.bf16.gmra.mxu1 %v4239_v23 }
 0x165   : > { %2301 = vmatprep.mubr.bf16.mxu0 %v4244_v24  ;;  %v3480_v34 = vadd.f32 %v3479_v25, %v3353_v31  ;;  %v2649_v35 = vadd.f32 %v2648_v33, %v2103_v32  ;;  %2846 = vmatprep.mubr.bf16.mxu1 %v4247_v28  ;;  %v4265_v24 = vld [vmem:[%s4523_s27 + $0x4ec] ss:$16 sps:$4 sm:$0xff]  }
 0x166   : > { %v2105_v36 = vpop.f32.mrf.mxu0  ;;  %v2650_v37 = vpop.f32.mrf.mxu1 }
 0x167   : > { %3093 = vst [vmem:[%s4692_s14 + $0xb0] sm:$0xff] %v2649_v35  ;;  %v3220_v38 = vadd.f32 %v3219_v30, %v2649_v35  ;;  %v3354_v39 = vmul.f32 %v2649_v35, %v2649_v35  ;;  %v4260_v37 = vld [vmem:[%s4523_s27 + $0x4e0] ss:$16 sps:$4 sm:$0xff]  }
 0x168   : > { %v2106_v40 = vpop.f32.mrf.mxu0  ;;  %v2651_v42 = vpop.f32.mrf.mxu1 }
 0x169   : > { %v3481_v45 = vadd.f32 %v3480_v34, %v3354_v39  ;;  %v2652_v46 = vadd.f32 %v2651_v42, %v2106_v40  ;;  %v4263_v39 = vld [vmem:[%s4523_s27 + $0x4e8] ss:$16 sps:$4 sm:$0xff]   ;;  %v4268_v40 = vld [vmem:[%s4523_s27 + $0x504] ss:$16 sps:$4 sm:$0xff]  }
 0x16a   : > { %v2108_v47 = vpop.f32.mrf.mxu0  ;;  %v2653_v49 = vpop.f32.mrf.mxu1 }
 0x16b   : > { %3094 = vst [vmem:[%s4692_s14 + $0xb8] sm:$0xff] %v2652_v46  ;;  %v3221_v50 = vadd.f32 %v3220_v38, %v2652_v46  ;;  %v3355_v51 = vmul.f32 %v2652_v46, %v2652_v46 }
 0x16c   : > { %v2111_v52 = vpop.f32.mrf.mxu0  ;;  %2302 = vmatmul.mubr.bf16.gmra.mxu0 %v4242_v41  ;;  %v2656_v53 = vpop.f32.mrf.mxu1  ;;  %2847 = vmatmul.mubr.bf16.gmra.mxu1 %v4245_v43 }
 0x16d   : > { %2309 = vmatprep.mubr.bf16.mxu0 %v4250_v44  ;;  %v3482_v54 = vadd.f32 %v3481_v45, %v3355_v51  ;;  %v2657_v55 = vadd.f32 %v2656_v53, %v2111_v52  ;;  %2854 = vmatprep.mubr.bf16.mxu1 %v4253_v48  ;;  %v4271_v44 = vld [vmem:[%s4523_s27 + $0x50c] ss:$16 sps:$4 sm:$0xff]  }
 0x16e   : > { %v2113_v56 = vpop.f32.mrf.mxu0  ;;  %v2658_v57 = vpop.f32.mrf.mxu1 }
 0x16f   : > { %3095 = vst [vmem:[%s4692_s14 + $0xc0] sm:$0xff] %v2657_v55  ;;  %v3222_v58 = vadd.f32 %v3221_v50, %v2657_v55  ;;  %v3356_v59 = vmul.f32 %v2657_v55, %v2657_v55  ;;  %v4266_v57 = vld [vmem:[%s4523_s27 + $0x500] ss:$16 sps:$4 sm:$0xff]  }
 0x170   : > { %v2114_v60 = vpop.f32.mrf.mxu0  ;;  %v2659_v62 = vpop.f32.mrf.mxu1 }
 0x171   : > { %v3483_v1 = vadd.f32 %v3482_v54, %v3356_v59  ;;  %v2660_v2 = vadd.f32 %v2659_v62, %v2114_v60  ;;  %v4269_v59 = vld [vmem:[%s4523_s27 + $0x508] ss:$16 sps:$4 sm:$0xff]   ;;  %v4274_v60 = vld [vmem:[%s4523_s27 + $0x524] ss:$16 sps:$4 sm:$0xff]  }
 0x172   : > { %v2116_v3 = vpop.f32.mrf.mxu0  ;;  %v2661_v5 = vpop.f32.mrf.mxu1 }
 0x173   : > { %3096 = vst [vmem:[%s4692_s14 + $0xc8] sm:$0xff] %v2660_v2  ;;  %v3223_v6 = vadd.f32 %v3222_v58, %v2660_v2  ;;  %v3357_v7 = vmul.f32 %v2660_v2, %v2660_v2 }
 0x174   : > { %v2119_v8 = vpop.f32.mrf.mxu0  ;;  %2310 = vmatmul.mubr.bf16.gmra.mxu0 %v4248_v61  ;;  %v2664_v9 = vpop.f32.mrf.mxu1  ;;  %2855 = vmatmul.mubr.bf16.gmra.mxu1 %v4251_v63 }
 0x175   : > { %2317 = vmatprep.mubr.bf16.mxu0 %v4256_v0  ;;  %v3484_v10 = vadd.f32 %v3483_v1, %v3357_v7  ;;  %v2665_v11 = vadd.f32 %v2664_v9, %v2119_v8  ;;  %2862 = vmatprep.mubr.bf16.mxu1 %v4259_v4  ;;  %v4277_v0 = vld [vmem:[%s4523_s27 + $0x52c] ss:$16 sps:$4 sm:$0xff]  }
 0x176   : > { %v2121_v12 = vpop.f32.mrf.mxu0  ;;  %v2666_v13 = vpop.f32.mrf.mxu1 }
 0x177   : > { %3097 = vst [vmem:[%s4692_s14 + $0xd0] sm:$0xff] %v2665_v11  ;;  %v3224_v14 = vadd.f32 %v3223_v6, %v2665_v11  ;;  %v3358_v15 = vmul.f32 %v2665_v11, %v2665_v11  ;;  %v4272_v13 = vld [vmem:[%s4523_s27 + $0x520] ss:$16 sps:$4 sm:$0xff]  }
 0x178   : > { %v2122_v16 = vpop.f32.mrf.mxu0  ;;  %v2667_v18 = vpop.f32.mrf.mxu1 }
 0x179   : > { %v3485_v21 = vadd.f32 %v3484_v10, %v3358_v15  ;;  %v2668_v22 = vadd.f32 %v2667_v18, %v2122_v16  ;;  %v4275_v15 = vld [vmem:[%s4523_s27 + $0x528] ss:$16 sps:$4 sm:$0xff]   ;;  %v4280_v16 = vld [vmem:[%s4523_s27 + $0x544] ss:$16 sps:$4 sm:$0xff]  }
 0x17a   : > { %v2124_v23 = vpop.f32.mrf.mxu0  ;;  %v2669_v25 = vpop.f32.mrf.mxu1 }
 0x17b   : > { %3098 = vst [vmem:[%s4692_s14 + $0xd8] sm:$0xff] %v2668_v22  ;;  %v3225_v26 = vadd.f32 %v3224_v14, %v2668_v22  ;;  %v3359_v27 = vmul.f32 %v2668_v22, %v2668_v22 }
 0x17c   : > { %v2127_v28 = vpop.f32.mrf.mxu0  ;;  %2318 = vmatmul.mubr.bf16.gmra.mxu0 %v4254_v17  ;;  %v2672_v29 = vpop.f32.mrf.mxu1  ;;  %2863 = vmatmul.mubr.bf16.gmra.mxu1 %v4257_v19 }
 0x17d   : > { %2325 = vmatprep.mubr.bf16.mxu0 %v4262_v20  ;;  %v3486_v30 = vadd.f32 %v3485_v21, %v3359_v27  ;;  %v2673_v31 = vadd.f32 %v2672_v29, %v2127_v28  ;;  %2870 = vmatprep.mubr.bf16.mxu1 %v4265_v24  ;;  %v4283_v20 = vld [vmem:[%s4523_s27 + $0x54c] ss:$16 sps:$4 sm:$0xff]  }
 0x17e   : > { %v2129_v32 = vpop.f32.mrf.mxu0  ;;  %v2674_v33 = vpop.f32.mrf.mxu1 }
 0x17f   : > { %3099 = vst [vmem:[%s4692_s14 + $0xe0] sm:$0xff] %v2673_v31  ;;  %v3226_v34 = vadd.f32 %v3225_v26, %v2673_v31  ;;  %v3360_v35 = vmul.f32 %v2673_v31, %v2673_v31  ;;  %v4278_v33 = vld [vmem:[%s4523_s27 + $0x540] ss:$16 sps:$4 sm:$0xff]  }
 0x180   : > { %v2130_v36 = vpop.f32.mrf.mxu0  ;;  %v2675_v38 = vpop.f32.mrf.mxu1 }
 0x181   : > { %v3487_v41 = vadd.f32 %v3486_v30, %v3360_v35  ;;  %v2676_v42 = vadd.f32 %v2675_v38, %v2130_v36  ;;  %v4281_v35 = vld [vmem:[%s4523_s27 + $0x548] ss:$16 sps:$4 sm:$0xff]   ;;  %v4286_v36 = vld [vmem:[%s4523_s27 + $0x564] ss:$16 sps:$4 sm:$0xff]  }
 0x182   : > { %v2132_v43 = vpop.f32.mrf.mxu0  ;;  %v2677_v45 = vpop.f32.mrf.mxu1 }
 0x183   : > { %3100 = vst [vmem:[%s4692_s14 + $0xe8] sm:$0xff] %v2676_v42  ;;  %v3227_v46 = vadd.f32 %v3226_v34, %v2676_v42  ;;  %v3361_v47 = vmul.f32 %v2676_v42, %v2676_v42 }
 0x184   : > { %v2135_v48 = vpop.f32.mrf.mxu0  ;;  %2326 = vmatmul.mubr.bf16.gmra.mxu0 %v4260_v37  ;;  %v2680_v49 = vpop.f32.mrf.mxu1  ;;  %2871 = vmatmul.mubr.bf16.gmra.mxu1 %v4263_v39 }
 0x185   : > { %2333 = vmatprep.mubr.bf16.mxu0 %v4268_v40  ;;  %v3488_v50 = vadd.f32 %v3487_v41, %v3361_v47  ;;  %v2681_v51 = vadd.f32 %v2680_v49, %v2135_v48  ;;  %2878 = vmatprep.mubr.bf16.mxu1 %v4271_v44  ;;  %v4289_v40 = vld [vmem:[%s4523_s27 + $0x56c] ss:$16 sps:$4 sm:$0xff]  }
 0x186   : > { %v2137_v52 = vpop.f32.mrf.mxu0  ;;  %v2682_v53 = vpop.f32.mrf.mxu1 }
 0x187   : > { %3101 = vst [vmem:[%s4692_s14 + $0xf0] sm:$0xff] %v2681_v51  ;;  %v3228_v54 = vadd.f32 %v3227_v46, %v2681_v51  ;;  %v3362_v55 = vmul.f32 %v2681_v51, %v2681_v51  ;;  %v4284_v53 = vld [vmem:[%s4523_s27 + $0x560] ss:$16 sps:$4 sm:$0xff]  }
 0x188   : > { %v2138_v56 = vpop.f32.mrf.mxu0  ;;  %v2683_v58 = vpop.f32.mrf.mxu1 }
 0x189   : > { %v3489_v61 = vadd.f32 %v3488_v50, %v3362_v55  ;;  %v2684_v62 = vadd.f32 %v2683_v58, %v2138_v56  ;;  %v4287_v55 = vld [vmem:[%s4523_s27 + $0x568] ss:$16 sps:$4 sm:$0xff]   ;;  %v4292_v56 = vld [vmem:[%s4523_s27 + $0x584] ss:$16 sps:$4 sm:$0xff]  }
 0x18a   : > { %v2140_v63 = vpop.f32.mrf.mxu0  ;;  %v2685_v1 = vpop.f32.mrf.mxu1 }
 0x18b   : > { %3102 = vst [vmem:[%s4692_s14 + $0xf8] sm:$0xff] %v2684_v62  ;;  %v3229_v2 = vadd.f32 %v3228_v54, %v2684_v62  ;;  %v3363_v3 = vmul.f32 %v2684_v62, %v2684_v62 }
 0x18c   : > { %v2143_v4 = vpop.f32.mrf.mxu0  ;;  %2334 = vmatmul.mubr.bf16.gmra.mxu0 %v4266_v57  ;;  %v2688_v5 = vpop.f32.mrf.mxu1  ;;  %2879 = vmatmul.mubr.bf16.gmra.mxu1 %v4269_v59 }
 0x18d   : > { %2341 = vmatprep.mubr.bf16.mxu0 %v4274_v60  ;;  %v3490_v6 = vadd.f32 %v3489_v61, %v3363_v3  ;;  %v2689_v7 = vadd.f32 %v2688_v5, %v2143_v4  ;;  %2886 = vmatprep.mubr.bf16.mxu1 %v4277_v0  ;;  %v4295_v60 = vld [vmem:[%s4523_s27 + $0x58c] ss:$16 sps:$4 sm:$0xff]  }
 0x18e   : > { %v2145_v8 = vpop.f32.mrf.mxu0  ;;  %v2690_v9 = vpop.f32.mrf.mxu1 }
 0x18f   : > { %3103 = vst [vmem:[%s4692_s14 + $0x100] sm:$0xff] %v2689_v7  ;;  %v3230_v10 = vadd.f32 %v3229_v2, %v2689_v7  ;;  %v3364_v11 = vmul.f32 %v2689_v7, %v2689_v7  ;;  %v4290_v9 = vld [vmem:[%s4523_s27 + $0x580] ss:$16 sps:$4 sm:$0xff]  }
 0x190   : > { %v2146_v12 = vpop.f32.mrf.mxu0  ;;  %v2691_v14 = vpop.f32.mrf.mxu1 }
 0x191   : > { %v3491_v17 = vadd.f32 %v3490_v6, %v3364_v11  ;;  %v2692_v18 = vadd.f32 %v2691_v14, %v2146_v12  ;;  %v4293_v11 = vld [vmem:[%s4523_s27 + $0x588] ss:$16 sps:$4 sm:$0xff]   ;;  %v4298_v12 = vld [vmem:[%s4523_s27 + $0x5a4] ss:$16 sps:$4 sm:$0xff]  }
 0x192   : > { %v2148_v19 = vpop.f32.mrf.mxu0  ;;  %v2693_v21 = vpop.f32.mrf.mxu1 }
 0x193   : > { %3104 = vst [vmem:[%s4692_s14 + $0x108] sm:$0xff] %v2692_v18  ;;  %v3231_v22 = vadd.f32 %v3230_v10, %v2692_v18  ;;  %v3365_v23 = vmul.f32 %v2692_v18, %v2692_v18 }
 0x194   : > { %v2151_v24 = vpop.f32.mrf.mxu0  ;;  %2342 = vmatmul.mubr.bf16.gmra.mxu0 %v4272_v13  ;;  %v2696_v25 = vpop.f32.mrf.mxu1  ;;  %2887 = vmatmul.mubr.bf16.gmra.mxu1 %v4275_v15 }
 0x195   : > { %2349 = vmatprep.mubr.bf16.mxu0 %v4280_v16  ;;  %v3492_v26 = vadd.f32 %v3491_v17, %v3365_v23  ;;  %v2697_v27 = vadd.f32 %v2696_v25, %v2151_v24  ;;  %2894 = vmatprep.mubr.bf16.mxu1 %v4283_v20  ;;  %v4301_v16 = vld [vmem:[%s4523_s27 + $0x5ac] ss:$16 sps:$4 sm:$0xff]  }
 0x196   : > { %v2153_v28 = vpop.f32.mrf.mxu0  ;;  %v2698_v29 = vpop.f32.mrf.mxu1 }
 0x197   : > { %3105 = vst [vmem:[%s4692_s14 + $0x110] sm:$0xff] %v2697_v27  ;;  %v3232_v30 = vadd.f32 %v3231_v22, %v2697_v27  ;;  %v3366_v31 = vmul.f32 %v2697_v27, %v2697_v27  ;;  %v4296_v29 = vld [vmem:[%s4523_s27 + $0x5a0] ss:$16 sps:$4 sm:$0xff]  }
 0x198   : > { %v2154_v32 = vpop.f32.mrf.mxu0  ;;  %v2699_v34 = vpop.f32.mrf.mxu1 }
 0x199   : > { %v3493_v37 = vadd.f32 %v3492_v26, %v3366_v31  ;;  %v2700_v38 = vadd.f32 %v2699_v34, %v2154_v32  ;;  %v4299_v31 = vld [vmem:[%s4523_s27 + $0x5a8] ss:$16 sps:$4 sm:$0xff]   ;;  %v4304_v32 = vld [vmem:[%s4523_s27 + $0x5c4] ss:$16 sps:$4 sm:$0xff]  }
 0x19a   : > { %v2156_v39 = vpop.f32.mrf.mxu0  ;;  %v2701_v41 = vpop.f32.mrf.mxu1 }
 0x19b   : > { %3106 = vst [vmem:[%s4692_s14 + $0x118] sm:$0xff] %v2700_v38  ;;  %v3233_v42 = vadd.f32 %v3232_v30, %v2700_v38  ;;  %v3367_v43 = vmul.f32 %v2700_v38, %v2700_v38 }
 0x19c   : > { %v2159_v44 = vpop.f32.mrf.mxu0  ;;  %2350 = vmatmul.mubr.bf16.gmra.mxu0 %v4278_v33  ;;  %v2704_v45 = vpop.f32.mrf.mxu1  ;;  %2895 = vmatmul.mubr.bf16.gmra.mxu1 %v4281_v35 }
 0x19d   : > { %2357 = vmatprep.mubr.bf16.mxu0 %v4286_v36  ;;  %v3494_v46 = vadd.f32 %v3493_v37, %v3367_v43  ;;  %v2705_v47 = vadd.f32 %v2704_v45, %v2159_v44  ;;  %2902 = vmatprep.mubr.bf16.mxu1 %v4289_v40  ;;  %v4307_v36 = vld [vmem:[%s4523_s27 + $0x5cc] ss:$16 sps:$4 sm:$0xff]  }
 0x19e   : > { %v2161_v48 = vpop.f32.mrf.mxu0  ;;  %v2706_v49 = vpop.f32.mrf.mxu1 }
 0x19f   : > { %3107 = vst [vmem:[%s4692_s14 + $0x120] sm:$0xff] %v2705_v47  ;;  %v3234_v50 = vadd.f32 %v3233_v42, %v2705_v47  ;;  %v3368_v51 = vmul.f32 %v2705_v47, %v2705_v47  ;;  %v4302_v49 = vld [vmem:[%s4523_s27 + $0x5c0] ss:$16 sps:$4 sm:$0xff]  }
 0x1a0   : > { %v2162_v52 = vpop.f32.mrf.mxu0  ;;  %v2707_v54 = vpop.f32.mrf.mxu1 }
 0x1a1   : > { %v3495_v57 = vadd.f32 %v3494_v46, %v3368_v51  ;;  %v2708_v58 = vadd.f32 %v2707_v54, %v2162_v52  ;;  %v4305_v51 = vld [vmem:[%s4523_s27 + $0x5c8] ss:$16 sps:$4 sm:$0xff]   ;;  %v4310_v52 = vld [vmem:[%s4523_s27 + $0x5e4] ss:$16 sps:$4 sm:$0xff]  }
 0x1a2   : > { %v2164_v59 = vpop.f32.mrf.mxu0  ;;  %v2709_v61 = vpop.f32.mrf.mxu1 }
 0x1a3   : > { %3108 = vst [vmem:[%s4692_s14 + $0x128] sm:$0xff] %v2708_v58  ;;  %v3235_v62 = vadd.f32 %v3234_v50, %v2708_v58  ;;  %v3369_v63 = vmul.f32 %v2708_v58, %v2708_v58 }
 0x1a4   : > { %v2167_v0 = vpop.f32.mrf.mxu0  ;;  %2358 = vmatmul.mubr.bf16.gmra.mxu0 %v4284_v53  ;;  %v2712_v1 = vpop.f32.mrf.mxu1  ;;  %2903 = vmatmul.mubr.bf16.gmra.mxu1 %v4287_v55 }
 0x1a5   : > { %2365 = vmatprep.mubr.bf16.mxu0 %v4292_v56  ;;  %v3496_v2 = vadd.f32 %v3495_v57, %v3369_v63  ;;  %v2713_v3 = vadd.f32 %v2712_v1, %v2167_v0  ;;  %2910 = vmatprep.mubr.bf16.mxu1 %v4295_v60  ;;  %v4313_v56 = vld [vmem:[%s4523_s27 + $0x5ec] ss:$16 sps:$4 sm:$0xff]  }
 0x1a6   : > { %v2169_v4 = vpop.f32.mrf.mxu0  ;;  %v2714_v5 = vpop.f32.mrf.mxu1 }
 0x1a7   : > { %3109 = vst [vmem:[%s4692_s14 + $0x130] sm:$0xff] %v2713_v3  ;;  %v3236_v6 = vadd.f32 %v3235_v62, %v2713_v3  ;;  %v3370_v7 = vmul.f32 %v2713_v3, %v2713_v3  ;;  %v4308_v5 = vld [vmem:[%s4523_s27 + $0x5e0] ss:$16 sps:$4 sm:$0xff]  }
 0x1a8   : > { %v2170_v8 = vpop.f32.mrf.mxu0  ;;  %v2715_v10 = vpop.f32.mrf.mxu1 }
 0x1a9   : > { %v3497_v13 = vadd.f32 %v3496_v2, %v3370_v7  ;;  %v2716_v14 = vadd.f32 %v2715_v10, %v2170_v8  ;;  %v4311_v7 = vld [vmem:[%s4523_s27 + $0x5e8] ss:$16 sps:$4 sm:$0xff]   ;;  %v4316_v8 = vld [vmem:[%s4523_s27 + $0x604] ss:$16 sps:$4 sm:$0xff]  }
 0x1aa   : > { %v2172_v15 = vpop.f32.mrf.mxu0  ;;  %v2717_v17 = vpop.f32.mrf.mxu1 }
 0x1ab   : > { %3110 = vst [vmem:[%s4692_s14 + $0x138] sm:$0xff] %v2716_v14  ;;  %v3237_v18 = vadd.f32 %v3236_v6, %v2716_v14  ;;  %v3371_v19 = vmul.f32 %v2716_v14, %v2716_v14 }
 0x1ac   : > { %v2175_v20 = vpop.f32.mrf.mxu0  ;;  %2366 = vmatmul.mubr.bf16.gmra.mxu0 %v4290_v9  ;;  %v2720_v21 = vpop.f32.mrf.mxu1  ;;  %2911 = vmatmul.mubr.bf16.gmra.mxu1 %v4293_v11 }
 0x1ad   : > { %2373 = vmatprep.mubr.bf16.mxu0 %v4298_v12  ;;  %v3498_v22 = vadd.f32 %v3497_v13, %v3371_v19  ;;  %v2721_v23 = vadd.f32 %v2720_v21, %v2175_v20  ;;  %2918 = vmatprep.mubr.bf16.mxu1 %v4301_v16  ;;  %v4319_v12 = vld [vmem:[%s4523_s27 + $0x60c] ss:$16 sps:$4 sm:$0xff]  }
 0x1ae   : > { %v2177_v24 = vpop.f32.mrf.mxu0  ;;  %v2722_v25 = vpop.f32.mrf.mxu1 }
 0x1af   : > { %3111 = vst [vmem:[%s4692_s14 + $0x140] sm:$0xff] %v2721_v23  ;;  %v3238_v26 = vadd.f32 %v3237_v18, %v2721_v23  ;;  %v3372_v27 = vmul.f32 %v2721_v23, %v2721_v23  ;;  %v4314_v25 = vld [vmem:[%s4523_s27 + $0x600] ss:$16 sps:$4 sm:$0xff]  }
 0x1b0   : > { %v2178_v28 = vpop.f32.mrf.mxu0  ;;  %v2723_v30 = vpop.f32.mrf.mxu1 }
 0x1b1   : > { %v3499_v33 = vadd.f32 %v3498_v22, %v3372_v27  ;;  %v2724_v34 = vadd.f32 %v2723_v30, %v2178_v28  ;;  %v4317_v27 = vld [vmem:[%s4523_s27 + $0x608] ss:$16 sps:$4 sm:$0xff]   ;;  %v4322_v28 = vld [vmem:[%s4523_s27 + $0x624] ss:$16 sps:$4 sm:$0xff]  }
 0x1b2   : > { %v2180_v35 = vpop.f32.mrf.mxu0  ;;  %v2725_v37 = vpop.f32.mrf.mxu1 }
 0x1b3   : > { %3112 = vst [vmem:[%s4692_s14 + $0x148] sm:$0xff] %v2724_v34  ;;  %v3239_v38 = vadd.f32 %v3238_v26, %v2724_v34  ;;  %v3373_v39 = vmul.f32 %v2724_v34, %v2724_v34 }
 0x1b4   : > { %v2183_v40 = vpop.f32.mrf.mxu0  ;;  %2374 = vmatmul.mubr.bf16.gmra.mxu0 %v4296_v29  ;;  %v2728_v41 = vpop.f32.mrf.mxu1  ;;  %2919 = vmatmul.mubr.bf16.gmra.mxu1 %v4299_v31 }
 0x1b5   : > { %2381 = vmatprep.mubr.bf16.mxu0 %v4304_v32  ;;  %v3500_v42 = vadd.f32 %v3499_v33, %v3373_v39  ;;  %v2729_v43 = vadd.f32 %v2728_v41, %v2183_v40  ;;  %2926 = vmatprep.mubr.bf16.mxu1 %v4307_v36  ;;  %v4325_v32 = vld [vmem:[%s4523_s27 + $0x62c] ss:$16 sps:$4 sm:$0xff]  }
 0x1b6   : > { %v2185_v44 = vpop.f32.mrf.mxu0  ;;  %v2730_v45 = vpop.f32.mrf.mxu1 }
 0x1b7   : > { %3113 = vst [vmem:[%s4692_s14 + $0x150] sm:$0xff] %v2729_v43  ;;  %v3240_v46 = vadd.f32 %v3239_v38, %v2729_v43  ;;  %v3374_v47 = vmul.f32 %v2729_v43, %v2729_v43  ;;  %v4320_v45 = vld [vmem:[%s4523_s27 + $0x620] ss:$16 sps:$4 sm:$0xff]  }
 0x1b8   : > { %v2186_v48 = vpop.f32.mrf.mxu0  ;;  %v2731_v50 = vpop.f32.mrf.mxu1 }
 0x1b9   : > { %v3501_v53 = vadd.f32 %v3500_v42, %v3374_v47  ;;  %v2732_v54 = vadd.f32 %v2731_v50, %v2186_v48  ;;  %v4323_v47 = vld [vmem:[%s4523_s27 + $0x628] ss:$16 sps:$4 sm:$0xff]   ;;  %v4328_v48 = vld [vmem:[%s4523_s27 + $0x644] ss:$16 sps:$4 sm:$0xff]  }
 0x1ba   : > { %v2188_v55 = vpop.f32.mrf.mxu0  ;;  %v2733_v57 = vpop.f32.mrf.mxu1 }
 0x1bb   : > { %3114 = vst [vmem:[%s4692_s14 + $0x158] sm:$0xff] %v2732_v54  ;;  %v3241_v58 = vadd.f32 %v3240_v46, %v2732_v54  ;;  %v3375_v59 = vmul.f32 %v2732_v54, %v2732_v54 }
 0x1bc   : > { %v2191_v60 = vpop.f32.mrf.mxu0  ;;  %2382 = vmatmul.mubr.bf16.gmra.mxu0 %v4302_v49  ;;  %v2736_v61 = vpop.f32.mrf.mxu1  ;;  %2927 = vmatmul.mubr.bf16.gmra.mxu1 %v4305_v51 }
 0x1bd   : > { %2389 = vmatprep.mubr.bf16.mxu0 %v4310_v52  ;;  %v3502_v62 = vadd.f32 %v3501_v53, %v3375_v59  ;;  %v2737_v63 = vadd.f32 %v2736_v61, %v2191_v60  ;;  %2934 = vmatprep.mubr.bf16.mxu1 %v4313_v56  ;;  %v4331_v52 = vld [vmem:[%s4523_s27 + $0x64c] ss:$16 sps:$4 sm:$0xff]  }
 0x1be   : > { %v2193_v0 = vpop.f32.mrf.mxu0  ;;  %v2738_v1 = vpop.f32.mrf.mxu1 }
 0x1bf   : > { %3115 = vst [vmem:[%s4692_s14 + $0x160] sm:$0xff] %v2737_v63  ;;  %v3242_v2 = vadd.f32 %v3241_v58, %v2737_v63  ;;  %v3376_v3 = vmul.f32 %v2737_v63, %v2737_v63  ;;  %v4326_v1 = vld [vmem:[%s4523_s27 + $0x640] ss:$16 sps:$4 sm:$0xff]  }
 0x1c0   : > { %v2194_v4 = vpop.f32.mrf.mxu0  ;;  %v2739_v6 = vpop.f32.mrf.mxu1 }
 0x1c1   : > { %v3503_v9 = vadd.f32 %v3502_v62, %v3376_v3  ;;  %v2740_v10 = vadd.f32 %v2739_v6, %v2194_v4  ;;  %v4329_v3 = vld [vmem:[%s4523_s27 + $0x648] ss:$16 sps:$4 sm:$0xff]   ;;  %v4334_v4 = vld [vmem:[%s4523_s27 + $0x664] ss:$16 sps:$4 sm:$0xff]  }
 0x1c2   : > { %v2196_v11 = vpop.f32.mrf.mxu0  ;;  %v2741_v13 = vpop.f32.mrf.mxu1 }
 0x1c3   : > { %3116 = vst [vmem:[%s4692_s14 + $0x168] sm:$0xff] %v2740_v10  ;;  %v3243_v14 = vadd.f32 %v3242_v2, %v2740_v10  ;;  %v3377_v15 = vmul.f32 %v2740_v10, %v2740_v10 }
 0x1c4   : > { %v2199_v16 = vpop.f32.mrf.mxu0  ;;  %2390 = vmatmul.mubr.bf16.gmra.mxu0 %v4308_v5  ;;  %v2744_v17 = vpop.f32.mrf.mxu1  ;;  %2935 = vmatmul.mubr.bf16.gmra.mxu1 %v4311_v7 }
 0x1c5   : > { %2397 = vmatprep.mubr.bf16.mxu0 %v4316_v8  ;;  %v3504_v18 = vadd.f32 %v3503_v9, %v3377_v15  ;;  %v2745_v19 = vadd.f32 %v2744_v17, %v2199_v16  ;;  %2942 = vmatprep.mubr.bf16.mxu1 %v4319_v12  ;;  %v4337_v8 = vld [vmem:[%s4523_s27 + $0x66c] ss:$16 sps:$4 sm:$0xff]  }
 0x1c6   : > { %v2201_v20 = vpop.f32.mrf.mxu0  ;;  %v2746_v21 = vpop.f32.mrf.mxu1 }
 0x1c7   : > { %3117 = vst [vmem:[%s4692_s14 + $0x170] sm:$0xff] %v2745_v19  ;;  %v3244_v22 = vadd.f32 %v3243_v14, %v2745_v19  ;;  %v3378_v23 = vmul.f32 %v2745_v19, %v2745_v19  ;;  %v4332_v21 = vld [vmem:[%s4523_s27 + $0x660] ss:$16 sps:$4 sm:$0xff]  }
 0x1c8   : > { %v2202_v24 = vpop.f32.mrf.mxu0  ;;  %v2747_v26 = vpop.f32.mrf.mxu1 }
 0x1c9   : > { %v3505_v29 = vadd.f32 %v3504_v18, %v3378_v23  ;;  %v2748_v30 = vadd.f32 %v2747_v26, %v2202_v24  ;;  %v4335_v23 = vld [vmem:[%s4523_s27 + $0x668] ss:$16 sps:$4 sm:$0xff]   ;;  %v4340_v24 = vld [vmem:[%s4523_s27 + $0x684] ss:$16 sps:$4 sm:$0xff]  }
 0x1ca   : > { %v2204_v31 = vpop.f32.mrf.mxu0  ;;  %v2749_v33 = vpop.f32.mrf.mxu1 }
 0x1cb   : > { %3118 = vst [vmem:[%s4692_s14 + $0x178] sm:$0xff] %v2748_v30  ;;  %v3245_v34 = vadd.f32 %v3244_v22, %v2748_v30  ;;  %v3379_v35 = vmul.f32 %v2748_v30, %v2748_v30 }
 0x1cc   : > { %v2207_v36 = vpop.f32.mrf.mxu0  ;;  %2398 = vmatmul.mubr.bf16.gmra.mxu0 %v4314_v25  ;;  %v2752_v37 = vpop.f32.mrf.mxu1  ;;  %2943 = vmatmul.mubr.bf16.gmra.mxu1 %v4317_v27 }
 0x1cd   : > { %2405 = vmatprep.mubr.bf16.mxu0 %v4322_v28  ;;  %v3506_v38 = vadd.f32 %v3505_v29, %v3379_v35  ;;  %v2753_v39 = vadd.f32 %v2752_v37, %v2207_v36  ;;  %2950 = vmatprep.mubr.bf16.mxu1 %v4325_v32  ;;  %v4343_v28 = vld [vmem:[%s4523_s27 + $0x68c] ss:$16 sps:$4 sm:$0xff]  }
 0x1ce   : > { %v2209_v40 = vpop.f32.mrf.mxu0  ;;  %v2754_v41 = vpop.f32.mrf.mxu1 }
 0x1cf   : > { %3119 = vst [vmem:[%s4692_s14 + $0x180] sm:$0xff] %v2753_v39  ;;  %v3246_v42 = vadd.f32 %v3245_v34, %v2753_v39  ;;  %v3380_v43 = vmul.f32 %v2753_v39, %v2753_v39  ;;  %v4338_v41 = vld [vmem:[%s4523_s27 + $0x680] ss:$16 sps:$4 sm:$0xff]  }
 0x1d0   : > { %v2210_v44 = vpop.f32.mrf.mxu0  ;;  %v2755_v46 = vpop.f32.mrf.mxu1 }
 0x1d1   : > { %v3507_v49 = vadd.f32 %v3506_v38, %v3380_v43  ;;  %v2756_v50 = vadd.f32 %v2755_v46, %v2210_v44  ;;  %v4341_v43 = vld [vmem:[%s4523_s27 + $0x688] ss:$16 sps:$4 sm:$0xff]   ;;  %v4346_v44 = vld [vmem:[%s4523_s27 + $0x6a4] ss:$16 sps:$4 sm:$0xff]  }
 0x1d2   : > { %v2212_v51 = vpop.f32.mrf.mxu0  ;;  %v2757_v53 = vpop.f32.mrf.mxu1 }
 0x1d3   : > { %3120 = vst [vmem:[%s4692_s14 + $0x188] sm:$0xff] %v2756_v50  ;;  %v3247_v54 = vadd.f32 %v3246_v42, %v2756_v50  ;;  %v3381_v55 = vmul.f32 %v2756_v50, %v2756_v50 }
 0x1d4   : > { %v2215_v56 = vpop.f32.mrf.mxu0  ;;  %2406 = vmatmul.mubr.bf16.gmra.mxu0 %v4320_v45  ;;  %v2760_v57 = vpop.f32.mrf.mxu1  ;;  %2951 = vmatmul.mubr.bf16.gmra.mxu1 %v4323_v47 }
 0x1d5   : > { %2413 = vmatprep.mubr.bf16.mxu0 %v4328_v48  ;;  %v3508_v58 = vadd.f32 %v3507_v49, %v3381_v55  ;;  %v2761_v59 = vadd.f32 %v2760_v57, %v2215_v56  ;;  %2958 = vmatprep.mubr.bf16.mxu1 %v4331_v52  ;;  %v4349_v48 = vld [vmem:[%s4523_s27 + $0x6ac] ss:$16 sps:$4 sm:$0xff]  }
 0x1d6   : > { %v2217_v60 = vpop.f32.mrf.mxu0  ;;  %v2762_v61 = vpop.f32.mrf.mxu1 }
 0x1d7   : > { %3121 = vst [vmem:[%s4692_s14 + $0x190] sm:$0xff] %v2761_v59  ;;  %v3248_v62 = vadd.f32 %v3247_v54, %v2761_v59  ;;  %v3382_v63 = vmul.f32 %v2761_v59, %v2761_v59  ;;  %v4344_v61 = vld [vmem:[%s4523_s27 + $0x6a0] ss:$16 sps:$4 sm:$0xff]  }
 0x1d8   : > { %v2218_v0 = vpop.f32.mrf.mxu0  ;;  %v2763_v2 = vpop.f32.mrf.mxu1 }
 0x1d9   : > { %v3509_v5 = vadd.f32 %v3508_v58, %v3382_v63  ;;  %v2764_v6 = vadd.f32 %v2763_v2, %v2218_v0  ;;  %v4347_v63 = vld [vmem:[%s4523_s27 + $0x6a8] ss:$16 sps:$4 sm:$0xff]   ;;  %v4352_v0 = vld [vmem:[%s4523_s27 + $0x6c4] ss:$16 sps:$4 sm:$0xff]  }
 0x1da   : > { %v2220_v7 = vpop.f32.mrf.mxu0  ;;  %v2765_v9 = vpop.f32.mrf.mxu1 }
 0x1db   : > { %3122 = vst [vmem:[%s4692_s14 + $0x198] sm:$0xff] %v2764_v6  ;;  %v3249_v10 = vadd.f32 %v3248_v62, %v2764_v6  ;;  %v3383_v11 = vmul.f32 %v2764_v6, %v2764_v6 }
 0x1dc   : > { %v2223_v12 = vpop.f32.mrf.mxu0  ;;  %2414 = vmatmul.mubr.bf16.gmra.mxu0 %v4326_v1  ;;  %v2768_v13 = vpop.f32.mrf.mxu1  ;;  %2959 = vmatmul.mubr.bf16.gmra.mxu1 %v4329_v3 }
 0x1dd   : > { %2421 = vmatprep.mubr.bf16.mxu0 %v4334_v4  ;;  %v3510_v14 = vadd.f32 %v3509_v5, %v3383_v11  ;;  %v2769_v15 = vadd.f32 %v2768_v13, %v2223_v12  ;;  %2966 = vmatprep.mubr.bf16.mxu1 %v4337_v8  ;;  %v4355_v4 = vld [vmem:[%s4523_s27 + $0x6cc] ss:$16 sps:$4 sm:$0xff]  }
 0x1de   : > { %v2225_v16 = vpop.f32.mrf.mxu0  ;;  %v2770_v17 = vpop.f32.mrf.mxu1 }
 0x1df   : > { %3123 = vst [vmem:[%s4692_s14 + $0x1a0] sm:$0xff] %v2769_v15  ;;  %v3250_v18 = vadd.f32 %v3249_v10, %v2769_v15  ;;  %v3384_v19 = vmul.f32 %v2769_v15, %v2769_v15  ;;  %v4350_v17 = vld [vmem:[%s4523_s27 + $0x6c0] ss:$16 sps:$4 sm:$0xff]  }
 0x1e0   : > { %v2226_v20 = vpop.f32.mrf.mxu0  ;;  %v2771_v22 = vpop.f32.mrf.mxu1 }
 0x1e1   : > { %v3511_v25 = vadd.f32 %v3510_v14, %v3384_v19  ;;  %v2772_v26 = vadd.f32 %v2771_v22, %v2226_v20  ;;  %v4353_v19 = vld [vmem:[%s4523_s27 + $0x6c8] ss:$16 sps:$4 sm:$0xff]   ;;  %v4358_v20 = vld [vmem:[%s4523_s27 + $0x6e4] ss:$16 sps:$4 sm:$0xff]  }
 0x1e2   : > { %v2228_v27 = vpop.f32.mrf.mxu0  ;;  %v2773_v29 = vpop.f32.mrf.mxu1 }
 0x1e3   : > { %3124 = vst [vmem:[%s4692_s14 + $0x1a8] sm:$0xff] %v2772_v26  ;;  %v3251_v30 = vadd.f32 %v3250_v18, %v2772_v26  ;;  %v3385_v31 = vmul.f32 %v2772_v26, %v2772_v26 }
 0x1e4   : > { %v2231_v32 = vpop.f32.mrf.mxu0  ;;  %2422 = vmatmul.mubr.bf16.gmra.mxu0 %v4332_v21  ;;  %v2776_v33 = vpop.f32.mrf.mxu1  ;;  %2967 = vmatmul.mubr.bf16.gmra.mxu1 %v4335_v23 }
 0x1e5   : > { %2429 = vmatprep.mubr.bf16.mxu0 %v4340_v24  ;;  %v3512_v34 = vadd.f32 %v3511_v25, %v3385_v31  ;;  %v2777_v35 = vadd.f32 %v2776_v33, %v2231_v32  ;;  %2974 = vmatprep.mubr.bf16.mxu1 %v4343_v28  ;;  %v4361_v24 = vld [vmem:[%s4523_s27 + $0x6ec] ss:$16 sps:$4 sm:$0xff]  }
 0x1e6   : > { %v2233_v36 = vpop.f32.mrf.mxu0  ;;  %v2778_v37 = vpop.f32.mrf.mxu1 }
 0x1e7   : > { %3125 = vst [vmem:[%s4692_s14 + $0x1b0] sm:$0xff] %v2777_v35  ;;  %v3252_v38 = vadd.f32 %v3251_v30, %v2777_v35  ;;  %v3386_v39 = vmul.f32 %v2777_v35, %v2777_v35  ;;  %v4356_v37 = vld [vmem:[%s4523_s27 + $0x6e0] ss:$16 sps:$4 sm:$0xff]  }
 0x1e8   : > { %v2234_v40 = vpop.f32.mrf.mxu0  ;;  %v2779_v42 = vpop.f32.mrf.mxu1 }
 0x1e9   : > { %v3513_v45 = vadd.f32 %v3512_v34, %v3386_v39  ;;  %v2780_v46 = vadd.f32 %v2779_v42, %v2234_v40  ;;  %v4359_v39 = vld [vmem:[%s4523_s27 + $0x6e8] ss:$16 sps:$4 sm:$0xff]   ;;  %v4364_v40 = vld [vmem:[%s4523_s27 + $0x704] ss:$16 sps:$4 sm:$0xff]  }
 0x1ea   : > { %v2236_v47 = vpop.f32.mrf.mxu0  ;;  %v2781_v49 = vpop.f32.mrf.mxu1 }
 0x1eb   : > { %3126 = vst [vmem:[%s4692_s14 + $0x1b8] sm:$0xff] %v2780_v46  ;;  %v3253_v50 = vadd.f32 %v3252_v38, %v2780_v46  ;;  %v3387_v51 = vmul.f32 %v2780_v46, %v2780_v46 }
 0x1ec   : > { %v2239_v52 = vpop.f32.mrf.mxu0  ;;  %2430 = vmatmul.mubr.bf16.gmra.mxu0 %v4338_v41  ;;  %v2784_v53 = vpop.f32.mrf.mxu1  ;;  %2975 = vmatmul.mubr.bf16.gmra.mxu1 %v4341_v43 }
 0x1ed   : > { %2437 = vmatprep.mubr.bf16.mxu0 %v4346_v44  ;;  %v3514_v54 = vadd.f32 %v3513_v45, %v3387_v51  ;;  %v2785_v55 = vadd.f32 %v2784_v53, %v2239_v52  ;;  %2982 = vmatprep.mubr.bf16.mxu1 %v4349_v48  ;;  %v4367_v44 = vld [vmem:[%s4523_s27 + $0x70c] ss:$16 sps:$4 sm:$0xff]  }
 0x1ee   : > { %v2241_v56 = vpop.f32.mrf.mxu0  ;;  %v2786_v57 = vpop.f32.mrf.mxu1 }
 0x1ef   : > { %3127 = vst [vmem:[%s4692_s14 + $0x1c0] sm:$0xff] %v2785_v55  ;;  %v3254_v58 = vadd.f32 %v3253_v50, %v2785_v55  ;;  %v3388_v59 = vmul.f32 %v2785_v55, %v2785_v55  ;;  %v4362_v57 = vld [vmem:[%s4523_s27 + $0x700] ss:$16 sps:$4 sm:$0xff]  }
 0x1f0   : > { %v2242_v60 = vpop.f32.mrf.mxu0  ;;  %v2787_v62 = vpop.f32.mrf.mxu1 }
 0x1f1   : > { %v3515_v1 = vadd.f32 %v3514_v54, %v3388_v59  ;;  %v2788_v2 = vadd.f32 %v2787_v62, %v2242_v60  ;;  %v4365_v59 = vld [vmem:[%s4523_s27 + $0x708] ss:$16 sps:$4 sm:$0xff]   ;;  %v4370_v60 = vld [vmem:[%s4523_s27 + $0x724] ss:$16 sps:$4 sm:$0xff]  }
 0x1f2   : > { %v2244_v3 = vpop.f32.mrf.mxu0  ;;  %v2789_v5 = vpop.f32.mrf.mxu1 }
 0x1f3   : > { %3128 = vst [vmem:[%s4692_s14 + $0x1c8] sm:$0xff] %v2788_v2  ;;  %v3255_v6 = vadd.f32 %v3254_v58, %v2788_v2  ;;  %v3389_v7 = vmul.f32 %v2788_v2, %v2788_v2 }
 0x1f4   : > { %v2247_v8 = vpop.f32.mrf.mxu0  ;;  %2438 = vmatmul.mubr.bf16.gmra.mxu0 %v4344_v61  ;;  %v2792_v9 = vpop.f32.mrf.mxu1  ;;  %2983 = vmatmul.mubr.bf16.gmra.mxu1 %v4347_v63 }
 0x1f5   : > { %2445 = vmatprep.mubr.bf16.mxu0 %v4352_v0  ;;  %v3516_v10 = vadd.f32 %v3515_v1, %v3389_v7  ;;  %v2793_v11 = vadd.f32 %v2792_v9, %v2247_v8  ;;  %2990 = vmatprep.mubr.bf16.mxu1 %v4355_v4  ;;  %v4373_v0 = vld [vmem:[%s4523_s27 + $0x72c] ss:$16 sps:$4 sm:$0xff]  }
 0x1f6   : > { %v2249_v12 = vpop.f32.mrf.mxu0  ;;  %v2794_v13 = vpop.f32.mrf.mxu1 }
 0x1f7   : > { %3129 = vst [vmem:[%s4692_s14 + $0x1d0] sm:$0xff] %v2793_v11  ;;  %v3256_v14 = vadd.f32 %v3255_v6, %v2793_v11  ;;  %v3390_v15 = vmul.f32 %v2793_v11, %v2793_v11  ;;  %v4368_v13 = vld [vmem:[%s4523_s27 + $0x720] ss:$16 sps:$4 sm:$0xff]  }
 0x1f8   : > { %v2250_v16 = vpop.f32.mrf.mxu0  ;;  %v2795_v18 = vpop.f32.mrf.mxu1 }
 0x1f9   : > { %v3517_v21 = vadd.f32 %v3516_v10, %v3390_v15  ;;  %v2796_v22 = vadd.f32 %v2795_v18, %v2250_v16  ;;  %v4371_v15 = vld [vmem:[%s4523_s27 + $0x728] ss:$16 sps:$4 sm:$0xff]   ;;  %v4376_v16 = vld [vmem:[%s4523_s27 + $0x744] ss:$16 sps:$4 sm:$0xff]  }
 0x1fa   : > { %v2252_v23 = vpop.f32.mrf.mxu0  ;;  %v2797_v25 = vpop.f32.mrf.mxu1 }
 0x1fb   : > { %3130 = vst [vmem:[%s4692_s14 + $0x1d8] sm:$0xff] %v2796_v22  ;;  %v3257_v26 = vadd.f32 %v3256_v14, %v2796_v22  ;;  %v3391_v27 = vmul.f32 %v2796_v22, %v2796_v22 }
 0x1fc   : > { %v2255_v28 = vpop.f32.mrf.mxu0  ;;  %2446 = vmatmul.mubr.bf16.gmra.mxu0 %v4350_v17  ;;  %v2800_v29 = vpop.f32.mrf.mxu1  ;;  %2991 = vmatmul.mubr.bf16.gmra.mxu1 %v4353_v19 }
 0x1fd   : > { %2453 = vmatprep.mubr.bf16.mxu0 %v4358_v20  ;;  %v3518_v30 = vadd.f32 %v3517_v21, %v3391_v27  ;;  %v2801_v31 = vadd.f32 %v2800_v29, %v2255_v28  ;;  %2998 = vmatprep.mubr.bf16.mxu1 %v4361_v24  ;;  %v4379_v20 = vld [vmem:[%s4523_s27 + $0x74c] ss:$16 sps:$4 sm:$0xff]  }
 0x1fe   : > { %v2257_v32 = vpop.f32.mrf.mxu0  ;;  %v2802_v33 = vpop.f32.mrf.mxu1 }
 0x1ff   : > { %3131 = vst [vmem:[%s4692_s14 + $0x1e0] sm:$0xff] %v2801_v31  ;;  %v3258_v34 = vadd.f32 %v3257_v26, %v2801_v31  ;;  %v3392_v35 = vmul.f32 %v2801_v31, %v2801_v31  ;;  %v4374_v33 = vld [vmem:[%s4523_s27 + $0x740] ss:$16 sps:$4 sm:$0xff]  }
 0x200   : > { %v2258_v36 = vpop.f32.mrf.mxu0  ;;  %v2803_v38 = vpop.f32.mrf.mxu1 }
 0x201   : > { %v3519_v41 = vadd.f32 %v3518_v30, %v3392_v35  ;;  %v2804_v42 = vadd.f32 %v2803_v38, %v2258_v36  ;;  %v4377_v35 = vld [vmem:[%s4523_s27 + $0x748] ss:$16 sps:$4 sm:$0xff]   ;;  %v4382_v36 = vld [vmem:[%s4523_s27 + $0x764] ss:$16 sps:$4 sm:$0xff]  }
 0x202   : > { %v2260_v43 = vpop.f32.mrf.mxu0  ;;  %v2805_v45 = vpop.f32.mrf.mxu1 }
 0x203   : > { %3132 = vst [vmem:[%s4692_s14 + $0x1e8] sm:$0xff] %v2804_v42  ;;  %v3259_v46 = vadd.f32 %v3258_v34, %v2804_v42  ;;  %v3393_v47 = vmul.f32 %v2804_v42, %v2804_v42 }
 0x204   : > { %v2263_v48 = vpop.f32.mrf.mxu0  ;;  %2454 = vmatmul.mubr.bf16.gmra.mxu0 %v4356_v37  ;;  %v2808_v49 = vpop.f32.mrf.mxu1  ;;  %2999 = vmatmul.mubr.bf16.gmra.mxu1 %v4359_v39 }
 0x205   : > { %2461 = vmatprep.mubr.bf16.mxu0 %v4364_v40  ;;  %v3520_v50 = vadd.f32 %v3519_v41, %v3393_v47  ;;  %v2809_v51 = vadd.f32 %v2808_v49, %v2263_v48  ;;  %3006 = vmatprep.mubr.bf16.mxu1 %v4367_v44  ;;  %v4385_v40 = vld [vmem:[%s4523_s27 + $0x76c] ss:$16 sps:$4 sm:$0xff]  }
 0x206   : > { %v2265_v52 = vpop.f32.mrf.mxu0  ;;  %v2810_v53 = vpop.f32.mrf.mxu1 }
 0x207   : > { %3133 = vst [vmem:[%s4692_s14 + $0x1f0] sm:$0xff] %v2809_v51  ;;  %v3260_v54 = vadd.f32 %v3259_v46, %v2809_v51  ;;  %v3394_v55 = vmul.f32 %v2809_v51, %v2809_v51  ;;  %v4380_v53 = vld [vmem:[%s4523_s27 + $0x760] ss:$16 sps:$4 sm:$0xff]  }
 0x208   : > { %v2266_v56 = vpop.f32.mrf.mxu0  ;;  %v2811_v58 = vpop.f32.mrf.mxu1 }
 0x209   : > { %v3521_v61 = vadd.f32 %v3520_v50, %v3394_v55  ;;  %v2812_v62 = vadd.f32 %v2811_v58, %v2266_v56  ;;  %v4383_v55 = vld [vmem:[%s4523_s27 + $0x768] ss:$16 sps:$4 sm:$0xff]   ;;  %v4388_v56 = vld [vmem:[%s4523_s27 + $0x784] ss:$16 sps:$4 sm:$0xff]  }
 0x20a   : > { %v2268_v63 = vpop.f32.mrf.mxu0  ;;  %v2813_v1 = vpop.f32.mrf.mxu1 }
 0x20b   : > { %3134 = vst [vmem:[%s4692_s14 + $0x1f8] sm:$0xff] %v2812_v62  ;;  %v3261_v2 = vadd.f32 %v3260_v54, %v2812_v62  ;;  %v3395_v3 = vmul.f32 %v2812_v62, %v2812_v62 }
 0x20c   : > { %v2271_v4 = vpop.f32.mrf.mxu0  ;;  %2462 = vmatmul.mubr.bf16.gmra.mxu0 %v4362_v57  ;;  %v2816_v5 = vpop.f32.mrf.mxu1  ;;  %3007 = vmatmul.mubr.bf16.gmra.mxu1 %v4365_v59 }
 0x20d   : > { %2469 = vmatprep.mubr.bf16.mxu0 %v4370_v60  ;;  %v3522_v6 = vadd.f32 %v3521_v61, %v3395_v3  ;;  %v2817_v7 = vadd.f32 %v2816_v5, %v2271_v4  ;;  %3014 = vmatprep.mubr.bf16.mxu1 %v4373_v0  ;;  %v4391_v60 = vld [vmem:[%s4523_s27 + $0x78c] ss:$16 sps:$4 sm:$0xff]  }
 0x20e   : > { %v2273_v8 = vpop.f32.mrf.mxu0  ;;  %v2818_v9 = vpop.f32.mrf.mxu1 }
 0x20f   : > { %3135 = vst [vmem:[%s4692_s14 + $0x200] sm:$0xff] %v2817_v7  ;;  %v3262_v10 = vadd.f32 %v3261_v2, %v2817_v7  ;;  %v3396_v11 = vmul.f32 %v2817_v7, %v2817_v7  ;;  %v4386_v9 = vld [vmem:[%s4523_s27 + $0x780] ss:$16 sps:$4 sm:$0xff]  }
 0x210   : > { %v2274_v12 = vpop.f32.mrf.mxu0  ;;  %v2819_v14 = vpop.f32.mrf.mxu1 }
 0x211   : > { %v3523_v17 = vadd.f32 %v3522_v6, %v3396_v11  ;;  %v2820_v18 = vadd.f32 %v2819_v14, %v2274_v12  ;;  %v4389_v11 = vld [vmem:[%s4523_s27 + $0x788] ss:$16 sps:$4 sm:$0xff]   ;;  %v4394_v12 = vld [vmem:[%s4523_s27 + $0x7a4] ss:$16 sps:$4 sm:$0xff]  }
 0x212   : > { %v2276_v19 = vpop.f32.mrf.mxu0  ;;  %v2821_v21 = vpop.f32.mrf.mxu1 }
 0x213   : > { %3136 = vst [vmem:[%s4692_s14 + $0x208] sm:$0xff] %v2820_v18  ;;  %v3263_v22 = vadd.f32 %v3262_v10, %v2820_v18  ;;  %v3397_v23 = vmul.f32 %v2820_v18, %v2820_v18 }
 0x214   : > { %v2279_v24 = vpop.f32.mrf.mxu0  ;;  %2470 = vmatmul.mubr.bf16.gmra.mxu0 %v4368_v13  ;;  %v2824_v25 = vpop.f32.mrf.mxu1  ;;  %3015 = vmatmul.mubr.bf16.gmra.mxu1 %v4371_v15 }
 0x215   : > { %2477 = vmatprep.mubr.bf16.mxu0 %v4376_v16  ;;  %v3524_v26 = vadd.f32 %v3523_v17, %v3397_v23  ;;  %v2825_v27 = vadd.f32 %v2824_v25, %v2279_v24  ;;  %3022 = vmatprep.mubr.bf16.mxu1 %v4379_v20  ;;  %v4397_v16 = vld [vmem:[%s4523_s27 + $0x7ac] ss:$16 sps:$4 sm:$0xff]  }
 0x216   : > { %v2281_v28 = vpop.f32.mrf.mxu0  ;;  %v2826_v29 = vpop.f32.mrf.mxu1 }
 0x217   : > { %3137 = vst [vmem:[%s4692_s14 + $0x210] sm:$0xff] %v2825_v27  ;;  %v3264_v30 = vadd.f32 %v3263_v22, %v2825_v27  ;;  %v3398_v31 = vmul.f32 %v2825_v27, %v2825_v27  ;;  %v4392_v29 = vld [vmem:[%s4523_s27 + $0x7a0] ss:$16 sps:$4 sm:$0xff]  }
 0x218   : > { %v2282_v32 = vpop.f32.mrf.mxu0  ;;  %v2827_v34 = vpop.f32.mrf.mxu1 }
 0x219   : > { %v3525_v37 = vadd.f32 %v3524_v26, %v3398_v31  ;;  %v2828_v38 = vadd.f32 %v2827_v34, %v2282_v32  ;;  %v4395_v31 = vld [vmem:[%s4523_s27 + $0x7a8] ss:$16 sps:$4 sm:$0xff]   ;;  %v4400_v32 = vld [vmem:[%s4523_s27 + $0x7c4] ss:$16 sps:$4 sm:$0xff]  }
 0x21a   : > { %v2284_v39 = vpop.f32.mrf.mxu0  ;;  %v2829_v41 = vpop.f32.mrf.mxu1 }
 0x21b   : > { %3138 = vst [vmem:[%s4692_s14 + $0x218] sm:$0xff] %v2828_v38  ;;  %v3265_v42 = vadd.f32 %v3264_v30, %v2828_v38  ;;  %v3399_v43 = vmul.f32 %v2828_v38, %v2828_v38 }
 0x21c   : > { %v2287_v44 = vpop.f32.mrf.mxu0  ;;  %2478 = vmatmul.mubr.bf16.gmra.mxu0 %v4374_v33  ;;  %v2832_v45 = vpop.f32.mrf.mxu1  ;;  %3023 = vmatmul.mubr.bf16.gmra.mxu1 %v4377_v35 }
 0x21d   : > { %2485 = vmatprep.mubr.bf16.mxu0 %v4382_v36  ;;  %v3526_v46 = vadd.f32 %v3525_v37, %v3399_v43  ;;  %v2833_v47 = vadd.f32 %v2832_v45, %v2287_v44  ;;  %3030 = vmatprep.mubr.bf16.mxu1 %v4385_v40  ;;  %v4403_v36 = vld [vmem:[%s4523_s27 + $0x7cc] ss:$16 sps:$4 sm:$0xff]  }
 0x21e   : > { %v2289_v48 = vpop.f32.mrf.mxu0  ;;  %v2834_v49 = vpop.f32.mrf.mxu1 }
 0x21f   : > { %3139 = vst [vmem:[%s4692_s14 + $0x220] sm:$0xff] %v2833_v47  ;;  %v3266_v50 = vadd.f32 %v3265_v42, %v2833_v47  ;;  %v3400_v51 = vmul.f32 %v2833_v47, %v2833_v47  ;;  %v4398_v49 = vld [vmem:[%s4523_s27 + $0x7c0] ss:$16 sps:$4 sm:$0xff]  }
 0x220   : > { %v2290_v52 = vpop.f32.mrf.mxu0  ;;  %v2835_v54 = vpop.f32.mrf.mxu1 }
 0x221   : > { %v3527_v57 = vadd.f32 %v3526_v46, %v3400_v51  ;;  %v2836_v58 = vadd.f32 %v2835_v54, %v2290_v52  ;;  %v4401_v51 = vld [vmem:[%s4523_s27 + $0x7c8] ss:$16 sps:$4 sm:$0xff]   ;;  %v4406_v52 = vld [vmem:[%s4523_s27 + $0x7e4] ss:$16 sps:$4 sm:$0xff]  }
 0x222   : > { %v2292_v59 = vpop.f32.mrf.mxu0  ;;  %v2837_v61 = vpop.f32.mrf.mxu1 }
 0x223   : > { %3140 = vst [vmem:[%s4692_s14 + $0x228] sm:$0xff] %v2836_v58  ;;  %v3267_v62 = vadd.f32 %v3266_v50, %v2836_v58  ;;  %v3401_v63 = vmul.f32 %v2836_v58, %v2836_v58 }
 0x224   : > { %v2295_v0 = vpop.f32.mrf.mxu0  ;;  %2486 = vmatmul.mubr.bf16.gmra.mxu0 %v4380_v53  ;;  %v2840_v1 = vpop.f32.mrf.mxu1  ;;  %3031 = vmatmul.mubr.bf16.gmra.mxu1 %v4383_v55 }
 0x225   : > { %2493 = vmatprep.mubr.bf16.mxu0 %v4388_v56  ;;  %v3528_v2 = vadd.f32 %v3527_v57, %v3401_v63  ;;  %v2841_v3 = vadd.f32 %v2840_v1, %v2295_v0  ;;  %3038 = vmatprep.mubr.bf16.mxu1 %v4391_v60  ;;  %v4409_v56 = vld [vmem:[%s4523_s27 + $0x7ec] ss:$16 sps:$4 sm:$0xff]  }
 0x226   : > { %v2297_v4 = vpop.f32.mrf.mxu0  ;;  %v2842_v5 = vpop.f32.mrf.mxu1 }
 0x227   : > { %3141 = vst [vmem:[%s4692_s14 + $0x230] sm:$0xff] %v2841_v3  ;;  %v3268_v6 = vadd.f32 %v3267_v62, %v2841_v3  ;;  %v3402_v7 = vmul.f32 %v2841_v3, %v2841_v3  ;;  %v4404_v5 = vld [vmem:[%s4523_s27 + $0x7e0] ss:$16 sps:$4 sm:$0xff]  }
 0x228   : > { %v2298_v8 = vpop.f32.mrf.mxu0  ;;  %v2843_v10 = vpop.f32.mrf.mxu1 }
 0x229   : > { %v3529_v13 = vadd.f32 %v3528_v2, %v3402_v7  ;;  %v2844_v14 = vadd.f32 %v2843_v10, %v2298_v8  ;;  %v4407_v7 = vld [vmem:[%s4523_s27 + $0x7e8] ss:$16 sps:$4 sm:$0xff]  }
 0x22a   : > { %v2300_v15 = vpop.f32.mrf.mxu0  ;;  %v2845_v17 = vpop.f32.mrf.mxu1 }
 0x22b   : > { %3142 = vst [vmem:[%s4692_s14 + $0x238] sm:$0xff] %v2844_v14  ;;  %v3269_v18 = vadd.f32 %v3268_v6, %v2844_v14  ;;  %v3403_v19 = vmul.f32 %v2844_v14, %v2844_v14 }
 0x22c   : > { %v2303_v20 = vpop.f32.mrf.mxu0  ;;  %2494 = vmatmul.mubr.bf16.gmra.mxu0 %v4386_v9  ;;  %v2848_v21 = vpop.f32.mrf.mxu1  ;;  %3039 = vmatmul.mubr.bf16.gmra.mxu1 %v4389_v11 }
 0x22d   : > { %2501 = vmatprep.mubr.bf16.mxu0 %v4394_v12  ;;  %v3530_v22 = vadd.f32 %v3529_v13, %v3403_v19  ;;  %v2849_v23 = vadd.f32 %v2848_v21, %v2303_v20  ;;  %3046 = vmatprep.mubr.bf16.mxu1 %v4397_v16 }
 0x22e   : > { %v2305_v24 = vpop.f32.mrf.mxu0  ;;  %v2850_v25 = vpop.f32.mrf.mxu1 }
 0x22f   : > { %3143 = vst [vmem:[%s4692_s14 + $0x240] sm:$0xff] %v2849_v23  ;;  %v3270_v26 = vadd.f32 %v3269_v18, %v2849_v23  ;;  %v3404_v27 = vmul.f32 %v2849_v23, %v2849_v23 }
 0x230   : > { %v2306_v28 = vpop.f32.mrf.mxu0  ;;  %v2851_v30 = vpop.f32.mrf.mxu1 }
 0x231   : > { %v3531_v33 = vadd.f32 %v3530_v22, %v3404_v27  ;;  %v2852_v34 = vadd.f32 %v2851_v30, %v2306_v28 }
 0x232   : > { %v2308_v35 = vpop.f32.mrf.mxu0  ;;  %v2853_v37 = vpop.f32.mrf.mxu1 }
 0x233   : > { %3144 = vst [vmem:[%s4692_s14 + $0x248] sm:$0xff] %v2852_v34  ;;  %v3271_v38 = vadd.f32 %v3270_v26, %v2852_v34  ;;  %v3405_v39 = vmul.f32 %v2852_v34, %v2852_v34 }
 0x234   : > { %v2311_v40 = vpop.f32.mrf.mxu0  ;;  %2502 = vmatmul.mubr.bf16.gmra.mxu0 %v4392_v29  ;;  %v2856_v41 = vpop.f32.mrf.mxu1  ;;  %3047 = vmatmul.mubr.bf16.gmra.mxu1 %v4395_v31 }
 0x235   : > { %2509 = vmatprep.mubr.bf16.mxu0 %v4400_v32  ;;  %v3532_v42 = vadd.f32 %v3531_v33, %v3405_v39  ;;  %v2857_v43 = vadd.f32 %v2856_v41, %v2311_v40  ;;  %3054 = vmatprep.mubr.bf16.mxu1 %v4403_v36 }
 0x236   : > { %v2313_v44 = vpop.f32.mrf.mxu0  ;;  %v2858_v45 = vpop.f32.mrf.mxu1 }
 0x237   : > { %3145 = vst [vmem:[%s4692_s14 + $0x250] sm:$0xff] %v2857_v43  ;;  %v3272_v46 = vadd.f32 %v3271_v38, %v2857_v43  ;;  %v3406_v47 = vmul.f32 %v2857_v43, %v2857_v43 }
 0x238   : > { %v2314_v48 = vpop.f32.mrf.mxu0  ;;  %v2859_v50 = vpop.f32.mrf.mxu1 }
 0x239   : > { %v3533_v53 = vadd.f32 %v3532_v42, %v3406_v47  ;;  %v2860_v54 = vadd.f32 %v2859_v50, %v2314_v48 }
 0x23a   : > { %v2316_v55 = vpop.f32.mrf.mxu0  ;;  %v2861_v57 = vpop.f32.mrf.mxu1 }
 0x23b   : > { %3146 = vst [vmem:[%s4692_s14 + $0x258] sm:$0xff] %v2860_v54  ;;  %v3273_v58 = vadd.f32 %v3272_v46, %v2860_v54  ;;  %v3407_v59 = vmul.f32 %v2860_v54, %v2860_v54 }
 0x23c   : > { %v2319_v60 = vpop.f32.mrf.mxu0  ;;  %2510 = vmatmul.mubr.bf16.gmra.mxu0 %v4398_v49  ;;  %v2864_v61 = vpop.f32.mrf.mxu1  ;;  %3055 = vmatmul.mubr.bf16.gmra.mxu1 %v4401_v51 }
 0x23d   : > { %2517 = vmatprep.mubr.bf16.mxu0 %v4406_v52  ;;  %v3534_v62 = vadd.f32 %v3533_v53, %v3407_v59  ;;  %v2865_v63 = vadd.f32 %v2864_v61, %v2319_v60  ;;  %3062 = vmatprep.mubr.bf16.mxu1 %v4409_v56 }
 0x23e   : > { %v2321_v0 = vpop.f32.mrf.mxu0  ;;  %v2866_v1 = vpop.f32.mrf.mxu1 }
 0x23f   : > { %3147 = vst [vmem:[%s4692_s14 + $0x260] sm:$0xff] %v2865_v63  ;;  %v3274_v2 = vadd.f32 %v3273_v58, %v2865_v63  ;;  %v3408_v3 = vmul.f32 %v2865_v63, %v2865_v63 }
 0x240   : > { %v2322_v4 = vpop.f32.mrf.mxu0  ;;  %v2867_v6 = vpop.f32.mrf.mxu1 }
 0x241   : > { %v3535_v8 = vadd.f32 %v3534_v62, %v3408_v3  ;;  %v2868_v9 = vadd.f32 %v2867_v6, %v2322_v4 }
 0x242   : > { %v2324_v10 = vpop.f32.mrf.mxu0  ;;  %v2869_v11 = vpop.f32.mrf.mxu1 }
 0x243   : > { %3148 = vst [vmem:[%s4692_s14 + $0x268] sm:$0xff] %v2868_v9  ;;  %v3275_v12 = vadd.f32 %v3274_v2, %v2868_v9  ;;  %v3409_v13 = vmul.f32 %v2868_v9, %v2868_v9 }
 0x244   : > { %v2327_v14 = vpop.f32.mrf.mxu0  ;;  %2518 = vmatmul.mubr.bf16.gmra.mxu0 %v4404_v5  ;;  %v2872_v15 = vpop.f32.mrf.mxu1  ;;  %3063 = vmatmul.mubr.bf16.gmra.mxu1 %v4407_v7 }
 0x245   : > { %v3536_v16 = vadd.f32 %v3535_v8, %v3409_v13  ;;  %v2873_v17 = vadd.f32 %v2872_v15, %v2327_v14 }
 0x246   : > { %v2329_v18 = vpop.f32.mrf.mxu0  ;;  %v2874_v19 = vpop.f32.mrf.mxu1 }
 0x247   : > { %3149 = vst [vmem:[%s4692_s14 + $0x270] sm:$0xff] %v2873_v17  ;;  %v3276_v20 = vadd.f32 %v3275_v12, %v2873_v17  ;;  %v3410_v21 = vmul.f32 %v2873_v17, %v2873_v17 }
 0x248   : > { %v2330_v22 = vpop.f32.mrf.mxu0  ;;  %v2875_v23 = vpop.f32.mrf.mxu1 }
 0x249   : > { %v3537_v24 = vadd.f32 %v3536_v16, %v3410_v21  ;;  %v2876_v25 = vadd.f32 %v2875_v23, %v2330_v22 }
 0x24a   : > { %v2332_v26 = vpop.f32.mrf.mxu0  ;;  %v2877_v27 = vpop.f32.mrf.mxu1 }
 0x24b   : > { %3150 = vst [vmem:[%s4692_s14 + $0x278] sm:$0xff] %v2876_v25  ;;  %v3277_v28 = vadd.f32 %v3276_v20, %v2876_v25  ;;  %v3411_v29 = vmul.f32 %v2876_v25, %v2876_v25 }
 0x24c   : > { %v2335_v30 = vpop.f32.mrf.mxu0  ;;  %v2880_v31 = vpop.f32.mrf.mxu1 }
 0x24d   : > { %v3538_v32 = vadd.f32 %v3537_v24, %v3411_v29  ;;  %v2881_v33 = vadd.f32 %v2880_v31, %v2335_v30 }
 0x24e   : > { %v2337_v34 = vpop.f32.mrf.mxu0  ;;  %v2882_v35 = vpop.f32.mrf.mxu1 }
 0x24f   : > { %3151 = vst [vmem:[%s4692_s14 + $0x280] sm:$0xff] %v2881_v33  ;;  %v3278_v36 = vadd.f32 %v3277_v28, %v2881_v33  ;;  %v3412_v37 = vmul.f32 %v2881_v33, %v2881_v33 }
 0x250   : > { %v2338_v38 = vpop.f32.mrf.mxu0  ;;  %v2883_v39 = vpop.f32.mrf.mxu1 }
 0x251   : > { %v3539_v40 = vadd.f32 %v3538_v32, %v3412_v37  ;;  %v2884_v41 = vadd.f32 %v2883_v39, %v2338_v38 }
 0x252   : > { %v2340_v42 = vpop.f32.mrf.mxu0  ;;  %v2885_v43 = vpop.f32.mrf.mxu1 }
 0x253   : > { %3152 = vst [vmem:[%s4692_s14 + $0x288] sm:$0xff] %v2884_v41  ;;  %v3279_v44 = vadd.f32 %v3278_v36, %v2884_v41  ;;  %v3413_v45 = vmul.f32 %v2884_v41, %v2884_v41 }
 0x254   : > { %v2343_v46 = vpop.f32.mrf.mxu0  ;;  %v2888_v47 = vpop.f32.mrf.mxu1 }
 0x255   : > { %v3540_v48 = vadd.f32 %v3539_v40, %v3413_v45  ;;  %v2889_v49 = vadd.f32 %v2888_v47, %v2343_v46 }
 0x256   : > { %v2345_v50 = vpop.f32.mrf.mxu0  ;;  %v2890_v51 = vpop.f32.mrf.mxu1 }
 0x257   : > { %3153 = vst [vmem:[%s4692_s14 + $0x290] sm:$0xff] %v2889_v49  ;;  %v3280_v52 = vadd.f32 %v3279_v44, %v2889_v49  ;;  %v3414_v53 = vmul.f32 %v2889_v49, %v2889_v49 }
 0x258   : > { %v2346_v54 = vpop.f32.mrf.mxu0  ;;  %v2891_v55 = vpop.f32.mrf.mxu1 }
 0x259   : > { %v3541_v56 = vadd.f32 %v3540_v48, %v3414_v53  ;;  %v2892_v57 = vadd.f32 %v2891_v55, %v2346_v54 }
 0x25a   : > { %v2348_v58 = vpop.f32.mrf.mxu0  ;;  %v2893_v59 = vpop.f32.mrf.mxu1 }
 0x25b   : > { %3154 = vst [vmem:[%s4692_s14 + $0x298] sm:$0xff] %v2892_v57  ;;  %v3281_v60 = vadd.f32 %v3280_v52, %v2892_v57  ;;  %v3415_v61 = vmul.f32 %v2892_v57, %v2892_v57 }
 0x25c   : > { %v2351_v62 = vpop.f32.mrf.mxu0  ;;  %v2896_v63 = vpop.f32.mrf.mxu1 }
 0x25d   : > { %v3542_v0 = vadd.f32 %v3541_v56, %v3415_v61  ;;  %v2897_v1 = vadd.f32 %v2896_v63, %v2351_v62 }
 0x25e   : > { %v2353_v2 = vpop.f32.mrf.mxu0  ;;  %v2898_v3 = vpop.f32.mrf.mxu1 }
 0x25f   : > { %3155 = vst [vmem:[%s4692_s14 + $0x2a0] sm:$0xff] %v2897_v1  ;;  %v3282_v4 = vadd.f32 %v3281_v60, %v2897_v1  ;;  %v3416_v5 = vmul.f32 %v2897_v1, %v2897_v1 }
 0x260   : > { %v2354_v6 = vpop.f32.mrf.mxu0  ;;  %v2899_v7 = vpop.f32.mrf.mxu1 }
 0x261   : > { %v3543_v8 = vadd.f32 %v3542_v0, %v3416_v5  ;;  %v2900_v9 = vadd.f32 %v2899_v7, %v2354_v6 }
 0x262   : > { %v2356_v10 = vpop.f32.mrf.mxu0  ;;  %v2901_v11 = vpop.f32.mrf.mxu1 }
 0x263   : > { %3156 = vst [vmem:[%s4692_s14 + $0x2a8] sm:$0xff] %v2900_v9  ;;  %v3283_v12 = vadd.f32 %v3282_v4, %v2900_v9  ;;  %v3417_v13 = vmul.f32 %v2900_v9, %v2900_v9 }
 0x264   : > { %v2359_v14 = vpop.f32.mrf.mxu0  ;;  %v2904_v15 = vpop.f32.mrf.mxu1 }
 0x265   : > { %v3544_v16 = vadd.f32 %v3543_v8, %v3417_v13  ;;  %v2905_v17 = vadd.f32 %v2904_v15, %v2359_v14 }
 0x266   : > { %v2361_v18 = vpop.f32.mrf.mxu0  ;;  %v2906_v19 = vpop.f32.mrf.mxu1 }
 0x267   : > { %3157 = vst [vmem:[%s4692_s14 + $0x2b0] sm:$0xff] %v2905_v17  ;;  %v3284_v20 = vadd.f32 %v3283_v12, %v2905_v17  ;;  %v3418_v21 = vmul.f32 %v2905_v17, %v2905_v17 }
 0x268   : > { %v2362_v22 = vpop.f32.mrf.mxu0  ;;  %v2907_v23 = vpop.f32.mrf.mxu1 }
 0x269   : > { %v3545_v24 = vadd.f32 %v3544_v16, %v3418_v21  ;;  %v2908_v25 = vadd.f32 %v2907_v23, %v2362_v22 }
 0x26a   : > { %v2364_v26 = vpop.f32.mrf.mxu0  ;;  %v2909_v27 = vpop.f32.mrf.mxu1 }
 0x26b   : > { %3158 = vst [vmem:[%s4692_s14 + $0x2b8] sm:$0xff] %v2908_v25  ;;  %v3285_v28 = vadd.f32 %v3284_v20, %v2908_v25  ;;  %v3419_v29 = vmul.f32 %v2908_v25, %v2908_v25 }
 0x26c   : > { %v2367_v30 = vpop.f32.mrf.mxu0  ;;  %v2912_v31 = vpop.f32.mrf.mxu1 }
 0x26d   : > { %v3546_v32 = vadd.f32 %v3545_v24, %v3419_v29  ;;  %v2913_v33 = vadd.f32 %v2912_v31, %v2367_v30 }
 0x26e   : > { %v2369_v34 = vpop.f32.mrf.mxu0  ;;  %v2914_v35 = vpop.f32.mrf.mxu1 }
 0x26f   : > { %3159 = vst [vmem:[%s4692_s14 + $0x2c0] sm:$0xff] %v2913_v33  ;;  %v3286_v36 = vadd.f32 %v3285_v28, %v2913_v33  ;;  %v3420_v37 = vmul.f32 %v2913_v33, %v2913_v33 }
 0x270   : > { %v2370_v38 = vpop.f32.mrf.mxu0  ;;  %v2915_v39 = vpop.f32.mrf.mxu1 }
 0x271   : > { %v3547_v40 = vadd.f32 %v3546_v32, %v3420_v37  ;;  %v2916_v41 = vadd.f32 %v2915_v39, %v2370_v38 }
 0x272   : > { %v2372_v42 = vpop.f32.mrf.mxu0  ;;  %v2917_v43 = vpop.f32.mrf.mxu1 }
 0x273   : > { %3160 = vst [vmem:[%s4692_s14 + $0x2c8] sm:$0xff] %v2916_v41  ;;  %v3287_v44 = vadd.f32 %v3286_v36, %v2916_v41  ;;  %v3421_v45 = vmul.f32 %v2916_v41, %v2916_v41 }
 0x274   : > { %v2375_v46 = vpop.f32.mrf.mxu0  ;;  %v2920_v47 = vpop.f32.mrf.mxu1 }
 0x275   : > { %v3548_v48 = vadd.f32 %v3547_v40, %v3421_v45  ;;  %v2921_v49 = vadd.f32 %v2920_v47, %v2375_v46 }
 0x276   : > { %v2377_v50 = vpop.f32.mrf.mxu0  ;;  %v2922_v51 = vpop.f32.mrf.mxu1 }
 0x277   : > { %3161 = vst [vmem:[%s4692_s14 + $0x2d0] sm:$0xff] %v2921_v49  ;;  %v3288_v52 = vadd.f32 %v3287_v44, %v2921_v49  ;;  %v3422_v53 = vmul.f32 %v2921_v49, %v2921_v49 }
 0x278   : > { %v2378_v54 = vpop.f32.mrf.mxu0  ;;  %v2923_v55 = vpop.f32.mrf.mxu1 }
 0x279   : > { %v3549_v56 = vadd.f32 %v3548_v48, %v3422_v53  ;;  %v2924_v57 = vadd.f32 %v2923_v55, %v2378_v54 }
 0x27a   : > { %v2380_v58 = vpop.f32.mrf.mxu0  ;;  %v2925_v59 = vpop.f32.mrf.mxu1 }
 0x27b   : > { %3162 = vst [vmem:[%s4692_s14 + $0x2d8] sm:$0xff] %v2924_v57  ;;  %v3289_v60 = vadd.f32 %v3288_v52, %v2924_v57  ;;  %v3423_v61 = vmul.f32 %v2924_v57, %v2924_v57 }
 0x27c   : > { %v2383_v62 = vpop.f32.mrf.mxu0  ;;  %v2928_v63 = vpop.f32.mrf.mxu1 }
 0x27d   : > { %v3550_v0 = vadd.f32 %v3549_v56, %v3423_v61  ;;  %v2929_v1 = vadd.f32 %v2928_v63, %v2383_v62 }
 0x27e   : > { %v2385_v2 = vpop.f32.mrf.mxu0  ;;  %v2930_v3 = vpop.f32.mrf.mxu1 }
 0x27f   : > { %3163 = vst [vmem:[%s4692_s14 + $0x2e0] sm:$0xff] %v2929_v1  ;;  %v3290_v4 = vadd.f32 %v3289_v60, %v2929_v1  ;;  %v3424_v5 = vmul.f32 %v2929_v1, %v2929_v1 }
 0x280   : > { %v2386_v6 = vpop.f32.mrf.mxu0  ;;  %v2931_v7 = vpop.f32.mrf.mxu1 }
 0x281   : > { %v3551_v8 = vadd.f32 %v3550_v0, %v3424_v5  ;;  %v2932_v9 = vadd.f32 %v2931_v7, %v2386_v6 }
 0x282   : > { %v2388_v10 = vpop.f32.mrf.mxu0  ;;  %v2933_v11 = vpop.f32.mrf.mxu1 }
 0x283   : > { %3164 = vst [vmem:[%s4692_s14 + $0x2e8] sm:$0xff] %v2932_v9  ;;  %v3291_v12 = vadd.f32 %v3290_v4, %v2932_v9  ;;  %v3425_v13 = vmul.f32 %v2932_v9, %v2932_v9 }
 0x284   : > { %v2391_v14 = vpop.f32.mrf.mxu0  ;;  %v2936_v15 = vpop.f32.mrf.mxu1 }
 0x285   : > { %v3552_v16 = vadd.f32 %v3551_v8, %v3425_v13  ;;  %v2937_v17 = vadd.f32 %v2936_v15, %v2391_v14 }
 0x286   : > { %v2393_v18 = vpop.f32.mrf.mxu0  ;;  %v2938_v19 = vpop.f32.mrf.mxu1 }
 0x287   : > { %3165 = vst [vmem:[%s4692_s14 + $0x2f0] sm:$0xff] %v2937_v17  ;;  %v3292_v20 = vadd.f32 %v3291_v12, %v2937_v17  ;;  %v3426_v21 = vmul.f32 %v2937_v17, %v2937_v17 }
 0x288   : > { %v2394_v22 = vpop.f32.mrf.mxu0  ;;  %v2939_v23 = vpop.f32.mrf.mxu1 }
 0x289   : > { %v3553_v24 = vadd.f32 %v3552_v16, %v3426_v21  ;;  %v2940_v25 = vadd.f32 %v2939_v23, %v2394_v22 }
 0x28a   : > { %v2396_v26 = vpop.f32.mrf.mxu0  ;;  %v2941_v27 = vpop.f32.mrf.mxu1 }
 0x28b   : > { %3166 = vst [vmem:[%s4692_s14 + $0x2f8] sm:$0xff] %v2940_v25  ;;  %v3293_v28 = vadd.f32 %v3292_v20, %v2940_v25  ;;  %v3427_v29 = vmul.f32 %v2940_v25, %v2940_v25 }
 0x28c   : > { %v2399_v30 = vpop.f32.mrf.mxu0  ;;  %v2944_v31 = vpop.f32.mrf.mxu1 }
 0x28d   : > { %v4944_v32 = vadd.f32 %v3553_v24, %v3427_v29  ;;  %v4946_v33 = vadd.f32 %v2944_v31, %v2399_v30 }
 0x28e   : > { %v2401_v34 = vpop.f32.mrf.mxu0  ;;  %v2946_v35 = vpop.f32.mrf.mxu1 }
 0x28f   : > { %3167 = vst [vmem:[%s4692_s14 + $0x300] sm:$0xff] %v4946_v33  ;;  %v4951_v36 = vadd.f32 %v3293_v28, %v4946_v33 }
 0x290   : > { %v2402_v37 = vpop.f32.mrf.mxu0  ;;  %v2947_v38 = vpop.f32.mrf.mxu1 }
 0x291   : > { %v4953_v39 = vadd.f32 %v2947_v38, %v2402_v37 }
 0x292   : > { %v2404_v40 = vpop.f32.mrf.mxu0  ;;  %v2949_v41 = vpop.f32.mrf.mxu1 }
 0x293   : > { %3168 = vst [vmem:[%s4692_s14 + $0x308] sm:$0xff] %v4953_v39 }
 0x294   : > { %v2407_v42 = vpop.f32.mrf.mxu0  ;;  %v2952_v43 = vpop.f32.mrf.mxu1 }
 0x295   : > { %v4957_v44 = vadd.f32 %v2952_v43, %v2407_v42 }
 0x296   : > { %v2409_v45 = vpop.f32.mrf.mxu0  ;;  %v2954_v46 = vpop.f32.mrf.mxu1 }
 0x297   : > { %3169 = vst [vmem:[%s4692_s14 + $0x310] sm:$0xff] %v4957_v44 }
 0x298   : > { %v2410_v47 = vpop.f32.mrf.mxu0  ;;  %v2955_v48 = vpop.f32.mrf.mxu1 }
 0x299   : > { %v4961_v49 = vadd.f32 %v2955_v48, %v2410_v47 }
 0x29a   : > { %v2412_v50 = vpop.f32.mrf.mxu0  ;;  %v2957_v51 = vpop.f32.mrf.mxu1 }
 0x29b   : > { %3170 = vst [vmem:[%s4692_s14 + $0x318] sm:$0xff] %v4961_v49 }
 0x29c   : > { %v2415_v52 = vpop.f32.mrf.mxu0  ;;  %v2960_v53 = vpop.f32.mrf.mxu1 }
 0x29d   : > { %v4965_v54 = vadd.f32 %v2960_v53, %v2415_v52 }
 0x29e   : > { %v2417_v55 = vpop.f32.mrf.mxu0  ;;  %v2962_v56 = vpop.f32.mrf.mxu1 }
 0x29f   : > { %3171 = vst [vmem:[%s4692_s14 + $0x320] sm:$0xff] %v4965_v54  ;;  %v3428_v55 = vmul.f32 %v4946_v33, %v4946_v33  ;;  %v3430_v33 = vmul.f32 %v4957_v44, %v4957_v44 }
 0x2a0   : > { %v2418_v57 = vpop.f32.mrf.mxu0  ;;  %v2963_v58 = vpop.f32.mrf.mxu1 }
 0x2a1   : > { %v4969_v59 = vadd.f32 %v2963_v58, %v2418_v57  ;;  %v3429_v58 = vmul.f32 %v4953_v39, %v4953_v39 }
 0x2a2   : > { %v2420_v60 = vpop.f32.mrf.mxu0  ;;  %v2965_v61 = vpop.f32.mrf.mxu1 }
 0x2a3   : > { %3172 = vst [vmem:[%s4692_s14 + $0x328] sm:$0xff] %v4969_v59 }
 0x2a4   : > { %v2423_v62 = vpop.f32.mrf.mxu0  ;;  %v2968_v63 = vpop.f32.mrf.mxu1 }
 0x2a5   : > { %v4973_v0 = vadd.f32 %v2968_v63, %v2423_v62  ;;  %v3555_v63 = vadd.f32 %v4944_v32, %v3428_v55 }
 0x2a6   : > { %v2425_v1 = vpop.f32.mrf.mxu0  ;;  %v2970_v2 = vpop.f32.mrf.mxu1 }
 0x2a7   : > { %3173 = vst [vmem:[%s4692_s14 + $0x330] sm:$0xff] %v4973_v0  ;;  %v3295_v1 = vadd.f32 %v4951_v36, %v4953_v39  ;;  %v3432_v39 = vmul.f32 %v4965_v54, %v4965_v54 }
 0x2a8   : > { %v2426_v3 = vpop.f32.mrf.mxu0  ;;  %v2971_v4 = vpop.f32.mrf.mxu1 }
 0x2a9   : > { %v4977_v5 = vadd.f32 %v2971_v4, %v2426_v3  ;;  %v3556_v4 = vadd.f32 %v3555_v63, %v3429_v58 }
 0x2aa   : > { %v2428_v6 = vpop.f32.mrf.mxu0  ;;  %v2973_v7 = vpop.f32.mrf.mxu1 }
 0x2ab   : > { %3174 = vst [vmem:[%s4692_s14 + $0x338] sm:$0xff] %v4977_v5  ;;  %v3296_v6 = vadd.f32 %v3295_v1, %v4957_v44  ;;  %v3431_v7 = vmul.f32 %v4961_v49, %v4961_v49 }
 0x2ac   : > { %v2431_v8 = vpop.f32.mrf.mxu0  ;;  %v2976_v9 = vpop.f32.mrf.mxu1 }
 0x2ad   : > { %v4981_v10 = vadd.f32 %v2976_v9, %v2431_v8  ;;  %v3297_v36 = vadd.f32 %v3296_v6, %v4961_v49 }
 0x2ae   : > { %v2433_v11 = vpop.f32.mrf.mxu0  ;;  %v2978_v12 = vpop.f32.mrf.mxu1 }
 0x2af   : > { %3175 = vst [vmem:[%s4692_s14 + $0x340] sm:$0xff] %v4981_v10  ;;  %v3557_v11 = vadd.f32 %v3556_v4, %v3430_v33  ;;  %v3298_v44 = vadd.f32 %v3297_v36, %v4965_v54 }
 0x2b0   : > { %v2434_v13 = vpop.f32.mrf.mxu0  ;;  %v2979_v14 = vpop.f32.mrf.mxu1 }
 0x2b1   : > { %v4985_v15 = vadd.f32 %v2979_v14, %v2434_v13  ;;  %v3558_v14 = vadd.f32 %v3557_v11, %v3431_v7  ;;  %v3299_v49 = vadd.f32 %v3298_v44, %v4969_v59 }
 0x2b2   : > { %v2436_v16 = vpop.f32.mrf.mxu0  ;;  %v2981_v17 = vpop.f32.mrf.mxu1 }
 0x2b3   : > { %3176 = vst [vmem:[%s4692_s14 + $0x348] sm:$0xff] %v4985_v15  ;;  %v3433_v16 = vmul.f32 %v4969_v59, %v4969_v59  ;;  %v3300_v54 = vadd.f32 %v3299_v49, %v4973_v0 }
 0x2b4   : > { %v2439_v18 = vpop.f32.mrf.mxu0  ;;  %v2984_v19 = vpop.f32.mrf.mxu1 }
 0x2b5   : > { %v4989_v20 = vadd.f32 %v2984_v19, %v2439_v18  ;;  %v3301_v59 = vadd.f32 %v3300_v54, %v4977_v5 }
 0x2b6   : > { %v2441_v21 = vpop.f32.mrf.mxu0  ;;  %v2986_v22 = vpop.f32.mrf.mxu1 }
 0x2b7   : > { %3177 = vst [vmem:[%s4692_s14 + $0x350] sm:$0xff] %v4989_v20  ;;  %v3559_v21 = vadd.f32 %v3558_v14, %v3432_v39  ;;  %v3434_v22 = vmul.f32 %v4973_v0, %v4973_v0  ;;  %v3302_v0 = vadd.f32 %v3301_v59, %v4981_v10 }
 0x2b8   : > { %v2442_v23 = vpop.f32.mrf.mxu0  ;;  %v2987_v24 = vpop.f32.mrf.mxu1 }
 0x2b9   : > { %v4993_v25 = vadd.f32 %v2987_v24, %v2442_v23 }
 0x2ba   : > { %v2444_v26 = vpop.f32.mrf.mxu0  ;;  %v2989_v27 = vpop.f32.mrf.mxu1 }
 0x2bb   : > { %3178 = vst [vmem:[%s4692_s14 + $0x358] sm:$0xff] %v4993_v25  ;;  %v3560_v26 = vadd.f32 %v3559_v21, %v3433_v16  ;;  %v3435_v27 = vmul.f32 %v4977_v5, %v4977_v5  ;;  %v3303_v5 = vadd.f32 %v3302_v0, %v4985_v15 }
 0x2bc   : > { %v2447_v28 = vpop.f32.mrf.mxu0  ;;  %v2992_v29 = vpop.f32.mrf.mxu1 }
 0x2bd   : > { %v4997_v30 = vadd.f32 %v2992_v29, %v2447_v28 }
 0x2be   : > { %v2449_v31 = vpop.f32.mrf.mxu0  ;;  %v2994_v34 = vpop.f32.mrf.mxu1 }
 0x2bf   : > { %3179 = vst [vmem:[%s4692_s14 + $0x360] sm:$0xff] %v4997_v30  ;;  %v3561_v34 = vadd.f32 %v3560_v26, %v3434_v22  ;;  %v3440_v63 = vmul.f32 %v4997_v30, %v4997_v30 }
 0x2c0   : > { %v2450_v35 = vpop.f32.mrf.mxu0  ;;  %v2995_v37 = vpop.f32.mrf.mxu1 }
 0x2c1   : > { %v5001_v38 = vadd.f32 %v2995_v37, %v2450_v35  ;;  %v3436_v35 = vmul.f32 %v4981_v10, %v4981_v10  ;;  %v3304_v10 = vadd.f32 %v3303_v5, %v4989_v20 }
 0x2c2   : > { %v2452_v40 = vpop.f32.mrf.mxu0  ;;  %v2997_v41 = vpop.f32.mrf.mxu1 }
 0x2c3   : > { %3180 = vst [vmem:[%s4692_s14 + $0x368] sm:$0xff] %v5001_v38  ;;  %v3562_v41 = vadd.f32 %v3561_v34, %v3435_v27 }
 0x2c4   : > { %v2455_v42 = vpop.f32.mrf.mxu0  ;;  %v3000_v43 = vpop.f32.mrf.mxu1 }
 0x2c5   : > { %v5005_v45 = vadd.f32 %v3000_v43, %v2455_v42  ;;  %v3437_v42 = vmul.f32 %v4985_v15, %v4985_v15  ;;  %v3305_v15 = vadd.f32 %v3304_v10, %v4993_v25 }
 0x2c6   : > { %v2457_v46 = vpop.f32.mrf.mxu0  ;;  %v3002_v47 = vpop.f32.mrf.mxu1 }
 0x2c7   : > { %3181 = vst [vmem:[%s4692_s14 + $0x370] sm:$0xff] %v5005_v45 }
 0x2c8   : > { %v2458_v48 = vpop.f32.mrf.mxu0  ;;  %v3003_v50 = vpop.f32.mrf.mxu1 }
 0x2c9   : > { %v5009_v51 = vadd.f32 %v3003_v50, %v2458_v48  ;;  %v3563_v48 = vadd.f32 %v3562_v41, %v3436_v35  ;;  %v3438_v50 = vmul.f32 %v4989_v20, %v4989_v20  ;;  %v3306_v20 = vadd.f32 %v3305_v15, %v4997_v30 }
 0x2ca   : > { %v2460_v52 = vpop.f32.mrf.mxu0  ;;  %v3005_v53 = vpop.f32.mrf.mxu1 }
 0x2cb   : > { %3182 = vst [vmem:[%s4692_s14 + $0x378] sm:$0xff] %v5009_v51  ;;  %v3564_v55 = vadd.f32 %v3563_v48, %v3437_v42  ;;  %v3443_v30 = vmul.f32 %v5009_v51, %v5009_v51 }
 0x2cc   : > { %v2463_v56 = vpop.f32.mrf.mxu0  ;;  %v3008_v57 = vpop.f32.mrf.mxu1 }
 0x2cd   : > { %v5017_v60 = vadd.f32 %v3008_v57, %v2463_v56  ;;  %v3439_v56 = vmul.f32 %v4993_v25, %v4993_v25  ;;  %v3307_v25 = vadd.f32 %v3306_v20, %v5001_v38 }
 0x2ce   : > { %v2465_v61 = vpop.f32.mrf.mxu0  ;;  %v3010_v62 = vpop.f32.mrf.mxu1 }
 0x2cf   : > { %3183 = vst [vmem:[%s4692_s14 + $0x380] sm:$0xff] %v5017_v60  ;;  %v3565_v62 = vadd.f32 %v3564_v55, %v3438_v50 }
 0x2d0   : > { %v2466_v2 = vpop.f32.mrf.mxu0  ;;  %v3011_v3 = vpop.f32.mrf.mxu1 }
 0x2d1   : > { %v5029_v8 = vadd.f32 %v3011_v3, %v2466_v2  ;;  %v3566_v2 = vadd.f32 %v3565_v62, %v3439_v56  ;;  %v3441_v3 = vmul.f32 %v5001_v38, %v5001_v38  ;;  %v3444_v38 = vmul.f32 %v5017_v60, %v5017_v60 }
 0x2d2   : > { %v2468_v9 = vpop.f32.mrf.mxu0  ;;  %v3013_v32 = vpop.f32.mrf.mxu1 }
 0x2d3   : > { %3184 = vst [vmem:[%s4692_s14 + $0x388] sm:$0xff] %v5029_v8  ;;  %v3567_v9 = vadd.f32 %v3566_v2, %v3440_v63  ;;  %v3442_v32 = vmul.f32 %v5005_v45, %v5005_v45 }
 0x2d4   : > { %v2471_v12 = vpop.f32.mrf.mxu0  ;;  %v3016_v13 = vpop.f32.mrf.mxu1 }
 0x2d5   : > { %v5039_v17 = vadd.f32 %v3016_v13, %v2471_v12  ;;  %v3568_v39 = vadd.f32 %v3567_v9, %v3441_v3  ;;  %v3308_v12 = vadd.f32 %v3307_v25, %v5005_v45  ;;  %v3445_v45 = vmul.f32 %v5029_v8, %v5029_v8 }
 0x2d6   : > { %v2473_v18 = vpop.f32.mrf.mxu0  ;;  %v3018_v19 = vpop.f32.mrf.mxu1 }
 0x2d7   : > { %3185 = vst [vmem:[%s4692_s14 + $0x390] sm:$0xff] %v5039_v17  ;;  %v3569_v16 = vadd.f32 %v3568_v39, %v3442_v32  ;;  %v3309_v18 = vadd.f32 %v3308_v12, %v5009_v51  ;;  %v3446_v51 = vmul.f32 %v5039_v17, %v5039_v17 }
 0x2d8   : > { %v2474_v23 = vpop.f32.mrf.mxu0  ;;  %v3019_v24 = vpop.f32.mrf.mxu1 }
 0x2d9   : > { %v5049_v28 = vadd.f32 %v3019_v24, %v2474_v23  ;;  %v3570_v49 = vadd.f32 %v3569_v16, %v3443_v30  ;;  %v3310_v22 = vadd.f32 %v3309_v18, %v5017_v60 }
 0x2da   : > { %v2476_v29 = vpop.f32.mrf.mxu0  ;;  %v3021_v31 = vpop.f32.mrf.mxu1 }
 0x2db   : > { %3186 = vst [vmem:[%s4692_s14 + $0x398] sm:$0xff] %v5049_v28  ;;  %v3571_v54 = vadd.f32 %v3570_v49, %v3444_v38  ;;  %v3311_v27 = vadd.f32 %v3310_v22, %v5029_v8  ;;  %v3447_v60 = vmul.f32 %v5049_v28, %v5049_v28 }
 0x2dc   : > { %v2479_v37 = vpop.f32.mrf.mxu0  ;;  %v3024_v40 = vpop.f32.mrf.mxu1 }
 0x2dd   : > { %v5059_v43 = vadd.f32 %v3024_v40, %v2479_v37  ;;  %v3572_v34 = vadd.f32 %v3571_v54, %v3445_v45  ;;  %v3312_v59 = vadd.f32 %v3311_v27, %v5039_v17 }
 0x2de   : > { %v2481_v46 = vpop.f32.mrf.mxu0  ;;  %v3026_v47 = vpop.f32.mrf.mxu1 }
 0x2df   : > { %3187 = vst [vmem:[%s4692_s14 + $0x3a0] sm:$0xff] %v5059_v43  ;;  %v3573_v41 = vadd.f32 %v3572_v34, %v3446_v51  ;;  %v3313_v0 = vadd.f32 %v3312_v59, %v5049_v28  ;;  %v3448_v8 = vmul.f32 %v5059_v43, %v5059_v43 }
 0x2e0   : > { %v2482_v52 = vpop.f32.mrf.mxu0  ;;  %v3027_v53 = vpop.f32.mrf.mxu1 }
 0x2e1   : > { %v5069_v57 = vadd.f32 %v3027_v53, %v2482_v52  ;;  %v3574_v47 = vadd.f32 %v3573_v41, %v3447_v60  ;;  %v3314_v48 = vadd.f32 %v3313_v0, %v5059_v43 }
 0x2e2   : > { %v2484_v58 = vpop.f32.mrf.mxu0  ;;  %v3029_v61 = vpop.f32.mrf.mxu1 }
 0x2e3   : > { %3188 = vst [vmem:[%s4692_s14 + $0x3a8] sm:$0xff] %v5069_v57  ;;  %v3449_v17 = vmul.f32 %v5069_v57, %v5069_v57  ;;  %v3575_v53 = vadd.f32 %v3574_v47, %v3448_v8  ;;  %v3315_v55 = vadd.f32 %v3314_v48, %v5069_v57 }
 0x2e4   : > { %v2487_v1 = vpop.f32.mrf.mxu0  ;;  %v3032_v33 = vpop.f32.mrf.mxu1 }
 0x2e5   : > { %v3033_v4 = vadd.f32 %v3032_v33, %v2487_v1  ;;  %v3576_v58 = vadd.f32 %v3575_v53, %v3449_v17 }
 0x2e6   : > { %v2489_v6 = vpop.f32.mrf.mxu0  ;;  %v3034_v7 = vpop.f32.mrf.mxu1 }
 0x2e7   : > { %3189 = vst [vmem:[%s4692_s14 + $0x3b0] sm:$0xff] %v3033_v4  ;;  %v3450_v28 = vmul.f32 %v3033_v4, %v3033_v4  ;;  %v3316_v61 = vadd.f32 %v3315_v55, %v3033_v4 }
 0x2e8   : > { %v2490_v11 = vpop.f32.mrf.mxu0  ;;  %v3035_v36 = vpop.f32.mrf.mxu1 }
 0x2e9   : > { %v3036_v13 = vadd.f32 %v3035_v36, %v2490_v11  ;;  %v3577_v1 = vadd.f32 %v3576_v58, %v3450_v28 }
 0x2ea   : > { %v2492_v14 = vpop.f32.mrf.mxu0  ;;  %v3037_v44 = vpop.f32.mrf.mxu1 }
 0x2eb   : > { %3190 = vst [vmem:[%s4692_s14 + $0x3b8] sm:$0xff] %v3036_v13  ;;  %v3451_v62 = vmul.f32 %v3036_v13, %v3036_v13  ;;  %v3317_v33 = vadd.f32 %v3316_v61, %v3036_v13 }
 0x2ec   : > { %v2495_v19 = vpop.f32.mrf.mxu0  ;;  %v3040_v21 = vpop.f32.mrf.mxu1 }
 0x2ed   : > { %v3041_v23 = vadd.f32 %v3040_v21, %v2495_v19  ;;  %v3578_v6 = vadd.f32 %v3577_v1, %v3451_v62 }
 0x2ee   : > { %v2497_v24 = vpop.f32.mrf.mxu0  ;;  %v3042_v26 = vpop.f32.mrf.mxu1 }
 0x2ef   : > { %3191 = vst [vmem:[%s4692_s14 + $0x3c0] sm:$0xff] %v3041_v23  ;;  %v3452_v2 = vmul.f32 %v3041_v23, %v3041_v23  ;;  %v3318_v7 = vadd.f32 %v3317_v33, %v3041_v23 }
 0x2f0   : > { %v2498_v29 = vpop.f32.mrf.mxu0  ;;  %v3043_v31 = vpop.f32.mrf.mxu1 }
 0x2f1   : > { %v3044_v35 = vadd.f32 %v3043_v31, %v2498_v29  ;;  %v3579_v11 = vadd.f32 %v3578_v6, %v3452_v2 }
 0x2f2   : > { %v2500_v37 = vpop.f32.mrf.mxu0  ;;  %v3045_v40 = vpop.f32.mrf.mxu1 }
 0x2f3   : > { %3192 = vst [vmem:[%s4692_s14 + $0x3c8] sm:$0xff] %v3044_v35  ;;  %v3453_v57 = vmul.f32 %v3044_v35, %v3044_v35  ;;  %v3319_v4 = vadd.f32 %v3318_v7, %v3044_v35 }
 0x2f4   : > { %v2503_v42 = vpop.f32.mrf.mxu0  ;;  %v3048_v46 = vpop.f32.mrf.mxu1 }
 0x2f5   : > { %v3049_v5 = vadd.f32 %v3048_v46, %v2503_v42  ;;  %v3580_v30 = vadd.f32 %v3579_v11, %v3453_v57 }
 0x2f6   : > { %v2505_v50 = vpop.f32.mrf.mxu0  ;;  %v3050_v52 = vpop.f32.mrf.mxu1 }
 0x2f7   : > { %3193 = vst [vmem:[%s4692_s14 + $0x3d0] sm:$0xff] %v3049_v5  ;;  %v3454_v36 = vmul.f32 %v3049_v5, %v3049_v5  ;;  %v3320_v14 = vadd.f32 %v3319_v4, %v3049_v5 }
 0x2f8   : > { %v2506_v10 = vpop.f32.mrf.mxu0  ;;  %v3051_v56 = vpop.f32.mrf.mxu1 }
 0x2f9   : > { %v3052_v15 = vadd.f32 %v3051_v56, %v2506_v10  ;;  %v3581_v38 = vadd.f32 %v3580_v30, %v3454_v36 }
 0x2fa   : > { %v2508_v63 = vpop.f32.mrf.mxu0  ;;  %v3053_v43 = vpop.f32.mrf.mxu1 }
 0x2fb   : > { %3194 = vst [vmem:[%s4692_s14 + $0x3d8] sm:$0xff] %v3052_v15  ;;  %v3455_v13 = vmul.f32 %v3052_v15, %v3052_v15  ;;  %v3321_v19 = vadd.f32 %v3320_v14, %v3052_v15 }
 0x2fc   : > { %v2511_v20 = vpop.f32.mrf.mxu0  ;;  %v3056_v3 = vpop.f32.mrf.mxu1 }
 0x2fd   : > { %v3057_v9 = vadd.f32 %v3056_v3, %v2511_v20  ;;  %v3582_v45 = vadd.f32 %v3581_v38, %v3455_v13 }
 0x2fe   : > { %v2513_v25 = vpop.f32.mrf.mxu0  ;;  %v3058_v32 = vpop.f32.mrf.mxu1 }
 0x2ff   : > { %3195 = vst [vmem:[%s4692_s14 + $0x3e0] sm:$0xff] %v3057_v9  ;;  %v3456_v21 = vmul.f32 %v3057_v9, %v3057_v9  ;;  %v3322_v23 = vadd.f32 %v3321_v19, %v3057_v9 }
 0x300   : > { %v2514_v39 = vpop.f32.mrf.mxu0  ;;  %v3059_v12 = vpop.f32.mrf.mxu1 }
 0x301   : > { %v3060_v44 = vadd.f32 %v3059_v12, %v2514_v39  ;;  %v3583_v51 = vadd.f32 %v3582_v45, %v3456_v21 }
 0x302   : > { %v2516_v16 = vpop.f32.mrf.mxu0  ;;  %v3061_v18 = vpop.f32.mrf.mxu1 }
 0x303   : > { %3196 = vst [vmem:[%s4692_s14 + $0x3e8] sm:$0xff] %v3060_v44  ;;  %v3457_v24 = vmul.f32 %v3060_v44, %v3060_v44  ;;  %v3323_v29 = vadd.f32 %v3322_v23, %v3060_v44 }
 0x304   : > { %v2519_v49 = vpop.f32.mrf.mxu0  ;;  %v3064_v22 = vpop.f32.mrf.mxu1 }
 0x305   : > { %v3065_v26 = vadd.f32 %v3064_v22, %v2519_v49  ;;  %v3584_v60 = vadd.f32 %v3583_v51, %v3457_v24 }
 0x306   : > { %v2521_v54 = vpop.f32.mrf.mxu0  ;;  %v3066_v27 = vpop.f32.mrf.mxu1 }
 0x307   : > { %3197 = vst [vmem:[%s4692_s14 + $0x3f0] sm:$0xff] %v3065_v26  ;;  %v3458_v31 = vmul.f32 %v3065_v26, %v3065_v26  ;;  %v3324_v35 = vadd.f32 %v3323_v29, %v3065_v26 }
 0x308   : > { %v2522_v34 = vpop.f32.mrf.mxu0  ;;  %v3067_v59 = vpop.f32.mrf.mxu1 }
 0x309   : > { %v3068_v37 = vadd.f32 %v3067_v59, %v2522_v34  ;;  %v3585_v0 = vadd.f32 %v3584_v60, %v3458_v31 }
 0x30a   : > { %v2524_v40 = vpop.f32.mrf.mxu0  ;;  %v3069_v41 = vpop.f32.mrf.mxu1 }
 0x30b   : > { %3198 = vst [vmem:[%s4692_s14 + $0x3f8] sm:$0xff] %v3068_v37  ;;  %v3325_v8 = vadd.f32 %v3324_v35, %v3068_v37  ;;  %v3459_v42 = vmul.f32 %v3068_v37, %v3068_v37 }
 0x30d   : > { %v3326_v46 = vrot.slane %v3325_v8, 4  ;;  %v3586_v47 = vadd.f32 %v3585_v0, %v3459_v42 }
 0x30f   : > { %v3327_v48 = vadd.f32 %v3326_v46, %v3325_v8  ;;  %v3587_v17 = vrot.slane %v3586_v47, 4 }
 0x311   : > { %v3328_v5 = vrot.slane %v3327_v48, 2  ;;  %v3588_v50 = vadd.f32 %v3587_v17, %v3586_v47 }
 0x313   : > { %v3329_v52 = vadd.f32 %v3328_v5, %v3327_v48  ;;  %v3589_v53 = vrot.slane %v3588_v50, 2 }
 0x315   : > { %v3330_v55 = vrot.slane %v3329_v52, 1  ;;  %v3590_v28 = vadd.f32 %v3589_v53, %v3588_v50 }
 0x317   : > { %v3591_v10 = vrot.slane %v3590_v28, 1  ;;  %v3331_v56 = vadd.f32 %v3330_v55, %v3329_v52 }
 0x319   : > { %v3592_v58 = vadd.f32 %v3591_v10, %v3590_v28 }
 0x31b   : > { %v3594_v61 = vsel %vm3593_vm0, %v3331_v56, %v3592_v58 }
 0x31c   : > { %3595 = vst [vmem:[%s187_s16] sm:$0x3] %v3594_v61 }
 0x31d PF: > { %s14_s12 = sadd.s32 1, %s4416_s12  }
 0x31e   : > { %p11_p5 = scmp.ge.s32.totalorder %s14_s12, 4  }
 0x320   :  { %13 = sbr.rel (!%p11_p5) target bundleno = 1 (0x1), region = 70 }

// kernel: number_noise_simulation.25
= control target key start
LH: loop header
LB: loop body
LE: loop exit
PB: predicated region body
PF: predicated region fallthrough
CT: control target
= control target key end

     0   :  { %s4351_s9 = smov 0   ;;  %s4890_s0 = inlined_call_operand.vmem [shape: bf16[2048,512], index: 0, kind: input, shape index: {}]   ;;  %s4891_s1 = inlined_call_operand.vmem [shape: bf16[512,128], index: 1, kind: input, shape index: {}]   ;;  %s4892_s2 = inlined_call_operand.vmem [shape: f32[2048,128], index: 2, kind: output, shape index: {}]  }
   0x1 LB: > { %s3345_s10 = sadd.s32 4294967295, %s4333_s9   ;;  %p3349_p0 = scmp.ge.s32.totalorder %s4333_s9, 1  ;;  %s4333_s9 = sphi %s4351_s9, %s12_s9  }
   0x2   : > { %p114_p1 = scmp.lt.s32.totalorder %s4333_s9, 3 }
   0x4   : > { %p115_p2 = pnand %p3349_p0, %p114_p1 }
   0x5   : > { %s3350_s3 = sshll.u32 (!%p115_p2), %s3345_s10, 7 }
   0x6   : > { %118 = sbr.rel (%p115_p2) target bundleno = 795 (0x31b), region = 28  ;;  %p138_p3 = scmp.lt.s32.totalorder (!%p115_p2), %s3350_s3, 255 }
   0xb   : > { %v3655_v0 = vld [vmem:[%s4891_s1 + $0x38] sm:$0xff]   ;;  %v4335_v1 = vmov 0   ;;  %v3657_v3 = vld [vmem:[%s4891_s1 + $0x30] sm:$0xff]   ;;  %v3659_v5 = vld [vmem:[%s4891_s1 + $0x28] sm:$0xff]   ;;  %s4894_s3 = smov (!%p138_p3, %s3350_s3), 255 }
   0xc   : > { %1943 = vmatprep.subr.bf16.mxu0 %v4335_v1  ;;  %2488 = vmatprep.subr.bf16.mxu1 %v4335_v1  ;;  %v3656_v2 = vld [vmem:[%s4891_s1 + $0xb8] sm:$0xff]   ;;  %v3658_v4 = vld [vmem:[%s4891_s1 + $0xb0] sm:$0xff]   ;;  %v3660_v6 = vld [vmem:[%s4891_s1 + $0xa8] sm:$0xff]   ;;  %s3645_s17 = sshll.u32 %s4894_s3, 4  ;;  %s3354_s28 = sshll.u32 %s4894_s3, 3 }
   0xd   : > { %1944 = vmatpush1.bf16.msra.mxu0 %v3655_v0  ;;  %2489 = vmatpush1.bf16.msra.mxu1 %v3656_v2  ;;  %v3661_v7 = vld [vmem:[%s4891_s1 + $0x20] sm:$0xff]   ;;  %v3663_v9 = vld [vmem:[%s4891_s1 + $0x18] sm:$0xff]   ;;  %v3665_v11 = vld [vmem:[%s4891_s1 + $0x10] sm:$0xff]   ;;  %s4434_s22 = scalar_lea.vmem %s4890_s0, %s3645_s17  ;;  %s4611_s4 = scalar_lea.vmem %s4892_s2, %s3354_s28 }
   0xe   : > { %1945 = vmatprep.subr.bf16.mxu0 %v4335_v1  ;;  %2490 = vmatprep.subr.bf16.mxu1 %v4335_v1  ;;  %v3662_v8 = vld [vmem:[%s4891_s1 + $0xa0] sm:$0xff]   ;;  %v3664_v10 = vld [vmem:[%s4891_s1 + $0x98] sm:$0xff]   ;;  %v3666_v12 = vld [vmem:[%s4891_s1 + $0x90] sm:$0xff]  }
   0xf   : > { %v3667_v13 = vld [vmem:[%s4891_s1 + $0x8] sm:$0xff]   ;;  %v3669_v15 = vld [vmem:[%s4891_s1] sm:$0xff]   ;;  %v3671_v17 = vld [vmem:[%s4891_s1 + $0x78] sm:$0xff]  }
  0x10   : > { %v3668_v14 = vld [vmem:[%s4891_s1 + $0x88] sm:$0xff]   ;;  %v3670_v16 = vld [vmem:[%s4891_s1 + $0x80] sm:$0xff]   ;;  %v3672_v18 = vld [vmem:[%s4891_s1 + $0xf8] sm:$0xff]  }
  0x11   : > { %1946 = vmatpush1.bf16.msra.mxu0 %v3657_v3  ;;  %2491 = vmatpush1.bf16.msra.mxu1 %v3658_v4  ;;  %v3689_v19 = vld [vmem:[%s4434_s22 + $0x4] ss:$16 sps:$4 sm:$0xff]   ;;  %v3692_v21 = vld [vmem:[%s4434_s22 + $0xc] ss:$16 sps:$4 sm:$0xff]   ;;  %v3687_v35 = vld [vmem:[%s4434_s22] ss:$16 sps:$4 sm:$0xff]  }
  0x12   : > { %1947 = vmatprep.subr.bf16.mxu0 %v4335_v1  ;;  %2492 = vmatprep.subr.bf16.mxu1 %v4335_v1  ;;  %v3673_v20 = vld [vmem:[%s4891_s1 + $0x70] sm:$0xff]   ;;  %v3675_v23 = vld [vmem:[%s4891_s1 + $0x68] sm:$0xff]   ;;  %v3677_v25 = vld [vmem:[%s4891_s1 + $0x60] sm:$0xff]  }
  0x13   : > { %v3674_v22 = vld [vmem:[%s4891_s1 + $0xf0] sm:$0xff]   ;;  %1975 = vmatprep.mubr.bf16.mxu0 %v3689_v19  ;;  %2520 = vmatprep.mubr.bf16.mxu1 %v3692_v21  ;;  %v3676_v24 = vld [vmem:[%s4891_s1 + $0xe8] sm:$0xff]   ;;  %v3678_v26 = vld [vmem:[%s4891_s1 + $0xe0] sm:$0xff]  }
  0x14   : > { %v3679_v27 = vld [vmem:[%s4891_s1 + $0x58] sm:$0xff]   ;;  %v3681_v29 = vld [vmem:[%s4891_s1 + $0x50] sm:$0xff]   ;;  %v3683_v31 = vld [vmem:[%s4891_s1 + $0x48] sm:$0xff]  }
  0x15   : > { %1948 = vmatpush1.bf16.msra.mxu0 %v3659_v5  ;;  %2493 = vmatpush1.bf16.msra.mxu1 %v3660_v6  ;;  %v3680_v28 = vld [vmem:[%s4891_s1 + $0xd8] sm:$0xff]   ;;  %v3682_v30 = vld [vmem:[%s4891_s1 + $0xd0] sm:$0xff]   ;;  %v3684_v32 = vld [vmem:[%s4891_s1 + $0xc8] sm:$0xff]  }
  0x16   : > { %1949 = vmatprep.subr.bf16.mxu0 %v4335_v1  ;;  %2494 = vmatprep.subr.bf16.mxu1 %v4335_v1  ;;  %v3685_v33 = vld [vmem:[%s4891_s1 + $0x40] sm:$0xff]   ;;  %v3690_v36 = vld [vmem:[%s4434_s22 + $0x8] ss:$16 sps:$4 sm:$0xff]   ;;  %v3695_v38 = vld [vmem:[%s4434_s22 + $0x2c] ss:$16 sps:$4 sm:$0xff]  }
  0x17   : > { %v3686_v34 = vld [vmem:[%s4891_s1 + $0xc0] sm:$0xff]   ;;  %v3698_v40 = vld [vmem:[%s4434_s22 + $0x28] ss:$16 sps:$4 sm:$0xff]   ;;  %v3701_v42 = vld [vmem:[%s4434_s22 + $0x4c] ss:$16 sps:$4 sm:$0xff]  }
  0x18   : > { %v3693_v37 = vld [vmem:[%s4434_s22 + $0x24] ss:$16 sps:$4 sm:$0xff]   ;;  %v3697_v39 = vld [vmem:[%s4434_s22 + $0x20] ss:$16 sps:$4 sm:$0xff]   ;;  %v3704_v44 = vld [vmem:[%s4434_s22 + $0x48] ss:$16 sps:$4 sm:$0xff]  }
  0x19   : > { %1950 = vmatpush1.bf16.msra.mxu0 %v3661_v7  ;;  %2495 = vmatpush1.bf16.msra.mxu1 %v3662_v8  ;;  %v3699_v41 = vld [vmem:[%s4434_s22 + $0x44] ss:$16 sps:$4 sm:$0xff]   ;;  %v3703_v43 = vld [vmem:[%s4434_s22 + $0x40] ss:$16 sps:$4 sm:$0xff]   ;;  %v3707_v46 = vld [vmem:[%s4434_s22 + $0x6c] ss:$16 sps:$4 sm:$0xff]  }
  0x1a   : > { %1951 = vmatprep.subr.bf16.mxu0 %v4335_v1  ;;  %2496 = vmatprep.subr.bf16.mxu1 %v4335_v1  ;;  %v3705_v45 = vld [vmem:[%s4434_s22 + $0x64] ss:$16 sps:$4 sm:$0xff]   ;;  %v3709_v47 = vld [vmem:[%s4434_s22 + $0x60] ss:$16 sps:$4 sm:$0xff]   ;;  %v3710_v48 = vld [vmem:[%s4434_s22 + $0x68] ss:$16 sps:$4 sm:$0xff]  }
  0x1b   : > { %v3711_v49 = vld [vmem:[%s4434_s22 + $0x84] ss:$16 sps:$4 sm:$0xff]   ;;  %v3713_v50 = vld [vmem:[%s4434_s22 + $0x8c] ss:$16 sps:$4 sm:$0xff]   ;;  %v3715_v51 = vld [vmem:[%s4434_s22 + $0x80] ss:$16 sps:$4 sm:$0xff]  }
  0x1c   : > { %v3716_v52 = vld [vmem:[%s4434_s22 + $0x88] ss:$16 sps:$4 sm:$0xff]   ;;  %v3717_v53 = vld [vmem:[%s4434_s22 + $0xa4] ss:$16 sps:$4 sm:$0xff]   ;;  %v3719_v54 = vld [vmem:[%s4434_s22 + $0xac] ss:$16 sps:$4 sm:$0xff]  }
  0x1d   : > { %1952 = vmatpush1.bf16.msra.mxu0 %v3663_v9  ;;  %2497 = vmatpush1.bf16.msra.mxu1 %v3664_v10  ;;  %v3721_v55 = vld [vmem:[%s4434_s22 + $0xa0] ss:$16 sps:$4 sm:$0xff]   ;;  %v3722_v56 = vld [vmem:[%s4434_s22 + $0xa8] ss:$16 sps:$4 sm:$0xff]   ;;  %v3723_v57 = vld [vmem:[%s4434_s22 + $0xc4] ss:$16 sps:$4 sm:$0xff]  }
  0x1e   : > { %1953 = vmatprep.subr.bf16.mxu0 %v4335_v1  ;;  %2498 = vmatprep.subr.bf16.mxu1 %v4335_v1  ;;  %v3725_v58 = vld [vmem:[%s4434_s22 + $0xcc] ss:$16 sps:$4 sm:$0xff]   ;;  %v3727_v59 = vld [vmem:[%s4434_s22 + $0xc0] ss:$16 sps:$4 sm:$0xff]   ;;  %v3728_v60 = vld [vmem:[%s4434_s22 + $0xc8] ss:$16 sps:$4 sm:$0xff]  }
  0x1f   : > { %v3729_v61 = vld [vmem:[%s4434_s22 + $0xe4] ss:$16 sps:$4 sm:$0xff]   ;;  %v3731_v62 = vld [vmem:[%s4434_s22 + $0xec] ss:$16 sps:$4 sm:$0xff]   ;;  %v3733_v63 = vld [vmem:[%s4434_s22 + $0xe0] ss:$16 sps:$4 sm:$0xff]  }
  0x20   : > { %v3734_v0 = vld [vmem:[%s4434_s22 + $0xe8] ss:$16 sps:$4 sm:$0xff]   ;;  %v3737_v2 = vld [vmem:[%s4434_s22 + $0x10c] ss:$16 sps:$4 sm:$0xff]   ;;  %v3739_v3 = vld [vmem:[%s4434_s22 + $0x100] ss:$16 sps:$4 sm:$0xff]  }
  0x21   : > { %1954 = vmatpush1.bf16.msra.mxu0 %v3665_v11  ;;  %2499 = vmatpush1.bf16.msra.mxu1 %v3666_v12  ;;  %v3740_v4 = vld [vmem:[%s4434_s22 + $0x108] ss:$16 sps:$4 sm:$0xff]   ;;  %v3741_v5 = vld [vmem:[%s4434_s22 + $0x124] ss:$16 sps:$4 sm:$0xff]   ;;  %v3743_v6 = vld [vmem:[%s4434_s22 + $0x12c] ss:$16 sps:$4 sm:$0xff]  }
  0x22   : > { %1955 = vmatprep.subr.bf16.mxu0 %v4335_v1  ;;  %2500 = vmatprep.subr.bf16.mxu1 %v4335_v1  ;;  %v3745_v7 = vld [vmem:[%s4434_s22 + $0x120] ss:$16 sps:$4 sm:$0xff]   ;;  %v3746_v8 = vld [vmem:[%s4434_s22 + $0x128] ss:$16 sps:$4 sm:$0xff]   ;;  %v3747_v9 = vld [vmem:[%s4434_s22 + $0x144] ss:$16 sps:$4 sm:$0xff]  }
  0x23   : > { %v3749_v10 = vld [vmem:[%s4434_s22 + $0x14c] ss:$16 sps:$4 sm:$0xff]   ;;  %v3751_v11 = vld [vmem:[%s4434_s22 + $0x140] ss:$16 sps:$4 sm:$0xff]   ;;  %v3752_v12 = vld [vmem:[%s4434_s22 + $0x148] ss:$16 sps:$4 sm:$0xff]  }
  0x24   : > { %v3763_v19 = vld [vmem:[%s4434_s22 + $0x180] ss:$16 sps:$4 sm:$0xff]   ;;  %v3765_v21 = vld [vmem:[%s4434_s22 + $0x1a4] ss:$16 sps:$4 sm:$0xff]  }
  0x25   : > { %1956 = vmatpush1.bf16.msra.mxu0 %v3667_v13  ;;  %2501 = vmatpush1.bf16.msra.mxu1 %v3668_v14  ;;  %v3753_v13 = vld [vmem:[%s4434_s22 + $0x164] ss:$16 sps:$4 sm:$0xff]   ;;  %v3755_v14 = vld [vmem:[%s4434_s22 + $0x16c] ss:$16 sps:$4 sm:$0xff]  }
  0x26   : > { %1957 = vmatprep.subr.bf16.mxu0 %v4335_v1  ;;  %2502 = vmatprep.subr.bf16.mxu1 %v4335_v1 }
  0x29   : > { %1958 = vmatpush1.bf16.msra.mxu0 %v3669_v15  ;;  %2503 = vmatpush1.bf16.msra.mxu1 %v3670_v16  ;;  %v3757_v15 = vld [vmem:[%s4434_s22 + $0x160] ss:$16 sps:$4 sm:$0xff]   ;;  %v3758_v16 = vld [vmem:[%s4434_s22 + $0x168] ss:$16 sps:$4 sm:$0xff]  }
  0x2a   : > { %1959 = vmatprep.subr.bf16.mxu0 %v4335_v1  ;;  %2504 = vmatprep.subr.bf16.mxu1 %v4335_v1 }
  0x2d   : > { %1960 = vmatpush2.bf16.msra.mxu0 %v3671_v17  ;;  %2505 = vmatpush2.bf16.msra.mxu1 %v3672_v18  ;;  %v3759_v17 = vld [vmem:[%s4434_s22 + $0x184] ss:$16 sps:$4 sm:$0xff]   ;;  %v3761_v18 = vld [vmem:[%s4434_s22 + $0x18c] ss:$16 sps:$4 sm:$0xff]  }
  0x2e   : > { %1961 = vmatprep.subr.bf16.mxu0 %v4335_v1  ;;  %2506 = vmatprep.subr.bf16.mxu1 %v4335_v1 }
  0x31   : > { %1962 = vmatpush2.bf16.msra.mxu0 %v3673_v20  ;;  %2507 = vmatpush2.bf16.msra.mxu1 %v3674_v22  ;;  %v3764_v20 = vld [vmem:[%s4434_s22 + $0x188] ss:$16 sps:$4 sm:$0xff]   ;;  %v3767_v22 = vld [vmem:[%s4434_s22 + $0x1ac] ss:$16 sps:$4 sm:$0xff]  }
  0x32   : > { %1963 = vmatprep.subr.bf16.mxu0 %v4335_v1  ;;  %2508 = vmatprep.subr.bf16.mxu1 %v4335_v1 }
  0x35   : > { %1964 = vmatpush2.bf16.msra.mxu0 %v3675_v23  ;;  %2509 = vmatpush2.bf16.msra.mxu1 %v3676_v24  ;;  %v3769_v23 = vld [vmem:[%s4434_s22 + $0x1a0] ss:$16 sps:$4 sm:$0xff]   ;;  %v3770_v24 = vld [vmem:[%s4434_s22 + $0x1a8] ss:$16 sps:$4 sm:$0xff]  }
  0x36   : > { %1965 = vmatprep.subr.bf16.mxu0 %v4335_v1  ;;  %2510 = vmatprep.subr.bf16.mxu1 %v4335_v1 }
  0x39   : > { %1966 = vmatpush2.bf16.msra.mxu0 %v3677_v25  ;;  %2511 = vmatpush2.bf16.msra.mxu1 %v3678_v26  ;;  %v3771_v25 = vld [vmem:[%s4434_s22 + $0x1c4] ss:$16 sps:$4 sm:$0xff]   ;;  %v3773_v26 = vld [vmem:[%s4434_s22 + $0x1cc] ss:$16 sps:$4 sm:$0xff]  }
  0x3a   : > { %1967 = vmatprep.subr.bf16.mxu0 %v4335_v1  ;;  %2512 = vmatprep.subr.bf16.mxu1 %v4335_v1 }
  0x3d   : > { %1968 = vmatpush2.bf16.msra.mxu0 %v3679_v27  ;;  %2513 = vmatpush2.bf16.msra.mxu1 %v3680_v28  ;;  %v3775_v27 = vld [vmem:[%s4434_s22 + $0x1c0] ss:$16 sps:$4 sm:$0xff]   ;;  %v3776_v28 = vld [vmem:[%s4434_s22 + $0x1c8] ss:$16 sps:$4 sm:$0xff]  }
  0x3e   : > { %1969 = vmatprep.subr.bf16.mxu0 %v4335_v1  ;;  %2514 = vmatprep.subr.bf16.mxu1 %v4335_v1 }
  0x41   : > { %1970 = vmatpush2.bf16.msra.mxu0 %v3681_v29  ;;  %2515 = vmatpush2.bf16.msra.mxu1 %v3682_v30  ;;  %v3777_v29 = vld [vmem:[%s4434_s22 + $0x1e4] ss:$16 sps:$4 sm:$0xff]   ;;  %v3779_v30 = vld [vmem:[%s4434_s22 + $0x1ec] ss:$16 sps:$4 sm:$0xff]  }
  0x42   : > { %1971 = vmatprep.subr.bf16.mxu0 %v4335_v1  ;;  %2516 = vmatprep.subr.bf16.mxu1 %v4335_v1 }
  0x45   : > { %1972 = vmatpush2.bf16.msra.mxu0 %v3683_v31  ;;  %2517 = vmatpush2.bf16.msra.mxu1 %v3684_v32  ;;  %v3781_v31 = vld [vmem:[%s4434_s22 + $0x1e0] ss:$16 sps:$4 sm:$0xff]   ;;  %v3782_v32 = vld [vmem:[%s4434_s22 + $0x1e8] ss:$16 sps:$4 sm:$0xff]  }
  0x46   : > { %1973 = vmatprep.subr.bf16.mxu0 %v4335_v1  ;;  %2518 = vmatprep.subr.bf16.mxu1 %v4335_v1  ;;  %v3735_v1 = vld [vmem:[%s4434_s22 + $0x104] ss:$16 sps:$4 sm:$0xff]  }
  0x49   : > { %1974 = vmatpush2.bf16.msra.mxu0 %v3685_v33  ;;  %2519 = vmatpush2.bf16.msra.mxu1 %v3686_v34  ;;  %v3783_v33 = vld [vmem:[%s4434_s22 + $0x204] ss:$16 sps:$4 sm:$0xff]   ;;  %v3785_v34 = vld [vmem:[%s4434_s22 + $0x20c] ss:$16 sps:$4 sm:$0xff]  }
  0x4c   : > { %1976 = vmatmul.mubr.bf16.vlgmr.msra.gmra.mxu0 %v3687_v35  ;;  %2521 = vmatmul.mubr.bf16.vlgmr.msra.gmra.mxu1 %v3690_v36  ;;  %v3787_v35 = vld [vmem:[%s4434_s22 + $0x200] ss:$16 sps:$4 sm:$0xff]   ;;  %v3788_v36 = vld [vmem:[%s4434_s22 + $0x208] ss:$16 sps:$4 sm:$0xff]  }
  0x4d   : > { %1983 = vmatprep.mubr.bf16.mxu0 %v3693_v37  ;;  %2528 = vmatprep.mubr.bf16.mxu1 %v3695_v38  ;;  %v3789_v37 = vld [vmem:[%s4434_s22 + $0x224] ss:$16 sps:$4 sm:$0xff]   ;;  %v3791_v38 = vld [vmem:[%s4434_s22 + $0x22c] ss:$16 sps:$4 sm:$0xff]  }
  0x54   : > { %1984 = vmatmul.mubr.bf16.gmra.mxu0 %v3697_v39  ;;  %2529 = vmatmul.mubr.bf16.gmra.mxu1 %v3698_v40  ;;  %v3793_v39 = vld [vmem:[%s4434_s22 + $0x220] ss:$16 sps:$4 sm:$0xff]   ;;  %v3794_v40 = vld [vmem:[%s4434_s22 + $0x228] ss:$16 sps:$4 sm:$0xff]  }
  0x55   : > { %1991 = vmatprep.mubr.bf16.mxu0 %v3699_v41  ;;  %2536 = vmatprep.mubr.bf16.mxu1 %v3701_v42  ;;  %v3795_v41 = vld [vmem:[%s4434_s22 + $0x244] ss:$16 sps:$4 sm:$0xff]   ;;  %v3797_v42 = vld [vmem:[%s4434_s22 + $0x24c] ss:$16 sps:$4 sm:$0xff]  }
  0x5c   : > { %1992 = vmatmul.mubr.bf16.gmra.mxu0 %v3703_v43  ;;  %2537 = vmatmul.mubr.bf16.gmra.mxu1 %v3704_v44  ;;  %v3799_v43 = vld [vmem:[%s4434_s22 + $0x240] ss:$16 sps:$4 sm:$0xff]   ;;  %v3800_v44 = vld [vmem:[%s4434_s22 + $0x248] ss:$16 sps:$4 sm:$0xff]  }
  0x5d   : > { %1999 = vmatprep.mubr.bf16.mxu0 %v3705_v45  ;;  %2544 = vmatprep.mubr.bf16.mxu1 %v3707_v46  ;;  %v3801_v45 = vld [vmem:[%s4434_s22 + $0x264] ss:$16 sps:$4 sm:$0xff]   ;;  %v3803_v46 = vld [vmem:[%s4434_s22 + $0x26c] ss:$16 sps:$4 sm:$0xff]  }
  0x64   : > { %2000 = vmatmul.mubr.bf16.gmra.mxu0 %v3709_v47  ;;  %2545 = vmatmul.mubr.bf16.gmra.mxu1 %v3710_v48  ;;  %v3805_v47 = vld [vmem:[%s4434_s22 + $0x260] ss:$16 sps:$4 sm:$0xff]   ;;  %v3806_v48 = vld [vmem:[%s4434_s22 + $0x268] ss:$16 sps:$4 sm:$0xff]  }
  0x65   : > { %2007 = vmatprep.mubr.bf16.mxu0 %v3711_v49  ;;  %2552 = vmatprep.mubr.bf16.mxu1 %v3713_v50  ;;  %v3807_v49 = vld [vmem:[%s4434_s22 + $0x284] ss:$16 sps:$4 sm:$0xff]   ;;  %v3809_v50 = vld [vmem:[%s4434_s22 + $0x28c] ss:$16 sps:$4 sm:$0xff]  }
  0x6c   : > { %2008 = vmatmul.mubr.bf16.gmra.mxu0 %v3715_v51  ;;  %2553 = vmatmul.mubr.bf16.gmra.mxu1 %v3716_v52  ;;  %v3811_v51 = vld [vmem:[%s4434_s22 + $0x280] ss:$16 sps:$4 sm:$0xff]   ;;  %v3812_v52 = vld [vmem:[%s4434_s22 + $0x288] ss:$16 sps:$4 sm:$0xff]  }
  0x6d   : > { %2015 = vmatprep.mubr.bf16.mxu0 %v3717_v53  ;;  %2560 = vmatprep.mubr.bf16.mxu1 %v3719_v54  ;;  %v3813_v53 = vld [vmem:[%s4434_s22 + $0x2a4] ss:$16 sps:$4 sm:$0xff]   ;;  %v3815_v54 = vld [vmem:[%s4434_s22 + $0x2ac] ss:$16 sps:$4 sm:$0xff]  }
  0x74   : > { %2016 = vmatmul.mubr.bf16.gmra.mxu0 %v3721_v55  ;;  %2561 = vmatmul.mubr.bf16.gmra.mxu1 %v3722_v56  ;;  %v3817_v55 = vld [vmem:[%s4434_s22 + $0x2a0] ss:$16 sps:$4 sm:$0xff]   ;;  %v3818_v56 = vld [vmem:[%s4434_s22 + $0x2a8] ss:$16 sps:$4 sm:$0xff]  }
  0x75   : > { %2023 = vmatprep.mubr.bf16.mxu0 %v3723_v57  ;;  %2568 = vmatprep.mubr.bf16.mxu1 %v3725_v58  ;;  %v3819_v57 = vld [vmem:[%s4434_s22 + $0x2c4] ss:$16 sps:$4 sm:$0xff]   ;;  %v3821_v58 = vld [vmem:[%s4434_s22 + $0x2cc] ss:$16 sps:$4 sm:$0xff]  }
  0x7c   : > { %2024 = vmatmul.mubr.bf16.gmra.mxu0 %v3727_v59  ;;  %2569 = vmatmul.mubr.bf16.gmra.mxu1 %v3728_v60  ;;  %v3823_v59 = vld [vmem:[%s4434_s22 + $0x2c0] ss:$16 sps:$4 sm:$0xff]   ;;  %v3824_v60 = vld [vmem:[%s4434_s22 + $0x2c8] ss:$16 sps:$4 sm:$0xff]  }
  0x7d   : > { %2031 = vmatprep.mubr.bf16.mxu0 %v3729_v61  ;;  %2576 = vmatprep.mubr.bf16.mxu1 %v3731_v62  ;;  %v3825_v61 = vld [vmem:[%s4434_s22 + $0x2e4] ss:$16 sps:$4 sm:$0xff]   ;;  %v3827_v62 = vld [vmem:[%s4434_s22 + $0x2ec] ss:$16 sps:$4 sm:$0xff]  }
  0x84   : > { %2032 = vmatmul.mubr.bf16.gmra.mxu0 %v3733_v63  ;;  %2577 = vmatmul.mubr.bf16.gmra.mxu1 %v3734_v0  ;;  %v3829_v63 = vld [vmem:[%s4434_s22 + $0x2e0] ss:$16 sps:$4 sm:$0xff]   ;;  %v3830_v0 = vld [vmem:[%s4434_s22 + $0x2e8] ss:$16 sps:$4 sm:$0xff]  }
  0x85   : > { %2039 = vmatprep.mubr.bf16.mxu0 %v3735_v1  ;;  %2584 = vmatprep.mubr.bf16.mxu1 %v3737_v2  ;;  %v3831_v1 = vld [vmem:[%s4434_s22 + $0x304] ss:$16 sps:$4 sm:$0xff]   ;;  %v3833_v2 = vld [vmem:[%s4434_s22 + $0x30c] ss:$16 sps:$4 sm:$0xff]  }
  0x8c   : > { %2040 = vmatmul.mubr.bf16.gmra.mxu0 %v3739_v3  ;;  %2585 = vmatmul.mubr.bf16.gmra.mxu1 %v3740_v4  ;;  %v3835_v3 = vld [vmem:[%s4434_s22 + $0x300] ss:$16 sps:$4 sm:$0xff]   ;;  %v3836_v4 = vld [vmem:[%s4434_s22 + $0x308] ss:$16 sps:$4 sm:$0xff]  }
  0x8d   : > { %2047 = vmatprep.mubr.bf16.mxu0 %v3741_v5  ;;  %2592 = vmatprep.mubr.bf16.mxu1 %v3743_v6  ;;  %v3837_v5 = vld [vmem:[%s4434_s22 + $0x324] ss:$16 sps:$4 sm:$0xff]   ;;  %v3839_v6 = vld [vmem:[%s4434_s22 + $0x32c] ss:$16 sps:$4 sm:$0xff]  }
  0x94   : > { %2048 = vmatmul.mubr.bf16.gmra.mxu0 %v3745_v7  ;;  %2593 = vmatmul.mubr.bf16.gmra.mxu1 %v3746_v8 }
  0x95   : > { %2055 = vmatprep.mubr.bf16.mxu0 %v3747_v9  ;;  %2600 = vmatprep.mubr.bf16.mxu1 %v3749_v10 }
  0x9c   : > { %2056 = vmatmul.mubr.bf16.gmra.mxu0 %v3751_v11  ;;  %2601 = vmatmul.mubr.bf16.gmra.mxu1 %v3752_v12 }
  0x9d   : > { %2063 = vmatprep.mubr.bf16.mxu0 %v3753_v13  ;;  %2608 = vmatprep.mubr.bf16.mxu1 %v3755_v14  ;;  %v3841_v13 = vld [vmem:[%s4434_s22 + $0x320] ss:$16 sps:$4 sm:$0xff]  }
  0xa4   : > { %2064 = vmatmul.mubr.bf16.gmra.mxu0 %v3757_v15  ;;  %2609 = vmatmul.mubr.bf16.gmra.mxu1 %v3758_v16  ;;  %v3842_v15 = vld [vmem:[%s4434_s22 + $0x328] ss:$16 sps:$4 sm:$0xff]   ;;  %v3843_v16 = vld [vmem:[%s4434_s22 + $0x344] ss:$16 sps:$4 sm:$0xff]  }
  0xa5   : > { %2071 = vmatprep.mubr.bf16.mxu0 %v3759_v17  ;;  %2616 = vmatprep.mubr.bf16.mxu1 %v3761_v18 }
  0xac   : > { %2072 = vmatmul.mubr.bf16.gmra.mxu0 %v3763_v19  ;;  %2617 = vmatmul.mubr.bf16.gmra.mxu1 %v3764_v20  ;;  %v3845_v19 = vld [vmem:[%s4434_s22 + $0x34c] ss:$16 sps:$4 sm:$0xff]  }
  0xad   : > { %2079 = vmatprep.mubr.bf16.mxu0 %v3765_v21  ;;  %2624 = vmatprep.mubr.bf16.mxu1 %v3767_v22 }
  0xb4   : > { %2080 = vmatmul.mubr.bf16.gmra.mxu0 %v3769_v23  ;;  %2625 = vmatmul.mubr.bf16.gmra.mxu1 %v3770_v24 }
  0xb5   : > { %2087 = vmatprep.mubr.bf16.mxu0 %v3771_v25  ;;  %2632 = vmatprep.mubr.bf16.mxu1 %v3773_v26 }
  0xbc   : > { %2088 = vmatmul.mubr.bf16.gmra.mxu0 %v3775_v27  ;;  %2633 = vmatmul.mubr.bf16.gmra.mxu1 %v3776_v28  ;;  %v3847_v27 = vld [vmem:[%s4434_s22 + $0x340] ss:$16 sps:$4 sm:$0xff]  }
  0xbd   : > { %2095 = vmatprep.mubr.bf16.mxu0 %v3777_v29  ;;  %2640 = vmatprep.mubr.bf16.mxu1 %v3779_v30  ;;  %v3848_v29 = vld [vmem:[%s4434_s22 + $0x348] ss:$16 sps:$4 sm:$0xff]   ;;  %v3849_v30 = vld [vmem:[%s4434_s22 + $0x364] ss:$16 sps:$4 sm:$0xff]  }
  0xc4   : > { %2096 = vmatmul.mubr.bf16.gmra.mxu0 %v3781_v31  ;;  %2641 = vmatmul.mubr.bf16.gmra.mxu1 %v3782_v32 }
  0xc5   : > { %2103 = vmatprep.mubr.bf16.mxu0 %v3783_v33  ;;  %2648 = vmatprep.mubr.bf16.mxu1 %v3785_v34  ;;  %v3851_v33 = vld [vmem:[%s4434_s22 + $0x36c] ss:$16 sps:$4 sm:$0xff]  }
  0xcc   : > { %2104 = vmatmul.mubr.bf16.gmra.mxu0 %v3787_v35  ;;  %2649 = vmatmul.mubr.bf16.gmra.mxu1 %v3788_v36 }
  0xcd   : > { %2111 = vmatprep.mubr.bf16.mxu0 %v3789_v37  ;;  %2656 = vmatprep.mubr.bf16.mxu1 %v3791_v38 }
  0xd4   : > { %2112 = vmatmul.mubr.bf16.gmra.mxu0 %v3793_v39  ;;  %2657 = vmatmul.mubr.bf16.gmra.mxu1 %v3794_v40 }
  0xd5   : > { %2119 = vmatprep.mubr.bf16.mxu0 %v3795_v41  ;;  %2664 = vmatprep.mubr.bf16.mxu1 %v3797_v42  ;;  %v3853_v42 = vld [vmem:[%s4434_s22 + $0x360] ss:$16 sps:$4 sm:$0xff]  }
  0xdc   : > { %2120 = vmatmul.mubr.bf16.gmra.mxu0 %v3799_v43  ;;  %2665 = vmatmul.mubr.bf16.gmra.mxu1 %v3800_v44 }
  0xdd   : > { %2127 = vmatprep.mubr.bf16.mxu0 %v3801_v45  ;;  %2672 = vmatprep.mubr.bf16.mxu1 %v3803_v46  ;;  %v3854_v45 = vld [vmem:[%s4434_s22 + $0x368] ss:$16 sps:$4 sm:$0xff]   ;;  %v3857_v46 = vld [vmem:[%s4434_s22 + $0x384] ss:$16 sps:$4 sm:$0xff]  }
  0xe4   : > { %2128 = vmatmul.mubr.bf16.gmra.mxu0 %v3805_v47  ;;  %2673 = vmatmul.mubr.bf16.gmra.mxu1 %v3806_v48 }
  0xe5   : > { %2135 = vmatprep.mubr.bf16.mxu0 %v3807_v49  ;;  %2680 = vmatprep.mubr.bf16.mxu1 %v3809_v50  ;;  %v3860_v49 = vld [vmem:[%s4434_s22 + $0x38c] ss:$16 sps:$4 sm:$0xff]  }
  0xec   : > { %2136 = vmatmul.mubr.bf16.gmra.mxu0 %v3811_v51  ;;  %2681 = vmatmul.mubr.bf16.gmra.mxu1 %v3812_v52 }
  0xed   : > { %2143 = vmatprep.mubr.bf16.mxu0 %v3813_v53  ;;  %2688 = vmatprep.mubr.bf16.mxu1 %v3815_v54 }
  0xf4   : > { %2144 = vmatmul.mubr.bf16.gmra.mxu0 %v3817_v55  ;;  %2689 = vmatmul.mubr.bf16.gmra.mxu1 %v3818_v56 }
  0xf5   : > { %2151 = vmatprep.mubr.bf16.mxu0 %v3819_v57  ;;  %2696 = vmatprep.mubr.bf16.mxu1 %v3821_v58  ;;  %v3855_v58 = vld [vmem:[%s4434_s22 + $0x380] ss:$16 sps:$4 sm:$0xff]  }
  0xfc   : > { %2152 = vmatmul.mubr.bf16.gmra.mxu0 %v3823_v59  ;;  %2697 = vmatmul.mubr.bf16.gmra.mxu1 %v3824_v60 }
  0xfd   : > { %2159 = vmatprep.mubr.bf16.mxu0 %v3825_v61  ;;  %2704 = vmatprep.mubr.bf16.mxu1 %v3827_v62  ;;  %v3858_v61 = vld [vmem:[%s4434_s22 + $0x388] ss:$16 sps:$4 sm:$0xff]   ;;  %v3863_v62 = vld [vmem:[%s4434_s22 + $0x3a4] ss:$16 sps:$4 sm:$0xff]  }
 0x104   : > { %2160 = vmatmul.mubr.bf16.gmra.mxu0 %v3829_v63  ;;  %2705 = vmatmul.mubr.bf16.gmra.mxu1 %v3830_v0 }
 0x105   : > { %2167 = vmatprep.mubr.bf16.mxu0 %v3831_v1  ;;  %2712 = vmatprep.mubr.bf16.mxu1 %v3833_v2  ;;  %v3866_v1 = vld [vmem:[%s4434_s22 + $0x3ac] ss:$16 sps:$4 sm:$0xff]  }
 0x10c   : > { %v1977_v7 = vpop.f32.mrf.mxu0  ;;  %2168 = vmatmul.mubr.bf16.gmra.mxu0 %v3835_v3  ;;  %v2522_v8 = vpop.f32.mrf.mxu1  ;;  %2713 = vmatmul.mubr.bf16.gmra.mxu1 %v3836_v4 }
 0x10d   : > { %2175 = vmatprep.mubr.bf16.mxu0 %v3837_v5  ;;  %v2523_v9 = vadd.f32 %v2522_v8, %v1977_v7  ;;  %2720 = vmatprep.mubr.bf16.mxu1 %v3839_v6 }
 0x10e   : > { %v1979_v10 = vpop.f32.mrf.mxu0  ;;  %v2524_v11 = vpop.f32.mrf.mxu1 }
 0x10f   : > { %4071 = vtanh.f32 %v2523_v9  ;;  %v3861_v10 = vld [vmem:[%s4434_s22 + $0x3a0] ss:$16 sps:$4 sm:$0xff]  }
 0x110   : > { %v1980_v12 = vpop.f32.mrf.mxu0  ;;  %v2525_v14 = vpop.f32.mrf.mxu1 }
 0x111   : > { %v2526_v17 = vadd.f32 %v2525_v14, %v1980_v12  ;;  %v3869_v14 = vld [vmem:[%s4434_s22 + $0x3c4] ss:$16 sps:$4 sm:$0xff]  }
 0x112   : > { %v1982_v18 = vpop.f32.mrf.mxu0  ;;  %v2527_v20 = vpop.f32.mrf.mxu1 }
 0x113   : > { %4073 = vtanh.f32 %v2526_v17  ;;  %v3872_v17 = vld [vmem:[%s4434_s22 + $0x3cc] ss:$16 sps:$4 sm:$0xff]  }
 0x114   : > { %v1985_v21 = vpop.f32.mrf.mxu0  ;;  %2176 = vmatmul.mubr.bf16.gmra.mxu0 %v3841_v13  ;;  %v2530_v22 = vpop.f32.mrf.mxu1  ;;  %2721 = vmatmul.mubr.bf16.gmra.mxu1 %v3842_v15  ;;  %v3864_v13 = vld [vmem:[%s4434_s22 + $0x3a8] ss:$16 sps:$4 sm:$0xff]  }
 0x115   : > { %2183 = vmatprep.mubr.bf16.mxu0 %v3843_v16  ;;  %v2531_v23 = vadd.f32 %v2530_v22, %v1985_v21  ;;  %2728 = vmatprep.mubr.bf16.mxu1 %v3845_v19 }
 0x116   : > { %v1987_v24 = vpop.f32.mrf.mxu0  ;;  %v2532_v25 = vpop.f32.mrf.mxu1 }
 0x117   : > { %4075 = vtanh.f32 %v2531_v23 }
 0x118   : > { %v1988_v26 = vpop.f32.mrf.mxu0  ;;  %v2533_v28 = vpop.f32.mrf.mxu1 }
 0x119   : > { %v2534_v31 = vadd.f32 %v2533_v28, %v1988_v26  ;;  %v3867_v26 = vld [vmem:[%s4434_s22 + $0x3c0] ss:$16 sps:$4 sm:$0xff]  }
 0x11a   : > { %v1990_v32 = vpop.f32.mrf.mxu0  ;;  %v2535_v34 = vpop.f32.mrf.mxu1 }
 0x11b   : > { %4077 = vtanh.f32 %v2534_v31 }
 0x11c   : > { %v1993_v35 = vpop.f32.mrf.mxu0  ;;  %2184 = vmatmul.mubr.bf16.gmra.mxu0 %v3847_v27  ;;  %v4072_v36 = vpop.eup %4071  ;;  %2729 = vmatmul.mubr.bf16.gmra.mxu1 %v3848_v29  ;;  %v3870_v29 = vld [vmem:[%s4434_s22 + $0x3c8] ss:$16 sps:$4 sm:$0xff]  }
 0x11d   : > { %v2538_v37 = vpop.f32.mrf.mxu1  ;;  %2191 = vmatprep.mubr.bf16.mxu0 %v3849_v30  ;;  %3161 = vst [vmem:[%s4611_s4] sm:$0xff] %v4072_v36  ;;  %2736 = vmatprep.mubr.bf16.mxu1 %v3851_v33  ;;  %v3875_v30 = vld [vmem:[%s4434_s22 + $0x3e4] ss:$16 sps:$4 sm:$0xff]   ;;  %v3878_v33 = vld [vmem:[%s4434_s22 + $0x3ec] ss:$16 sps:$4 sm:$0xff]  }
 0x11e   : > { %v2539_v38 = vadd.f32 %v2538_v37, %v1993_v35  ;;  %v1995_v39 = vpop.f32.mrf.mxu0 }
 0x11f   : > { %v2540_v40 = vpop.f32.mrf.mxu1 }
 0x120   : > { %4079 = vtanh.f32 %v2539_v38  ;;  %v1996_v41 = vpop.f32.mrf.mxu0  ;;  %v4074_v43 = vpop.eup %4073 }
 0x121   : > { %v2541_v44 = vpop.f32.mrf.mxu1  ;;  %3162 = vst [vmem:[%s4611_s4 + $0x8] sm:$0xff] %v4074_v43 }
 0x122   : > { %v2542_v47 = vadd.f32 %v2541_v44, %v1996_v41  ;;  %v1998_v48 = vpop.f32.mrf.mxu0 }
 0x123   : > { %v2543_v50 = vpop.f32.mrf.mxu1 }
 0x124   : > { %4081 = vtanh.f32 %v2542_v47  ;;  %v2001_v51 = vpop.f32.mrf.mxu0  ;;  %2192 = vmatmul.mubr.bf16.gmra.mxu0 %v3853_v42  ;;  %v4076_v52 = vpop.eup %4075  ;;  %2737 = vmatmul.mubr.bf16.gmra.mxu1 %v3854_v45  ;;  %v3873_v42 = vld [vmem:[%s4434_s22 + $0x3e0] ss:$16 sps:$4 sm:$0xff]   ;;  %v3876_v45 = vld [vmem:[%s4434_s22 + $0x3e8] ss:$16 sps:$4 sm:$0xff]  }
 0x125   : > { %v2546_v53 = vpop.f32.mrf.mxu1  ;;  %2199 = vmatprep.mubr.bf16.mxu0 %v3857_v46  ;;  %3163 = vst [vmem:[%s4611_s4 + $0x10] sm:$0xff] %v4076_v52  ;;  %2744 = vmatprep.mubr.bf16.mxu1 %v3860_v49  ;;  %v3881_v46 = vld [vmem:[%s4434_s22 + $0x404] ss:$16 sps:$4 sm:$0xff]   ;;  %v3884_v49 = vld [vmem:[%s4434_s22 + $0x40c] ss:$16 sps:$4 sm:$0xff]  }
 0x126   : > { %v2547_v54 = vadd.f32 %v2546_v53, %v2001_v51  ;;  %v2003_v55 = vpop.f32.mrf.mxu0 }
 0x127   : > { %v2548_v56 = vpop.f32.mrf.mxu1 }
 0x128   : > { %4083 = vtanh.f32 %v2547_v54  ;;  %v2004_v57 = vpop.f32.mrf.mxu0  ;;  %v4078_v59 = vpop.eup %4077 }
 0x129   : > { %v2549_v60 = vpop.f32.mrf.mxu1  ;;  %3164 = vst [vmem:[%s4611_s4 + $0x18] sm:$0xff] %v4078_v59 }
 0x12a   : > { %v2550_v63 = vadd.f32 %v2549_v60, %v2004_v57  ;;  %v2006_v0 = vpop.f32.mrf.mxu0 }
 0x12b   : > { %v2551_v2 = vpop.f32.mrf.mxu1 }
 0x12c   : > { %4085 = vtanh.f32 %v2550_v63  ;;  %v2009_v3 = vpop.f32.mrf.mxu0  ;;  %2200 = vmatmul.mubr.bf16.gmra.mxu0 %v3855_v58  ;;  %2745 = vmatmul.mubr.bf16.gmra.mxu1 %v3858_v61  ;;  %v3879_v58 = vld [vmem:[%s4434_s22 + $0x400] ss:$16 sps:$4 sm:$0xff]   ;;  %v3882_v61 = vld [vmem:[%s4434_s22 + $0x408] ss:$16 sps:$4 sm:$0xff]  }
 0x12d   : > { %v4080_v4 = vpop.eup %4079  ;;  %v2554_v5 = vpop.f32.mrf.mxu1  ;;  %2207 = vmatprep.mubr.bf16.mxu0 %v3863_v62  ;;  %2752 = vmatprep.mubr.bf16.mxu1 %v3866_v1  ;;  %v3887_v62 = vld [vmem:[%s4434_s22 + $0x424] ss:$16 sps:$4 sm:$0xff]   ;;  %v3890_v1 = vld [vmem:[%s4434_s22 + $0x42c] ss:$16 sps:$4 sm:$0xff]  }
 0x12e   : > { %3165 = vst [vmem:[%s4611_s4 + $0x20] sm:$0xff] %v4080_v4  ;;  %v2555_v6 = vadd.f32 %v2554_v5, %v2009_v3  ;;  %v2011_v7 = vpop.f32.mrf.mxu0 }
 0x12f   : > { %v2556_v8 = vpop.f32.mrf.mxu1 }
 0x130   : > { %4087 = vtanh.f32 %v2555_v6  ;;  %v2012_v9 = vpop.f32.mrf.mxu0 }
 0x131   : > { %v4082_v11 = vpop.eup %4081  ;;  %v2557_v12 = vpop.f32.mrf.mxu1 }
 0x132   : > { %3166 = vst [vmem:[%s4611_s4 + $0x28] sm:$0xff] %v4082_v11  ;;  %v2558_v15 = vadd.f32 %v2557_v12, %v2012_v9  ;;  %v2014_v16 = vpop.f32.mrf.mxu0 }
 0x133   : > { %v2559_v18 = vpop.f32.mrf.mxu1 }
 0x134   : > { %4089 = vtanh.f32 %v2558_v15  ;;  %v2017_v19 = vpop.f32.mrf.mxu0  ;;  %2208 = vmatmul.mubr.bf16.gmra.mxu0 %v3861_v10  ;;  %2753 = vmatmul.mubr.bf16.gmra.mxu1 %v3864_v13  ;;  %v3885_v10 = vld [vmem:[%s4434_s22 + $0x420] ss:$16 sps:$4 sm:$0xff]   ;;  %v3888_v13 = vld [vmem:[%s4434_s22 + $0x428] ss:$16 sps:$4 sm:$0xff]  }
 0x135   : > { %v4084_v20 = vpop.eup %4083  ;;  %v2562_v21 = vpop.f32.mrf.mxu1  ;;  %2215 = vmatprep.mubr.bf16.mxu0 %v3869_v14  ;;  %2760 = vmatprep.mubr.bf16.mxu1 %v3872_v17  ;;  %v3893_v14 = vld [vmem:[%s4434_s22 + $0x444] ss:$16 sps:$4 sm:$0xff]   ;;  %v3896_v17 = vld [vmem:[%s4434_s22 + $0x44c] ss:$16 sps:$4 sm:$0xff]  }
 0x136   : > { %3167 = vst [vmem:[%s4611_s4 + $0x30] sm:$0xff] %v4084_v20  ;;  %v2563_v22 = vadd.f32 %v2562_v21, %v2017_v19  ;;  %v2019_v23 = vpop.f32.mrf.mxu0 }
 0x137   : > { %v2564_v24 = vpop.f32.mrf.mxu1 }
 0x138   : > { %4091 = vtanh.f32 %v2563_v22  ;;  %v2020_v25 = vpop.f32.mrf.mxu0 }
 0x139   : > { %v4086_v27 = vpop.eup %4085  ;;  %v2565_v28 = vpop.f32.mrf.mxu1 }
 0x13a   : > { %3168 = vst [vmem:[%s4611_s4 + $0x38] sm:$0xff] %v4086_v27  ;;  %v2566_v31 = vadd.f32 %v2565_v28, %v2020_v25  ;;  %v2022_v32 = vpop.f32.mrf.mxu0 }
 0x13b   : > { %v2567_v34 = vpop.f32.mrf.mxu1 }
 0x13c   : > { %4093 = vtanh.f32 %v2566_v31  ;;  %v2025_v35 = vpop.f32.mrf.mxu0  ;;  %2216 = vmatmul.mubr.bf16.gmra.mxu0 %v3867_v26  ;;  %2761 = vmatmul.mubr.bf16.gmra.mxu1 %v3870_v29  ;;  %v3891_v26 = vld [vmem:[%s4434_s22 + $0x440] ss:$16 sps:$4 sm:$0xff]   ;;  %v3894_v29 = vld [vmem:[%s4434_s22 + $0x448] ss:$16 sps:$4 sm:$0xff]  }
 0x13d   : > { %v4088_v36 = vpop.eup %4087  ;;  %v2570_v37 = vpop.f32.mrf.mxu1  ;;  %2223 = vmatprep.mubr.bf16.mxu0 %v3875_v30  ;;  %2768 = vmatprep.mubr.bf16.mxu1 %v3878_v33  ;;  %v3899_v30 = vld [vmem:[%s4434_s22 + $0x464] ss:$16 sps:$4 sm:$0xff]   ;;  %v3902_v33 = vld [vmem:[%s4434_s22 + $0x46c] ss:$16 sps:$4 sm:$0xff]  }
 0x13e   : > { %3169 = vst [vmem:[%s4611_s4 + $0x40] sm:$0xff] %v4088_v36  ;;  %v2571_v38 = vadd.f32 %v2570_v37, %v2025_v35  ;;  %v2027_v39 = vpop.f32.mrf.mxu0 }
 0x13f   : > { %v2572_v40 = vpop.f32.mrf.mxu1 }
 0x140   : > { %4095 = vtanh.f32 %v2571_v38  ;;  %v2028_v41 = vpop.f32.mrf.mxu0 }
 0x141   : > { %v4090_v43 = vpop.eup %4089  ;;  %v2573_v44 = vpop.f32.mrf.mxu1 }
 0x142   : > { %3170 = vst [vmem:[%s4611_s4 + $0x48] sm:$0xff] %v4090_v43  ;;  %v2574_v47 = vadd.f32 %v2573_v44, %v2028_v41  ;;  %v2030_v48 = vpop.f32.mrf.mxu0 }
 0x143   : > { %v2575_v50 = vpop.f32.mrf.mxu1 }
 0x144   : > { %4097 = vtanh.f32 %v2574_v47  ;;  %v2033_v51 = vpop.f32.mrf.mxu0  ;;  %2224 = vmatmul.mubr.bf16.gmra.mxu0 %v3873_v42  ;;  %2769 = vmatmul.mubr.bf16.gmra.mxu1 %v3876_v45  ;;  %v3897_v42 = vld [vmem:[%s4434_s22 + $0x460] ss:$16 sps:$4 sm:$0xff]   ;;  %v3900_v45 = vld [vmem:[%s4434_s22 + $0x468] ss:$16 sps:$4 sm:$0xff]  }
 0x145   : > { %v4092_v52 = vpop.eup %4091  ;;  %v2578_v53 = vpop.f32.mrf.mxu1  ;;  %2231 = vmatprep.mubr.bf16.mxu0 %v3881_v46  ;;  %2776 = vmatprep.mubr.bf16.mxu1 %v3884_v49  ;;  %v3905_v46 = vld [vmem:[%s4434_s22 + $0x484] ss:$16 sps:$4 sm:$0xff]   ;;  %v3908_v49 = vld [vmem:[%s4434_s22 + $0x48c] ss:$16 sps:$4 sm:$0xff]  }
 0x146   : > { %3171 = vst [vmem:[%s4611_s4 + $0x50] sm:$0xff] %v4092_v52  ;;  %v2579_v54 = vadd.f32 %v2578_v53, %v2033_v51  ;;  %v2035_v55 = vpop.f32.mrf.mxu0 }
 0x147   : > { %v2580_v56 = vpop.f32.mrf.mxu1 }
 0x148   : > { %4099 = vtanh.f32 %v2579_v54  ;;  %v2036_v57 = vpop.f32.mrf.mxu0 }
 0x149   : > { %v4094_v59 = vpop.eup %4093  ;;  %v2581_v60 = vpop.f32.mrf.mxu1 }
 0x14a   : > { %3172 = vst [vmem:[%s4611_s4 + $0x58] sm:$0xff] %v4094_v59  ;;  %v2582_v63 = vadd.f32 %v2581_v60, %v2036_v57  ;;  %v2038_v0 = vpop.f32.mrf.mxu0 }
 0x14b   : > { %v2583_v2 = vpop.f32.mrf.mxu1 }
 0x14c   : > { %4101 = vtanh.f32 %v2582_v63  ;;  %v2041_v3 = vpop.f32.mrf.mxu0  ;;  %2232 = vmatmul.mubr.bf16.gmra.mxu0 %v3879_v58  ;;  %2777 = vmatmul.mubr.bf16.gmra.mxu1 %v3882_v61  ;;  %v3903_v58 = vld [vmem:[%s4434_s22 + $0x480] ss:$16 sps:$4 sm:$0xff]   ;;  %v3906_v61 = vld [vmem:[%s4434_s22 + $0x488] ss:$16 sps:$4 sm:$0xff]  }
 0x14d   : > { %v4096_v4 = vpop.eup %4095  ;;  %v2586_v5 = vpop.f32.mrf.mxu1  ;;  %2239 = vmatprep.mubr.bf16.mxu0 %v3887_v62  ;;  %2784 = vmatprep.mubr.bf16.mxu1 %v3890_v1  ;;  %v3911_v62 = vld [vmem:[%s4434_s22 + $0x4a4] ss:$16 sps:$4 sm:$0xff]   ;;  %v3914_v1 = vld [vmem:[%s4434_s22 + $0x4ac] ss:$16 sps:$4 sm:$0xff]  }
 0x14e   : > { %3173 = vst [vmem:[%s4611_s4 + $0x60] sm:$0xff] %v4096_v4  ;;  %v2587_v6 = vadd.f32 %v2586_v5, %v2041_v3  ;;  %v2043_v7 = vpop.f32.mrf.mxu0 }
 0x14f   : > { %v2588_v8 = vpop.f32.mrf.mxu1 }
 0x150   : > { %4103 = vtanh.f32 %v2587_v6  ;;  %v2044_v9 = vpop.f32.mrf.mxu0 }
 0x151   : > { %v4098_v11 = vpop.eup %4097  ;;  %v2589_v12 = vpop.f32.mrf.mxu1 }
 0x152   : > { %3174 = vst [vmem:[%s4611_s4 + $0x68] sm:$0xff] %v4098_v11  ;;  %v2590_v15 = vadd.f32 %v2589_v12, %v2044_v9  ;;  %v2046_v16 = vpop.f32.mrf.mxu0 }
 0x153   : > { %v2591_v18 = vpop.f32.mrf.mxu1 }
 0x154   : > { %4105 = vtanh.f32 %v2590_v15  ;;  %v2049_v19 = vpop.f32.mrf.mxu0  ;;  %2240 = vmatmul.mubr.bf16.gmra.mxu0 %v3885_v10  ;;  %2785 = vmatmul.mubr.bf16.gmra.mxu1 %v3888_v13  ;;  %v3909_v10 = vld [vmem:[%s4434_s22 + $0x4a0] ss:$16 sps:$4 sm:$0xff]   ;;  %v3912_v13 = vld [vmem:[%s4434_s22 + $0x4a8] ss:$16 sps:$4 sm:$0xff]  }
 0x155   : > { %v4100_v20 = vpop.eup %4099  ;;  %v2594_v21 = vpop.f32.mrf.mxu1  ;;  %2247 = vmatprep.mubr.bf16.mxu0 %v3893_v14  ;;  %2792 = vmatprep.mubr.bf16.mxu1 %v3896_v17  ;;  %v3917_v14 = vld [vmem:[%s4434_s22 + $0x4c4] ss:$16 sps:$4 sm:$0xff]   ;;  %v3920_v17 = vld [vmem:[%s4434_s22 + $0x4cc] ss:$16 sps:$4 sm:$0xff]  }
 0x156   : > { %3175 = vst [vmem:[%s4611_s4 + $0x70] sm:$0xff] %v4100_v20  ;;  %v2595_v22 = vadd.f32 %v2594_v21, %v2049_v19  ;;  %v2051_v23 = vpop.f32.mrf.mxu0 }
 0x157   : > { %v2596_v24 = vpop.f32.mrf.mxu1 }
 0x158   : > { %4107 = vtanh.f32 %v2595_v22  ;;  %v2052_v25 = vpop.f32.mrf.mxu0 }
 0x159   : > { %v4102_v27 = vpop.eup %4101  ;;  %v2597_v28 = vpop.f32.mrf.mxu1 }
 0x15a   : > { %3176 = vst [vmem:[%s4611_s4 + $0x78] sm:$0xff] %v4102_v27  ;;  %v2598_v31 = vadd.f32 %v2597_v28, %v2052_v25  ;;  %v2054_v32 = vpop.f32.mrf.mxu0 }
 0x15b   : > { %v2599_v34 = vpop.f32.mrf.mxu1 }
 0x15c   : > { %4109 = vtanh.f32 %v2598_v31  ;;  %v2057_v35 = vpop.f32.mrf.mxu0  ;;  %2248 = vmatmul.mubr.bf16.gmra.mxu0 %v3891_v26  ;;  %2793 = vmatmul.mubr.bf16.gmra.mxu1 %v3894_v29  ;;  %v3915_v26 = vld [vmem:[%s4434_s22 + $0x4c0] ss:$16 sps:$4 sm:$0xff]   ;;  %v3918_v29 = vld [vmem:[%s4434_s22 + $0x4c8] ss:$16 sps:$4 sm:$0xff]  }
 0x15d   : > { %v4104_v36 = vpop.eup %4103  ;;  %v2602_v37 = vpop.f32.mrf.mxu1  ;;  %2255 = vmatprep.mubr.bf16.mxu0 %v3899_v30  ;;  %2800 = vmatprep.mubr.bf16.mxu1 %v3902_v33  ;;  %v3923_v30 = vld [vmem:[%s4434_s22 + $0x4e4] ss:$16 sps:$4 sm:$0xff]   ;;  %v3926_v33 = vld [vmem:[%s4434_s22 + $0x4ec] ss:$16 sps:$4 sm:$0xff]  }
 0x15e   : > { %3177 = vst [vmem:[%s4611_s4 + $0x80] sm:$0xff] %v4104_v36  ;;  %v2603_v38 = vadd.f32 %v2602_v37, %v2057_v35  ;;  %v2059_v39 = vpop.f32.mrf.mxu0 }
 0x15f   : > { %v2604_v40 = vpop.f32.mrf.mxu1 }
 0x160   : > { %4111 = vtanh.f32 %v2603_v38  ;;  %v2060_v41 = vpop.f32.mrf.mxu0 }
 0x161   : > { %v4106_v43 = vpop.eup %4105  ;;  %v2605_v44 = vpop.f32.mrf.mxu1 }
 0x162   : > { %3178 = vst [vmem:[%s4611_s4 + $0x88] sm:$0xff] %v4106_v43  ;;  %v2606_v47 = vadd.f32 %v2605_v44, %v2060_v41  ;;  %v2062_v48 = vpop.f32.mrf.mxu0 }
 0x163   : > { %v2607_v50 = vpop.f32.mrf.mxu1 }
 0x164   : > { %4113 = vtanh.f32 %v2606_v47  ;;  %v2065_v51 = vpop.f32.mrf.mxu0  ;;  %2256 = vmatmul.mubr.bf16.gmra.mxu0 %v3897_v42  ;;  %2801 = vmatmul.mubr.bf16.gmra.mxu1 %v3900_v45  ;;  %v3921_v42 = vld [vmem:[%s4434_s22 + $0x4e0] ss:$16 sps:$4 sm:$0xff]   ;;  %v3924_v45 = vld [vmem:[%s4434_s22 + $0x4e8] ss:$16 sps:$4 sm:$0xff]  }
 0x165   : > { %v4108_v52 = vpop.eup %4107  ;;  %v2610_v53 = vpop.f32.mrf.mxu1  ;;  %2263 = vmatprep.mubr.bf16.mxu0 %v3905_v46  ;;  %2808 = vmatprep.mubr.bf16.mxu1 %v3908_v49  ;;  %v3929_v46 = vld [vmem:[%s4434_s22 + $0x504] ss:$16 sps:$4 sm:$0xff]   ;;  %v3932_v49 = vld [vmem:[%s4434_s22 + $0x50c] ss:$16 sps:$4 sm:$0xff]  }
 0x166   : > { %3179 = vst [vmem:[%s4611_s4 + $0x90] sm:$0xff] %v4108_v52  ;;  %v2611_v54 = vadd.f32 %v2610_v53, %v2065_v51  ;;  %v2067_v55 = vpop.f32.mrf.mxu0 }
 0x167   : > { %v2612_v56 = vpop.f32.mrf.mxu1 }
 0x168   : > { %4115 = vtanh.f32 %v2611_v54  ;;  %v2068_v57 = vpop.f32.mrf.mxu0 }
 0x169   : > { %v4110_v59 = vpop.eup %4109  ;;  %v2613_v60 = vpop.f32.mrf.mxu1 }
 0x16a   : > { %3180 = vst [vmem:[%s4611_s4 + $0x98] sm:$0xff] %v4110_v59  ;;  %v2614_v63 = vadd.f32 %v2613_v60, %v2068_v57  ;;  %v2070_v0 = vpop.f32.mrf.mxu0 }
 0x16b   : > { %v2615_v2 = vpop.f32.mrf.mxu1 }
 0x16c   : > { %4117 = vtanh.f32 %v2614_v63  ;;  %v2073_v3 = vpop.f32.mrf.mxu0  ;;  %2264 = vmatmul.mubr.bf16.gmra.mxu0 %v3903_v58  ;;  %2809 = vmatmul.mubr.bf16.gmra.mxu1 %v3906_v61  ;;  %v3927_v58 = vld [vmem:[%s4434_s22 + $0x500] ss:$16 sps:$4 sm:$0xff]   ;;  %v3930_v61 = vld [vmem:[%s4434_s22 + $0x508] ss:$16 sps:$4 sm:$0xff]  }
 0x16d   : > { %v4112_v4 = vpop.eup %4111  ;;  %v2618_v5 = vpop.f32.mrf.mxu1  ;;  %2271 = vmatprep.mubr.bf16.mxu0 %v3911_v62  ;;  %2816 = vmatprep.mubr.bf16.mxu1 %v3914_v1  ;;  %v3935_v62 = vld [vmem:[%s4434_s22 + $0x524] ss:$16 sps:$4 sm:$0xff]   ;;  %v3938_v1 = vld [vmem:[%s4434_s22 + $0x52c] ss:$16 sps:$4 sm:$0xff]  }
 0x16e   : > { %3181 = vst [vmem:[%s4611_s4 + $0xa0] sm:$0xff] %v4112_v4  ;;  %v2619_v6 = vadd.f32 %v2618_v5, %v2073_v3  ;;  %v2075_v7 = vpop.f32.mrf.mxu0 }
 0x16f   : > { %v2620_v8 = vpop.f32.mrf.mxu1 }
 0x170   : > { %4119 = vtanh.f32 %v2619_v6  ;;  %v2076_v9 = vpop.f32.mrf.mxu0 }
 0x171   : > { %v4114_v11 = vpop.eup %4113  ;;  %v2621_v12 = vpop.f32.mrf.mxu1 }
 0x172   : > { %3182 = vst [vmem:[%s4611_s4 + $0xa8] sm:$0xff] %v4114_v11  ;;  %v2622_v15 = vadd.f32 %v2621_v12, %v2076_v9  ;;  %v2078_v16 = vpop.f32.mrf.mxu0 }
 0x173   : > { %v2623_v18 = vpop.f32.mrf.mxu1 }
 0x174   : > { %4121 = vtanh.f32 %v2622_v15  ;;  %v2081_v19 = vpop.f32.mrf.mxu0  ;;  %2272 = vmatmul.mubr.bf16.gmra.mxu0 %v3909_v10  ;;  %2817 = vmatmul.mubr.bf16.gmra.mxu1 %v3912_v13  ;;  %v3933_v10 = vld [vmem:[%s4434_s22 + $0x520] ss:$16 sps:$4 sm:$0xff]   ;;  %v3936_v13 = vld [vmem:[%s4434_s22 + $0x528] ss:$16 sps:$4 sm:$0xff]  }
 0x175   : > { %v4116_v20 = vpop.eup %4115  ;;  %v2626_v21 = vpop.f32.mrf.mxu1  ;;  %2279 = vmatprep.mubr.bf16.mxu0 %v3917_v14  ;;  %2824 = vmatprep.mubr.bf16.mxu1 %v3920_v17  ;;  %v3941_v14 = vld [vmem:[%s4434_s22 + $0x544] ss:$16 sps:$4 sm:$0xff]   ;;  %v3944_v17 = vld [vmem:[%s4434_s22 + $0x54c] ss:$16 sps:$4 sm:$0xff]  }
 0x176   : > { %3183 = vst [vmem:[%s4611_s4 + $0xb0] sm:$0xff] %v4116_v20  ;;  %v2627_v22 = vadd.f32 %v2626_v21, %v2081_v19  ;;  %v2083_v23 = vpop.f32.mrf.mxu0 }
 0x177   : > { %v2628_v24 = vpop.f32.mrf.mxu1 }
 0x178   : > { %4123 = vtanh.f32 %v2627_v22  ;;  %v2084_v25 = vpop.f32.mrf.mxu0 }
 0x179   : > { %v4118_v27 = vpop.eup %4117  ;;  %v2629_v28 = vpop.f32.mrf.mxu1 }
 0x17a   : > { %3184 = vst [vmem:[%s4611_s4 + $0xb8] sm:$0xff] %v4118_v27  ;;  %v2630_v31 = vadd.f32 %v2629_v28, %v2084_v25  ;;  %v2086_v32 = vpop.f32.mrf.mxu0 }
 0x17b   : > { %v2631_v34 = vpop.f32.mrf.mxu1 }
 0x17c   : > { %4125 = vtanh.f32 %v2630_v31  ;;  %v2089_v35 = vpop.f32.mrf.mxu0  ;;  %2280 = vmatmul.mubr.bf16.gmra.mxu0 %v3915_v26  ;;  %2825 = vmatmul.mubr.bf16.gmra.mxu1 %v3918_v29  ;;  %v3939_v26 = vld [vmem:[%s4434_s22 + $0x540] ss:$16 sps:$4 sm:$0xff]   ;;  %v3942_v29 = vld [vmem:[%s4434_s22 + $0x548] ss:$16 sps:$4 sm:$0xff]  }
 0x17d   : > { %v4120_v36 = vpop.eup %4119  ;;  %v2634_v37 = vpop.f32.mrf.mxu1  ;;  %2287 = vmatprep.mubr.bf16.mxu0 %v3923_v30  ;;  %2832 = vmatprep.mubr.bf16.mxu1 %v3926_v33  ;;  %v3947_v30 = vld [vmem:[%s4434_s22 + $0x564] ss:$16 sps:$4 sm:$0xff]   ;;  %v3950_v33 = vld [vmem:[%s4434_s22 + $0x56c] ss:$16 sps:$4 sm:$0xff]  }
 0x17e   : > { %3185 = vst [vmem:[%s4611_s4 + $0xc0] sm:$0xff] %v4120_v36  ;;  %v2635_v38 = vadd.f32 %v2634_v37, %v2089_v35  ;;  %v2091_v39 = vpop.f32.mrf.mxu0 }
 0x17f   : > { %v2636_v40 = vpop.f32.mrf.mxu1 }
 0x180   : > { %4127 = vtanh.f32 %v2635_v38  ;;  %v2092_v41 = vpop.f32.mrf.mxu0 }
 0x181   : > { %v4122_v43 = vpop.eup %4121  ;;  %v2637_v44 = vpop.f32.mrf.mxu1 }
 0x182   : > { %3186 = vst [vmem:[%s4611_s4 + $0xc8] sm:$0xff] %v4122_v43  ;;  %v2638_v47 = vadd.f32 %v2637_v44, %v2092_v41  ;;  %v2094_v48 = vpop.f32.mrf.mxu0 }
 0x183   : > { %v2639_v50 = vpop.f32.mrf.mxu1 }
 0x184   : > { %4129 = vtanh.f32 %v2638_v47  ;;  %v2097_v51 = vpop.f32.mrf.mxu0  ;;  %2288 = vmatmul.mubr.bf16.gmra.mxu0 %v3921_v42  ;;  %2833 = vmatmul.mubr.bf16.gmra.mxu1 %v3924_v45  ;;  %v3945_v42 = vld [vmem:[%s4434_s22 + $0x560] ss:$16 sps:$4 sm:$0xff]   ;;  %v3948_v45 = vld [vmem:[%s4434_s22 + $0x568] ss:$16 sps:$4 sm:$0xff]  }
 0x185   : > { %v4124_v52 = vpop.eup %4123  ;;  %v2642_v53 = vpop.f32.mrf.mxu1  ;;  %2295 = vmatprep.mubr.bf16.mxu0 %v3929_v46  ;;  %2840 = vmatprep.mubr.bf16.mxu1 %v3932_v49  ;;  %v3953_v46 = vld [vmem:[%s4434_s22 + $0x584] ss:$16 sps:$4 sm:$0xff]   ;;  %v3956_v49 = vld [vmem:[%s4434_s22 + $0x58c] ss:$16 sps:$4 sm:$0xff]  }
 0x186   : > { %3187 = vst [vmem:[%s4611_s4 + $0xd0] sm:$0xff] %v4124_v52  ;;  %v2643_v54 = vadd.f32 %v2642_v53, %v2097_v51  ;;  %v2099_v55 = vpop.f32.mrf.mxu0 }
 0x187   : > { %v2644_v56 = vpop.f32.mrf.mxu1 }
 0x188   : > { %4131 = vtanh.f32 %v2643_v54  ;;  %v2100_v57 = vpop.f32.mrf.mxu0 }
 0x189   : > { %v4126_v59 = vpop.eup %4125  ;;  %v2645_v60 = vpop.f32.mrf.mxu1 }
 0x18a   : > { %3188 = vst [vmem:[%s4611_s4 + $0xd8] sm:$0xff] %v4126_v59  ;;  %v2646_v63 = vadd.f32 %v2645_v60, %v2100_v57  ;;  %v2102_v0 = vpop.f32.mrf.mxu0 }
 0x18b   : > { %v2647_v2 = vpop.f32.mrf.mxu1 }
 0x18c   : > { %4133 = vtanh.f32 %v2646_v63  ;;  %v2105_v3 = vpop.f32.mrf.mxu0  ;;  %2296 = vmatmul.mubr.bf16.gmra.mxu0 %v3927_v58  ;;  %2841 = vmatmul.mubr.bf16.gmra.mxu1 %v3930_v61  ;;  %v3951_v58 = vld [vmem:[%s4434_s22 + $0x580] ss:$16 sps:$4 sm:$0xff]   ;;  %v3954_v61 = vld [vmem:[%s4434_s22 + $0x588] ss:$16 sps:$4 sm:$0xff]  }
 0x18d   : > { %v4128_v4 = vpop.eup %4127  ;;  %v2650_v5 = vpop.f32.mrf.mxu1  ;;  %2303 = vmatprep.mubr.bf16.mxu0 %v3935_v62  ;;  %2848 = vmatprep.mubr.bf16.mxu1 %v3938_v1  ;;  %v3959_v62 = vld [vmem:[%s4434_s22 + $0x5a4] ss:$16 sps:$4 sm:$0xff]   ;;  %v3962_v1 = vld [vmem:[%s4434_s22 + $0x5ac] ss:$16 sps:$4 sm:$0xff]  }
 0x18e   : > { %3189 = vst [vmem:[%s4611_s4 + $0xe0] sm:$0xff] %v4128_v4  ;;  %v2651_v6 = vadd.f32 %v2650_v5, %v2105_v3  ;;  %v2107_v7 = vpop.f32.mrf.mxu0 }
 0x18f   : > { %v2652_v8 = vpop.f32.mrf.mxu1 }
 0x190   : > { %4135 = vtanh.f32 %v2651_v6  ;;  %v2108_v9 = vpop.f32.mrf.mxu0 }
 0x191   : > { %v4130_v11 = vpop.eup %4129  ;;  %v2653_v12 = vpop.f32.mrf.mxu1 }
 0x192   : > { %3190 = vst [vmem:[%s4611_s4 + $0xe8] sm:$0xff] %v4130_v11  ;;  %v2654_v15 = vadd.f32 %v2653_v12, %v2108_v9  ;;  %v2110_v16 = vpop.f32.mrf.mxu0 }
 0x193   : > { %v2655_v18 = vpop.f32.mrf.mxu1 }
 0x194   : > { %4137 = vtanh.f32 %v2654_v15  ;;  %v2113_v19 = vpop.f32.mrf.mxu0  ;;  %2304 = vmatmul.mubr.bf16.gmra.mxu0 %v3933_v10  ;;  %2849 = vmatmul.mubr.bf16.gmra.mxu1 %v3936_v13  ;;  %v3957_v10 = vld [vmem:[%s4434_s22 + $0x5a0] ss:$16 sps:$4 sm:$0xff]   ;;  %v3960_v13 = vld [vmem:[%s4434_s22 + $0x5a8] ss:$16 sps:$4 sm:$0xff]  }
 0x195   : > { %v4132_v20 = vpop.eup %4131  ;;  %v2658_v21 = vpop.f32.mrf.mxu1  ;;  %2311 = vmatprep.mubr.bf16.mxu0 %v3941_v14  ;;  %2856 = vmatprep.mubr.bf16.mxu1 %v3944_v17  ;;  %v3965_v14 = vld [vmem:[%s4434_s22 + $0x5c4] ss:$16 sps:$4 sm:$0xff]   ;;  %v3968_v17 = vld [vmem:[%s4434_s22 + $0x5cc] ss:$16 sps:$4 sm:$0xff]  }
 0x196   : > { %3191 = vst [vmem:[%s4611_s4 + $0xf0] sm:$0xff] %v4132_v20  ;;  %v2659_v22 = vadd.f32 %v2658_v21, %v2113_v19  ;;  %v2115_v23 = vpop.f32.mrf.mxu0 }
 0x197   : > { %v2660_v24 = vpop.f32.mrf.mxu1 }
 0x198   : > { %4139 = vtanh.f32 %v2659_v22  ;;  %v2116_v25 = vpop.f32.mrf.mxu0 }
 0x199   : > { %v4134_v27 = vpop.eup %4133  ;;  %v2661_v28 = vpop.f32.mrf.mxu1 }
 0x19a   : > { %3192 = vst [vmem:[%s4611_s4 + $0xf8] sm:$0xff] %v4134_v27  ;;  %v2662_v31 = vadd.f32 %v2661_v28, %v2116_v25  ;;  %v2118_v32 = vpop.f32.mrf.mxu0 }
 0x19b   : > { %v2663_v34 = vpop.f32.mrf.mxu1 }
 0x19c   : > { %4141 = vtanh.f32 %v2662_v31  ;;  %v2121_v35 = vpop.f32.mrf.mxu0  ;;  %2312 = vmatmul.mubr.bf16.gmra.mxu0 %v3939_v26  ;;  %2857 = vmatmul.mubr.bf16.gmra.mxu1 %v3942_v29  ;;  %v3963_v26 = vld [vmem:[%s4434_s22 + $0x5c0] ss:$16 sps:$4 sm:$0xff]   ;;  %v3966_v29 = vld [vmem:[%s4434_s22 + $0x5c8] ss:$16 sps:$4 sm:$0xff]  }
 0x19d   : > { %v4136_v36 = vpop.eup %4135  ;;  %v2666_v37 = vpop.f32.mrf.mxu1  ;;  %2319 = vmatprep.mubr.bf16.mxu0 %v3947_v30  ;;  %2864 = vmatprep.mubr.bf16.mxu1 %v3950_v33  ;;  %v3971_v30 = vld [vmem:[%s4434_s22 + $0x5e4] ss:$16 sps:$4 sm:$0xff]   ;;  %v3974_v33 = vld [vmem:[%s4434_s22 + $0x5ec] ss:$16 sps:$4 sm:$0xff]  }
 0x19e   : > { %3193 = vst [vmem:[%s4611_s4 + $0x100] sm:$0xff] %v4136_v36  ;;  %v2667_v38 = vadd.f32 %v2666_v37, %v2121_v35  ;;  %v2123_v39 = vpop.f32.mrf.mxu0 }
 0x19f   : > { %v2668_v40 = vpop.f32.mrf.mxu1 }
 0x1a0   : > { %4143 = vtanh.f32 %v2667_v38  ;;  %v2124_v41 = vpop.f32.mrf.mxu0 }
 0x1a1   : > { %v4138_v43 = vpop.eup %4137  ;;  %v2669_v44 = vpop.f32.mrf.mxu1 }
 0x1a2   : > { %3194 = vst [vmem:[%s4611_s4 + $0x108] sm:$0xff] %v4138_v43  ;;  %v2670_v47 = vadd.f32 %v2669_v44, %v2124_v41  ;;  %v2126_v48 = vpop.f32.mrf.mxu0 }
 0x1a3   : > { %v2671_v50 = vpop.f32.mrf.mxu1 }
 0x1a4   : > { %4145 = vtanh.f32 %v2670_v47  ;;  %v2129_v51 = vpop.f32.mrf.mxu0  ;;  %2320 = vmatmul.mubr.bf16.gmra.mxu0 %v3945_v42  ;;  %2865 = vmatmul.mubr.bf16.gmra.mxu1 %v3948_v45  ;;  %v3969_v42 = vld [vmem:[%s4434_s22 + $0x5e0] ss:$16 sps:$4 sm:$0xff]   ;;  %v3972_v45 = vld [vmem:[%s4434_s22 + $0x5e8] ss:$16 sps:$4 sm:$0xff]  }
 0x1a5   : > { %v4140_v52 = vpop.eup %4139  ;;  %v2674_v53 = vpop.f32.mrf.mxu1  ;;  %2327 = vmatprep.mubr.bf16.mxu0 %v3953_v46  ;;  %2872 = vmatprep.mubr.bf16.mxu1 %v3956_v49  ;;  %v3977_v46 = vld [vmem:[%s4434_s22 + $0x604] ss:$16 sps:$4 sm:$0xff]   ;;  %v3980_v49 = vld [vmem:[%s4434_s22 + $0x60c] ss:$16 sps:$4 sm:$0xff]  }
 0x1a6   : > { %3195 = vst [vmem:[%s4611_s4 + $0x110] sm:$0xff] %v4140_v52  ;;  %v2675_v54 = vadd.f32 %v2674_v53, %v2129_v51  ;;  %v2131_v55 = vpop.f32.mrf.mxu0 }
 0x1a7   : > { %v2676_v56 = vpop.f32.mrf.mxu1 }
 0x1a8   : > { %4147 = vtanh.f32 %v2675_v54  ;;  %v2132_v57 = vpop.f32.mrf.mxu0 }
 0x1a9   : > { %v4142_v59 = vpop.eup %4141  ;;  %v2677_v60 = vpop.f32.mrf.mxu1 }
 0x1aa   : > { %3196 = vst [vmem:[%s4611_s4 + $0x118] sm:$0xff] %v4142_v59  ;;  %v2678_v63 = vadd.f32 %v2677_v60, %v2132_v57  ;;  %v2134_v0 = vpop.f32.mrf.mxu0 }
 0x1ab   : > { %v2679_v2 = vpop.f32.mrf.mxu1 }
 0x1ac   : > { %4149 = vtanh.f32 %v2678_v63  ;;  %v2137_v3 = vpop.f32.mrf.mxu0  ;;  %2328 = vmatmul.mubr.bf16.gmra.mxu0 %v3951_v58  ;;  %2873 = vmatmul.mubr.bf16.gmra.mxu1 %v3954_v61  ;;  %v3975_v58 = vld [vmem:[%s4434_s22 + $0x600] ss:$16 sps:$4 sm:$0xff]   ;;  %v3978_v61 = vld [vmem:[%s4434_s22 + $0x608] ss:$16 sps:$4 sm:$0xff]  }
 0x1ad   : > { %v4144_v4 = vpop.eup %4143  ;;  %v2682_v5 = vpop.f32.mrf.mxu1  ;;  %2335 = vmatprep.mubr.bf16.mxu0 %v3959_v62  ;;  %2880 = vmatprep.mubr.bf16.mxu1 %v3962_v1  ;;  %v3983_v62 = vld [vmem:[%s4434_s22 + $0x624] ss:$16 sps:$4 sm:$0xff]   ;;  %v3986_v1 = vld [vmem:[%s4434_s22 + $0x62c] ss:$16 sps:$4 sm:$0xff]  }
 0x1ae   : > { %3197 = vst [vmem:[%s4611_s4 + $0x120] sm:$0xff] %v4144_v4  ;;  %v2683_v6 = vadd.f32 %v2682_v5, %v2137_v3  ;;  %v2139_v7 = vpop.f32.mrf.mxu0 }
 0x1af   : > { %v2684_v8 = vpop.f32.mrf.mxu1 }
 0x1b0   : > { %4151 = vtanh.f32 %v2683_v6  ;;  %v2140_v9 = vpop.f32.mrf.mxu0 }
 0x1b1   : > { %v4146_v11 = vpop.eup %4145  ;;  %v2685_v12 = vpop.f32.mrf.mxu1 }
 0x1b2   : > { %3198 = vst [vmem:[%s4611_s4 + $0x128] sm:$0xff] %v4146_v11  ;;  %v2686_v15 = vadd.f32 %v2685_v12, %v2140_v9  ;;  %v2142_v16 = vpop.f32.mrf.mxu0 }
 0x1b3   : > { %v2687_v18 = vpop.f32.mrf.mxu1 }
 0x1b4   : > { %4153 = vtanh.f32 %v2686_v15  ;;  %v2145_v19 = vpop.f32.mrf.mxu0  ;;  %2336 = vmatmul.mubr.bf16.gmra.mxu0 %v3957_v10  ;;  %2881 = vmatmul.mubr.bf16.gmra.mxu1 %v3960_v13  ;;  %v3981_v10 = vld [vmem:[%s4434_s22 + $0x620] ss:$16 sps:$4 sm:$0xff]   ;;  %v3984_v13 = vld [vmem:[%s4434_s22 + $0x628] ss:$16 sps:$4 sm:$0xff]  }
 0x1b5   : > { %v4148_v20 = vpop.eup %4147  ;;  %v2690_v21 = vpop.f32.mrf.mxu1  ;;  %2343 = vmatprep.mubr.bf16.mxu0 %v3965_v14  ;;  %2888 = vmatprep.mubr.bf16.mxu1 %v3968_v17  ;;  %v3989_v14 = vld [vmem:[%s4434_s22 + $0x644] ss:$16 sps:$4 sm:$0xff]   ;;  %v3992_v17 = vld [vmem:[%s4434_s22 + $0x64c] ss:$16 sps:$4 sm:$0xff]  }
 0x1b6   : > { %3199 = vst [vmem:[%s4611_s4 + $0x130] sm:$0xff] %v4148_v20  ;;  %v2691_v22 = vadd.f32 %v2690_v21, %v2145_v19  ;;  %v2147_v23 = vpop.f32.mrf.mxu0 }
 0x1b7   : > { %v2692_v24 = vpop.f32.mrf.mxu1 }
 0x1b8   : > { %4155 = vtanh.f32 %v2691_v22  ;;  %v2148_v25 = vpop.f32.mrf.mxu0 }
 0x1b9   : > { %v4150_v27 = vpop.eup %4149  ;;  %v2693_v28 = vpop.f32.mrf.mxu1 }
 0x1ba   : > { %3200 = vst [vmem:[%s4611_s4 + $0x138] sm:$0xff] %v4150_v27  ;;  %v2694_v31 = vadd.f32 %v2693_v28, %v2148_v25  ;;  %v2150_v32 = vpop.f32.mrf.mxu0 }
 0x1bb   : > { %v2695_v34 = vpop.f32.mrf.mxu1 }
 0x1bc   : > { %4157 = vtanh.f32 %v2694_v31  ;;  %v2153_v35 = vpop.f32.mrf.mxu0  ;;  %2344 = vmatmul.mubr.bf16.gmra.mxu0 %v3963_v26  ;;  %2889 = vmatmul.mubr.bf16.gmra.mxu1 %v3966_v29  ;;  %v3987_v26 = vld [vmem:[%s4434_s22 + $0x640] ss:$16 sps:$4 sm:$0xff]   ;;  %v3990_v29 = vld [vmem:[%s4434_s22 + $0x648] ss:$16 sps:$4 sm:$0xff]  }
 0x1bd   : > { %v4152_v36 = vpop.eup %4151  ;;  %v2698_v37 = vpop.f32.mrf.mxu1  ;;  %2351 = vmatprep.mubr.bf16.mxu0 %v3971_v30  ;;  %2896 = vmatprep.mubr.bf16.mxu1 %v3974_v33  ;;  %v3995_v30 = vld [vmem:[%s4434_s22 + $0x664] ss:$16 sps:$4 sm:$0xff]   ;;  %v3998_v33 = vld [vmem:[%s4434_s22 + $0x66c] ss:$16 sps:$4 sm:$0xff]  }
 0x1be   : > { %3201 = vst [vmem:[%s4611_s4 + $0x140] sm:$0xff] %v4152_v36  ;;  %v2699_v38 = vadd.f32 %v2698_v37, %v2153_v35  ;;  %v2155_v39 = vpop.f32.mrf.mxu0 }
 0x1bf   : > { %v2700_v40 = vpop.f32.mrf.mxu1 }
 0x1c0   : > { %4159 = vtanh.f32 %v2699_v38  ;;  %v2156_v41 = vpop.f32.mrf.mxu0 }
 0x1c1   : > { %v4154_v43 = vpop.eup %4153  ;;  %v2701_v44 = vpop.f32.mrf.mxu1 }
 0x1c2   : > { %3202 = vst [vmem:[%s4611_s4 + $0x148] sm:$0xff] %v4154_v43  ;;  %v2702_v47 = vadd.f32 %v2701_v44, %v2156_v41  ;;  %v2158_v48 = vpop.f32.mrf.mxu0 }
 0x1c3   : > { %v2703_v50 = vpop.f32.mrf.mxu1 }
 0x1c4   : > { %4161 = vtanh.f32 %v2702_v47  ;;  %v2161_v51 = vpop.f32.mrf.mxu0  ;;  %2352 = vmatmul.mubr.bf16.gmra.mxu0 %v3969_v42  ;;  %2897 = vmatmul.mubr.bf16.gmra.mxu1 %v3972_v45  ;;  %v3993_v42 = vld [vmem:[%s4434_s22 + $0x660] ss:$16 sps:$4 sm:$0xff]   ;;  %v3996_v45 = vld [vmem:[%s4434_s22 + $0x668] ss:$16 sps:$4 sm:$0xff]  }
 0x1c5   : > { %v4156_v52 = vpop.eup %4155  ;;  %v2706_v53 = vpop.f32.mrf.mxu1  ;;  %2359 = vmatprep.mubr.bf16.mxu0 %v3977_v46  ;;  %2904 = vmatprep.mubr.bf16.mxu1 %v3980_v49  ;;  %v4001_v46 = vld [vmem:[%s4434_s22 + $0x684] ss:$16 sps:$4 sm:$0xff]   ;;  %v4004_v49 = vld [vmem:[%s4434_s22 + $0x68c] ss:$16 sps:$4 sm:$0xff]  }
 0x1c6   : > { %3203 = vst [vmem:[%s4611_s4 + $0x150] sm:$0xff] %v4156_v52  ;;  %v2707_v54 = vadd.f32 %v2706_v53, %v2161_v51  ;;  %v2163_v55 = vpop.f32.mrf.mxu0 }
 0x1c7   : > { %v2708_v56 = vpop.f32.mrf.mxu1 }
 0x1c8   : > { %4163 = vtanh.f32 %v2707_v54  ;;  %v2164_v57 = vpop.f32.mrf.mxu0 }
 0x1c9   : > { %v4158_v59 = vpop.eup %4157  ;;  %v2709_v60 = vpop.f32.mrf.mxu1 }
 0x1ca   : > { %3204 = vst [vmem:[%s4611_s4 + $0x158] sm:$0xff] %v4158_v59  ;;  %v2710_v63 = vadd.f32 %v2709_v60, %v2164_v57  ;;  %v2166_v0 = vpop.f32.mrf.mxu0 }
 0x1cb   : > { %v2711_v2 = vpop.f32.mrf.mxu1 }
 0x1cc   : > { %4165 = vtanh.f32 %v2710_v63  ;;  %v2169_v3 = vpop.f32.mrf.mxu0  ;;  %2360 = vmatmul.mubr.bf16.gmra.mxu0 %v3975_v58  ;;  %2905 = vmatmul.mubr.bf16.gmra.mxu1 %v3978_v61  ;;  %v3999_v58 = vld [vmem:[%s4434_s22 + $0x680] ss:$16 sps:$4 sm:$0xff]   ;;  %v4002_v61 = vld [vmem:[%s4434_s22 + $0x688] ss:$16 sps:$4 sm:$0xff]  }
 0x1cd   : > { %v4160_v4 = vpop.eup %4159  ;;  %v2714_v5 = vpop.f32.mrf.mxu1  ;;  %2367 = vmatprep.mubr.bf16.mxu0 %v3983_v62  ;;  %2912 = vmatprep.mubr.bf16.mxu1 %v3986_v1  ;;  %v4007_v62 = vld [vmem:[%s4434_s22 + $0x6a4] ss:$16 sps:$4 sm:$0xff]   ;;  %v4010_v1 = vld [vmem:[%s4434_s22 + $0x6ac] ss:$16 sps:$4 sm:$0xff]  }
 0x1ce   : > { %3205 = vst [vmem:[%s4611_s4 + $0x160] sm:$0xff] %v4160_v4  ;;  %v2715_v6 = vadd.f32 %v2714_v5, %v2169_v3  ;;  %v2171_v7 = vpop.f32.mrf.mxu0 }
 0x1cf   : > { %v2716_v8 = vpop.f32.mrf.mxu1 }
 0x1d0   : > { %4167 = vtanh.f32 %v2715_v6  ;;  %v2172_v9 = vpop.f32.mrf.mxu0 }
 0x1d1   : > { %v4162_v11 = vpop.eup %4161  ;;  %v2717_v12 = vpop.f32.mrf.mxu1 }
 0x1d2   : > { %3206 = vst [vmem:[%s4611_s4 + $0x168] sm:$0xff] %v4162_v11  ;;  %v2718_v15 = vadd.f32 %v2717_v12, %v2172_v9  ;;  %v2174_v16 = vpop.f32.mrf.mxu0 }
 0x1d3   : > { %v2719_v18 = vpop.f32.mrf.mxu1 }
 0x1d4   : > { %4169 = vtanh.f32 %v2718_v15  ;;  %v2177_v19 = vpop.f32.mrf.mxu0  ;;  %2368 = vmatmul.mubr.bf16.gmra.mxu0 %v3981_v10  ;;  %2913 = vmatmul.mubr.bf16.gmra.mxu1 %v3984_v13  ;;  %v4005_v10 = vld [vmem:[%s4434_s22 + $0x6a0] ss:$16 sps:$4 sm:$0xff]   ;;  %v4008_v13 = vld [vmem:[%s4434_s22 + $0x6a8] ss:$16 sps:$4 sm:$0xff]  }
 0x1d5   : > { %v4164_v20 = vpop.eup %4163  ;;  %v2722_v21 = vpop.f32.mrf.mxu1  ;;  %2375 = vmatprep.mubr.bf16.mxu0 %v3989_v14  ;;  %2920 = vmatprep.mubr.bf16.mxu1 %v3992_v17  ;;  %v4013_v14 = vld [vmem:[%s4434_s22 + $0x6c4] ss:$16 sps:$4 sm:$0xff]   ;;  %v4016_v17 = vld [vmem:[%s4434_s22 + $0x6cc] ss:$16 sps:$4 sm:$0xff]  }
 0x1d6   : > { %3207 = vst [vmem:[%s4611_s4 + $0x170] sm:$0xff] %v4164_v20  ;;  %v2723_v22 = vadd.f32 %v2722_v21, %v2177_v19  ;;  %v2179_v23 = vpop.f32.mrf.mxu0 }
 0x1d7   : > { %v2724_v24 = vpop.f32.mrf.mxu1 }
 0x1d8   : > { %4171 = vtanh.f32 %v2723_v22  ;;  %v2180_v25 = vpop.f32.mrf.mxu0 }
 0x1d9   : > { %v4166_v27 = vpop.eup %4165  ;;  %v2725_v28 = vpop.f32.mrf.mxu1 }
 0x1da   : > { %3208 = vst [vmem:[%s4611_s4 + $0x178] sm:$0xff] %v4166_v27  ;;  %v2726_v31 = vadd.f32 %v2725_v28, %v2180_v25  ;;  %v2182_v32 = vpop.f32.mrf.mxu0 }
 0x1db   : > { %v2727_v34 = vpop.f32.mrf.mxu1 }
 0x1dc   : > { %4173 = vtanh.f32 %v2726_v31  ;;  %v2185_v35 = vpop.f32.mrf.mxu0  ;;  %2376 = vmatmul.mubr.bf16.gmra.mxu0 %v3987_v26  ;;  %2921 = vmatmul.mubr.bf16.gmra.mxu1 %v3990_v29  ;;  %v4011_v26 = vld [vmem:[%s4434_s22 + $0x6c0] ss:$16 sps:$4 sm:$0xff]   ;;  %v4014_v29 = vld [vmem:[%s4434_s22 + $0x6c8] ss:$16 sps:$4 sm:$0xff]  }
 0x1dd   : > { %v4168_v36 = vpop.eup %4167  ;;  %v2730_v37 = vpop.f32.mrf.mxu1  ;;  %2383 = vmatprep.mubr.bf16.mxu0 %v3995_v30  ;;  %2928 = vmatprep.mubr.bf16.mxu1 %v3998_v33  ;;  %v4019_v30 = vld [vmem:[%s4434_s22 + $0x6e4] ss:$16 sps:$4 sm:$0xff]   ;;  %v4022_v33 = vld [vmem:[%s4434_s22 + $0x6ec] ss:$16 sps:$4 sm:$0xff]  }
 0x1de   : > { %3209 = vst [vmem:[%s4611_s4 + $0x180] sm:$0xff] %v4168_v36  ;;  %v2731_v38 = vadd.f32 %v2730_v37, %v2185_v35  ;;  %v2187_v39 = vpop.f32.mrf.mxu0 }
 0x1df   : > { %v2732_v40 = vpop.f32.mrf.mxu1 }
 0x1e0   : > { %4175 = vtanh.f32 %v2731_v38  ;;  %v2188_v41 = vpop.f32.mrf.mxu0 }
 0x1e1   : > { %v4170_v43 = vpop.eup %4169  ;;  %v2733_v44 = vpop.f32.mrf.mxu1 }
 0x1e2   : > { %3210 = vst [vmem:[%s4611_s4 + $0x188] sm:$0xff] %v4170_v43  ;;  %v2734_v47 = vadd.f32 %v2733_v44, %v2188_v41  ;;  %v2190_v48 = vpop.f32.mrf.mxu0 }
 0x1e3   : > { %v2735_v50 = vpop.f32.mrf.mxu1 }
 0x1e4   : > { %4177 = vtanh.f32 %v2734_v47  ;;  %v2193_v51 = vpop.f32.mrf.mxu0  ;;  %2384 = vmatmul.mubr.bf16.gmra.mxu0 %v3993_v42  ;;  %2929 = vmatmul.mubr.bf16.gmra.mxu1 %v3996_v45  ;;  %v4017_v42 = vld [vmem:[%s4434_s22 + $0x6e0] ss:$16 sps:$4 sm:$0xff]   ;;  %v4020_v45 = vld [vmem:[%s4434_s22 + $0x6e8] ss:$16 sps:$4 sm:$0xff]  }
 0x1e5   : > { %v4172_v52 = vpop.eup %4171  ;;  %v2738_v53 = vpop.f32.mrf.mxu1  ;;  %2391 = vmatprep.mubr.bf16.mxu0 %v4001_v46  ;;  %2936 = vmatprep.mubr.bf16.mxu1 %v4004_v49  ;;  %v4025_v46 = vld [vmem:[%s4434_s22 + $0x704] ss:$16 sps:$4 sm:$0xff]   ;;  %v4028_v49 = vld [vmem:[%s4434_s22 + $0x70c] ss:$16 sps:$4 sm:$0xff]  }
 0x1e6   : > { %3211 = vst [vmem:[%s4611_s4 + $0x190] sm:$0xff] %v4172_v52  ;;  %v2739_v54 = vadd.f32 %v2738_v53, %v2193_v51  ;;  %v2195_v55 = vpop.f32.mrf.mxu0 }
 0x1e7   : > { %v2740_v56 = vpop.f32.mrf.mxu1 }
 0x1e8   : > { %4179 = vtanh.f32 %v2739_v54  ;;  %v2196_v57 = vpop.f32.mrf.mxu0 }
 0x1e9   : > { %v4174_v59 = vpop.eup %4173  ;;  %v2741_v60 = vpop.f32.mrf.mxu1 }
 0x1ea   : > { %3212 = vst [vmem:[%s4611_s4 + $0x198] sm:$0xff] %v4174_v59  ;;  %v2742_v63 = vadd.f32 %v2741_v60, %v2196_v57  ;;  %v2198_v0 = vpop.f32.mrf.mxu0 }
 0x1eb   : > { %v2743_v2 = vpop.f32.mrf.mxu1 }
 0x1ec   : > { %4181 = vtanh.f32 %v2742_v63  ;;  %v2201_v3 = vpop.f32.mrf.mxu0  ;;  %2392 = vmatmul.mubr.bf16.gmra.mxu0 %v3999_v58  ;;  %2937 = vmatmul.mubr.bf16.gmra.mxu1 %v4002_v61  ;;  %v4023_v58 = vld [vmem:[%s4434_s22 + $0x700] ss:$16 sps:$4 sm:$0xff]   ;;  %v4026_v61 = vld [vmem:[%s4434_s22 + $0x708] ss:$16 sps:$4 sm:$0xff]  }
 0x1ed   : > { %v4176_v4 = vpop.eup %4175  ;;  %v2746_v5 = vpop.f32.mrf.mxu1  ;;  %2399 = vmatprep.mubr.bf16.mxu0 %v4007_v62  ;;  %2944 = vmatprep.mubr.bf16.mxu1 %v4010_v1  ;;  %v4031_v62 = vld [vmem:[%s4434_s22 + $0x724] ss:$16 sps:$4 sm:$0xff]   ;;  %v4034_v1 = vld [vmem:[%s4434_s22 + $0x72c] ss:$16 sps:$4 sm:$0xff]  }
 0x1ee   : > { %3213 = vst [vmem:[%s4611_s4 + $0x1a0] sm:$0xff] %v4176_v4  ;;  %v2747_v6 = vadd.f32 %v2746_v5, %v2201_v3  ;;  %v2203_v7 = vpop.f32.mrf.mxu0 }
 0x1ef   : > { %v2748_v8 = vpop.f32.mrf.mxu1 }
 0x1f0   : > { %4183 = vtanh.f32 %v2747_v6  ;;  %v2204_v9 = vpop.f32.mrf.mxu0 }
 0x1f1   : > { %v4178_v11 = vpop.eup %4177  ;;  %v2749_v12 = vpop.f32.mrf.mxu1 }
 0x1f2   : > { %3214 = vst [vmem:[%s4611_s4 + $0x1a8] sm:$0xff] %v4178_v11  ;;  %v2750_v15 = vadd.f32 %v2749_v12, %v2204_v9  ;;  %v2206_v16 = vpop.f32.mrf.mxu0 }
 0x1f3   : > { %v2751_v18 = vpop.f32.mrf.mxu1 }
 0x1f4   : > { %4185 = vtanh.f32 %v2750_v15  ;;  %v2209_v19 = vpop.f32.mrf.mxu0  ;;  %2400 = vmatmul.mubr.bf16.gmra.mxu0 %v4005_v10  ;;  %2945 = vmatmul.mubr.bf16.gmra.mxu1 %v4008_v13  ;;  %v4029_v10 = vld [vmem:[%s4434_s22 + $0x720] ss:$16 sps:$4 sm:$0xff]   ;;  %v4032_v13 = vld [vmem:[%s4434_s22 + $0x728] ss:$16 sps:$4 sm:$0xff]  }
 0x1f5   : > { %v4180_v20 = vpop.eup %4179  ;;  %v2754_v21 = vpop.f32.mrf.mxu1  ;;  %2407 = vmatprep.mubr.bf16.mxu0 %v4013_v14  ;;  %2952 = vmatprep.mubr.bf16.mxu1 %v4016_v17  ;;  %v4037_v14 = vld [vmem:[%s4434_s22 + $0x744] ss:$16 sps:$4 sm:$0xff]   ;;  %v4040_v17 = vld [vmem:[%s4434_s22 + $0x74c] ss:$16 sps:$4 sm:$0xff]  }
 0x1f6   : > { %3215 = vst [vmem:[%s4611_s4 + $0x1b0] sm:$0xff] %v4180_v20  ;;  %v2755_v22 = vadd.f32 %v2754_v21, %v2209_v19  ;;  %v2211_v23 = vpop.f32.mrf.mxu0 }
 0x1f7   : > { %v2756_v24 = vpop.f32.mrf.mxu1 }
 0x1f8   : > { %4187 = vtanh.f32 %v2755_v22  ;;  %v2212_v25 = vpop.f32.mrf.mxu0 }
 0x1f9   : > { %v4182_v27 = vpop.eup %4181  ;;  %v2757_v28 = vpop.f32.mrf.mxu1 }
 0x1fa   : > { %3216 = vst [vmem:[%s4611_s4 + $0x1b8] sm:$0xff] %v4182_v27  ;;  %v2758_v31 = vadd.f32 %v2757_v28, %v2212_v25  ;;  %v2214_v32 = vpop.f32.mrf.mxu0 }
 0x1fb   : > { %v2759_v34 = vpop.f32.mrf.mxu1 }
 0x1fc   : > { %4189 = vtanh.f32 %v2758_v31  ;;  %v2217_v35 = vpop.f32.mrf.mxu0  ;;  %2408 = vmatmul.mubr.bf16.gmra.mxu0 %v4011_v26  ;;  %2953 = vmatmul.mubr.bf16.gmra.mxu1 %v4014_v29  ;;  %v4035_v26 = vld [vmem:[%s4434_s22 + $0x740] ss:$16 sps:$4 sm:$0xff]   ;;  %v4038_v29 = vld [vmem:[%s4434_s22 + $0x748] ss:$16 sps:$4 sm:$0xff]  }
 0x1fd   : > { %v4184_v36 = vpop.eup %4183  ;;  %v2762_v37 = vpop.f32.mrf.mxu1  ;;  %2415 = vmatprep.mubr.bf16.mxu0 %v4019_v30  ;;  %2960 = vmatprep.mubr.bf16.mxu1 %v4022_v33  ;;  %v4043_v30 = vld [vmem:[%s4434_s22 + $0x764] ss:$16 sps:$4 sm:$0xff]   ;;  %v4046_v33 = vld [vmem:[%s4434_s22 + $0x76c] ss:$16 sps:$4 sm:$0xff]  }
 0x1fe   : > { %3217 = vst [vmem:[%s4611_s4 + $0x1c0] sm:$0xff] %v4184_v36  ;;  %v2763_v38 = vadd.f32 %v2762_v37, %v2217_v35  ;;  %v2219_v39 = vpop.f32.mrf.mxu0 }
 0x1ff   : > { %v2764_v40 = vpop.f32.mrf.mxu1 }
 0x200   : > { %4191 = vtanh.f32 %v2763_v38  ;;  %v2220_v41 = vpop.f32.mrf.mxu0 }
 0x201   : > { %v4186_v43 = vpop.eup %4185  ;;  %v2765_v44 = vpop.f32.mrf.mxu1 }
 0x202   : > { %3218 = vst [vmem:[%s4611_s4 + $0x1c8] sm:$0xff] %v4186_v43  ;;  %v2766_v47 = vadd.f32 %v2765_v44, %v2220_v41  ;;  %v2222_v48 = vpop.f32.mrf.mxu0 }
 0x203   : > { %v2767_v50 = vpop.f32.mrf.mxu1 }
 0x204   : > { %4193 = vtanh.f32 %v2766_v47  ;;  %v2225_v51 = vpop.f32.mrf.mxu0  ;;  %2416 = vmatmul.mubr.bf16.gmra.mxu0 %v4017_v42  ;;  %2961 = vmatmul.mubr.bf16.gmra.mxu1 %v4020_v45  ;;  %v4041_v42 = vld [vmem:[%s4434_s22 + $0x760] ss:$16 sps:$4 sm:$0xff]   ;;  %v4044_v45 = vld [vmem:[%s4434_s22 + $0x768] ss:$16 sps:$4 sm:$0xff]  }
 0x205   : > { %v4188_v52 = vpop.eup %4187  ;;  %v2770_v53 = vpop.f32.mrf.mxu1  ;;  %2423 = vmatprep.mubr.bf16.mxu0 %v4025_v46  ;;  %2968 = vmatprep.mubr.bf16.mxu1 %v4028_v49  ;;  %v4049_v46 = vld [vmem:[%s4434_s22 + $0x784] ss:$16 sps:$4 sm:$0xff]   ;;  %v4052_v49 = vld [vmem:[%s4434_s22 + $0x78c] ss:$16 sps:$4 sm:$0xff]  }
 0x206   : > { %3219 = vst [vmem:[%s4611_s4 + $0x1d0] sm:$0xff] %v4188_v52  ;;  %v2771_v54 = vadd.f32 %v2770_v53, %v2225_v51  ;;  %v2227_v55 = vpop.f32.mrf.mxu0 }
 0x207   : > { %v2772_v56 = vpop.f32.mrf.mxu1 }
 0x208   : > { %4195 = vtanh.f32 %v2771_v54  ;;  %v2228_v57 = vpop.f32.mrf.mxu0 }
 0x209   : > { %v4190_v59 = vpop.eup %4189  ;;  %v2773_v60 = vpop.f32.mrf.mxu1 }
 0x20a   : > { %3220 = vst [vmem:[%s4611_s4 + $0x1d8] sm:$0xff] %v4190_v59  ;;  %v2774_v63 = vadd.f32 %v2773_v60, %v2228_v57  ;;  %v2230_v0 = vpop.f32.mrf.mxu0 }
 0x20b   : > { %v2775_v2 = vpop.f32.mrf.mxu1 }
 0x20c   : > { %4197 = vtanh.f32 %v2774_v63  ;;  %v2233_v3 = vpop.f32.mrf.mxu0  ;;  %2424 = vmatmul.mubr.bf16.gmra.mxu0 %v4023_v58  ;;  %2969 = vmatmul.mubr.bf16.gmra.mxu1 %v4026_v61  ;;  %v4047_v58 = vld [vmem:[%s4434_s22 + $0x780] ss:$16 sps:$4 sm:$0xff]   ;;  %v4050_v61 = vld [vmem:[%s4434_s22 + $0x788] ss:$16 sps:$4 sm:$0xff]  }
 0x20d   : > { %v4192_v4 = vpop.eup %4191  ;;  %v2778_v5 = vpop.f32.mrf.mxu1  ;;  %2431 = vmatprep.mubr.bf16.mxu0 %v4031_v62  ;;  %2976 = vmatprep.mubr.bf16.mxu1 %v4034_v1  ;;  %v4055_v62 = vld [vmem:[%s4434_s22 + $0x7a4] ss:$16 sps:$4 sm:$0xff]   ;;  %v4058_v1 = vld [vmem:[%s4434_s22 + $0x7ac] ss:$16 sps:$4 sm:$0xff]  }
 0x20e   : > { %3221 = vst [vmem:[%s4611_s4 + $0x1e0] sm:$0xff] %v4192_v4  ;;  %v2779_v6 = vadd.f32 %v2778_v5, %v2233_v3  ;;  %v2235_v7 = vpop.f32.mrf.mxu0 }
 0x20f   : > { %v2780_v8 = vpop.f32.mrf.mxu1 }
 0x210   : > { %4199 = vtanh.f32 %v2779_v6  ;;  %v2236_v9 = vpop.f32.mrf.mxu0 }
 0x211   : > { %v4194_v11 = vpop.eup %4193  ;;  %v2781_v12 = vpop.f32.mrf.mxu1 }
 0x212   : > { %3222 = vst [vmem:[%s4611_s4 + $0x1e8] sm:$0xff] %v4194_v11  ;;  %v2782_v15 = vadd.f32 %v2781_v12, %v2236_v9  ;;  %v2238_v16 = vpop.f32.mrf.mxu0 }
 0x213   : > { %v2783_v18 = vpop.f32.mrf.mxu1 }
 0x214   : > { %4201 = vtanh.f32 %v2782_v15  ;;  %v2241_v19 = vpop.f32.mrf.mxu0  ;;  %2432 = vmatmul.mubr.bf16.gmra.mxu0 %v4029_v10  ;;  %2977 = vmatmul.mubr.bf16.gmra.mxu1 %v4032_v13  ;;  %v4053_v10 = vld [vmem:[%s4434_s22 + $0x7a0] ss:$16 sps:$4 sm:$0xff]   ;;  %v4056_v13 = vld [vmem:[%s4434_s22 + $0x7a8] ss:$16 sps:$4 sm:$0xff]  }
 0x215   : > { %v4196_v20 = vpop.eup %4195  ;;  %v2786_v21 = vpop.f32.mrf.mxu1  ;;  %2439 = vmatprep.mubr.bf16.mxu0 %v4037_v14  ;;  %2984 = vmatprep.mubr.bf16.mxu1 %v4040_v17  ;;  %v4061_v14 = vld [vmem:[%s4434_s22 + $0x7c4] ss:$16 sps:$4 sm:$0xff]   ;;  %v4064_v17 = vld [vmem:[%s4434_s22 + $0x7cc] ss:$16 sps:$4 sm:$0xff]  }
 0x216   : > { %3223 = vst [vmem:[%s4611_s4 + $0x1f0] sm:$0xff] %v4196_v20  ;;  %v2787_v22 = vadd.f32 %v2786_v21, %v2241_v19  ;;  %v2243_v23 = vpop.f32.mrf.mxu0 }
 0x217   : > { %v2788_v24 = vpop.f32.mrf.mxu1 }
 0x218   : > { %4203 = vtanh.f32 %v2787_v22  ;;  %v2244_v25 = vpop.f32.mrf.mxu0 }
 0x219   : > { %v4198_v27 = vpop.eup %4197  ;;  %v2789_v28 = vpop.f32.mrf.mxu1 }
 0x21a   : > { %3224 = vst [vmem:[%s4611_s4 + $0x1f8] sm:$0xff] %v4198_v27  ;;  %v2790_v31 = vadd.f32 %v2789_v28, %v2244_v25  ;;  %v2246_v32 = vpop.f32.mrf.mxu0 }
 0x21b   : > { %v2791_v34 = vpop.f32.mrf.mxu1 }
 0x21c   : > { %4205 = vtanh.f32 %v2790_v31  ;;  %v2249_v35 = vpop.f32.mrf.mxu0  ;;  %2440 = vmatmul.mubr.bf16.gmra.mxu0 %v4035_v26  ;;  %2985 = vmatmul.mubr.bf16.gmra.mxu1 %v4038_v29  ;;  %v4059_v26 = vld [vmem:[%s4434_s22 + $0x7c0] ss:$16 sps:$4 sm:$0xff]   ;;  %v4062_v29 = vld [vmem:[%s4434_s22 + $0x7c8] ss:$16 sps:$4 sm:$0xff]  }
 0x21d   : > { %v4200_v36 = vpop.eup %4199  ;;  %v2794_v37 = vpop.f32.mrf.mxu1  ;;  %2447 = vmatprep.mubr.bf16.mxu0 %v4043_v30  ;;  %2992 = vmatprep.mubr.bf16.mxu1 %v4046_v33  ;;  %v4067_v30 = vld [vmem:[%s4434_s22 + $0x7e4] ss:$16 sps:$4 sm:$0xff]   ;;  %v4070_v33 = vld [vmem:[%s4434_s22 + $0x7ec] ss:$16 sps:$4 sm:$0xff]  }
 0x21e   : > { %3225 = vst [vmem:[%s4611_s4 + $0x200] sm:$0xff] %v4200_v36  ;;  %v2795_v38 = vadd.f32 %v2794_v37, %v2249_v35  ;;  %v2251_v39 = vpop.f32.mrf.mxu0 }
 0x21f   : > { %v2796_v40 = vpop.f32.mrf.mxu1 }
 0x220   : > { %4207 = vtanh.f32 %v2795_v38  ;;  %v2252_v41 = vpop.f32.mrf.mxu0 }
 0x221   : > { %v4202_v43 = vpop.eup %4201  ;;  %v2797_v44 = vpop.f32.mrf.mxu1 }
 0x222   : > { %3226 = vst [vmem:[%s4611_s4 + $0x208] sm:$0xff] %v4202_v43  ;;  %v2798_v47 = vadd.f32 %v2797_v44, %v2252_v41  ;;  %v2254_v48 = vpop.f32.mrf.mxu0 }
 0x223   : > { %v2799_v50 = vpop.f32.mrf.mxu1 }
 0x224   : > { %4209 = vtanh.f32 %v2798_v47  ;;  %v2257_v51 = vpop.f32.mrf.mxu0  ;;  %2448 = vmatmul.mubr.bf16.gmra.mxu0 %v4041_v42  ;;  %2993 = vmatmul.mubr.bf16.gmra.mxu1 %v4044_v45  ;;  %v4065_v42 = vld [vmem:[%s4434_s22 + $0x7e0] ss:$16 sps:$4 sm:$0xff]   ;;  %v4068_v45 = vld [vmem:[%s4434_s22 + $0x7e8] ss:$16 sps:$4 sm:$0xff]  }
 0x225   : > { %v4204_v52 = vpop.eup %4203  ;;  %v2802_v53 = vpop.f32.mrf.mxu1  ;;  %2455 = vmatprep.mubr.bf16.mxu0 %v4049_v46  ;;  %3000 = vmatprep.mubr.bf16.mxu1 %v4052_v49 }
 0x226   : > { %3227 = vst [vmem:[%s4611_s4 + $0x210] sm:$0xff] %v4204_v52  ;;  %v2803_v54 = vadd.f32 %v2802_v53, %v2257_v51  ;;  %v2259_v55 = vpop.f32.mrf.mxu0 }
 0x227   : > { %v2804_v56 = vpop.f32.mrf.mxu1 }
 0x228   : > { %4211 = vtanh.f32 %v2803_v54  ;;  %v2260_v57 = vpop.f32.mrf.mxu0 }
 0x229   : > { %v4206_v59 = vpop.eup %4205  ;;  %v2805_v60 = vpop.f32.mrf.mxu1 }
 0x22a   : > { %3228 = vst [vmem:[%s4611_s4 + $0x218] sm:$0xff] %v4206_v59  ;;  %v2806_v63 = vadd.f32 %v2805_v60, %v2260_v57  ;;  %v2262_v0 = vpop.f32.mrf.mxu0 }
 0x22b   : > { %v2807_v2 = vpop.f32.mrf.mxu1 }
 0x22c   : > { %4213 = vtanh.f32 %v2806_v63  ;;  %v2265_v3 = vpop.f32.mrf.mxu0  ;;  %2456 = vmatmul.mubr.bf16.gmra.mxu0 %v4047_v58  ;;  %3001 = vmatmul.mubr.bf16.gmra.mxu1 %v4050_v61 }
 0x22d   : > { %v4208_v4 = vpop.eup %4207  ;;  %v2810_v5 = vpop.f32.mrf.mxu1  ;;  %2463 = vmatprep.mubr.bf16.mxu0 %v4055_v62  ;;  %3008 = vmatprep.mubr.bf16.mxu1 %v4058_v1 }
 0x22e   : > { %3229 = vst [vmem:[%s4611_s4 + $0x220] sm:$0xff] %v4208_v4  ;;  %v2811_v6 = vadd.f32 %v2810_v5, %v2265_v3  ;;  %v2267_v7 = vpop.f32.mrf.mxu0 }
 0x22f   : > { %v2812_v8 = vpop.f32.mrf.mxu1 }
 0x230   : > { %4215 = vtanh.f32 %v2811_v6  ;;  %v2268_v9 = vpop.f32.mrf.mxu0 }
 0x231   : > { %v4210_v11 = vpop.eup %4209  ;;  %v2813_v12 = vpop.f32.mrf.mxu1 }
 0x232   : > { %3230 = vst [vmem:[%s4611_s4 + $0x228] sm:$0xff] %v4210_v11  ;;  %v2814_v15 = vadd.f32 %v2813_v12, %v2268_v9  ;;  %v2270_v16 = vpop.f32.mrf.mxu0 }
 0x233   : > { %v2815_v18 = vpop.f32.mrf.mxu1 }
 0x234   : > { %4217 = vtanh.f32 %v2814_v15  ;;  %v2273_v19 = vpop.f32.mrf.mxu0  ;;  %2464 = vmatmul.mubr.bf16.gmra.mxu0 %v4053_v10  ;;  %3009 = vmatmul.mubr.bf16.gmra.mxu1 %v4056_v13 }
 0x235   : > { %v4212_v20 = vpop.eup %4211  ;;  %v2818_v21 = vpop.f32.mrf.mxu1  ;;  %2471 = vmatprep.mubr.bf16.mxu0 %v4061_v14  ;;  %3016 = vmatprep.mubr.bf16.mxu1 %v4064_v17 }
 0x236   : > { %3231 = vst [vmem:[%s4611_s4 + $0x230] sm:$0xff] %v4212_v20  ;;  %v2819_v22 = vadd.f32 %v2818_v21, %v2273_v19  ;;  %v2275_v23 = vpop.f32.mrf.mxu0 }
 0x237   : > { %v2820_v24 = vpop.f32.mrf.mxu1 }
 0x238   : > { %4219 = vtanh.f32 %v2819_v22  ;;  %v2276_v25 = vpop.f32.mrf.mxu0 }
 0x239   : > { %v4214_v27 = vpop.eup %4213  ;;  %v2821_v28 = vpop.f32.mrf.mxu1 }
 0x23a   : > { %3232 = vst [vmem:[%s4611_s4 + $0x238] sm:$0xff] %v4214_v27  ;;  %v2822_v31 = vadd.f32 %v2821_v28, %v2276_v25  ;;  %v2278_v32 = vpop.f32.mrf.mxu0 }
 0x23b   : > { %v2823_v34 = vpop.f32.mrf.mxu1 }
 0x23c   : > { %4221 = vtanh.f32 %v2822_v31  ;;  %v2281_v35 = vpop.f32.mrf.mxu0  ;;  %2472 = vmatmul.mubr.bf16.gmra.mxu0 %v4059_v26  ;;  %3017 = vmatmul.mubr.bf16.gmra.mxu1 %v4062_v29 }
 0x23d   : > { %v4216_v36 = vpop.eup %4215  ;;  %v2826_v37 = vpop.f32.mrf.mxu1  ;;  %2479 = vmatprep.mubr.bf16.mxu0 %v4067_v30  ;;  %3024 = vmatprep.mubr.bf16.mxu1 %v4070_v33 }
 0x23e   : > { %3233 = vst [vmem:[%s4611_s4 + $0x240] sm:$0xff] %v4216_v36  ;;  %v2827_v38 = vadd.f32 %v2826_v37, %v2281_v35  ;;  %v2283_v39 = vpop.f32.mrf.mxu0 }
 0x23f   : > { %v2828_v40 = vpop.f32.mrf.mxu1 }
 0x240   : > { %4223 = vtanh.f32 %v2827_v38  ;;  %v2284_v41 = vpop.f32.mrf.mxu0 }
 0x241   : > { %v4218_v43 = vpop.eup %4217  ;;  %v2829_v44 = vpop.f32.mrf.mxu1 }
 0x242   : > { %3234 = vst [vmem:[%s4611_s4 + $0x248] sm:$0xff] %v4218_v43  ;;  %v2830_v46 = vadd.f32 %v2829_v44, %v2284_v41  ;;  %v2286_v47 = vpop.f32.mrf.mxu0 }
 0x243   : > { %v2831_v48 = vpop.f32.mrf.mxu1 }
 0x244   : > { %4225 = vtanh.f32 %v2830_v46  ;;  %v2289_v49 = vpop.f32.mrf.mxu0  ;;  %2480 = vmatmul.mubr.bf16.gmra.mxu0 %v4065_v42  ;;  %3025 = vmatmul.mubr.bf16.gmra.mxu1 %v4068_v45 }
 0x245   : > { %v4220_v50 = vpop.eup %4219  ;;  %v2834_v51 = vpop.f32.mrf.mxu1 }
 0x246   : > { %3235 = vst [vmem:[%s4611_s4 + $0x250] sm:$0xff] %v4220_v50  ;;  %v2835_v52 = vadd.f32 %v2834_v51, %v2289_v49  ;;  %v2291_v53 = vpop.f32.mrf.mxu0 }
 0x247   : > { %v2836_v54 = vpop.f32.mrf.mxu1 }
 0x248   : > { %4227 = vtanh.f32 %v2835_v52  ;;  %v2292_v55 = vpop.f32.mrf.mxu0 }
 0x249   : > { %v4222_v56 = vpop.eup %4221  ;;  %v2837_v57 = vpop.f32.mrf.mxu1 }
 0x24a   : > { %3236 = vst [vmem:[%s4611_s4 + $0x258] sm:$0xff] %v4222_v56  ;;  %v2838_v58 = vadd.f32 %v2837_v57, %v2292_v55  ;;  %v2294_v59 = vpop.f32.mrf.mxu0 }
 0x24b   : > { %v2839_v60 = vpop.f32.mrf.mxu1 }
 0x24c   : > { %4229 = vtanh.f32 %v2838_v58  ;;  %v2297_v61 = vpop.f32.mrf.mxu0 }
 0x24d   : > { %v4224_v62 = vpop.eup %4223  ;;  %v2842_v63 = vpop.f32.mrf.mxu1 }
 0x24e   : > { %3237 = vst [vmem:[%s4611_s4 + $0x260] sm:$0xff] %v4224_v62  ;;  %v2843_v0 = vadd.f32 %v2842_v63, %v2297_v61  ;;  %v2299_v1 = vpop.f32.mrf.mxu0 }
 0x24f   : > { %v2844_v2 = vpop.f32.mrf.mxu1 }
 0x250   : > { %4231 = vtanh.f32 %v2843_v0  ;;  %v2300_v3 = vpop.f32.mrf.mxu0 }
 0x251   : > { %v4226_v4 = vpop.eup %4225  ;;  %v2845_v5 = vpop.f32.mrf.mxu1 }
 0x252   : > { %3238 = vst [vmem:[%s4611_s4 + $0x268] sm:$0xff] %v4226_v4  ;;  %v2846_v6 = vadd.f32 %v2845_v5, %v2300_v3  ;;  %v2302_v7 = vpop.f32.mrf.mxu0 }
 0x253   : > { %v2847_v8 = vpop.f32.mrf.mxu1 }
 0x254   : > { %4233 = vtanh.f32 %v2846_v6  ;;  %v2305_v9 = vpop.f32.mrf.mxu0 }
 0x255   : > { %v4228_v10 = vpop.eup %4227  ;;  %v2850_v11 = vpop.f32.mrf.mxu1 }
 0x256   : > { %3239 = vst [vmem:[%s4611_s4 + $0x270] sm:$0xff] %v4228_v10  ;;  %v2851_v12 = vadd.f32 %v2850_v11, %v2305_v9  ;;  %v2307_v13 = vpop.f32.mrf.mxu0 }
 0x257   : > { %v2852_v14 = vpop.f32.mrf.mxu1 }
 0x258   : > { %4235 = vtanh.f32 %v2851_v12  ;;  %v2308_v15 = vpop.f32.mrf.mxu0 }
 0x259   : > { %v4230_v16 = vpop.eup %4229  ;;  %v2853_v17 = vpop.f32.mrf.mxu1 }
 0x25a   : > { %3240 = vst [vmem:[%s4611_s4 + $0x278] sm:$0xff] %v4230_v16  ;;  %v2854_v18 = vadd.f32 %v2853_v17, %v2308_v15  ;;  %v2310_v19 = vpop.f32.mrf.mxu0 }
 0x25b   : > { %v2855_v20 = vpop.f32.mrf.mxu1 }
 0x25c   : > { %4237 = vtanh.f32 %v2854_v18  ;;  %v2313_v21 = vpop.f32.mrf.mxu0 }
 0x25d   : > { %v4232_v22 = vpop.eup %4231  ;;  %v2858_v23 = vpop.f32.mrf.mxu1 }
 0x25e   : > { %3241 = vst [vmem:[%s4611_s4 + $0x280] sm:$0xff] %v4232_v22  ;;  %v2859_v24 = vadd.f32 %v2858_v23, %v2313_v21  ;;  %v2315_v25 = vpop.f32.mrf.mxu0 }
 0x25f   : > { %v2860_v26 = vpop.f32.mrf.mxu1 }
 0x260   : > { %4239 = vtanh.f32 %v2859_v24  ;;  %v2316_v27 = vpop.f32.mrf.mxu0 }
 0x261   : > { %v4234_v28 = vpop.eup %4233  ;;  %v2861_v29 = vpop.f32.mrf.mxu1 }
 0x262   : > { %3242 = vst [vmem:[%s4611_s4 + $0x288] sm:$0xff] %v4234_v28  ;;  %v2862_v30 = vadd.f32 %v2861_v29, %v2316_v27  ;;  %v2318_v31 = vpop.f32.mrf.mxu0 }
 0x263   : > { %v2863_v32 = vpop.f32.mrf.mxu1 }
 0x264   : > { %4241 = vtanh.f32 %v2862_v30  ;;  %v2321_v33 = vpop.f32.mrf.mxu0 }
 0x265   : > { %v4236_v34 = vpop.eup %4235  ;;  %v2866_v35 = vpop.f32.mrf.mxu1 }
 0x266   : > { %3243 = vst [vmem:[%s4611_s4 + $0x290] sm:$0xff] %v4236_v34  ;;  %v2867_v36 = vadd.f32 %v2866_v35, %v2321_v33  ;;  %v2323_v37 = vpop.f32.mrf.mxu0 }
 0x267   : > { %v2868_v38 = vpop.f32.mrf.mxu1 }
 0x268   : > { %4243 = vtanh.f32 %v2867_v36  ;;  %v2324_v39 = vpop.f32.mrf.mxu0 }
 0x269   : > { %v4238_v40 = vpop.eup %4237  ;;  %v2869_v41 = vpop.f32.mrf.mxu1 }
 0x26a   : > { %3244 = vst [vmem:[%s4611_s4 + $0x298] sm:$0xff] %v4238_v40  ;;  %v2870_v42 = vadd.f32 %v2869_v41, %v2324_v39  ;;  %v2326_v43 = vpop.f32.mrf.mxu0 }
 0x26b   : > { %v2871_v44 = vpop.f32.mrf.mxu1 }
 0x26c   : > { %4245 = vtanh.f32 %v2870_v42  ;;  %v2329_v45 = vpop.f32.mrf.mxu0 }
 0x26d   : > { %v4240_v46 = vpop.eup %4239  ;;  %v2874_v47 = vpop.f32.mrf.mxu1 }
 0x26e   : > { %3245 = vst [vmem:[%s4611_s4 + $0x2a0] sm:$0xff] %v4240_v46  ;;  %v2875_v48 = vadd.f32 %v2874_v47, %v2329_v45  ;;  %v2331_v49 = vpop.f32.mrf.mxu0 }
 0x26f   : > { %v2876_v50 = vpop.f32.mrf.mxu1 }
 0x270   : > { %4247 = vtanh.f32 %v2875_v48  ;;  %v2332_v51 = vpop.f32.mrf.mxu0 }
 0x271   : > { %v4242_v52 = vpop.eup %4241  ;;  %v2877_v53 = vpop.f32.mrf.mxu1 }
 0x272   : > { %3246 = vst [vmem:[%s4611_s4 + $0x2a8] sm:$0xff] %v4242_v52  ;;  %v2878_v54 = vadd.f32 %v2877_v53, %v2332_v51  ;;  %v2334_v55 = vpop.f32.mrf.mxu0 }
 0x273   : > { %v2879_v56 = vpop.f32.mrf.mxu1 }
 0x274   : > { %4249 = vtanh.f32 %v2878_v54  ;;  %v2337_v57 = vpop.f32.mrf.mxu0 }
 0x275   : > { %v4244_v58 = vpop.eup %4243  ;;  %v2882_v59 = vpop.f32.mrf.mxu1 }
 0x276   : > { %3247 = vst [vmem:[%s4611_s4 + $0x2b0] sm:$0xff] %v4244_v58  ;;  %v2883_v60 = vadd.f32 %v2882_v59, %v2337_v57  ;;  %v2339_v61 = vpop.f32.mrf.mxu0 }
 0x277   : > { %v2884_v62 = vpop.f32.mrf.mxu1 }
 0x278   : > { %4251 = vtanh.f32 %v2883_v60  ;;  %v2340_v63 = vpop.f32.mrf.mxu0 }
 0x279   : > { %v4246_v0 = vpop.eup %4245  ;;  %v2885_v1 = vpop.f32.mrf.mxu1 }
 0x27a   : > { %3248 = vst [vmem:[%s4611_s4 + $0x2b8] sm:$0xff] %v4246_v0  ;;  %v2886_v2 = vadd.f32 %v2885_v1, %v2340_v63  ;;  %v2342_v3 = vpop.f32.mrf.mxu0 }
 0x27b   : > { %v2887_v4 = vpop.f32.mrf.mxu1 }
 0x27c   : > { %4253 = vtanh.f32 %v2886_v2  ;;  %v2345_v5 = vpop.f32.mrf.mxu0 }
 0x27d   : > { %v4248_v6 = vpop.eup %4247  ;;  %v2890_v7 = vpop.f32.mrf.mxu1 }
 0x27e   : > { %3249 = vst [vmem:[%s4611_s4 + $0x2c0] sm:$0xff] %v4248_v6  ;;  %v2891_v8 = vadd.f32 %v2890_v7, %v2345_v5  ;;  %v2347_v9 = vpop.f32.mrf.mxu0 }
 0x27f   : > { %v2892_v10 = vpop.f32.mrf.mxu1 }
 0x280   : > { %4255 = vtanh.f32 %v2891_v8  ;;  %v2348_v11 = vpop.f32.mrf.mxu0 }
 0x281   : > { %v4250_v12 = vpop.eup %4249  ;;  %v2893_v13 = vpop.f32.mrf.mxu1 }
 0x282   : > { %3250 = vst [vmem:[%s4611_s4 + $0x2c8] sm:$0xff] %v4250_v12  ;;  %v2894_v14 = vadd.f32 %v2893_v13, %v2348_v11  ;;  %v2350_v15 = vpop.f32.mrf.mxu0 }
 0x283   : > { %v2895_v16 = vpop.f32.mrf.mxu1 }
 0x284   : > { %4257 = vtanh.f32 %v2894_v14  ;;  %v2353_v17 = vpop.f32.mrf.mxu0 }
 0x285   : > { %v4252_v18 = vpop.eup %4251  ;;  %v2898_v19 = vpop.f32.mrf.mxu1 }
 0x286   : > { %3251 = vst [vmem:[%s4611_s4 + $0x2d0] sm:$0xff] %v4252_v18  ;;  %v2899_v20 = vadd.f32 %v2898_v19, %v2353_v17  ;;  %v2355_v21 = vpop.f32.mrf.mxu0 }
 0x287   : > { %v2900_v22 = vpop.f32.mrf.mxu1 }
 0x288   : > { %4259 = vtanh.f32 %v2899_v20  ;;  %v2356_v23 = vpop.f32.mrf.mxu0 }
 0x289   : > { %v4254_v24 = vpop.eup %4253  ;;  %v2901_v25 = vpop.f32.mrf.mxu1 }
 0x28a   : > { %3252 = vst [vmem:[%s4611_s4 + $0x2d8] sm:$0xff] %v4254_v24  ;;  %v2902_v26 = vadd.f32 %v2901_v25, %v2356_v23  ;;  %v2358_v27 = vpop.f32.mrf.mxu0 }
 0x28b   : > { %v2903_v28 = vpop.f32.mrf.mxu1 }
 0x28c   : > { %4261 = vtanh.f32 %v2902_v26  ;;  %v2361_v29 = vpop.f32.mrf.mxu0 }
 0x28d   : > { %v4256_v30 = vpop.eup %4255  ;;  %v2906_v31 = vpop.f32.mrf.mxu1 }
 0x28e   : > { %3253 = vst [vmem:[%s4611_s4 + $0x2e0] sm:$0xff] %v4256_v30  ;;  %v2907_v32 = vadd.f32 %v2906_v31, %v2361_v29  ;;  %v2363_v33 = vpop.f32.mrf.mxu0 }
 0x28f   : > { %v2908_v34 = vpop.f32.mrf.mxu1 }
 0x290   : > { %4263 = vtanh.f32 %v2907_v32  ;;  %v2364_v35 = vpop.f32.mrf.mxu0 }
 0x291   : > { %v4258_v36 = vpop.eup %4257  ;;  %v2909_v37 = vpop.f32.mrf.mxu1 }
 0x292   : > { %3254 = vst [vmem:[%s4611_s4 + $0x2e8] sm:$0xff] %v4258_v36  ;;  %v2910_v38 = vadd.f32 %v2909_v37, %v2364_v35  ;;  %v2366_v39 = vpop.f32.mrf.mxu0 }
 0x293   : > { %v2911_v40 = vpop.f32.mrf.mxu1 }
 0x294   : > { %4265 = vtanh.f32 %v2910_v38  ;;  %v2369_v41 = vpop.f32.mrf.mxu0 }
 0x295   : > { %v4260_v42 = vpop.eup %4259  ;;  %v2914_v43 = vpop.f32.mrf.mxu1 }
 0x296   : > { %3255 = vst [vmem:[%s4611_s4 + $0x2f0] sm:$0xff] %v4260_v42  ;;  %v2915_v44 = vadd.f32 %v2914_v43, %v2369_v41  ;;  %v2371_v45 = vpop.f32.mrf.mxu0 }
 0x297   : > { %v2916_v46 = vpop.f32.mrf.mxu1 }
 0x298   : > { %4267 = vtanh.f32 %v2915_v44  ;;  %v2372_v47 = vpop.f32.mrf.mxu0 }
 0x299   : > { %v4262_v48 = vpop.eup %4261  ;;  %v2917_v49 = vpop.f32.mrf.mxu1 }
 0x29a   : > { %3256 = vst [vmem:[%s4611_s4 + $0x2f8] sm:$0xff] %v4262_v48  ;;  %v2918_v50 = vadd.f32 %v2917_v49, %v2372_v47  ;;  %v2374_v51 = vpop.f32.mrf.mxu0 }
 0x29b   : > { %v2919_v52 = vpop.f32.mrf.mxu1 }
 0x29c   : > { %4269 = vtanh.f32 %v2918_v50  ;;  %v2377_v53 = vpop.f32.mrf.mxu0 }
 0x29d   : > { %v4264_v54 = vpop.eup %4263  ;;  %v2922_v55 = vpop.f32.mrf.mxu1 }
 0x29e   : > { %3257 = vst [vmem:[%s4611_s4 + $0x300] sm:$0xff] %v4264_v54  ;;  %v2923_v56 = vadd.f32 %v2922_v55, %v2377_v53  ;;  %v2379_v57 = vpop.f32.mrf.mxu0 }
 0x29f   : > { %v2924_v58 = vpop.f32.mrf.mxu1 }
 0x2a0   : > { %4271 = vtanh.f32 %v2923_v56  ;;  %v2380_v59 = vpop.f32.mrf.mxu0 }
 0x2a1   : > { %v4266_v60 = vpop.eup %4265  ;;  %v2925_v61 = vpop.f32.mrf.mxu1 }
 0x2a2   : > { %3258 = vst [vmem:[%s4611_s4 + $0x308] sm:$0xff] %v4266_v60  ;;  %v2926_v62 = vadd.f32 %v2925_v61, %v2380_v59  ;;  %v2382_v63 = vpop.f32.mrf.mxu0 }
 0x2a3   : > { %v2927_v0 = vpop.f32.mrf.mxu1 }
 0x2a4   : > { %4273 = vtanh.f32 %v2926_v62  ;;  %v2385_v1 = vpop.f32.mrf.mxu0 }
 0x2a5   : > { %v4268_v2 = vpop.eup %4267  ;;  %v2930_v3 = vpop.f32.mrf.mxu1 }
 0x2a6   : > { %3259 = vst [vmem:[%s4611_s4 + $0x310] sm:$0xff] %v4268_v2  ;;  %v2931_v4 = vadd.f32 %v2930_v3, %v2385_v1  ;;  %v2387_v5 = vpop.f32.mrf.mxu0 }
 0x2a7   : > { %v2932_v6 = vpop.f32.mrf.mxu1 }
 0x2a8   : > { %4275 = vtanh.f32 %v2931_v4  ;;  %v2388_v7 = vpop.f32.mrf.mxu0 }
 0x2a9   : > { %v4270_v8 = vpop.eup %4269  ;;  %v2933_v9 = vpop.f32.mrf.mxu1 }
 0x2aa   : > { %3260 = vst [vmem:[%s4611_s4 + $0x318] sm:$0xff] %v4270_v8  ;;  %v2934_v10 = vadd.f32 %v2933_v9, %v2388_v7  ;;  %v2390_v11 = vpop.f32.mrf.mxu0 }
 0x2ab   : > { %v2935_v12 = vpop.f32.mrf.mxu1 }
 0x2ac   : > { %4277 = vtanh.f32 %v2934_v10  ;;  %v2393_v13 = vpop.f32.mrf.mxu0 }
 0x2ad   : > { %v4272_v14 = vpop.eup %4271  ;;  %v2938_v15 = vpop.f32.mrf.mxu1 }
 0x2ae   : > { %3261 = vst [vmem:[%s4611_s4 + $0x320] sm:$0xff] %v4272_v14  ;;  %v2939_v16 = vadd.f32 %v2938_v15, %v2393_v13  ;;  %v2395_v17 = vpop.f32.mrf.mxu0 }
 0x2af   : > { %v2940_v18 = vpop.f32.mrf.mxu1 }
 0x2b0   : > { %4279 = vtanh.f32 %v2939_v16  ;;  %v2396_v19 = vpop.f32.mrf.mxu0 }
 0x2b1   : > { %v4274_v20 = vpop.eup %4273  ;;  %v2941_v21 = vpop.f32.mrf.mxu1 }
 0x2b2   : > { %3262 = vst [vmem:[%s4611_s4 + $0x328] sm:$0xff] %v4274_v20  ;;  %v2942_v22 = vadd.f32 %v2941_v21, %v2396_v19  ;;  %v2398_v23 = vpop.f32.mrf.mxu0 }
 0x2b3   : > { %v2943_v24 = vpop.f32.mrf.mxu1 }
 0x2b4   : > { %4281 = vtanh.f32 %v2942_v22  ;;  %v2401_v25 = vpop.f32.mrf.mxu0 }
 0x2b5   : > { %v4276_v26 = vpop.eup %4275  ;;  %v2946_v27 = vpop.f32.mrf.mxu1 }
 0x2b6   : > { %3263 = vst [vmem:[%s4611_s4 + $0x330] sm:$0xff] %v4276_v26  ;;  %v2947_v28 = vadd.f32 %v2946_v27, %v2401_v25  ;;  %v2403_v29 = vpop.f32.mrf.mxu0 }
 0x2b7   : > { %v2948_v30 = vpop.f32.mrf.mxu1 }
 0x2b8   : > { %4283 = vtanh.f32 %v2947_v28  ;;  %v2404_v31 = vpop.f32.mrf.mxu0 }
 0x2b9   : > { %v4278_v32 = vpop.eup %4277  ;;  %v2949_v33 = vpop.f32.mrf.mxu1 }
 0x2ba   : > { %3264 = vst [vmem:[%s4611_s4 + $0x338] sm:$0xff] %v4278_v32  ;;  %v2950_v34 = vadd.f32 %v2949_v33, %v2404_v31  ;;  %v2406_v35 = vpop.f32.mrf.mxu0 }
 0x2bb   : > { %v2951_v36 = vpop.f32.mrf.mxu1 }
 0x2bc   : > { %4285 = vtanh.f32 %v2950_v34  ;;  %v2409_v37 = vpop.f32.mrf.mxu0 }
 0x2bd   : > { %v4280_v38 = vpop.eup %4279  ;;  %v2954_v39 = vpop.f32.mrf.mxu1 }
 0x2be   : > { %3265 = vst [vmem:[%s4611_s4 + $0x340] sm:$0xff] %v4280_v38  ;;  %v2955_v40 = vadd.f32 %v2954_v39, %v2409_v37  ;;  %v2411_v41 = vpop.f32.mrf.mxu0 }
 0x2bf   : > { %v2956_v42 = vpop.f32.mrf.mxu1 }
 0x2c0   : > { %4287 = vtanh.f32 %v2955_v40  ;;  %v2412_v43 = vpop.f32.mrf.mxu0 }
 0x2c1   : > { %v4282_v44 = vpop.eup %4281  ;;  %v2957_v45 = vpop.f32.mrf.mxu1 }
 0x2c2   : > { %3266 = vst [vmem:[%s4611_s4 + $0x348] sm:$0xff] %v4282_v44  ;;  %v2958_v46 = vadd.f32 %v2957_v45, %v2412_v43  ;;  %v2414_v47 = vpop.f32.mrf.mxu0 }
 0x2c3   : > { %v2959_v48 = vpop.f32.mrf.mxu1 }
 0x2c4   : > { %4289 = vtanh.f32 %v2958_v46  ;;  %v2417_v49 = vpop.f32.mrf.mxu0 }
 0x2c5   : > { %v4284_v50 = vpop.eup %4283  ;;  %v2962_v51 = vpop.f32.mrf.mxu1 }
 0x2c6   : > { %3267 = vst [vmem:[%s4611_s4 + $0x350] sm:$0xff] %v4284_v50  ;;  %v2963_v52 = vadd.f32 %v2962_v51, %v2417_v49  ;;  %v2419_v53 = vpop.f32.mrf.mxu0 }
 0x2c7   : > { %v2964_v54 = vpop.f32.mrf.mxu1 }
 0x2c8   : > { %4291 = vtanh.f32 %v2963_v52  ;;  %v2420_v55 = vpop.f32.mrf.mxu0 }
 0x2c9   : > { %v4286_v56 = vpop.eup %4285  ;;  %v2965_v57 = vpop.f32.mrf.mxu1 }
 0x2ca   : > { %3268 = vst [vmem:[%s4611_s4 + $0x358] sm:$0xff] %v4286_v56  ;;  %v2966_v58 = vadd.f32 %v2965_v57, %v2420_v55  ;;  %v2422_v59 = vpop.f32.mrf.mxu0 }
 0x2cb   : > { %v2967_v60 = vpop.f32.mrf.mxu1 }
 0x2cc   : > { %4293 = vtanh.f32 %v2966_v58  ;;  %v2425_v61 = vpop.f32.mrf.mxu0 }
 0x2cd   : > { %v4288_v62 = vpop.eup %4287  ;;  %v2970_v63 = vpop.f32.mrf.mxu1 }
 0x2ce   : > { %3269 = vst [vmem:[%s4611_s4 + $0x360] sm:$0xff] %v4288_v62  ;;  %v2971_v0 = vadd.f32 %v2970_v63, %v2425_v61  ;;  %v2427_v1 = vpop.f32.mrf.mxu0 }
 0x2cf   : > { %v2972_v2 = vpop.f32.mrf.mxu1 }
 0x2d0   : > { %4295 = vtanh.f32 %v2971_v0  ;;  %v2428_v3 = vpop.f32.mrf.mxu0 }
 0x2d1   : > { %v4290_v4 = vpop.eup %4289  ;;  %v2973_v5 = vpop.f32.mrf.mxu1 }
 0x2d2   : > { %3270 = vst [vmem:[%s4611_s4 + $0x368] sm:$0xff] %v4290_v4  ;;  %v2974_v6 = vadd.f32 %v2973_v5, %v2428_v3  ;;  %v2430_v7 = vpop.f32.mrf.mxu0 }
 0x2d3   : > { %v2975_v8 = vpop.f32.mrf.mxu1 }
 0x2d4   : > { %4297 = vtanh.f32 %v2974_v6  ;;  %v2433_v9 = vpop.f32.mrf.mxu0 }
 0x2d5   : > { %v4292_v10 = vpop.eup %4291  ;;  %v2978_v11 = vpop.f32.mrf.mxu1 }
 0x2d6   : > { %3271 = vst [vmem:[%s4611_s4 + $0x370] sm:$0xff] %v4292_v10  ;;  %v2979_v12 = vadd.f32 %v2978_v11, %v2433_v9  ;;  %v2435_v13 = vpop.f32.mrf.mxu0 }
 0x2d7   : > { %v2980_v14 = vpop.f32.mrf.mxu1 }
 0x2d8   : > { %4299 = vtanh.f32 %v2979_v12  ;;  %v2436_v15 = vpop.f32.mrf.mxu0 }
 0x2d9   : > { %v4294_v16 = vpop.eup %4293  ;;  %v2981_v17 = vpop.f32.mrf.mxu1 }
 0x2da   : > { %3272 = vst [vmem:[%s4611_s4 + $0x378] sm:$0xff] %v4294_v16  ;;  %v2982_v18 = vadd.f32 %v2981_v17, %v2436_v15  ;;  %v2438_v19 = vpop.f32.mrf.mxu0 }
 0x2db   : > { %v2983_v20 = vpop.f32.mrf.mxu1 }
 0x2dc   : > { %4301 = vtanh.f32 %v2982_v18  ;;  %v2441_v21 = vpop.f32.mrf.mxu0 }
 0x2dd   : > { %v4296_v22 = vpop.eup %4295  ;;  %v2986_v23 = vpop.f32.mrf.mxu1 }
 0x2de   : > { %3273 = vst [vmem:[%s4611_s4 + $0x380] sm:$0xff] %v4296_v22  ;;  %v2987_v24 = vadd.f32 %v2986_v23, %v2441_v21  ;;  %v2443_v25 = vpop.f32.mrf.mxu0 }
 0x2df   : > { %v2988_v26 = vpop.f32.mrf.mxu1 }
 0x2e0   : > { %4303 = vtanh.f32 %v2987_v24  ;;  %v2444_v27 = vpop.f32.mrf.mxu0 }
 0x2e1   : > { %v4298_v28 = vpop.eup %4297  ;;  %v2989_v29 = vpop.f32.mrf.mxu1 }
 0x2e2   : > { %3274 = vst [vmem:[%s4611_s4 + $0x388] sm:$0xff] %v4298_v28  ;;  %v2990_v30 = vadd.f32 %v2989_v29, %v2444_v27  ;;  %v2446_v31 = vpop.f32.mrf.mxu0 }
 0x2e3   : > { %v2991_v32 = vpop.f32.mrf.mxu1 }
 0x2e4   : > { %4305 = vtanh.f32 %v2990_v30  ;;  %v2449_v33 = vpop.f32.mrf.mxu0 }
 0x2e5   : > { %v4300_v34 = vpop.eup %4299  ;;  %v2994_v35 = vpop.f32.mrf.mxu1 }
 0x2e6   : > { %3275 = vst [vmem:[%s4611_s4 + $0x390] sm:$0xff] %v4300_v34  ;;  %v2995_v36 = vadd.f32 %v2994_v35, %v2449_v33  ;;  %v2451_v37 = vpop.f32.mrf.mxu0 }
 0x2e7   : > { %v2996_v38 = vpop.f32.mrf.mxu1 }
 0x2e8   : > { %4307 = vtanh.f32 %v2995_v36  ;;  %v2452_v39 = vpop.f32.mrf.mxu0 }
 0x2e9   : > { %v4302_v40 = vpop.eup %4301  ;;  %v2997_v41 = vpop.f32.mrf.mxu1 }
 0x2ea   : > { %3276 = vst [vmem:[%s4611_s4 + $0x398] sm:$0xff] %v4302_v40  ;;  %v2998_v42 = vadd.f32 %v2997_v41, %v2452_v39  ;;  %v2454_v43 = vpop.f32.mrf.mxu0 }
 0x2eb   : > { %v2999_v44 = vpop.f32.mrf.mxu1 }
 0x2ec   : > { %4309 = vtanh.f32 %v2998_v42  ;;  %v2457_v45 = vpop.f32.mrf.mxu0 }
 0x2ed   : > { %v4304_v46 = vpop.eup %4303  ;;  %v3002_v47 = vpop.f32.mrf.mxu1 }
 0x2ee   : > { %3277 = vst [vmem:[%s4611_s4 + $0x3a0] sm:$0xff] %v4304_v46  ;;  %v3003_v48 = vadd.f32 %v3002_v47, %v2457_v45  ;;  %v2459_v49 = vpop.f32.mrf.mxu0 }
 0x2ef   : > { %v3004_v50 = vpop.f32.mrf.mxu1 }
 0x2f0   : > { %4311 = vtanh.f32 %v3003_v48  ;;  %v2460_v51 = vpop.f32.mrf.mxu0 }
 0x2f1   : > { %v4306_v52 = vpop.eup %4305  ;;  %v3005_v53 = vpop.f32.mrf.mxu1 }
 0x2f2   : > { %3278 = vst [vmem:[%s4611_s4 + $0x3a8] sm:$0xff] %v4306_v52  ;;  %v3006_v54 = vadd.f32 %v3005_v53, %v2460_v51  ;;  %v2462_v55 = vpop.f32.mrf.mxu0 }
 0x2f3   : > { %v3007_v56 = vpop.f32.mrf.mxu1 }
 0x2f4   : > { %4313 = vtanh.f32 %v3006_v54  ;;  %v2465_v57 = vpop.f32.mrf.mxu0 }
 0x2f5   : > { %v4308_v58 = vpop.eup %4307  ;;  %v3010_v59 = vpop.f32.mrf.mxu1 }
 0x2f6   : > { %3279 = vst [vmem:[%s4611_s4 + $0x3b0] sm:$0xff] %v4308_v58  ;;  %v3011_v60 = vadd.f32 %v3010_v59, %v2465_v57  ;;  %v2467_v61 = vpop.f32.mrf.mxu0 }
 0x2f7   : > { %v3012_v62 = vpop.f32.mrf.mxu1 }
 0x2f8   : > { %4315 = vtanh.f32 %v3011_v60  ;;  %v2468_v63 = vpop.f32.mrf.mxu0 }
 0x2f9   : > { %v4310_v0 = vpop.eup %4309  ;;  %v3013_v1 = vpop.f32.mrf.mxu1 }
 0x2fa   : > { %3280 = vst [vmem:[%s4611_s4 + $0x3b8] sm:$0xff] %v4310_v0  ;;  %v3014_v2 = vadd.f32 %v3013_v1, %v2468_v63  ;;  %v2470_v3 = vpop.f32.mrf.mxu0 }
 0x2fb   : > { %v3015_v4 = vpop.f32.mrf.mxu1 }
 0x2fc   : > { %4317 = vtanh.f32 %v3014_v2  ;;  %v2473_v5 = vpop.f32.mrf.mxu0 }
 0x2fd   : > { %v4312_v6 = vpop.eup %4311  ;;  %v3018_v7 = vpop.f32.mrf.mxu1 }
 0x2fe   : > { %3281 = vst [vmem:[%s4611_s4 + $0x3c0] sm:$0xff] %v4312_v6  ;;  %v3019_v8 = vadd.f32 %v3018_v7, %v2473_v5  ;;  %v2475_v9 = vpop.f32.mrf.mxu0 }
 0x2ff   : > { %v3020_v10 = vpop.f32.mrf.mxu1 }
 0x300   : > { %4319 = vtanh.f32 %v3019_v8  ;;  %v2476_v11 = vpop.f32.mrf.mxu0 }
 0x301   : > { %v4314_v12 = vpop.eup %4313  ;;  %v3021_v13 = vpop.f32.mrf.mxu1 }
 0x302   : > { %3282 = vst [vmem:[%s4611_s4 + $0x3c8] sm:$0xff] %v4314_v12  ;;  %v3022_v14 = vadd.f32 %v3021_v13, %v2476_v11  ;;  %v2478_v15 = vpop.f32.mrf.mxu0 }
 0x303   : > { %v3023_v16 = vpop.f32.mrf.mxu1 }
 0x304   : > { %4321 = vtanh.f32 %v3022_v14  ;;  %v2481_v17 = vpop.f32.mrf.mxu0 }
 0x305   : > { %v4316_v18 = vpop.eup %4315  ;;  %v3026_v19 = vpop.f32.mrf.mxu1 }
 0x306   : > { %3283 = vst [vmem:[%s4611_s4 + $0x3d0] sm:$0xff] %v4316_v18  ;;  %v3027_v20 = vadd.f32 %v3026_v19, %v2481_v17  ;;  %v2483_v21 = vpop.f32.mrf.mxu0 }
 0x307   : > { %v3028_v22 = vpop.f32.mrf.mxu1 }
 0x308   : > { %4323 = vtanh.f32 %v3027_v20  ;;  %v2484_v23 = vpop.f32.mrf.mxu0 }
 0x309   : > { %v4318_v24 = vpop.eup %4317  ;;  %v3029_v25 = vpop.f32.mrf.mxu1 }
 0x30a   : > { %3284 = vst [vmem:[%s4611_s4 + $0x3d8] sm:$0xff] %v4318_v24  ;;  %v3030_v26 = vadd.f32 %v3029_v25, %v2484_v23  ;;  %v2486_v27 = vpop.f32.mrf.mxu0 }
 0x30b   : > { %v3031_v28 = vpop.f32.mrf.mxu1 }
 0x30c   : > { %4325 = vtanh.f32 %v3030_v26 }
 0x30d   : > { %v4320_v29 = vpop.eup %4319 }
 0x30e   : > { %3285 = vst [vmem:[%s4611_s4 + $0x3e0] sm:$0xff] %v4320_v29 }
 0x311   : > { %v4322_v30 = vpop.eup %4321 }
 0x312   : > { %3286 = vst [vmem:[%s4611_s4 + $0x3e8] sm:$0xff] %v4322_v30 }
 0x315   : > { %v4324_v31 = vpop.eup %4323 }
 0x316   : > { %3287 = vst [vmem:[%s4611_s4 + $0x3f0] sm:$0xff] %v4324_v31 }
 0x319   : > { %v4326_v32 = vpop.eup %4325 }
 0x31a   : > { %3288 = vst [vmem:[%s4611_s4 + $0x3f8] sm:$0xff] %v4326_v32 }
 0x31b PF: > { %s12_s9 = sadd.s32 1, %s4333_s9  }
 0x31c   : > { %p9_p4 = scmp.ge.s32.totalorder %s12_s9, 4  }
 0x31e   :  { %11 = sbr.rel (!%p9_p4) target bundleno = 1 (0x1), region = 58 }

</bundles_post_ra>
